<compile_context>
chip_gen: v7x
topology: tpu7x:2x2x1
jax: 0.10.0
libtpu: 0.0.40
codegen_flags: <defaults>
</compile_context>

<pallas_src>
import jax
import jax.numpy as jnp
from jax.experimental import pallas as pl
from jax.experimental.pallas import tpu as pltpu

# ---- model dimensions (small, consistent with the module's forward) ----
B = 2                  # batch
C, H, W = 3, 16, 16    # image
D_IN = C * H * W       # 768 (flattened image, lane-aligned)
ENC_HID = 512
FEAT = 512             # encoder output / predictor in/out dim
PRED_HID = 1024
BN_EPS = 1e-5
LANES = 128            # lane-dense output width

# Packed-vector layout: all (1, N) params concatenated along lanes.
# Every width is a multiple of 128, so all slice offsets are lane-aligned.
_VEC_LAYOUT_SHARED = [
    ("se1", ENC_HID), ("be1", ENC_HID),
    ("se2", FEAT), ("be2", FEAT),
    ("sp1", PRED_HID), ("bp1", PRED_HID),
    ("gamma", PRED_HID), ("beta", PRED_HID),
    ("sp2", FEAT), ("bp2", FEAT),
]
_VEC_LAYOUT_TARGET = [
    ("st1", ENC_HID), ("bt1", ENC_HID),
    ("st2", FEAT), ("bt2", FEAT),
]


def _vec_layout(shared_target):
    layout = list(_VEC_LAYOUT_SHARED)
    if not shared_target:
        layout += list(_VEC_LAYOUT_TARGET)
    offsets, off = {}, 0
    for name, width in layout:
        offsets[name] = (off, width)
        off += width
    return layout, offsets, off


def _cos_rows(a, b):
    an = a * jax.lax.rsqrt(jnp.sum(a * a, axis=-1, keepdims=True))
    bn = b * jax.lax.rsqrt(jnp.sum(b * b, axis=-1, keepdims=True))
    return jnp.sum(an * bn, axis=-1, keepdims=True)   # (rows, 1)


def _make_byol_kernel(shared_target, offsets):
    def kernel(*refs):
        if shared_target:
            (x_ref, vec_ref,
             we1_ref, we2_ref, wp1_ref, wp2_ref,
             loss_ref) = refs
        else:
            (x_ref, vec_ref,
             we1_ref, we2_ref, wt1_ref, wt2_ref, wp1_ref, wp2_ref,
             loss_ref) = refs

        def vec(name):
            off, width = offsets[name]
            return vec_ref[:, off:off + width]          # (1, width) f32, static slice

        def qmm(a_bf16, wq_ref, scale):
            # int8 weights -> bf16 MXU operands, f32 accumulation, then the
            # per-output-channel dequant scale is applied to the accumulator.
            w_bf16 = wq_ref[...].astype(jnp.float32).astype(jnp.bfloat16)
            acc = jnp.dot(a_bf16, w_bf16, preferred_element_type=jnp.float32)
            return acc * scale

        def encoder(x_bf16, w1_ref, s1, b1, w2_ref, s2, b2):
            h = jnp.maximum(qmm(x_bf16, w1_ref, s1) + b1, 0.0)
            return qmm(h.astype(jnp.bfloat16), w2_ref, s2) + b2

        def predictor(f):
            # Linear -> BatchNorm1d (training stats over this view) -> ReLU -> Linear.
            h = qmm(f.astype(jnp.bfloat16), wp1_ref, vec("sp1")) + vec("bp1")
            m = jnp.mean(h, axis=0, keepdims=True)
            var = jnp.maximum(jnp.mean(h * h, axis=0, keepdims=True) - m * m, 0.0)
            h = (h - m) * jax.lax.rsqrt(var + BN_EPS)    # rsqrt -> EUP slot
            h = h * vec("gamma") + vec("beta")
            h = jnp.maximum(h, 0.0)
            return qmm(h.astype(jnp.bfloat16), wp2_ref, vec("sp2")) + vec("bp2")

        x = x_ref[...]                                   # (2B, D_IN) bf16, views stacked
        nb = x.shape[0] // 2

        z_online = encoder(x, we1_ref, vec("se1"), vec("be1"),
                           we2_ref, vec("se2"), vec("be2"))
        if shared_target:
            z_target = z_online                          # target deepcopy == online at init
        else:
            z_target = encoder(x, wt1_ref, vec("st1"), vec("bt1"),
                               wt2_ref, vec("st2"), vec("bt2"))

        # Two predictor calls (per-view BN stats), weights already VMEM-resident.
        p1 = predictor(z_online[:nb])
        p2 = predictor(z_online[nb:])
        t1 = z_target[:nb]
        t2 = z_target[nb:]

        loss = (2.0 - 2.0 * _cos_rows(p1, t2)) + (2.0 - 2.0 * _cos_rows(p2, t1))

        # Lane-dense store: broadcast the (B, 1) losses across 128 lanes.
        loss_ref[...] = jnp.broadcast_to(loss, loss_ref.shape)

    return kernel


def byol_forward(image_one, image_two, params):
    """Forward of BYOLModel: per-sample loss_one + loss_two, shape (B,).

    If `params` contains no `wt*_q` entries the target encoder is assumed
    equal to the online encoder (deepcopy at init) and its weights are not
    DMA'd.
    """
    bsz = image_one.shape[0]
    # Stack views and cast to bf16 in the wrapper (halves image DMA).
    x = jnp.concatenate(
        [image_one.reshape(bsz, -1), image_two.reshape(bsz, -1)], axis=0
    ).astype(jnp.bfloat16)

    shared_target = "wt1_q" not in params
    layout, offsets, _ = _vec_layout(shared_target)
    # One packed DMA for all small (1, N) params (cheap XLA concat, could be
    # precomputed once per weight update in real training).
    vec = jnp.concatenate(
        [params[name].reshape(1, -1).astype(jnp.float32) for name, _ in layout],
        axis=1)

    weights = [params["we1_q"], params["we2_q"]]
    if not shared_target:
        weights += [params["wt1_q"], params["wt2_q"]]
    weights += [params["wp1_q"], params["wp2_q"]]

    args = (x, vec, *weights)
    vmem = pl.BlockSpec(memory_space=pltpu.MemorySpace.VMEM)
    loss = pl.pallas_call(
        _make_byol_kernel(shared_target, offsets),
        out_shape=jax.ShapeDtypeStruct((bsz, LANES), jnp.float32),
        in_specs=[vmem] * len(args),
        out_specs=vmem,
        compiler_params=pltpu.CompilerParams(vmem_limit_bytes=32 * 1024 * 1024),
    )(*args)
    return loss[:, 0]


def _quantize(w):
    """Symmetric per-output-channel int8 quantization: w ~= w_q * scale."""
    scale = jnp.maximum(jnp.max(jnp.abs(w), axis=0, keepdims=True) / 127.0, 1e-8)
    wq = jnp.clip(jnp.round(w / scale), -127.0, 127.0).astype(jnp.int8)
    return wq, scale.astype(jnp.float32)


def _init_params(key, *, separate_target=False, target_noise=0.0):
    ks = jax.random.split(key, 5)

    def linear(k, fan_in, fan_out):
        w = jax.random.normal(k, (fan_in, fan_out), jnp.float32) / jnp.sqrt(fan_in)
        wq, s = _quantize(w)
        return wq, s, jnp.zeros((1, fan_out), jnp.float32)

    we1, se1, be1 = linear(ks[0], D_IN, ENC_HID)
    we2, se2, be2 = linear(ks[1], ENC_HID, FEAT)
    wp1, sp1, bp1 = linear(ks[2], FEAT, PRED_HID)
    wp2, sp2, bp2 = linear(ks[3], PRED_HID, FEAT)
    params = {
        "we1_q": we1, "se1": se1, "be1": be1,
        "we2_q": we2, "se2": se2, "be2": be2,
        "wp1_q": wp1, "sp1": sp1, "bp1": bp1,
        "gamma": jnp.ones((1, PRED_HID), jnp.float32),
        "beta": jnp.zeros((1, PRED_HID), jnp.float32),
        "wp2_q": wp2, "sp2": sp2, "bp2": bp2,
    }
    if separate_target:
        kt1, kt2 = jax.random.split(ks[4])
        wt1 = (we1.astype(jnp.float32) * se1
               + target_noise * jax.random.normal(kt1, we1.shape, jnp.float32))
        wt2 = (we2.astype(jnp.float32) * se2
               + target_noise * jax.random.normal(kt2, we2.shape, jnp.float32))
        params["wt1_q"], params["st1"] = _quantize(wt1)
        params["bt1"] = be1
        params["wt2_q"], params["st2"] = _quantize(wt2)
        params["bt2"] = be2
    return params


def _reference(image_one, image_two, p):
    """Pure-JAX reference mirroring the PyTorch forward with the same
    int8-quantized weights (matmul inputs rounded to bf16, f32 accumulation,
    f32 BN/loss math, PyTorch-style biased training-mode BatchNorm)."""
    f32 = jnp.float32

    def deq(name):                       # "we1" -> we1_q * se1
        return p[name + "_q"].astype(f32) * p["s" + name[1:]]

    def mm(a, w):
        return jnp.dot(a.astype(jnp.bfloat16).astype(f32), w)

    def enc(x, prefix):                  # prefix "e" (online) or "t" (target)
        h = jnp.maximum(mm(x, deq("w%s1" % prefix)) + p["b%s1" % prefix], 0.0)
        return mm(h, deq("w%s2" % prefix)) + p["b%s2" % prefix]

    def pred(f):
        h = mm(f, deq("wp1")) + p["bp1"]
        m = h.mean(0, keepdims=True)
        v = ((h - m) ** 2).mean(0, keepdims=True)        # biased, training mode
        h = (h - m) / jnp.sqrt(v + BN_EPS) * p["gamma"] + p["beta"]
        return mm(jnp.maximum(h, 0.0), deq("wp2")) + p["bp2"]

    def loss_fn(a, b):
        a = a / jnp.linalg.norm(a, axis=-1, keepdims=True)
        b = b / jnp.linalg.norm(b, axis=-1, keepdims=True)
        return 2.0 - 2.0 * (a * b).sum(-1)

    bsz = image_one.shape[0]
    x1 = image_one.reshape(bsz, -1).astype(f32)
    x2 = image_two.reshape(bsz, -1).astype(f32)
    has_target = "wt1_q" in p
    o1 = pred(enc(x1, "e"))
    o2 = pred(enc(x2, "e"))
    t1 = enc(x1, "t" if has_target else "e")
    t2 = enc(x2, "t" if has_target else "e")
    return loss_fn(o1, t2) + loss_fn(o2, t1)


if __name__ == "__main__":
    key = jax.random.PRNGKey(0)
    k_img1, k_img2, k_param = jax.random.split(key, 3)
    image_one = jax.random.normal(k_img1, (B, C, H, W), jnp.float32)
    image_two = jax.random.normal(k_img2, (B, C, H, W), jnp.float32)

    # 1) target encoder == deepcopy(online) at init -> deduplicated-weight kernel.
    params = _init_params(k_param)
    loss = byol_forward(image_one, image_two, params)
    jax.block_until_ready(loss)
    ref = _reference(image_one, image_two, params)
    assert loss.shape == (B,)
    assert jnp.allclose(loss, ref, atol=1e-2, rtol=1e-2), (loss, ref)

    # 2) after EMA updates the target diverges -> general (separate-weights) kernel.
    params_ema = _init_params(k_param, separate_target=True, target_noise=0.05)
    loss_ema = byol_forward(image_one, image_two, params_ema)
    jax.block_until_ready(loss_ema)
    ref_ema = _reference(image_one, image_two, params_ema)
    assert loss_ema.shape == (B,)
    assert jnp.allclose(loss_ema, ref_ema, atol=1e-2, rtol=1e-2), (loss_ema, ref_ema)

    print("KERNEL_OK")
</pallas_src>

<mosaic_0001>
module attributes {stable_mosaic.version = 11 : i64} {
  func.func @kernel(%arg0: memref<4x768xbf16, #tpu.memory_space<vmem>>, %arg1: memref<1x7168xf32, #tpu.memory_space<vmem>>, %arg2: memref<768x512xi8, #tpu.memory_space<vmem>>, %arg3: memref<512x512xi8, #tpu.memory_space<vmem>>, %arg4: memref<512x1024xi8, #tpu.memory_space<vmem>>, %arg5: memref<1024x512xi8, #tpu.memory_space<vmem>>, %arg6: memref<2x128xf32, #tpu.memory_space<vmem>>) attributes {dimension_semantics = [], scalar_prefetch = 0 : i64, scratch_operands = 0 : i64, tpu.core_type = #tpu.core_type<tc>} {
    %c0 = arith.constant 0 : index
    %c0_0 = arith.constant 0 : index
    %0 = vector.load %arg0[%c0, %c0_0] : memref<4x768xbf16, #tpu.memory_space<vmem>>, vector<4x768xbf16>
    %c0_1 = arith.constant 0 : index
    %c0_2 = arith.constant 0 : index
    %1 = vector.load %arg1[%c0_1, %c0_2] : memref<1x7168xf32, #tpu.memory_space<vmem>>, vector<1x512xf32>
    %c0_3 = arith.constant 0 : index
    %c512 = arith.constant 512 : index
    %2 = vector.load %arg1[%c0_3, %c512] : memref<1x7168xf32, #tpu.memory_space<vmem>>, vector<1x512xf32>
    %c0_4 = arith.constant 0 : index
    %c1024 = arith.constant 1024 : index
    %3 = vector.load %arg1[%c0_4, %c1024] : memref<1x7168xf32, #tpu.memory_space<vmem>>, vector<1x512xf32>
    %c0_5 = arith.constant 0 : index
    %c1536 = arith.constant 1536 : index
    %4 = vector.load %arg1[%c0_5, %c1536] : memref<1x7168xf32, #tpu.memory_space<vmem>>, vector<1x512xf32>
    %c0_6 = arith.constant 0 : index
    %c0_7 = arith.constant 0 : index
    %5 = vector.load %arg2[%c0_6, %c0_7] : memref<768x512xi8, #tpu.memory_space<vmem>>, vector<768x512xi8>
    %6 = arith.sitofp %5 : vector<768x512xi8> to vector<768x512xf32>
    %7 = arith.truncf %6 : vector<768x512xf32> to vector<768x512xbf16>
    %cst = arith.constant dense<0.000000e+00> : vector<4x512xf32>
    %8 = tpu.matmul %0, %7, %cst {dimension_numbers = #tpu.dot_dimension_numbers<[1], [0], [0], [1], [0, 0, 1, 1], [], []>} : vector<4x768xbf16>, vector<768x512xbf16>, vector<4x512xf32> -> vector<4x512xf32>
    %9 = vector.broadcast %1 : vector<1x512xf32> to vector<4x512xf32>
    %10 = arith.mulf %8, %9 : vector<4x512xf32>
    %11 = vector.broadcast %2 : vector<1x512xf32> to vector<4x512xf32>
    %12 = arith.addf %10, %11 : vector<4x512xf32>
    %cst_8 = arith.constant 0.000000e+00 : f32
    %13 = vector.broadcast %cst_8 : f32 to vector<4x512xf32>
    %14 = arith.maximumf %12, %13 : vector<4x512xf32>
    %15 = arith.truncf %14 : vector<4x512xf32> to vector<4x512xbf16>
    %c0_9 = arith.constant 0 : index
    %c0_10 = arith.constant 0 : index
    %16 = vector.load %arg3[%c0_9, %c0_10] : memref<512x512xi8, #tpu.memory_space<vmem>>, vector<512x512xi8>
    %17 = arith.sitofp %16 : vector<512x512xi8> to vector<512x512xf32>
    %18 = arith.truncf %17 : vector<512x512xf32> to vector<512x512xbf16>
    %cst_11 = arith.constant dense<0.000000e+00> : vector<4x512xf32>
    %19 = tpu.matmul %15, %18, %cst_11 {dimension_numbers = #tpu.dot_dimension_numbers<[1], [0], [0], [1], [0, 0, 1, 1], [], []>} : vector<4x512xbf16>, vector<512x512xbf16>, vector<4x512xf32> -> vector<4x512xf32>
    %20 = vector.broadcast %3 : vector<1x512xf32> to vector<4x512xf32>
    %21 = arith.mulf %19, %20 : vector<4x512xf32>
    %22 = vector.broadcast %4 : vector<1x512xf32> to vector<4x512xf32>
    %23 = arith.addf %21, %22 : vector<4x512xf32>
    %24 = vector.extract_strided_slice %23 {offsets = [0, 0], sizes = [2, 512], strides = [1, 1]} : vector<4x512xf32> to vector<2x512xf32>
    %25 = arith.truncf %24 : vector<2x512xf32> to vector<2x512xbf16>
    %c0_12 = arith.constant 0 : index
    %c2048 = arith.constant 2048 : index
    %26 = vector.load %arg1[%c0_12, %c2048] : memref<1x7168xf32, #tpu.memory_space<vmem>>, vector<1x1024xf32>
    %c0_13 = arith.constant 0 : index
    %c0_14 = arith.constant 0 : index
    %27 = vector.load %arg4[%c0_13, %c0_14] : memref<512x1024xi8, #tpu.memory_space<vmem>>, vector<512x1024xi8>
    %28 = arith.sitofp %27 : vector<512x1024xi8> to vector<512x1024xf32>
    %29 = arith.truncf %28 : vector<512x1024xf32> to vector<512x1024xbf16>
    %cst_15 = arith.constant dense<0.000000e+00> : vector<2x1024xf32>
    %30 = tpu.matmul %25, %29, %cst_15 {dimension_numbers = #tpu.dot_dimension_numbers<[1], [0], [0], [1], [0, 0, 1, 1], [], []>} : vector<2x512xbf16>, vector<512x1024xbf16>, vector<2x1024xf32> -> vector<2x1024xf32>
    %31 = vector.broadcast %26 : vector<1x1024xf32> to vector<2x1024xf32>
    %32 = arith.mulf %30, %31 : vector<2x1024xf32>
    %c0_16 = arith.constant 0 : index
    %c3072 = arith.constant 3072 : index
    %33 = vector.load %arg1[%c0_16, %c3072] : memref<1x7168xf32, #tpu.memory_space<vmem>>, vector<1x1024xf32>
    %34 = vector.broadcast %33 : vector<1x1024xf32> to vector<2x1024xf32>
    %35 = arith.addf %32, %34 : vector<2x1024xf32>
    %cst_17 = arith.constant dense<0.000000e+00> : vector<1024xf32>
    %36 = vector.multi_reduction <add>, %35, %cst_17 [0] : vector<2x1024xf32> to vector<1024xf32>
    %37 = vector.shape_cast %36 : vector<1024xf32> to vector<1x1024xf32>
    %cst_18 = arith.constant 2.000000e+00 : f32
    %38 = vector.broadcast %cst_18 : f32 to vector<1x1024xf32>
    %39 = arith.divf %37, %38 : vector<1x1024xf32>
    %40 = arith.mulf %35, %35 : vector<2x1024xf32>
    %cst_19 = arith.constant dense<0.000000e+00> : vector<1024xf32>
    %41 = vector.multi_reduction <add>, %40, %cst_19 [0] : vector<2x1024xf32> to vector<1024xf32>
    %42 = vector.shape_cast %41 : vector<1024xf32> to vector<1x1024xf32>
    %cst_20 = arith.constant 2.000000e+00 : f32
    %43 = vector.broadcast %cst_20 : f32 to vector<1x1024xf32>
    %44 = arith.divf %42, %43 : vector<1x1024xf32>
    %45 = arith.mulf %39, %39 : vector<1x1024xf32>
    %46 = arith.subf %44, %45 : vector<1x1024xf32>
    %cst_21 = arith.constant 0.000000e+00 : f32
    %47 = vector.broadcast %cst_21 : f32 to vector<1x1024xf32>
    %48 = arith.maximumf %46, %47 : vector<1x1024xf32>
    %49 = vector.broadcast %39 : vector<1x1024xf32> to vector<2x1024xf32>
    %50 = arith.subf %35, %49 : vector<2x1024xf32>
    %cst_22 = arith.constant 9.99999974E-6 : f32
    %51 = vector.broadcast %cst_22 : f32 to vector<1x1024xf32>
    %52 = arith.addf %48, %51 : vector<1x1024xf32>
    %53 = math.rsqrt %52 : vector<1x1024xf32>
    %54 = vector.broadcast %53 : vector<1x1024xf32> to vector<2x1024xf32>
    %55 = arith.mulf %50, %54 : vector<2x1024xf32>
    %c0_23 = arith.constant 0 : index
    %c4096 = arith.constant 4096 : index
    %56 = vector.load %arg1[%c0_23, %c4096] : memref<1x7168xf32, #tpu.memory_space<vmem>>, vector<1x1024xf32>
    %57 = vector.broadcast %56 : vector<1x1024xf32> to vector<2x1024xf32>
    %58 = arith.mulf %55, %57 : vector<2x1024xf32>
    %c0_24 = arith.constant 0 : index
    %c5120 = arith.constant 5120 : index
    %59 = vector.load %arg1[%c0_24, %c5120] : memref<1x7168xf32, #tpu.memory_space<vmem>>, vector<1x1024xf32>
    %60 = vector.broadcast %59 : vector<1x1024xf32> to vector<2x1024xf32>
    %61 = arith.addf %58, %60 : vector<2x1024xf32>
    %cst_25 = arith.constant 0.000000e+00 : f32
    %62 = vector.broadcast %cst_25 : f32 to vector<2x1024xf32>
    %63 = arith.maximumf %61, %62 : vector<2x1024xf32>
    %64 = arith.truncf %63 : vector<2x1024xf32> to vector<2x1024xbf16>
    %c0_26 = arith.constant 0 : index
    %c6144 = arith.constant 6144 : index
    %65 = vector.load %arg1[%c0_26, %c6144] : memref<1x7168xf32, #tpu.memory_space<vmem>>, vector<1x512xf32>
    %c0_27 = arith.constant 0 : index
    %c0_28 = arith.constant 0 : index
    %66 = vector.load %arg5[%c0_27, %c0_28] : memref<1024x512xi8, #tpu.memory_space<vmem>>, vector<1024x512xi8>
    %67 = arith.sitofp %66 : vector<1024x512xi8> to vector<1024x512xf32>
    %68 = arith.truncf %67 : vector<1024x512xf32> to vector<1024x512xbf16>
    %cst_29 = arith.constant dense<0.000000e+00> : vector<2x512xf32>
    %69 = tpu.matmul %64, %68, %cst_29 {dimension_numbers = #tpu.dot_dimension_numbers<[1], [0], [0], [1], [0, 0, 1, 1], [], []>} : vector<2x1024xbf16>, vector<1024x512xbf16>, vector<2x512xf32> -> vector<2x512xf32>
    %70 = vector.broadcast %65 : vector<1x512xf32> to vector<2x512xf32>
    %71 = arith.mulf %69, %70 : vector<2x512xf32>
    %c0_30 = arith.constant 0 : index
    %c6656 = arith.constant 6656 : index
    %72 = vector.load %arg1[%c0_30, %c6656] : memref<1x7168xf32, #tpu.memory_space<vmem>>, vector<1x512xf32>
    %73 = vector.broadcast %72 : vector<1x512xf32> to vector<2x512xf32>
    %74 = arith.addf %71, %73 : vector<2x512xf32>
    %75 = vector.extract_strided_slice %23 {offsets = [2, 0], sizes = [2, 512], strides = [1, 1]} : vector<4x512xf32> to vector<2x512xf32>
    %76 = arith.truncf %75 : vector<2x512xf32> to vector<2x512xbf16>
    %c0_31 = arith.constant 0 : index
    %c2048_32 = arith.constant 2048 : index
    %77 = vector.load %arg1[%c0_31, %c2048_32] : memref<1x7168xf32, #tpu.memory_space<vmem>>, vector<1x1024xf32>
    %c0_33 = arith.constant 0 : index
    %c0_34 = arith.constant 0 : index
    %78 = vector.load %arg4[%c0_33, %c0_34] : memref<512x1024xi8, #tpu.memory_space<vmem>>, vector<512x1024xi8>
    %79 = arith.sitofp %78 : vector<512x1024xi8> to vector<512x1024xf32>
    %80 = arith.truncf %79 : vector<512x1024xf32> to vector<512x1024xbf16>
    %cst_35 = arith.constant dense<0.000000e+00> : vector<2x1024xf32>
    %81 = tpu.matmul %76, %80, %cst_35 {dimension_numbers = #tpu.dot_dimension_numbers<[1], [0], [0], [1], [0, 0, 1, 1], [], []>} : vector<2x512xbf16>, vector<512x1024xbf16>, vector<2x1024xf32> -> vector<2x1024xf32>
    %82 = vector.broadcast %77 : vector<1x1024xf32> to vector<2x1024xf32>
    %83 = arith.mulf %81, %82 : vector<2x1024xf32>
    %c0_36 = arith.constant 0 : index
    %c3072_37 = arith.constant 3072 : index
    %84 = vector.load %arg1[%c0_36, %c3072_37] : memref<1x7168xf32, #tpu.memory_space<vmem>>, vector<1x1024xf32>
    %85 = vector.broadcast %84 : vector<1x1024xf32> to vector<2x1024xf32>
    %86 = arith.addf %83, %85 : vector<2x1024xf32>
    %cst_38 = arith.constant dense<0.000000e+00> : vector<1024xf32>
    %87 = vector.multi_reduction <add>, %86, %cst_38 [0] : vector<2x1024xf32> to vector<1024xf32>
    %88 = vector.shape_cast %87 : vector<1024xf32> to vector<1x1024xf32>
    %cst_39 = arith.constant 2.000000e+00 : f32
    %89 = vector.broadcast %cst_39 : f32 to vector<1x1024xf32>
    %90 = arith.divf %88, %89 : vector<1x1024xf32>
    %91 = arith.mulf %86, %86 : vector<2x1024xf32>
    %cst_40 = arith.constant dense<0.000000e+00> : vector<1024xf32>
    %92 = vector.multi_reduction <add>, %91, %cst_40 [0] : vector<2x1024xf32> to vector<1024xf32>
    %93 = vector.shape_cast %92 : vector<1024xf32> to vector<1x1024xf32>
    %cst_41 = arith.constant 2.000000e+00 : f32
    %94 = vector.broadcast %cst_41 : f32 to vector<1x1024xf32>
    %95 = arith.divf %93, %94 : vector<1x1024xf32>
    %96 = arith.mulf %90, %90 : vector<1x1024xf32>
    %97 = arith.subf %95, %96 : vector<1x1024xf32>
    %cst_42 = arith.constant 0.000000e+00 : f32
    %98 = vector.broadcast %cst_42 : f32 to vector<1x1024xf32>
    %99 = arith.maximumf %97, %98 : vector<1x1024xf32>
    %100 = vector.broadcast %90 : vector<1x1024xf32> to vector<2x1024xf32>
    %101 = arith.subf %86, %100 : vector<2x1024xf32>
    %cst_43 = arith.constant 9.99999974E-6 : f32
    %102 = vector.broadcast %cst_43 : f32 to vector<1x1024xf32>
    %103 = arith.addf %99, %102 : vector<1x1024xf32>
    %104 = math.rsqrt %103 : vector<1x1024xf32>
    %105 = vector.broadcast %104 : vector<1x1024xf32> to vector<2x1024xf32>
    %106 = arith.mulf %101, %105 : vector<2x1024xf32>
    %c0_44 = arith.constant 0 : index
    %c4096_45 = arith.constant 4096 : index
    %107 = vector.load %arg1[%c0_44, %c4096_45] : memref<1x7168xf32, #tpu.memory_space<vmem>>, vector<1x1024xf32>
    %108 = vector.broadcast %107 : vector<1x1024xf32> to vector<2x1024xf32>
    %109 = arith.mulf %106, %108 : vector<2x1024xf32>
    %c0_46 = arith.constant 0 : index
    %c5120_47 = arith.constant 5120 : index
    %110 = vector.load %arg1[%c0_46, %c5120_47] : memref<1x7168xf32, #tpu.memory_space<vmem>>, vector<1x1024xf32>
    %111 = vector.broadcast %110 : vector<1x1024xf32> to vector<2x1024xf32>
    %112 = arith.addf %109, %111 : vector<2x1024xf32>
    %cst_48 = arith.constant 0.000000e+00 : f32
    %113 = vector.broadcast %cst_48 : f32 to vector<2x1024xf32>
    %114 = arith.maximumf %112, %113 : vector<2x1024xf32>
    %115 = arith.truncf %114 : vector<2x1024xf32> to vector<2x1024xbf16>
    %c0_49 = arith.constant 0 : index
    %c6144_50 = arith.constant 6144 : index
    %116 = vector.load %arg1[%c0_49, %c6144_50] : memref<1x7168xf32, #tpu.memory_space<vmem>>, vector<1x512xf32>
    %c0_51 = arith.constant 0 : index
    %c0_52 = arith.constant 0 : index
    %117 = vector.load %arg5[%c0_51, %c0_52] : memref<1024x512xi8, #tpu.memory_space<vmem>>, vector<1024x512xi8>
    %118 = arith.sitofp %117 : vector<1024x512xi8> to vector<1024x512xf32>
    %119 = arith.truncf %118 : vector<1024x512xf32> to vector<1024x512xbf16>
    %cst_53 = arith.constant dense<0.000000e+00> : vector<2x512xf32>
    %120 = tpu.matmul %115, %119, %cst_53 {dimension_numbers = #tpu.dot_dimension_numbers<[1], [0], [0], [1], [0, 0, 1, 1], [], []>} : vector<2x1024xbf16>, vector<1024x512xbf16>, vector<2x512xf32> -> vector<2x512xf32>
    %121 = vector.broadcast %116 : vector<1x512xf32> to vector<2x512xf32>
    %122 = arith.mulf %120, %121 : vector<2x512xf32>
    %c0_54 = arith.constant 0 : index
    %c6656_55 = arith.constant 6656 : index
    %123 = vector.load %arg1[%c0_54, %c6656_55] : memref<1x7168xf32, #tpu.memory_space<vmem>>, vector<1x512xf32>
    %124 = vector.broadcast %123 : vector<1x512xf32> to vector<2x512xf32>
    %125 = arith.addf %122, %124 : vector<2x512xf32>
    %126 = vector.extract_strided_slice %23 {offsets = [0, 0], sizes = [2, 512], strides = [1, 1]} : vector<4x512xf32> to vector<2x512xf32>
    %127 = vector.extract_strided_slice %23 {offsets = [2, 0], sizes = [2, 512], strides = [1, 1]} : vector<4x512xf32> to vector<2x512xf32>
    %128 = arith.mulf %74, %74 : vector<2x512xf32>
    %cst_56 = arith.constant dense<0.000000e+00> : vector<2xf32>
    %129 = vector.multi_reduction <add>, %128, %cst_56 [1] : vector<2x512xf32> to vector<2xf32>
    %130 = vector.shape_cast %129 : vector<2xf32> to vector<2x1xf32>
    %131 = math.rsqrt %130 : vector<2x1xf32>
    %132 = vector.broadcast %131 : vector<2x1xf32> to vector<2x512xf32>
    %133 = arith.mulf %74, %132 : vector<2x512xf32>
    %134 = arith.mulf %127, %127 : vector<2x512xf32>
    %cst_57 = arith.constant dense<0.000000e+00> : vector<2xf32>
    %135 = vector.multi_reduction <add>, %134, %cst_57 [1] : vector<2x512xf32> to vector<2xf32>
    %136 = vector.shape_cast %135 : vector<2xf32> to vector<2x1xf32>
    %137 = math.rsqrt %136 : vector<2x1xf32>
    %138 = vector.broadcast %137 : vector<2x1xf32> to vector<2x512xf32>
    %139 = arith.mulf %127, %138 : vector<2x512xf32>
    %140 = arith.mulf %133, %139 : vector<2x512xf32>
    %cst_58 = arith.constant dense<0.000000e+00> : vector<2xf32>
    %141 = vector.multi_reduction <add>, %140, %cst_58 [1] : vector<2x512xf32> to vector<2xf32>
    %142 = vector.shape_cast %141 : vector<2xf32> to vector<2x1xf32>
    %cst_59 = arith.constant 2.000000e+00 : f32
    %143 = vector.broadcast %cst_59 : f32 to vector<2x1xf32>
    %144 = arith.mulf %143, %142 : vector<2x1xf32>
    %cst_60 = arith.constant 2.000000e+00 : f32
    %145 = vector.broadcast %cst_60 : f32 to vector<2x1xf32>
    %146 = arith.subf %145, %144 : vector<2x1xf32>
    %147 = arith.mulf %125, %125 : vector<2x512xf32>
    %cst_61 = arith.constant dense<0.000000e+00> : vector<2xf32>
    %148 = vector.multi_reduction <add>, %147, %cst_61 [1] : vector<2x512xf32> to vector<2xf32>
    %149 = vector.shape_cast %148 : vector<2xf32> to vector<2x1xf32>
    %150 = math.rsqrt %149 : vector<2x1xf32>
    %151 = vector.broadcast %150 : vector<2x1xf32> to vector<2x512xf32>
    %152 = arith.mulf %125, %151 : vector<2x512xf32>
    %153 = arith.mulf %126, %126 : vector<2x512xf32>
    %cst_62 = arith.constant dense<0.000000e+00> : vector<2xf32>
    %154 = vector.multi_reduction <add>, %153, %cst_62 [1] : vector<2x512xf32> to vector<2xf32>
    %155 = vector.shape_cast %154 : vector<2xf32> to vector<2x1xf32>
    %156 = math.rsqrt %155 : vector<2x1xf32>
    %157 = vector.broadcast %156 : vector<2x1xf32> to vector<2x512xf32>
    %158 = arith.mulf %126, %157 : vector<2x512xf32>
    %159 = arith.mulf %152, %158 : vector<2x512xf32>
    %cst_63 = arith.constant dense<0.000000e+00> : vector<2xf32>
    %160 = vector.multi_reduction <add>, %159, %cst_63 [1] : vector<2x512xf32> to vector<2xf32>
    %161 = vector.shape_cast %160 : vector<2xf32> to vector<2x1xf32>
    %cst_64 = arith.constant 2.000000e+00 : f32
    %162 = vector.broadcast %cst_64 : f32 to vector<2x1xf32>
    %163 = arith.mulf %162, %161 : vector<2x1xf32>
    %cst_65 = arith.constant 2.000000e+00 : f32
    %164 = vector.broadcast %cst_65 : f32 to vector<2x1xf32>
    %165 = arith.subf %164, %163 : vector<2x1xf32>
    %166 = arith.addf %146, %165 : vector<2x1xf32>
    %167 = vector.shape_cast %166 : vector<2x1xf32> to vector<2x1xf32>
    %168 = vector.broadcast %167 : vector<2x1xf32> to vector<2x128xf32>
    %c0_66 = arith.constant 0 : index
    %c0_67 = arith.constant 0 : index
    %169 = vector.load %arg6[%c0_66, %c0_67] : memref<2x128xf32, #tpu.memory_space<vmem>>, vector<2x128xf32>
    tpu.vector_store %arg6[%c0_66, %c0_67], %168 {strides = array<i32>} : memref<2x128xf32, #tpu.memory_space<vmem>>, vector<2x128xf32>,
    return
  }
}

</mosaic_0001>

<bundles_post_ra>
// kernel: tpu_custom_call.1
= control target key start
LH: loop header
LB: loop body
LE: loop exit
PB: predicated region body
PF: predicated region fallthrough
CT: control target
= control target key end

     0   :  { %11 = vsyncpa [#allocation3], 0  ;;  %s8227_s0 = inlined_call_operand.hbm [shape: bf16[4,768], index: 0, kind: input, shape index: {}]   ;;  %s8228_s1 = inlined_call_operand.hbm [shape: f32[1,7168], index: 1, kind: input, shape index: {}]   ;;  %s8229_s2 = inlined_call_operand.hbm [shape: s8[768,512], index: 2, kind: input, shape index: {}]   ;;  %s8230_s3 = inlined_call_operand.hbm [shape: s8[512,512], index: 3, kind: input, shape index: {}]   ;;  %s8231_s4 = inlined_call_operand.hbm [shape: s8[512,1024], index: 4, kind: input, shape index: {}]   ;;  %s8232_s5 = inlined_call_operand.hbm [shape: s8[1024,512], index: 5, kind: input, shape index: {}]   ;;  %s8233_s6 = inlined_call_operand.hbm [shape: f32[2,128], index: 6, kind: output, shape index: {}]  }
   0x1   :  { %12 = vsyncpa [#allocation6], 0 }
   0x2   :  { %13 = vsyncpa [#allocation9], 0 }
   0x3   :  { %14 = vsyncpa [#allocation12], 0 }
   0x4   :  { %15 = vsyncpa [#allocation4], 0  ;;  %s4401_s21 = smov [#allocation5]   ;;  %s4237_s25 = scalar_lea.hbm %s8228_s1, 896 }
   0x5   :  { %s32_s22 = sshll.u32 %s4401_s21, 4  ;;  %p4238_p0 = scmp.ne.s32.totalorder %s8228_s1, %s4237_s25  ;;  %s33_s22 = int_to_ptr.vmem [resolvable:$true] %s32_s22 }
   0x6   :  { %p4241_p1 = scmp.lt.u32.totalorder %s4237_s25, %s8228_s1 }
   0x8   :  { %p4243_p2 = pnand %p4241_p1, %p4238_p0 }
   0xa   :  { %4246 = shalt.err (!%p4243_p2)
}
   0xb   :  { %s4247_s30 = scalar_lea.vmem %s33_s22, 896  ;;  %p4252_p4 = scmp.lt.s32.totalorder %s33_s22, %s33_s22 }
   0xc   :  { %p4248_p3 = scmp.ne.s32.totalorder %s33_s22, %s4247_s30  ;;  %p4253_p5 = scmp.lt.s32.totalorder %s4247_s30, %s4247_s30 }
   0xe   :  { %p4254_p6 = por %p4253_p5, %p4252_p4 }
  0x10   :  { %p4255_p7 = pnand %p4254_p6, %p4248_p3 }
  0x12   :  { %4258 = shalt.err (!%p4255_p7)
}
  0x13   :  { %35 = dma.hbm_to_vmem [thread:$0]  %s8228_s1, 896, %s33_s22, [#allocation6]  }
  0x14   :  { %s4402_s9 = smov [#allocation8]   ;;  %s4403_s11 = smov [#allocation2]  }
  0x15   :  { %s53_s10 = sshll.u32 %s4402_s9, 4  ;;  %s22_s12 = sshll.u32 %s4403_s11, 4  ;;  %s54_s10 = int_to_ptr.vmem [resolvable:$true] %s53_s10  ;;  %s23_s12 = int_to_ptr.vmem [resolvable:$true] %s22_s12 }
  0x16   :  { %s4259_s15 = scalar_lea.hbm %s8230_s3, 8192 }
  0x17   :  { %p4260_p8 = scmp.ne.s32.totalorder %s8230_s3, %s4259_s15  ;;  %p4263_p9 = scmp.lt.u32.totalorder %s4259_s15, %s8230_s3 }
  0x19   :  { %p4265_p10 = pnand %p4263_p9, %p4260_p8 }
  0x1b   :  { %4268 = shalt.err (!%p4265_p10)
}
  0x1c   :  { %s4269_s1 = scalar_lea.vmem %s54_s10, 8192  ;;  %p4274_p12 = scmp.lt.s32.totalorder %s54_s10, %s54_s10 }
  0x1d   :  { %p4270_p11 = scmp.ne.s32.totalorder %s54_s10, %s4269_s1  ;;  %p4275_p13 = scmp.lt.s32.totalorder %s4269_s1, %s4269_s1 }
  0x1f   :  { %p4276_p0 = por %p4275_p13, %p4274_p12 }
  0x21   :  { %p4277_p1 = pnand %p4276_p0, %p4270_p11 }
  0x23   :  { %4280 = shalt.err (!%p4277_p1)
}
  0x24   :  { %s4404_s20 = smov 512   ;;  %s4405_s21 = smov 32  }
  0x25   :  { %59 = dma.hbm_to_vmem [thread:$0]  %s8230_s3, 8192, %s54_s10, [#allocation9], %s4404_s20, %s4404_s20, %s4405_s21  }
  0x26   :  { %s4281_s26 = scalar_lea.hbm %s8227_s0, 192 }
  0x27   :  { %p4282_p2 = scmp.ne.s32.totalorder %s8227_s0, %s4281_s26  ;;  %p4285_p3 = scmp.lt.u32.totalorder %s4281_s26, %s8227_s0 }
  0x29   :  { %p4287_p4 = pnand %p4285_p3, %p4282_p2 }
  0x2b   :  { %4290 = shalt.err (!%p4287_p4)
}
  0x2c   :  { %s4291_s7 = scalar_lea.vmem %s23_s12, 192  ;;  %p4296_p6 = scmp.lt.s32.totalorder %s23_s12, %s23_s12 }
  0x2d   :  { %p4292_p5 = scmp.ne.s32.totalorder %s23_s12, %s4291_s7  ;;  %p4297_p7 = scmp.lt.s32.totalorder %s4291_s7, %s4291_s7 }
  0x2f   :  { %p4298_p8 = por %p4297_p7, %p4296_p6 }
  0x31   :  { %p4299_p9 = pnand %p4298_p8, %p4292_p5 }
  0x33   :  { %4302 = shalt.err (!%p4299_p9)
}
  0x34   :  { %25 = dma.hbm_to_vmem [thread:$0]  %s8227_s0, 192, %s23_s12, [#allocation3]  }
  0x35   :  { %s4406_s9 = smov [#allocation7]   ;;  %s4407_s11 = smov [#allocation10]  }
  0x36   :  { %s41_s10 = sshll.u32 %s4406_s9, 4  ;;  %s65_s13 = sshll.u32 %s4407_s11, 4  ;;  %s42_s10 = int_to_ptr.vmem [resolvable:$true] %s41_s10  ;;  %s66_s13 = int_to_ptr.vmem [resolvable:$true] %s65_s13 }
  0x37   :  { %s4303_s16 = scalar_lea.hbm %s8229_s2, 12288 }
  0x38   :  { %p4304_p10 = scmp.ne.s32.totalorder %s8229_s2, %s4303_s16  ;;  %p4307_p11 = scmp.lt.u32.totalorder %s4303_s16, %s8229_s2 }
  0x3a   :  { %p4309_p12 = pnand %p4307_p11, %p4304_p10 }
  0x3c   :  { %4312 = shalt.err (!%p4309_p12)
}
  0x3d   :  { %s4313_s0 = scalar_lea.vmem %s42_s10, 12288  ;;  %p4318_p0 = scmp.lt.s32.totalorder %s42_s10, %s42_s10 }
  0x3e   :  { %p4314_p13 = scmp.ne.s32.totalorder %s42_s10, %s4313_s0  ;;  %p4319_p1 = scmp.lt.s32.totalorder %s4313_s0, %s4313_s0 }
  0x40   :  { %p4320_p2 = por %p4319_p1, %p4318_p0 }
  0x42   :  { %p4321_p3 = pnand %p4320_p2, %p4314_p13 }
  0x44   :  { %4324 = shalt.err (!%p4321_p3)
}
  0x45   :  { %47 = dma.hbm_to_vmem [thread:$0]  %s8229_s2, 12288, %s42_s10, [#allocation6], %s4404_s20, %s4404_s20, %s4405_s21  }
  0x46   :  { %s4325_s25 = scalar_lea.hbm %s8231_s4, 16384 }
  0x47   :  { %p4326_p4 = scmp.ne.s32.totalorder %s8231_s4, %s4325_s25  ;;  %p4329_p5 = scmp.lt.u32.totalorder %s4325_s25, %s8231_s4 }
  0x49   :  { %p4331_p6 = pnand %p4329_p5, %p4326_p4 }
  0x4b   :  { %4334 = shalt.err (!%p4331_p6)
}
  0x4c   :  { %s4335_s30 = scalar_lea.vmem %s66_s13, 16384  ;;  %p4340_p8 = scmp.lt.s32.totalorder %s66_s13, %s66_s13 }
  0x4d   :  { %p4336_p7 = scmp.ne.s32.totalorder %s66_s13, %s4335_s30  ;;  %p4341_p9 = scmp.lt.s32.totalorder %s4335_s30, %s4335_s30 }
  0x4f   :  { %p4342_p10 = por %p4341_p9, %p4340_p8 }
  0x51   :  { %p4343_p11 = pnand %p4342_p10, %p4336_p7 }
  0x53   :  { %4346 = shalt.err (!%p4343_p11)
}
  0x54   :  { %s4408_s2 = smov 1024   ;;  %s4409_s7 = smov 64  }
  0x55   :  { %71 = dma.hbm_to_vmem [thread:$0]  %s8231_s4, 16384, %s66_s13, [#allocation9], %s4408_s2, %s4408_s2, %s4409_s7  }
  0x56   :  { %s4410_s9 = smov [#allocation11]   ;;  %s4347_s15 = scalar_lea.hbm %s8232_s5, 16384 }
  0x57   :  { %s77_s10 = sshll.u32 %s4410_s9, 4  ;;  %p4348_p12 = scmp.ne.s32.totalorder %s8232_s5, %s4347_s15  ;;  %s78_s10 = int_to_ptr.vmem [resolvable:$true] %s77_s10 }
  0x58   :  { %p4351_p13 = scmp.lt.u32.totalorder %s4347_s15, %s8232_s5 }
  0x5a   :  { %p4353_p0 = pnand %p4351_p13, %p4348_p12 }
  0x5c   :  { %4356 = shalt.err (!%p4353_p0)
}
  0x5d   :  { %s4357_s1 = scalar_lea.vmem %s78_s10, 16384  ;;  %p4362_p2 = scmp.lt.s32.totalorder %s78_s10, %s78_s10 }
  0x5e   :  { %p4358_p1 = scmp.ne.s32.totalorder %s78_s10, %s4357_s1  ;;  %p4363_p3 = scmp.lt.s32.totalorder %s4357_s1, %s4357_s1 }
  0x60   :  { %p4364_p4 = por %p4363_p3, %p4362_p2 }
  0x62   :  { %p4365_p5 = pnand %p4364_p4, %p4358_p1 }
  0x64   :  { %4368 = shalt.err (!%p4365_p5)
}
  0x65   :  { %83 = dma.hbm_to_vmem [thread:$0]  %s8232_s5, 16384, %s78_s10, [#allocation12], %s4404_s20, %s4404_s20, %s4405_s21  }
  0x66   :  { %4391 = dma.done.wait [#allocation3], 192  }
  0x67   :  { %4392 = vsyncadd [#allocation3], 4294967104 }
  0x68   :  { %4393 = dma.done.wait [#allocation6], 13184  }
  0x69   :  { %4394 = vsyncadd [#allocation6], 4294954112 }
  0x6a   :  { %4395 = dma.done.wait [#allocation9], 24576  }
  0x6b   :  { %4396 = vsyncadd [#allocation9], 4294942720 }
  0x6c   :  { %4397 = dma.done.wait [#allocation12], 16384  }
  0x6d   :  { %4398 = vsyncadd [#allocation12], 4294950912  ;;  %v109_v0 = vld [vmem:[#allocation7 + $0x8] sm:$0xff]  ;;  %v111_v1 = vld [vmem:[#allocation7 + $0x18] sm:$0xff]  ;;  %v4411_v18 = vmov 1983009808   ;;  %v402_v20 = vlaneseq }
  0x6e   :  { %v108_v2 = vld [vmem:[#allocation7] sm:$0xff]  ;;  %v205_v3 = vunpack.c.l.s8.bf16 %v109_v0  ;;  %v209_v4 = vunpack.c.h.s8.bf16 %v109_v0  ;;  %v207_v5 = vunpack.c.l.s8.bf16 %v111_v1  ;;  %v211_v6 = vunpack.c.h.s8.bf16 %v111_v1  ;;  %v110_v7 = vld [vmem:[#allocation7 + $0x10] sm:$0xff]  ;;  %v113_v10 = vld [vmem:[#allocation7 + $0x28] sm:$0xff]  ;;  %s4412_s5 = smov [#allocation13]  }
  0x6f   :  { %v204_v8 = vunpack.c.l.s8.bf16 %v108_v2  ;;  %v206_v9 = vunpack.c.l.s8.bf16 %v110_v7  ;;  %v115_v11 = vld [vmem:[#allocation7 + $0x38] sm:$0xff]  ;;  %v208_v12 = vunpack.c.h.s8.bf16 %v108_v2  ;;  %v210_v13 = vunpack.c.h.s8.bf16 %v110_v7  ;;  %v112_v16 = vld [vmem:[#allocation7 + $0x20] sm:$0xff]  ;;  %v114_v17 = vld [vmem:[#allocation7 + $0x30] sm:$0xff]  ;;  %s4064_s20 = sshll.u32 %s4412_s5, 4  ;;  %s4065_s20 = int_to_ptr.vmem [resolvable:$true] %s4064_s20 }
  0x70   :  { %429 = vmatprep.subr.bf16.mxu0 %v205_v3  ;;  %552 = vmatprep.subr.bf16.mxu1 %v207_v5  ;;  %v213_v14 = vunpack.c.l.s8.bf16 %v113_v10  ;;  %v215_v15 = vunpack.c.l.s8.bf16 %v115_v11  ;;  %v400_v19 = vunpack.c.l.s4 %v4411_v18  ;;  %v212_v21 = vunpack.c.l.s8.bf16 %v112_v16  ;;  %v117_v27 = vld [vmem:[#allocation7 + $0x48] sm:$0xff]  ;;  %v119_v28 = vld [vmem:[#allocation7 + $0x58] sm:$0xff]  ;;  %v116_v33 = vld [vmem:[#allocation7 + $0x40] sm:$0xff]  ;;  %s4369_s21 = scalar_lea.vmem %s4065_s20, 32  ;;  %p4374_p7 = scmp.lt.s32.totalorder %s4065_s20, %s4065_s20 }
  0x71   :  { %430 = vmatpush1.bf16.msra.mxu0 %v204_v8  ;;  %553 = vmatpush1.bf16.msra.mxu1 %v206_v9  ;;  %v214_v22 = vunpack.c.l.s8.bf16 %v114_v17  ;;  %v217_v23 = vunpack.c.h.s8.bf16 %v113_v10  ;;  %v219_v24 = vunpack.c.h.s8.bf16 %v115_v11  ;;  %v4529_v26 = vshrl.u32 %v402_v20, 7  ;;  %v118_v34 = vld [vmem:[#allocation7 + $0x50] sm:$0xff]  ;;  %v4534_v36 = vld [vmem:[#allocation2] sm:$0xff]  ;;  %v121_v42 = vld [vmem:[#allocation7 + $0x68] sm:$0xff]  ;;  %p4370_p6 = scmp.ne.s32.totalorder %s4065_s20, %s4369_s21  ;;  %p4375_p8 = scmp.lt.s32.totalorder %s4369_s21, %s4369_s21 }
  0x72   :  { %431 = vmatprep.subr.bf16.mxu0 %v209_v4  ;;  %554 = vmatprep.subr.bf16.mxu1 %v211_v6  ;;  %v401_v25 = vunpack.c.0.s8 %v400_v19  ;;  %v216_v29 = vunpack.c.h.s8.bf16 %v112_v16  ;;  %v218_v30 = vunpack.c.h.s8.bf16 %v114_v17  ;;  %v221_v31 = vunpack.c.l.s8.bf16 %v117_v27  ;;  %v123_v43 = vld [vmem:[#allocation7 + $0x78] sm:$0xff]  ;;  %v120_v49 = vld [vmem:[#allocation7 + $0x60] sm:$0xff]  ;;  %v122_v50 = vld [vmem:[#allocation7 + $0x70] sm:$0xff] }
  0x73   :  { %v223_v32 = vunpack.c.l.s8.bf16 %v119_v28  ;;  %v220_v37 = vunpack.c.l.s8.bf16 %v116_v33  ;;  %v222_v38 = vunpack.c.l.s8.bf16 %v118_v34  ;;  %v225_v39 = vunpack.c.h.s8.bf16 %v117_v27  ;;  %v125_v55 = vld [vmem:[#allocation7 + $0x88] sm:$0xff]  ;;  %v127_v56 = vld [vmem:[#allocation7 + $0x98] sm:$0xff]  ;;  %v124_v61 = vld [vmem:[#allocation7 + $0x80] sm:$0xff]  ;;  %p4376_p9 = por %p4375_p8, %p4374_p7 }
  0x74   :  { %v4532_v35 = vsub.s32 %v401_v25, %v4529_v26  ;;  %v227_v40 = vunpack.c.h.s8.bf16 %v119_v28  ;;  %v224_v45 = vunpack.c.h.s8.bf16 %v116_v33  ;;  %v226_v46 = vunpack.c.h.s8.bf16 %v118_v34  ;;  %v126_v62 = vld [vmem:[#allocation7 + $0x90] sm:$0xff]  ;;  %v129_v3 = vld [vmem:[#allocation7 + $0xa8] sm:$0xff]  ;;  %v131_v4 = vld [vmem:[#allocation7 + $0xb8] sm:$0xff] }
  0x75   :  { %432 = vmatpush1.bf16.msra.mxu0 %v208_v12  ;;  %555 = vmatpush1.bf16.msra.mxu1 %v210_v13  ;;  %v229_v47 = vunpack.c.l.s8.bf16 %v121_v42  ;;  %v231_v48 = vunpack.c.l.s8.bf16 %v123_v43  ;;  %v228_v51 = vunpack.c.l.s8.bf16 %v120_v49  ;;  %v230_v52 = vunpack.c.l.s8.bf16 %v122_v50  ;;  %v128_v9 = vld [vmem:[#allocation7 + $0xa0] sm:$0xff]  ;;  %v130_v10 = vld [vmem:[#allocation7 + $0xb0] sm:$0xff]  ;;  %v135_v16 = vld [vmem:[#allocation7 + $0xd8] sm:$0xff]  ;;  %p4377_p10 = pnand %p4376_p9, %p4370_p6 }
  0x76   :  { %433 = vmatprep.subr.bf16.mxu0 %v213_v14  ;;  %556 = vmatprep.subr.bf16.mxu1 %v215_v15  ;;  %v4538_v41 = vrot.slane %v4534_v36, %v4532_v35  ;;  %v233_v53 = vunpack.c.h.s8.bf16 %v121_v42  ;;  %v235_v54 = vunpack.c.h.s8.bf16 %v123_v43  ;;  %v232_v57 = vunpack.c.h.s8.bf16 %v120_v49  ;;  %v133_v15 = vld [vmem:[#allocation7 + $0xc8] sm:$0xff]  ;;  %v136_v34 = vld [vmem:[#allocation7 + $0xe0] sm:$0xff] }
  0x77   :  { %v234_v58 = vunpack.c.h.s8.bf16 %v122_v50  ;;  %v237_v59 = vunpack.c.l.s8.bf16 %v125_v55  ;;  %v239_v60 = vunpack.c.l.s8.bf16 %v127_v56  ;;  %v236_v63 = vunpack.c.l.s8.bf16 %v124_v61  ;;  %v137_v28 = vld [vmem:[#allocation7 + $0xe8] sm:$0xff]  ;;  %v140_v50 = vld [vmem:[#allocation7 + $0x100] sm:$0xff] }
  0x78   :  { %v413_v44 = vcombine.high %v4538_v41, %v4538_v41  ;;  %v238_v0 = vunpack.c.l.s8.bf16 %v126_v62  ;;  %v241_v1 = vunpack.c.h.s8.bf16 %v125_v55  ;;  %v243_v2 = vunpack.c.h.s8.bf16 %v127_v56  ;;  %v145_v56 = vld [vmem:[#allocation7 + $0x128] sm:$0xff] }
  0x79   :  { %434 = vmatpush1.bf16.msra.mxu0 %v212_v21  ;;  %557 = vmatpush1.bf16.msra.mxu1 %v214_v22  ;;  %v240_v5 = vunpack.c.h.s8.bf16 %v124_v61  ;;  %v242_v6 = vunpack.c.h.s8.bf16 %v126_v62  ;;  %v245_v7 = vunpack.c.l.s8.bf16 %v129_v3  ;;  %v247_v8 = vunpack.c.l.s8.bf16 %v131_v4  ;;  %v132_v21 = vld [vmem:[#allocation7 + $0xc0] sm:$0xff]  ;;  %v134_v22 = vld [vmem:[#allocation7 + $0xd0] sm:$0xff] }
  0x7a   :  { %435 = vmatprep.subr.bf16.mxu0 %v217_v23  ;;  %558 = vmatprep.subr.bf16.mxu1 %v219_v24  ;;  %v244_v11 = vunpack.c.l.s8.bf16 %v128_v9  ;;  %v246_v12 = vunpack.c.l.s8.bf16 %v130_v10  ;;  %v249_v13 = vunpack.c.h.s8.bf16 %v129_v3  ;;  %v251_v14 = vunpack.c.h.s8.bf16 %v131_v4  ;;  %v144_v62 = vld [vmem:[#allocation7 + $0x120] sm:$0xff]  ;;  %v149_v3 = vld [vmem:[#allocation7 + $0x148] sm:$0xff]  ;;  %v151_v4 = vld [vmem:[#allocation7 + $0x158] sm:$0xff] }
  0x7b   :  { %461 = vmatprep.mubr.bf16.mxu0 %v413_v44  ;;  %584 = vmatprep.mubr.bf16.mxu1 %v413_v44  ;;  %v248_v17 = vunpack.c.h.s8.bf16 %v128_v9  ;;  %v250_v18 = vunpack.c.h.s8.bf16 %v130_v10  ;;  %v253_v19 = vunpack.c.l.s8.bf16 %v133_v15  ;;  %v255_v20 = vunpack.c.l.s8.bf16 %v135_v16  ;;  %v141_v44 = vld [vmem:[#allocation7 + $0x108] sm:$0xff]  ;;  %v148_v9 = vld [vmem:[#allocation7 + $0x140] sm:$0xff]  ;;  %v150_v10 = vld [vmem:[#allocation7 + $0x150] sm:$0xff] }
  0x7c   :  { %v252_v23 = vunpack.c.l.s8.bf16 %v132_v21  ;;  %v254_v24 = vunpack.c.l.s8.bf16 %v134_v22  ;;  %v257_v25 = vunpack.c.h.s8.bf16 %v133_v15  ;;  %v259_v27 = vunpack.c.h.s8.bf16 %v135_v16  ;;  %v153_v15 = vld [vmem:[#allocation7 + $0x168] sm:$0xff]  ;;  %v155_v16 = vld [vmem:[#allocation7 + $0x178] sm:$0xff] }
  0x7d   :  { %436 = vmatpush1.bf16.msra.mxu0 %v216_v29  ;;  %559 = vmatpush1.bf16.msra.mxu1 %v218_v30  ;;  %v139_v29 = vld [vmem:[#allocation7 + $0xf8] sm:$0xff]  ;;  %v256_v30 = vunpack.c.h.s8.bf16 %v132_v21  ;;  %v398_v43 = vcombine.high %v4534_v36, %v4534_v36  ;;  %v273_v36 = vunpack.c.h.s8.bf16 %v141_v44  ;;  %v152_v21 = vld [vmem:[#allocation7 + $0x160] sm:$0xff]  ;;  %vm3967_vm0 = vcmask 1043458  }
  0x7e   :  { %437 = vmatprep.subr.bf16.mxu0 %v221_v31  ;;  %560 = vmatprep.subr.bf16.mxu1 %v223_v32  ;;  %v258_v31 = vunpack.c.h.s8.bf16 %v134_v22  ;;  %v261_v32 = vunpack.c.l.s8.bf16 %v137_v28  ;;  %v263_v33 = vunpack.c.l.s8.bf16 %v139_v29  ;;  %v267_v42 = vunpack.c.h.s8.bf16 %v139_v29  ;;  %v154_v22 = vld [vmem:[#allocation7 + $0x170] sm:$0xff]  ;;  %v159_v29 = vld [vmem:[#allocation7 + $0x198] sm:$0xff] }
  0x7f   :  { %vm1955_vm1 = vcmask 1041408  }
  0x81   :  { %438 = vmatpush1.bf16.msra.mxu0 %v220_v37  ;;  %561 = vmatpush1.bf16.msra.mxu1 %v222_v38  ;;  %v138_v37 = vld [vmem:[#allocation7 + $0xf0] sm:$0xff]  ;;  %v260_v38 = vunpack.c.l.s8.bf16 %v136_v34 }
  0x82   :  { %439 = vmatprep.subr.bf16.mxu0 %v225_v39  ;;  %562 = vmatprep.subr.bf16.mxu1 %v227_v40  ;;  %v262_v39 = vunpack.c.l.s8.bf16 %v138_v37  ;;  %v265_v40 = vunpack.c.h.s8.bf16 %v137_v28  ;;  %v157_v28 = vld [vmem:[#allocation7 + $0x188] sm:$0xff] }
  0x85   :  { %440 = vmatpush1.bf16.msra.mxu0 %v224_v45  ;;  %563 = vmatpush1.bf16.msra.mxu1 %v226_v46  ;;  %v143_v45 = vld [vmem:[#allocation7 + $0x118] sm:$0xff]  ;;  %v264_v46 = vunpack.c.h.s8.bf16 %v136_v34  ;;  %v156_v34 = vld [vmem:[#allocation7 + $0x180] sm:$0xff] }
  0x86   :  { %441 = vmatprep.subr.bf16.mxu0 %v229_v47  ;;  %564 = vmatprep.subr.bf16.mxu1 %v231_v48  ;;  %v266_v47 = vunpack.c.h.s8.bf16 %v138_v37  ;;  %v269_v48 = vunpack.c.l.s8.bf16 %v141_v44  ;;  %v271_v49 = vunpack.c.l.s8.bf16 %v143_v45  ;;  %v275_v55 = vunpack.c.h.s8.bf16 %v143_v45  ;;  %v158_v37 = vld [vmem:[#allocation7 + $0x190] sm:$0xff]  ;;  %v163_v44 = vld [vmem:[#allocation7 + $0x1b8] sm:$0xff] }
  0x87   :  { %v304_v45 = vunpack.c.h.s8.bf16 %v156_v34 }
  0x89   :  { %442 = vmatpush1.bf16.msra.mxu0 %v228_v51  ;;  %565 = vmatpush1.bf16.msra.mxu1 %v230_v52  ;;  %v142_v51 = vld [vmem:[#allocation7 + $0x110] sm:$0xff]  ;;  %v4545_v52 = vrot.slane %v398_v43, %v4532_v35  ;;  %v272_v35 = vunpack.c.h.s8.bf16 %v140_v50  ;;  %v161_v43 = vld [vmem:[#allocation7 + $0x1a8] sm:$0xff] }
  0x8a   :  { %443 = vmatprep.subr.bf16.mxu0 %v233_v53  ;;  %566 = vmatprep.subr.bf16.mxu1 %v235_v54  ;;  %v268_v53 = vunpack.c.l.s8.bf16 %v140_v50  ;;  %v270_v54 = vunpack.c.l.s8.bf16 %v142_v51  ;;  %v162_v50 = vld [vmem:[#allocation7 + $0x1b0] sm:$0xff] }
  0x8d   :  { %444 = vmatpush1.bf16.msra.mxu0 %v232_v57  ;;  %567 = vmatpush1.bf16.msra.mxu1 %v234_v58  ;;  %v147_v57 = vld [vmem:[#allocation7 + $0x138] sm:$0xff]  ;;  %v414_v58 = vcombine.high %v4545_v52, %v4545_v52 }
  0x8e   :  { %445 = vmatprep.subr.bf16.mxu0 %v237_v59  ;;  %568 = vmatprep.subr.bf16.mxu1 %v239_v60  ;;  %v274_v59 = vunpack.c.h.s8.bf16 %v142_v51  ;;  %v277_v60 = vunpack.c.l.s8.bf16 %v145_v56  ;;  %v279_v61 = vunpack.c.l.s8.bf16 %v147_v57 }
  0x91   :  { %446 = vmatpush1.bf16.msra.mxu0 %v236_v63  ;;  %569 = vmatpush1.bf16.msra.mxu1 %v238_v0  ;;  %v146_v63 = vld [vmem:[#allocation7 + $0x130] sm:$0xff]  ;;  %v276_v0 = vunpack.c.l.s8.bf16 %v144_v62 }
  0x92   :  { %447 = vmatprep.subr.bf16.mxu0 %v241_v1  ;;  %570 = vmatprep.subr.bf16.mxu1 %v243_v2  ;;  %v278_v1 = vunpack.c.l.s8.bf16 %v146_v63  ;;  %v281_v2 = vunpack.c.h.s8.bf16 %v145_v56  ;;  %v167_v56 = vld [vmem:[#allocation7 + $0x1d8] sm:$0xff] }
  0x95   :  { %448 = vmatpush1.bf16.msra.mxu0 %v240_v5  ;;  %571 = vmatpush1.bf16.msra.mxu1 %v242_v6  ;;  %v280_v5 = vunpack.c.h.s8.bf16 %v144_v62  ;;  %v282_v6 = vunpack.c.h.s8.bf16 %v146_v63 }
  0x96   :  { %449 = vmatprep.subr.bf16.mxu0 %v245_v7  ;;  %572 = vmatprep.subr.bf16.mxu1 %v247_v8  ;;  %v285_v7 = vunpack.c.l.s8.bf16 %v149_v3  ;;  %v287_v8 = vunpack.c.l.s8.bf16 %v151_v4 }
  0x99   :  { %450 = vmatpush1.bf16.msra.mxu0 %v244_v11  ;;  %573 = vmatpush1.bf16.msra.mxu1 %v246_v12  ;;  %v284_v11 = vunpack.c.l.s8.bf16 %v148_v9  ;;  %v286_v12 = vunpack.c.l.s8.bf16 %v150_v10 }
  0x9a   :  { %451 = vmatprep.subr.bf16.mxu0 %v249_v13  ;;  %574 = vmatprep.subr.bf16.mxu1 %v251_v14  ;;  %v289_v13 = vunpack.c.h.s8.bf16 %v149_v3  ;;  %v291_v14 = vunpack.c.h.s8.bf16 %v151_v4 }
  0x9d   :  { %452 = vmatpush1.bf16.msra.mxu0 %v248_v17  ;;  %575 = vmatpush1.bf16.msra.mxu1 %v250_v18  ;;  %v288_v17 = vunpack.c.h.s8.bf16 %v148_v9  ;;  %v290_v18 = vunpack.c.h.s8.bf16 %v150_v10 }
  0x9e   :  { %453 = vmatprep.subr.bf16.mxu0 %v253_v19  ;;  %576 = vmatprep.subr.bf16.mxu1 %v255_v20  ;;  %v293_v19 = vunpack.c.l.s8.bf16 %v153_v15  ;;  %v295_v20 = vunpack.c.l.s8.bf16 %v155_v16 }
  0xa1   :  { %454 = vmatpush1.bf16.msra.mxu0 %v252_v23  ;;  %577 = vmatpush1.bf16.msra.mxu1 %v254_v24  ;;  %v292_v23 = vunpack.c.l.s8.bf16 %v152_v21  ;;  %v294_v24 = vunpack.c.l.s8.bf16 %v154_v22 }
  0xa2   :  { %455 = vmatprep.subr.bf16.mxu0 %v257_v25  ;;  %578 = vmatprep.subr.bf16.mxu1 %v259_v27  ;;  %v297_v25 = vunpack.c.h.s8.bf16 %v153_v15  ;;  %v299_v27 = vunpack.c.h.s8.bf16 %v155_v16 }
  0xa5   :  { %456 = vmatpush1.bf16.msra.mxu0 %v256_v30  ;;  %579 = vmatpush1.bf16.msra.mxu1 %v258_v31  ;;  %v296_v30 = vunpack.c.h.s8.bf16 %v152_v21  ;;  %v298_v31 = vunpack.c.h.s8.bf16 %v154_v22  ;;  %v4551_v21 = vld.sshfl [vmem:[#allocation2 + $0x8] sm:$0x33 pattern:$0x76325410] }
  0xa6   :  { %457 = vmatprep.subr.bf16.mxu0 %v261_v32  ;;  %580 = vmatprep.subr.bf16.mxu1 %v263_v33  ;;  %v301_v32 = vunpack.c.l.s8.bf16 %v157_v28  ;;  %v303_v33 = vunpack.c.l.s8.bf16 %v159_v29 }
  0xa9   :  { %458 = vmatpush1.bf16.msra.mxu0 %v260_v38  ;;  %581 = vmatpush1.bf16.msra.mxu1 %v262_v39  ;;  %v300_v38 = vunpack.c.l.s8.bf16 %v156_v34  ;;  %v302_v39 = vunpack.c.l.s8.bf16 %v158_v37  ;;  %v176_v34 = vld [vmem:[#allocation7 + $0x220] sm:$0xff] }
  0xaa   :  { %459 = vmatprep.subr.bf16.mxu0 %v265_v40  ;;  %582 = vmatprep.subr.bf16.mxu1 %v267_v42  ;;  %v305_v40 = vunpack.c.h.s8.bf16 %v157_v28  ;;  %v307_v42 = vunpack.c.h.s8.bf16 %v159_v29  ;;  %v179_v28 = vld [vmem:[#allocation7 + $0x238] sm:$0xff]  ;;  %v422_v29 = vcombine.high %v4551_v21, %v4551_v21 }
  0xad   :  { %460 = vmatpush1.bf16.msra.mxu0 %v264_v46  ;;  %583 = vmatpush1.bf16.msra.mxu1 %v266_v47  ;;  %v306_v46 = vunpack.c.h.s8.bf16 %v158_v37  ;;  %v309_v47 = vunpack.c.l.s8.bf16 %v161_v43  ;;  %v178_v37 = vld [vmem:[#allocation7 + $0x230] sm:$0xff] }
  0xae   :  { %470 = vmatprep.subr.bf16.mxu0 %v269_v48  ;;  %593 = vmatprep.subr.bf16.mxu1 %v271_v49  ;;  %v311_v48 = vunpack.c.l.s8.bf16 %v163_v44  ;;  %v160_v49 = vld [vmem:[#allocation7 + $0x1a0] sm:$0xff] }
  0xaf   :  { %v308_v51 = vunpack.c.l.s8.bf16 %v160_v49 }
  0xb0   :  { %462 = vmatmul.mubr.bf16.vlgmr.msra.gmra.mrb[0].mxu0 %v4538_v41  ;;  %585 = vmatmul.mubr.bf16.vlgmr.msra.gmra.mrb[0].mxu1 %v4538_v41  ;;  %v283_v41 = vunpack.c.h.s8.bf16 %v147_v57  ;;  %v312_v57 = vunpack.c.h.s8.bf16 %v160_v49  ;;  %v182_v49 = vld [vmem:[#allocation7 + $0x250] sm:$0xff] }
  0xb1   :  { %471 = vmatpush1.bf16.msra.mxu0 %v268_v53  ;;  %594 = vmatpush1.bf16.msra.mxu1 %v270_v54  ;;  %v310_v53 = vunpack.c.l.s8.bf16 %v162_v50  ;;  %v313_v54 = vunpack.c.h.s8.bf16 %v161_v43  ;;  %v183_v43 = vld [vmem:[#allocation7 + $0x258] sm:$0xff] }
  0xb2   :  { %472 = vmatprep.subr.bf16.mxu0 %v273_v36  ;;  %595 = vmatprep.subr.bf16.mxu1 %v275_v55  ;;  %v315_v36 = vunpack.c.h.s8.bf16 %v163_v44  ;;  %v165_v55 = vld [vmem:[#allocation7 + $0x1c8] sm:$0xff]  ;;  %v344_v44 = vunpack.c.h.s8.bf16 %v176_v34 }
  0xb3   :  { %502 = vmatprep.mubr.bf16.mxu0 %v414_v58  ;;  %625 = vmatprep.mubr.bf16.mxu1 %v414_v58  ;;  %v314_v58 = vunpack.c.h.s8.bf16 %v162_v50 }
  0xb5   :  { %473 = vmatpush1.bf16.msra.mxu0 %v272_v35  ;;  %596 = vmatpush1.bf16.msra.mxu1 %v274_v59  ;;  %v317_v35 = vunpack.c.l.s8.bf16 %v165_v55  ;;  %v319_v59 = vunpack.c.l.s8.bf16 %v167_v56 }
  0xb6   :  { %474 = vmatprep.subr.bf16.mxu0 %v277_v60  ;;  %597 = vmatprep.subr.bf16.mxu1 %v279_v61  ;;  %v164_v60 = vld [vmem:[#allocation7 + $0x1c0] sm:$0xff]  ;;  %v166_v61 = vld [vmem:[#allocation7 + $0x1d0] sm:$0xff] }
  0xb7   :  { %v316_v62 = vunpack.c.l.s8.bf16 %v164_v60  ;;  %v318_v63 = vunpack.c.l.s8.bf16 %v166_v61  ;;  %v320_v3 = vunpack.c.h.s8.bf16 %v164_v60  ;;  %v322_v4 = vunpack.c.h.s8.bf16 %v166_v61  ;;  %v186_v60 = vld [vmem:[#allocation7 + $0x270] sm:$0xff] }
  0xb9   :  { %475 = vmatpush1.bf16.msra.mxu0 %v276_v0  ;;  %598 = vmatpush1.bf16.msra.mxu1 %v278_v1  ;;  %v321_v0 = vunpack.c.h.s8.bf16 %v165_v55  ;;  %v323_v1 = vunpack.c.h.s8.bf16 %v167_v56  ;;  %v187_v55 = vld [vmem:[#allocation7 + $0x278] sm:$0xff] }
  0xba   :  { %476 = vmatprep.subr.bf16.mxu0 %v281_v2  ;;  %599 = vmatprep.subr.bf16.mxu1 %v283_v41  ;;  %v169_v2 = vld [vmem:[#allocation7 + $0x1e8] sm:$0xff]  ;;  %v171_v41 = vld [vmem:[#allocation7 + $0x1f8] sm:$0xff] }
  0xbd   :  { %477 = vmatpush1.bf16.msra.mxu0 %v280_v5  ;;  %600 = vmatpush1.bf16.msra.mxu1 %v282_v6  ;;  %v325_v5 = vunpack.c.l.s8.bf16 %v169_v2  ;;  %v327_v6 = vunpack.c.l.s8.bf16 %v171_v41 }
  0xbe   :  { %478 = vmatprep.subr.bf16.mxu0 %v285_v7  ;;  %601 = vmatprep.subr.bf16.mxu1 %v287_v8  ;;  %v168_v7 = vld [vmem:[#allocation7 + $0x1e0] sm:$0xff]  ;;  %v170_v8 = vld [vmem:[#allocation7 + $0x1f0] sm:$0xff] }
  0xbf   :  { %v324_v9 = vunpack.c.l.s8.bf16 %v168_v7  ;;  %v326_v10 = vunpack.c.l.s8.bf16 %v170_v8  ;;  %v328_v15 = vunpack.c.h.s8.bf16 %v168_v7  ;;  %v330_v16 = vunpack.c.h.s8.bf16 %v170_v8  ;;  %v190_v7 = vld [vmem:[#allocation7 + $0x290] sm:$0xff] }
  0xc1   :  { %479 = vmatpush1.bf16.msra.mxu0 %v284_v11  ;;  %602 = vmatpush1.bf16.msra.mxu1 %v286_v12  ;;  %v329_v11 = vunpack.c.h.s8.bf16 %v169_v2  ;;  %v331_v12 = vunpack.c.h.s8.bf16 %v171_v41  ;;  %v191_v2 = vld [vmem:[#allocation7 + $0x298] sm:$0xff] }
  0xc2   :  { %480 = vmatprep.subr.bf16.mxu0 %v289_v13  ;;  %603 = vmatprep.subr.bf16.mxu1 %v291_v14  ;;  %v173_v13 = vld [vmem:[#allocation7 + $0x208] sm:$0xff]  ;;  %v175_v14 = vld [vmem:[#allocation7 + $0x218] sm:$0xff] }
  0xc5   :  { %481 = vmatpush1.bf16.msra.mxu0 %v288_v17  ;;  %604 = vmatpush1.bf16.msra.mxu1 %v290_v18  ;;  %v333_v17 = vunpack.c.l.s8.bf16 %v173_v13  ;;  %v335_v18 = vunpack.c.l.s8.bf16 %v175_v14 }
  0xc6   :  { %482 = vmatprep.subr.bf16.mxu0 %v293_v19  ;;  %605 = vmatprep.subr.bf16.mxu1 %v295_v20  ;;  %v172_v19 = vld [vmem:[#allocation7 + $0x200] sm:$0xff]  ;;  %v174_v20 = vld [vmem:[#allocation7 + $0x210] sm:$0xff] }
  0xc7   :  { %v332_v22 = vunpack.c.l.s8.bf16 %v172_v19 }
  0xc9   :  { %483 = vmatpush1.bf16.msra.mxu0 %v292_v23  ;;  %606 = vmatpush1.bf16.msra.mxu1 %v294_v24  ;;  %v334_v23 = vunpack.c.l.s8.bf16 %v174_v20  ;;  %v337_v24 = vunpack.c.h.s8.bf16 %v173_v13  ;;  %v195_v13 = vld [vmem:[#allocation7 + $0x2b8] sm:$0xff] }
  0xca   :  { %484 = vmatprep.subr.bf16.mxu0 %v297_v25  ;;  %607 = vmatprep.subr.bf16.mxu1 %v299_v27  ;;  %v339_v25 = vunpack.c.h.s8.bf16 %v175_v14  ;;  %v177_v27 = vld [vmem:[#allocation7 + $0x228] sm:$0xff] }
  0xcd   :  { %485 = vmatpush1.bf16.msra.mxu0 %v296_v30  ;;  %608 = vmatpush1.bf16.msra.mxu1 %v298_v31  ;;  %v336_v30 = vunpack.c.h.s8.bf16 %v172_v19  ;;  %v338_v31 = vunpack.c.h.s8.bf16 %v174_v20  ;;  %v194_v19 = vld [vmem:[#allocation7 + $0x2b0] sm:$0xff] }
  0xce   :  { %486 = vmatprep.subr.bf16.mxu0 %v301_v32  ;;  %609 = vmatprep.subr.bf16.mxu1 %v303_v33  ;;  %v341_v32 = vunpack.c.l.s8.bf16 %v177_v27  ;;  %v343_v33 = vunpack.c.l.s8.bf16 %v179_v28 }
  0xd1   :  { %487 = vmatpush1.bf16.msra.mxu0 %v300_v38  ;;  %610 = vmatpush1.bf16.msra.mxu1 %v302_v39  ;;  %v340_v38 = vunpack.c.l.s8.bf16 %v176_v34  ;;  %v342_v39 = vunpack.c.l.s8.bf16 %v178_v37 }
  0xd2   :  { %488 = vmatprep.subr.bf16.mxu0 %v305_v40  ;;  %611 = vmatprep.subr.bf16.mxu1 %v307_v42  ;;  %v345_v40 = vunpack.c.h.s8.bf16 %v177_v27  ;;  %v181_v42 = vld [vmem:[#allocation7 + $0x248] sm:$0xff]  ;;  %v199_v27 = vld [vmem:[#allocation7 + $0x2d8] sm:$0xff] }
  0xd5   :  { %489 = vmatpush1.bf16.msra.mxu0 %v304_v45  ;;  %612 = vmatpush1.bf16.msra.mxu1 %v306_v46  ;;  %v346_v45 = vunpack.c.h.s8.bf16 %v178_v37  ;;  %v349_v46 = vunpack.c.l.s8.bf16 %v181_v42 }
  0xd6   :  { %490 = vmatprep.subr.bf16.mxu0 %v309_v47  ;;  %613 = vmatprep.subr.bf16.mxu1 %v311_v48  ;;  %v351_v47 = vunpack.c.l.s8.bf16 %v183_v43  ;;  %v180_v48 = vld [vmem:[#allocation7 + $0x240] sm:$0xff] }
  0xd7   :  { %v348_v50 = vunpack.c.l.s8.bf16 %v180_v48  ;;  %v352_v56 = vunpack.c.h.s8.bf16 %v180_v48 }
  0xd9   :  { %491 = vmatpush1.bf16.msra.mxu0 %v308_v51  ;;  %614 = vmatpush1.bf16.msra.mxu1 %v310_v53  ;;  %v350_v51 = vunpack.c.l.s8.bf16 %v182_v49  ;;  %v353_v53 = vunpack.c.h.s8.bf16 %v181_v42 }
  0xda   :  { %492 = vmatprep.subr.bf16.mxu0 %v313_v54  ;;  %615 = vmatprep.subr.bf16.mxu1 %v315_v36  ;;  %v355_v54 = vunpack.c.h.s8.bf16 %v183_v43  ;;  %v185_v36 = vld [vmem:[#allocation7 + $0x268] sm:$0xff] }
  0xdd   :  { %493 = vmatpush1.bf16.msra.mxu0 %v312_v57  ;;  %616 = vmatpush1.bf16.msra.mxu1 %v314_v58  ;;  %v354_v57 = vunpack.c.h.s8.bf16 %v182_v49  ;;  %v357_v58 = vunpack.c.l.s8.bf16 %v185_v36 }
  0xde   :  { %494 = vmatprep.subr.bf16.mxu0 %v317_v35  ;;  %617 = vmatprep.subr.bf16.mxu1 %v319_v59  ;;  %v359_v35 = vunpack.c.l.s8.bf16 %v187_v55  ;;  %v184_v59 = vld [vmem:[#allocation7 + $0x260] sm:$0xff] }
  0xdf   :  { %v356_v61 = vunpack.c.l.s8.bf16 %v184_v59  ;;  %v360_v41 = vunpack.c.h.s8.bf16 %v184_v59 }
  0xe1   :  { %495 = vmatpush1.bf16.msra.mxu0 %v316_v62  ;;  %618 = vmatpush1.bf16.msra.mxu1 %v318_v63  ;;  %v358_v62 = vunpack.c.l.s8.bf16 %v186_v60  ;;  %v361_v63 = vunpack.c.h.s8.bf16 %v185_v36 }
  0xe2   :  { %496 = vmatprep.subr.bf16.mxu0 %v321_v0  ;;  %619 = vmatprep.subr.bf16.mxu1 %v323_v1  ;;  %v363_v0 = vunpack.c.h.s8.bf16 %v187_v55  ;;  %v189_v1 = vld [vmem:[#allocation7 + $0x288] sm:$0xff] }
  0xe5   :  { %497 = vmatpush1.bf16.msra.mxu0 %v320_v3  ;;  %620 = vmatpush1.bf16.msra.mxu1 %v322_v4  ;;  %v362_v3 = vunpack.c.h.s8.bf16 %v186_v60  ;;  %v365_v4 = vunpack.c.l.s8.bf16 %v189_v1 }
  0xe6   :  { %498 = vmatprep.subr.bf16.mxu0 %v325_v5  ;;  %621 = vmatprep.subr.bf16.mxu1 %v327_v6  ;;  %v367_v5 = vunpack.c.l.s8.bf16 %v191_v2  ;;  %v188_v6 = vld [vmem:[#allocation7 + $0x280] sm:$0xff] }
  0xe7   :  { %v364_v8 = vunpack.c.l.s8.bf16 %v188_v6  ;;  %v368_v14 = vunpack.c.h.s8.bf16 %v188_v6 }
  0xe9   :  { %499 = vmatpush1.bf16.msra.mxu0 %v324_v9  ;;  %622 = vmatpush1.bf16.msra.mxu1 %v326_v10  ;;  %v366_v9 = vunpack.c.l.s8.bf16 %v190_v7  ;;  %v369_v10 = vunpack.c.h.s8.bf16 %v189_v1 }
  0xea   :  { %500 = vmatprep.subr.bf16.mxu0 %v329_v11  ;;  %623 = vmatprep.subr.bf16.mxu1 %v331_v12  ;;  %v371_v11 = vunpack.c.h.s8.bf16 %v191_v2  ;;  %v193_v12 = vld [vmem:[#allocation7 + $0x2a8] sm:$0xff] }
  0xed   :  { %501 = vmatpush1.bf16.msra.mxu0 %v328_v15  ;;  %624 = vmatpush1.bf16.msra.mxu1 %v330_v16  ;;  %v370_v15 = vunpack.c.h.s8.bf16 %v190_v7  ;;  %v373_v16 = vunpack.c.l.s8.bf16 %v193_v12 }
  0xee   :  { %511 = vmatprep.subr.bf16.mxu0 %v333_v17  ;;  %634 = vmatprep.subr.bf16.mxu1 %v335_v18  ;;  %v375_v17 = vunpack.c.l.s8.bf16 %v195_v13  ;;  %v192_v18 = vld [vmem:[#allocation7 + $0x2a0] sm:$0xff] }
  0xef   :  { %v372_v20 = vunpack.c.l.s8.bf16 %v192_v18 }
  0xf0   :  { %503 = vmatmul.mubr.bf16.vlgmr.msra.gmra.mrb[0].mxu0 %v4545_v52  ;;  %626 = vmatmul.mubr.bf16.vlgmr.msra.gmra.mrb[0].mxu1 %v4545_v52  ;;  %v347_v52 = vunpack.c.h.s8.bf16 %v179_v28  ;;  %v376_v28 = vunpack.c.h.s8.bf16 %v192_v18 }
  0xf1   :  { %512 = vmatpush1.bf16.msra.mxu0 %v332_v22  ;;  %635 = vmatpush1.bf16.msra.mxu1 %v334_v23  ;;  %v374_v22 = vunpack.c.l.s8.bf16 %v194_v19  ;;  %v377_v23 = vunpack.c.h.s8.bf16 %v193_v12 }
  0xf2   :  { %513 = vmatprep.subr.bf16.mxu0 %v337_v24  ;;  %636 = vmatprep.subr.bf16.mxu1 %v339_v25  ;;  %v379_v24 = vunpack.c.h.s8.bf16 %v195_v13  ;;  %v197_v25 = vld [vmem:[#allocation7 + $0x2c8] sm:$0xff] }
  0xf3   :  { %543 = vmatprep.mubr.bf16.mxu0 %v422_v29  ;;  %666 = vmatprep.mubr.bf16.mxu1 %v422_v29  ;;  %v378_v29 = vunpack.c.h.s8.bf16 %v194_v19 }
  0xf5   :  { %514 = vmatpush1.bf16.msra.mxu0 %v336_v30  ;;  %637 = vmatpush1.bf16.msra.mxu1 %v338_v31  ;;  %v381_v30 = vunpack.c.l.s8.bf16 %v197_v25  ;;  %v383_v31 = vunpack.c.l.s8.bf16 %v199_v27 }
  0xf6   :  { %515 = vmatprep.subr.bf16.mxu0 %v341_v32  ;;  %638 = vmatprep.subr.bf16.mxu1 %v343_v33  ;;  %v196_v32 = vld [vmem:[#allocation7 + $0x2c0] sm:$0xff]  ;;  %v198_v33 = vld [vmem:[#allocation7 + $0x2d0] sm:$0xff] }
  0xf7   :  { %v380_v34 = vunpack.c.l.s8.bf16 %v196_v32  ;;  %v382_v37 = vunpack.c.l.s8.bf16 %v198_v33  ;;  %v384_v42 = vunpack.c.h.s8.bf16 %v196_v32  ;;  %v386_v43 = vunpack.c.h.s8.bf16 %v198_v33 }
  0xf9   :  { %516 = vmatpush1.bf16.msra.mxu0 %v340_v38  ;;  %639 = vmatpush1.bf16.msra.mxu1 %v342_v39  ;;  %v385_v38 = vunpack.c.h.s8.bf16 %v197_v25  ;;  %v387_v39 = vunpack.c.h.s8.bf16 %v199_v27 }
  0xfa   :  { %517 = vmatprep.subr.bf16.mxu0 %v345_v40  ;;  %640 = vmatprep.subr.bf16.mxu1 %v347_v52  ;;  %v201_v40 = vld [vmem:[#allocation7 + $0x2e8] sm:$0xff]  ;;  %v203_v52 = vld [vmem:[#allocation7 + $0x2f8] sm:$0xff] }
  0xfd   :  { %518 = vmatpush1.bf16.msra.mxu0 %v344_v44  ;;  %641 = vmatpush1.bf16.msra.mxu1 %v346_v45  ;;  %v389_v44 = vunpack.c.l.s8.bf16 %v201_v40  ;;  %v391_v45 = vunpack.c.l.s8.bf16 %v203_v52 }
  0xfe   :  { %519 = vmatprep.subr.bf16.mxu0 %v349_v46  ;;  %642 = vmatprep.subr.bf16.mxu1 %v351_v47  ;;  %v200_v46 = vld [vmem:[#allocation7 + $0x2e0] sm:$0xff]  ;;  %v202_v47 = vld [vmem:[#allocation7 + $0x2f0] sm:$0xff] }
  0xff   :  { %v388_v48 = vunpack.c.l.s8.bf16 %v200_v46  ;;  %v390_v49 = vunpack.c.l.s8.bf16 %v202_v47  ;;  %v392_v36 = vunpack.c.h.s8.bf16 %v200_v46  ;;  %v394_v55 = vunpack.c.h.s8.bf16 %v202_v47 }
 0x101   :  { %520 = vmatpush1.bf16.msra.mxu0 %v348_v50  ;;  %643 = vmatpush1.bf16.msra.mxu1 %v350_v51  ;;  %v393_v50 = vunpack.c.h.s8.bf16 %v201_v40  ;;  %v395_v51 = vunpack.c.h.s8.bf16 %v203_v52 }
 0x102   :  { %521 = vmatprep.subr.bf16.mxu0 %v353_v53  ;;  %644 = vmatprep.subr.bf16.mxu1 %v355_v54  ;;  %v734_v53 = vld [vmem:[#allocation8 + $0x8] sm:$0xff]  ;;  %v736_v54 = vld [vmem:[#allocation8 + $0x18] sm:$0xff] }
 0x105   :  { %522 = vmatpush1.bf16.msra.mxu0 %v352_v56  ;;  %645 = vmatpush1.bf16.msra.mxu1 %v354_v57  ;;  %v798_v56 = vunpack.c.l.s8.bf16 %v734_v53  ;;  %v800_v57 = vunpack.c.l.s8.bf16 %v736_v54 }
 0x106   :  { %523 = vmatprep.subr.bf16.mxu0 %v357_v58  ;;  %646 = vmatprep.subr.bf16.mxu1 %v359_v35  ;;  %v733_v58 = vld [vmem:[#allocation8] sm:$0xff]  ;;  %v735_v35 = vld [vmem:[#allocation8 + $0x10] sm:$0xff] }
 0x107   :  { %v797_v59 = vunpack.c.l.s8.bf16 %v733_v58  ;;  %v799_v60 = vunpack.c.l.s8.bf16 %v735_v35  ;;  %v801_v1 = vunpack.c.h.s8.bf16 %v733_v58  ;;  %v803_v2 = vunpack.c.h.s8.bf16 %v735_v35 }
 0x109   :  { %524 = vmatpush1.bf16.msra.mxu0 %v356_v61  ;;  %647 = vmatpush1.bf16.msra.mxu1 %v358_v62  ;;  %v802_v61 = vunpack.c.h.s8.bf16 %v734_v53  ;;  %v804_v62 = vunpack.c.h.s8.bf16 %v736_v54 }
 0x10a   :  { %525 = vmatprep.subr.bf16.mxu0 %v361_v63  ;;  %648 = vmatprep.subr.bf16.mxu1 %v363_v0  ;;  %v738_v63 = vld [vmem:[#allocation8 + $0x28] sm:$0xff]  ;;  %v740_v0 = vld [vmem:[#allocation8 + $0x38] sm:$0xff] }
 0x10d   :  { %526 = vmatpush1.bf16.msra.mxu0 %v360_v41  ;;  %649 = vmatpush1.bf16.msra.mxu1 %v362_v3  ;;  %v806_v41 = vunpack.c.l.s8.bf16 %v738_v63  ;;  %v808_v3 = vunpack.c.l.s8.bf16 %v740_v0 }
 0x10e   :  { %527 = vmatprep.subr.bf16.mxu0 %v365_v4  ;;  %650 = vmatprep.subr.bf16.mxu1 %v367_v5  ;;  %v737_v4 = vld [vmem:[#allocation8 + $0x20] sm:$0xff]  ;;  %v739_v5 = vld [vmem:[#allocation8 + $0x30] sm:$0xff] }
 0x10f   :  { %v805_v6 = vunpack.c.l.s8.bf16 %v737_v4  ;;  %v807_v7 = vunpack.c.l.s8.bf16 %v739_v5  ;;  %v811_v12 = vunpack.c.h.s8.bf16 %v739_v5 }
 0x111   :  { %528 = vmatpush1.bf16.msra.mxu0 %v364_v8  ;;  %651 = vmatpush1.bf16.msra.mxu1 %v366_v9  ;;  %v810_v8 = vunpack.c.h.s8.bf16 %v738_v63  ;;  %v812_v9 = vunpack.c.h.s8.bf16 %v740_v0 }
 0x112   :  { %529 = vmatprep.subr.bf16.mxu0 %v369_v10  ;;  %652 = vmatprep.subr.bf16.mxu1 %v371_v11  ;;  %v742_v10 = vld [vmem:[#allocation8 + $0x48] sm:$0xff]  ;;  %v809_v11 = vunpack.c.h.s8.bf16 %v737_v4 }
 0x113   :  { %v814_v13 = vunpack.c.l.s8.bf16 %v742_v10  ;;  %v818_v19 = vunpack.c.h.s8.bf16 %v742_v10  ;;  %v764_v10 = vld [vmem:[#allocation8 + $0xf8] sm:$0xff] }
 0x115   :  { %530 = vmatpush1.bf16.msra.mxu0 %v368_v14  ;;  %653 = vmatpush1.bf16.msra.mxu1 %v370_v15  ;;  %v741_v15 = vld [vmem:[#allocation8 + $0x40] sm:$0xff] }
 0x116   :  { %531 = vmatprep.subr.bf16.mxu0 %v373_v16  ;;  %654 = vmatprep.subr.bf16.mxu1 %v375_v17  ;;  %v743_v16 = vld [vmem:[#allocation8 + $0x50] sm:$0xff]  ;;  %v813_v17 = vunpack.c.l.s8.bf16 %v741_v15 }
 0x117   :  { %v815_v18 = vunpack.c.l.s8.bf16 %v743_v16  ;;  %v819_v25 = vunpack.c.h.s8.bf16 %v743_v16 }
 0x119   :  { %532 = vmatpush1.bf16.msra.mxu0 %v372_v20  ;;  %655 = vmatpush1.bf16.msra.mxu1 %v374_v22  ;;  %v746_v22 = vld [vmem:[#allocation8 + $0x68] sm:$0xff] }
 0x11a   :  { %533 = vmatprep.subr.bf16.mxu0 %v377_v23  ;;  %656 = vmatprep.subr.bf16.mxu1 %v379_v24  ;;  %v748_v23 = vld [vmem:[#allocation8 + $0x78] sm:$0xff]  ;;  %v817_v24 = vunpack.c.h.s8.bf16 %v741_v15  ;;  %v822_v27 = vunpack.c.l.s8.bf16 %v746_v22  ;;  %v826_v33 = vunpack.c.h.s8.bf16 %v746_v22 }
 0x11b   :  { %v4561_v22 = vld [vmem:[#allocation8 + $0x118] sm:$0xff] }
 0x11d   :  { %534 = vmatpush1.bf16.msra.mxu0 %v376_v28  ;;  %657 = vmatpush1.bf16.msra.mxu1 %v378_v29  ;;  %v824_v28 = vunpack.c.l.s8.bf16 %v748_v23  ;;  %v745_v29 = vld [vmem:[#allocation8 + $0x60] sm:$0xff] }
 0x11e   :  { %535 = vmatprep.subr.bf16.mxu0 %v381_v30  ;;  %658 = vmatprep.subr.bf16.mxu1 %v383_v31  ;;  %v747_v30 = vld [vmem:[#allocation8 + $0x70] sm:$0xff]  ;;  %v821_v31 = vunpack.c.l.s8.bf16 %v745_v29 }
 0x11f   :  { %v823_v32 = vunpack.c.l.s8.bf16 %v747_v30  ;;  %v827_v40 = vunpack.c.h.s8.bf16 %v747_v30  ;;  %v4575_v30 = vsub.s32 3, %v4529_v26 }
 0x121   :  { %536 = vmatpush1.bf16.msra.mxu0 %v380_v34  ;;  %659 = vmatpush1.bf16.msra.mxu1 %v382_v37  ;;  %v828_v34 = vunpack.c.h.s8.bf16 %v748_v23  ;;  %v750_v37 = vld [vmem:[#allocation8 + $0x88] sm:$0xff]  ;;  %9155 = vst [vmem:[#allocation21_spill] sm:$0xff] %v4575_v30 }
 0x122   :  { %537 = vmatprep.subr.bf16.mxu0 %v385_v38  ;;  %660 = vmatprep.subr.bf16.mxu1 %v387_v39  ;;  %v752_v38 = vld [vmem:[#allocation8 + $0x98] sm:$0xff]  ;;  %v825_v39 = vunpack.c.h.s8.bf16 %v745_v29  ;;  %v830_v52 = vunpack.c.l.s8.bf16 %v750_v37  ;;  %v834_v47 = vunpack.c.h.s8.bf16 %v750_v37  ;;  %v4572_v29 = vsub.s32 1, %v4529_v26 }
 0x124   :  { %9154 = vst [vmem:[#allocation20_spill] sm:$0xff] %v4572_v29 }
 0x125   :  { %538 = vmatpush1.bf16.msra.mxu0 %v384_v42  ;;  %661 = vmatpush1.bf16.msra.mxu1 %v386_v43  ;;  %v832_v42 = vunpack.c.l.s8.bf16 %v752_v38  ;;  %v749_v43 = vld [vmem:[#allocation8 + $0x80] sm:$0xff] }
 0x126   :  { %539 = vmatprep.subr.bf16.mxu0 %v389_v44  ;;  %662 = vmatprep.subr.bf16.mxu1 %v391_v45  ;;  %v751_v44 = vld [vmem:[#allocation8 + $0x90] sm:$0xff]  ;;  %v829_v45 = vunpack.c.l.s8.bf16 %v749_v43 }
 0x127   :  { %v831_v46 = vunpack.c.l.s8.bf16 %v751_v44  ;;  %v835_v53 = vunpack.c.h.s8.bf16 %v751_v44 }
 0x129   :  { %540 = vmatpush1.bf16.msra.mxu0 %v388_v48  ;;  %663 = vmatpush1.bf16.msra.mxu1 %v390_v49  ;;  %v836_v48 = vunpack.c.h.s8.bf16 %v752_v38  ;;  %v754_v49 = vld [vmem:[#allocation8 + $0xa8] sm:$0xff] }
 0x12a   :  { %541 = vmatprep.subr.bf16.mxu0 %v393_v50  ;;  %664 = vmatprep.subr.bf16.mxu1 %v395_v51  ;;  %v756_v50 = vld [vmem:[#allocation8 + $0xb8] sm:$0xff]  ;;  %v833_v51 = vunpack.c.h.s8.bf16 %v749_v43  ;;  %v838_v54 = vunpack.c.l.s8.bf16 %v754_v49  ;;  %v842_v35 = vunpack.c.h.s8.bf16 %v754_v49 }
 0x12d   :  { %542 = vmatpush1.bf16.msra.mxu0 %v392_v36  ;;  %665 = vmatpush1.bf16.msra.mxu1 %v394_v55  ;;  %v840_v36 = vunpack.c.l.s8.bf16 %v756_v50  ;;  %v753_v55 = vld [vmem:[#allocation8 + $0xa0] sm:$0xff] }
 0x12e   :  { %925 = vmatprep.subr.bf16.mxu0 %v798_v56  ;;  %1007 = vmatprep.subr.bf16.mxu1 %v800_v57  ;;  %v755_v56 = vld [vmem:[#allocation8 + $0xb0] sm:$0xff]  ;;  %v837_v57 = vunpack.c.l.s8.bf16 %v753_v55 }
 0x12f   :  { %v839_v58 = vunpack.c.l.s8.bf16 %v755_v56  ;;  %v843_v63 = vunpack.c.h.s8.bf16 %v755_v56 }
 0x130   :  { %544 = vmatmul.mubr.bf16.vlgmr.msra.gmra.mrb[0].mxu0 %v4551_v21  ;;  %667 = vmatmul.mubr.bf16.vlgmr.msra.gmra.mrb[0].mxu1 %v4551_v21  ;;  %v744_v21 = vld [vmem:[#allocation8 + $0x58] sm:$0xff] }
 0x131   :  { %926 = vmatpush1.bf16.msra.mxu0 %v797_v59  ;;  %1008 = vmatpush1.bf16.msra.mxu1 %v799_v60  ;;  %v816_v14 = vunpack.c.l.s8.bf16 %v744_v21  ;;  %v820_v20 = vunpack.c.h.s8.bf16 %v744_v21  ;;  %v844_v59 = vunpack.c.h.s8.bf16 %v756_v50  ;;  %v758_v60 = vld [vmem:[#allocation8 + $0xc8] sm:$0xff] }
 0x132   :  { %927 = vmatprep.subr.bf16.mxu0 %v802_v61  ;;  %1009 = vmatprep.subr.bf16.mxu1 %v804_v62  ;;  %v760_v61 = vld [vmem:[#allocation8 + $0xd8] sm:$0xff]  ;;  %v841_v62 = vunpack.c.h.s8.bf16 %v753_v55  ;;  %v846_v0 = vunpack.c.l.s8.bf16 %v758_v60  ;;  %v850_v5 = vunpack.c.h.s8.bf16 %v758_v60 }
 0x135   :  { %928 = vmatpush1.bf16.msra.mxu0 %v801_v1  ;;  %1010 = vmatpush1.bf16.msra.mxu1 %v803_v2  ;;  %v848_v1 = vunpack.c.l.s8.bf16 %v760_v61  ;;  %v757_v2 = vld [vmem:[#allocation8 + $0xc0] sm:$0xff] }
 0x136   :  { %929 = vmatprep.subr.bf16.mxu0 %v806_v41  ;;  %1011 = vmatprep.subr.bf16.mxu1 %v808_v3  ;;  %v759_v41 = vld [vmem:[#allocation8 + $0xd0] sm:$0xff]  ;;  %v845_v3 = vunpack.c.l.s8.bf16 %v757_v2 }
 0x137   :  { %v847_v4 = vunpack.c.l.s8.bf16 %v759_v41 }
 0x139   :  { %930 = vmatpush1.bf16.msra.mxu0 %v805_v6  ;;  %1012 = vmatpush1.bf16.msra.mxu1 %v807_v7  ;;  %v852_v6 = vunpack.c.h.s8.bf16 %v760_v61  ;;  %v849_v7 = vunpack.c.h.s8.bf16 %v757_v2 }
 0x13a   :  { %931 = vmatprep.subr.bf16.mxu0 %v810_v8  ;;  %1013 = vmatprep.subr.bf16.mxu1 %v812_v9  ;;  %v851_v8 = vunpack.c.h.s8.bf16 %v759_v41  ;;  %v762_v9 = vld [vmem:[#allocation8 + $0xe8] sm:$0xff]  ;;  %v868_v41 = vunpack.c.h.s8.bf16 %v4561_v22 }
 0x13b   :  { %v854_v21 = vunpack.c.l.s8.bf16 %v762_v9  ;;  %v858_v16 = vunpack.c.h.s8.bf16 %v762_v9 }
 0x13d   :  { %932 = vmatpush1.bf16.msra.mxu0 %v809_v11  ;;  %1014 = vmatpush1.bf16.msra.mxu1 %v811_v12  ;;  %v856_v11 = vunpack.c.l.s8.bf16 %v764_v10  ;;  %v761_v12 = vld [vmem:[#allocation8 + $0xe0] sm:$0xff] }
 0x13e   :  { %933 = vmatprep.subr.bf16.mxu0 %v814_v13  ;;  %1015 = vmatprep.subr.bf16.mxu1 %v816_v14  ;;  %v763_v13 = vld [vmem:[#allocation8 + $0xf0] sm:$0xff]  ;;  %v853_v14 = vunpack.c.l.s8.bf16 %v761_v12 }
 0x13f   :  { %v855_v15 = vunpack.c.l.s8.bf16 %v763_v13 }
 0x141   :  { %934 = vmatpush1.bf16.msra.mxu0 %v813_v17  ;;  %1016 = vmatpush1.bf16.msra.mxu1 %v815_v18  ;;  %v860_v17 = vunpack.c.h.s8.bf16 %v764_v10  ;;  %v857_v18 = vunpack.c.h.s8.bf16 %v761_v12  ;;  %v769_v10 = vld [vmem:[#allocation8 + $0x120] sm:$0xff] }
 0x142   :  { %935 = vmatprep.subr.bf16.mxu0 %v818_v19  ;;  %1017 = vmatprep.subr.bf16.mxu1 %v820_v20  ;;  %v859_v19 = vunpack.c.h.s8.bf16 %v763_v13  ;;  %v4559_v20 = vld [vmem:[#allocation8 + $0x108] sm:$0xff] }
 0x143   :  { %v862_v23 = vunpack.c.l.s8.bf16 %v4559_v20  ;;  %v866_v2 = vunpack.c.h.s8.bf16 %v4559_v20 }
 0x145   :  { %936 = vmatpush1.bf16.msra.mxu0 %v817_v24  ;;  %1018 = vmatpush1.bf16.msra.mxu1 %v819_v25  ;;  %v864_v24 = vunpack.c.l.s8.bf16 %v4561_v22  ;;  %v4566_v25 = vsub.s32 0, %v4529_v26  ;;  %v773_v22 = vld [vmem:[#allocation8 + $0x140] sm:$0xff] }
 0x146   :  { %937 = vmatprep.subr.bf16.mxu0 %v822_v27  ;;  %1019 = vmatprep.subr.bf16.mxu1 %v824_v28  ;;  %v4569_v27 = vsub.s32 2, %v4529_v26  ;;  %v104_v28 = vld [vmem:[#allocation5] sm:$0xf] }
 0x147   :  { %v691_v37 = vrot.slane %v104_v28, %v4575_v30 }
 0x148   :  { %9153 = vst [vmem:[#allocation19_spill] sm:$0xff] %v4569_v27 }
 0x149   :  { %938 = vmatpush1.bf16.msra.mxu0 %v821_v31  ;;  %1020 = vmatpush1.bf16.msra.mxu1 %v823_v32  ;;  %v105_v31 = vld [vmem:[#allocation5 + $0x4] sm:$0xf]  ;;  %v679_v32 = vrot.slane %v104_v28, %v4566_v25 }
 0x14a   :  { %939 = vmatprep.subr.bf16.mxu0 %v826_v33  ;;  %1021 = vmatprep.subr.bf16.mxu1 %v828_v34  ;;  %v687_v33 = vrot.slane %v104_v28, %v4569_v27  ;;  %v683_v34 = vrot.slane %v104_v28, %v4572_v29  ;;  %v704_v38 = vrot.slane %v105_v31, %v4566_v25 }
 0x14b   :  { %v716_v43 = vrot.slane %v105_v31, %v4575_v30 }
 0x14d   :  { %940 = vmatpush1.bf16.msra.mxu0 %v825_v39  ;;  %1022 = vmatpush1.bf16.msra.mxu1 %v827_v40  ;;  %v712_v39 = vrot.slane %v105_v31, %v4569_v27 }
 0x14e   :  { %941 = vmatprep.subr.bf16.mxu0 %v830_v52  ;;  %1023 = vmatprep.subr.bf16.mxu1 %v832_v42  ;;  %v708_v42 = vrot.slane %v105_v31, %v4572_v29 }
 0x151   :  { %942 = vmatpush1.bf16.msra.mxu0 %v829_v45  ;;  %1024 = vmatpush1.bf16.msra.mxu1 %v831_v46 }
 0x152   :  { %943 = vmatprep.subr.bf16.mxu0 %v834_v47  ;;  %1025 = vmatprep.subr.bf16.mxu1 %v836_v48 }
 0x155   :  { %944 = vmatpush1.bf16.msra.mxu0 %v833_v51  ;;  %1026 = vmatpush1.bf16.msra.mxu1 %v835_v53 }
 0x156   :  { %945 = vmatprep.subr.bf16.mxu0 %v838_v54  ;;  %1027 = vmatprep.subr.bf16.mxu1 %v840_v36 }
 0x159   :  { %946 = vmatpush1.bf16.msra.mxu0 %v837_v57  ;;  %1028 = vmatpush1.bf16.msra.mxu1 %v839_v58 }
 0x15a   :  { %947 = vmatprep.subr.bf16.mxu0 %v842_v35  ;;  %1029 = vmatprep.subr.bf16.mxu1 %v844_v59  ;;  %v765_v35 = vld [vmem:[#allocation8 + $0x100] sm:$0xff]  ;;  %v767_v59 = vld [vmem:[#allocation8 + $0x110] sm:$0xff] }
 0x15d   :  { %948 = vmatpush1.bf16.msra.mxu0 %v841_v62  ;;  %1030 = vmatpush1.bf16.msra.mxu1 %v843_v63  ;;  %v861_v63 = vunpack.c.l.s8.bf16 %v765_v35 }
 0x15e   :  { %949 = vmatprep.subr.bf16.mxu0 %v846_v0  ;;  %1031 = vmatprep.subr.bf16.mxu1 %v848_v1  ;;  %v863_v0 = vunpack.c.l.s8.bf16 %v767_v59 }
 0x161   :  { %950 = vmatpush1.bf16.msra.mxu0 %v845_v3  ;;  %1032 = vmatpush1.bf16.msra.mxu1 %v847_v4  ;;  %v770_v3 = vld [vmem:[#allocation8 + $0x128] sm:$0xff]  ;;  %v772_v4 = vld [vmem:[#allocation8 + $0x138] sm:$0xff] }
 0x162   :  { %951 = vmatprep.subr.bf16.mxu0 %v850_v5  ;;  %1033 = vmatprep.subr.bf16.mxu1 %v852_v6  ;;  %v865_v6 = vunpack.c.h.s8.bf16 %v765_v35  ;;  %v872_v9 = vunpack.c.l.s8.bf16 %v772_v4  ;;  %v874_v13 = vunpack.c.h.s8.bf16 %v770_v3 }
 0x165   :  { %952 = vmatpush1.bf16.msra.mxu0 %v849_v7  ;;  %1034 = vmatpush1.bf16.msra.mxu1 %v851_v8  ;;  %v867_v7 = vunpack.c.h.s8.bf16 %v767_v59  ;;  %v870_v8 = vunpack.c.l.s8.bf16 %v770_v3  ;;  %v786_v59 = vld [vmem:[#allocation8 + $0x1a8] sm:$0xff] }
 0x166   :  { %953 = vmatprep.subr.bf16.mxu0 %v854_v21  ;;  %1035 = vmatprep.subr.bf16.mxu1 %v856_v11  ;;  %v771_v21 = vld [vmem:[#allocation8 + $0x130] sm:$0xff]  ;;  %v869_v11 = vunpack.c.l.s8.bf16 %v769_v10 }
 0x167   :  { %v871_v12 = vunpack.c.l.s8.bf16 %v771_v21 }
 0x169   :  { %954 = vmatpush1.bf16.msra.mxu0 %v853_v14  ;;  %1036 = vmatpush1.bf16.msra.mxu1 %v855_v15  ;;  %v876_v14 = vunpack.c.h.s8.bf16 %v772_v4  ;;  %v774_v15 = vld [vmem:[#allocation8 + $0x148] sm:$0xff]  ;;  %v906_v4 = vunpack.c.h.s8.bf16 %v786_v59 }
 0x16a   :  { %955 = vmatprep.subr.bf16.mxu0 %v858_v16  ;;  %1037 = vmatprep.subr.bf16.mxu1 %v860_v17  ;;  %v776_v16 = vld [vmem:[#allocation8 + $0x158] sm:$0xff]  ;;  %v873_v17 = vunpack.c.h.s8.bf16 %v769_v10  ;;  %v882_v31 = vunpack.c.h.s8.bf16 %v774_v15 }
 0x16b   :  { %v880_v20 = vunpack.c.l.s8.bf16 %v776_v16 }
 0x16d   :  { %956 = vmatpush1.bf16.msra.mxu0 %v857_v18  ;;  %1038 = vmatpush1.bf16.msra.mxu1 %v859_v19  ;;  %v875_v18 = vunpack.c.h.s8.bf16 %v771_v21  ;;  %v878_v19 = vunpack.c.l.s8.bf16 %v774_v15 }
 0x16e   :  { %966 = vmatprep.subr.bf16.mxu0 %v862_v23  ;;  %1048 = vmatprep.subr.bf16.mxu1 %v864_v24  ;;  %v775_v23 = vld [vmem:[#allocation8 + $0x150] sm:$0xff]  ;;  %v877_v24 = vunpack.c.l.s8.bf16 %v773_v22 }
 0x16f   :  { %v879_v28 = vunpack.c.l.s8.bf16 %v775_v23 }
 0x203   :  { %v545_v40 = vpop.f32.mrb[0].mxu0  ;;  %v668_v52 = vpop.f32.mrb[0].mxu1 }
 0x204   :  { %v696_v44 = vmul.f32 %v679_v32, %v545_v40  ;;  %v698_v45 = vmul.f32 %v687_v33, %v668_v52  ;;  %v547_v46 = vpop.f32.mrb[1].mxu0  ;;  %v670_v47 = vpop.f32.mrb[1].mxu1  ;;  %v884_v32 = vunpack.c.h.s8.bf16 %v776_v16  ;;  %v778_v33 = vld [vmem:[#allocation8 + $0x168] sm:$0xff]  ;;  %v777_v52 = vld [vmem:[#allocation8 + $0x160] sm:$0xff] }
 0x205   :  { %v697_v48 = vmul.f32 %v683_v34, %v547_v46  ;;  %v699_v49 = vmul.f32 %v691_v37, %v670_v47  ;;  %v549_v50 = vpop.f32.mrb[2].mxu0  ;;  %v672_v51 = vpop.f32.mrb[2].mxu1  ;;  %v780_v34 = vld [vmem:[#allocation8 + $0x178] sm:$0xff]  ;;  %v881_v37 = vunpack.c.h.s8.bf16 %v773_v22  ;;  %v782_v47 = vld [vmem:[#allocation8 + $0x188] sm:$0xff] }
 0x206   :  { %v721_v53 = vadd.f32 %v704_v38, %v696_v44  ;;  %v4585_v54 = vadd.f32 %v712_v39, %v698_v45  ;;  %v550_v36 = vpop.f32.mrb[3].mxu0  ;;  %v673_v55 = vpop.f32.mrb[3].mxu1  ;;  %v883_v38 = vunpack.c.h.s8.bf16 %v775_v23  ;;  %v886_v39 = vunpack.c.l.s8.bf16 %v778_v33 }
 0x207   :  { %v722_v56 = vadd.f32 %v708_v42, %v697_v48  ;;  %v724_v57 = vadd.f32 %v716_v43, %v699_v49  ;;  %v888_v40 = vunpack.c.l.s8.bf16 %v780_v34  ;;  %v779_v42 = vld [vmem:[#allocation8 + $0x170] sm:$0xff]  ;;  %v885_v43 = vunpack.c.l.s8.bf16 %v777_v52  ;;  %v784_v48 = vld [vmem:[#allocation8 + $0x198] sm:$0xff]  ;;  %v781_v36 = vld [vmem:[#allocation8 + $0x180] sm:$0xff] }
 0x208   :  { %v725_v58 = vmax.f32 %v721_v53, 0.0  ;;  %v887_v44 = vunpack.c.l.s8.bf16 %v779_v42  ;;  %v890_v45 = vunpack.c.h.s8.bf16 %v778_v33  ;;  %v892_v46 = vunpack.c.h.s8.bf16 %v780_v34  ;;  %v783_v55 = vld [vmem:[#allocation8 + $0x190] sm:$0xff] }
 0x209   :  { %v726_v60 = vmax.f32 %v722_v56, 0.0  ;;  %v728_v61 = vmax.f32 %v724_v57, 0.0  ;;  %v889_v49 = vunpack.c.h.s8.bf16 %v777_v52  ;;  %v891_v50 = vunpack.c.h.s8.bf16 %v779_v42 }
 0x20a   :  { %v729_v1 = vpack.c.bf16 %v725_v58, %v725_v58  ;;  %v894_v51 = vunpack.c.l.s8.bf16 %v782_v47  ;;  %v896_v53 = vunpack.c.l.s8.bf16 %v784_v48  ;;  %v893_v56 = vunpack.c.l.s8.bf16 %v781_v36 }
 0x20b   :  { %v730_v62 = vpack.c.bf16 %v726_v60, %v726_v60  ;;  %v732_v5 = vpack.c.bf16 %v728_v61, %v728_v61  ;;  %v895_v57 = vunpack.c.l.s8.bf16 %v783_v55  ;;  %v898_v58 = vunpack.c.h.s8.bf16 %v782_v47  ;;  %v788_v60 = vld [vmem:[#allocation8 + $0x1b8] sm:$0xff] }
 0x20c   :  { %v900_v35 = vunpack.c.h.s8.bf16 %v784_v48  ;;  %v897_v61 = vunpack.c.h.s8.bf16 %v781_v36  ;;  %v727_v52 = vmax.f32 %v4585_v54, 0.0 }
 0x20d   :  { %957 = vmatprep.mubr.bf16.mxu0 %v730_v62  ;;  %1039 = vmatprep.mubr.bf16.mxu1 %v730_v62  ;;  %v899_v62 = vunpack.c.h.s8.bf16 %v783_v55 }
 0x20e   :  { %958 = vmatmul.mubr.bf16.vlgmr.msra.gmra.mrb[4].mxu0 %v729_v1  ;;  %1040 = vmatmul.mubr.bf16.vlgmr.msra.gmra.mrb[4].mxu1 %v729_v1  ;;  %v785_v1 = vld [vmem:[#allocation8 + $0x1a0] sm:$0xff]  ;;  %v731_v48 = vpack.c.bf16 %v727_v52, %v727_v52 }
 0x20f   :  { %967 = vmatpush1.bf16.msra.mxu0 %v861_v63  ;;  %1049 = vmatpush1.bf16.msra.mxu1 %v863_v0  ;;  %v902_v63 = vunpack.c.l.s8.bf16 %v786_v59  ;;  %v904_v0 = vunpack.c.l.s8.bf16 %v788_v60 }
 0x210   :  { %998 = vmatprep.mubr.bf16.mxu0 %v732_v5  ;;  %1080 = vmatprep.mubr.bf16.mxu1 %v732_v5  ;;  %v908_v5 = vunpack.c.h.s8.bf16 %v788_v60 }
 0x211   :  { %968 = vmatprep.subr.bf16.mxu0 %v866_v2  ;;  %1050 = vmatprep.subr.bf16.mxu1 %v868_v41  ;;  %v787_v2 = vld [vmem:[#allocation8 + $0x1b0] sm:$0xff]  ;;  %v901_v41 = vunpack.c.l.s8.bf16 %v785_v1 }
 0x212   :  { %v903_v3 = vunpack.c.l.s8.bf16 %v787_v2 }
 0x213   :  { %969 = vmatpush1.bf16.msra.mxu0 %v865_v6  ;;  %1051 = vmatpush1.bf16.msra.mxu1 %v867_v7  ;;  %v790_v6 = vld [vmem:[#allocation8 + $0x1c8] sm:$0xff]  ;;  %v792_v7 = vld [vmem:[#allocation8 + $0x1d8] sm:$0xff] }
 0x214   :  { %970 = vmatprep.subr.bf16.mxu0 %v870_v8  ;;  %1052 = vmatprep.subr.bf16.mxu1 %v872_v9  ;;  %v905_v8 = vunpack.c.h.s8.bf16 %v785_v1  ;;  %v907_v9 = vunpack.c.h.s8.bf16 %v787_v2  ;;  %v910_v10 = vunpack.c.l.s8.bf16 %v790_v6  ;;  %v912_v21 = vunpack.c.l.s8.bf16 %v792_v7 }
 0x215   :  { %v914_v15 = vunpack.c.h.s8.bf16 %v790_v6  ;;  %v916_v16 = vunpack.c.h.s8.bf16 %v792_v7 }
 0x217   :  { %971 = vmatpush1.bf16.msra.mxu0 %v869_v11  ;;  %1053 = vmatpush1.bf16.msra.mxu1 %v871_v12  ;;  %v789_v11 = vld [vmem:[#allocation8 + $0x1c0] sm:$0xff]  ;;  %v791_v12 = vld [vmem:[#allocation8 + $0x1d0] sm:$0xff] }
 0x218   :  { %972 = vmatprep.subr.bf16.mxu0 %v874_v13  ;;  %1054 = vmatprep.subr.bf16.mxu1 %v876_v14  ;;  %v909_v13 = vunpack.c.l.s8.bf16 %v789_v11  ;;  %v911_v14 = vunpack.c.l.s8.bf16 %v791_v12 }
 0x21b   :  { %973 = vmatpush1.bf16.msra.mxu0 %v873_v17  ;;  %1055 = vmatpush1.bf16.msra.mxu1 %v875_v18  ;;  %v794_v17 = vld [vmem:[#allocation8 + $0x1e8] sm:$0xff]  ;;  %v796_v18 = vld [vmem:[#allocation8 + $0x1f8] sm:$0xff] }
 0x21c   :  { %974 = vmatprep.subr.bf16.mxu0 %v878_v19  ;;  %1056 = vmatprep.subr.bf16.mxu1 %v880_v20  ;;  %v913_v19 = vunpack.c.h.s8.bf16 %v789_v11  ;;  %v915_v20 = vunpack.c.h.s8.bf16 %v791_v12  ;;  %v918_v22 = vunpack.c.l.s8.bf16 %v794_v17  ;;  %v920_v23 = vunpack.c.l.s8.bf16 %v796_v18 }
 0x21d   :  { %v922_v33 = vunpack.c.h.s8.bf16 %v794_v17  ;;  %v924_v34 = vunpack.c.h.s8.bf16 %v796_v18 }
 0x21f   :  { %975 = vmatpush1.bf16.msra.mxu0 %v877_v24  ;;  %1057 = vmatpush1.bf16.msra.mxu1 %v879_v28  ;;  %v793_v24 = vld [vmem:[#allocation8 + $0x1e0] sm:$0xff]  ;;  %v795_v28 = vld [vmem:[#allocation8 + $0x1f0] sm:$0xff] }
 0x220   :  { %976 = vmatprep.subr.bf16.mxu0 %v882_v31  ;;  %1058 = vmatprep.subr.bf16.mxu1 %v884_v32  ;;  %v917_v31 = vunpack.c.l.s8.bf16 %v793_v24  ;;  %v919_v32 = vunpack.c.l.s8.bf16 %v795_v28 }
 0x223   :  { %977 = vmatpush1.bf16.msra.mxu0 %v881_v37  ;;  %1059 = vmatpush1.bf16.msra.mxu1 %v883_v38  ;;  %v4589_v37 = vld [vmem:[#allocation10 + $0x8] sm:$0xff]  ;;  %v4591_v38 = vld [vmem:[#allocation10 + $0x18] sm:$0xff] }
 0x224   :  { %978 = vmatprep.subr.bf16.mxu0 %v886_v39  ;;  %1060 = vmatprep.subr.bf16.mxu1 %v888_v40  ;;  %v921_v39 = vunpack.c.h.s8.bf16 %v793_v24  ;;  %v923_v40 = vunpack.c.h.s8.bf16 %v795_v28  ;;  %v8299_v42 = vunpack.c.l.s8.bf16 %v4589_v37  ;;  %v8295_v54 = vunpack.c.h.s8.bf16 %v4589_v37 }
 0x227   :  { %979 = vmatpush1.bf16.msra.mxu0 %v885_v43  ;;  %1061 = vmatpush1.bf16.msra.mxu1 %v887_v44  ;;  %v8298_v43 = vunpack.c.l.s8.bf16 %v4591_v38  ;;  %v4596_v44 = vld [vmem:[#allocation10] sm:$0xff] }
 0x228   :  { %980 = vmatprep.subr.bf16.mxu0 %v890_v45  ;;  %1062 = vmatprep.subr.bf16.mxu1 %v892_v46  ;;  %v4598_v45 = vld [vmem:[#allocation10 + $0x10] sm:$0xff]  ;;  %v8297_v46 = vunpack.c.l.s8.bf16 %v4596_v44 }
 0x229   :  { %v8296_v47 = vunpack.c.l.s8.bf16 %v4598_v45  ;;  %v8292_v36 = vunpack.c.h.s8.bf16 %v4598_v45 }
 0x22b   :  { %981 = vmatpush1.bf16.msra.mxu0 %v889_v49  ;;  %1063 = vmatpush1.bf16.msra.mxu1 %v891_v50  ;;  %v8294_v49 = vunpack.c.h.s8.bf16 %v4591_v38  ;;  %v4608_v50 = vld [vmem:[#allocation10 + $0x48] sm:$0xff] }
 0x22c   :  { %982 = vmatprep.subr.bf16.mxu0 %v894_v51  ;;  %1064 = vmatprep.subr.bf16.mxu1 %v896_v53  ;;  %v4610_v51 = vld [vmem:[#allocation10 + $0x58] sm:$0xff]  ;;  %v8293_v53 = vunpack.c.h.s8.bf16 %v4596_v44  ;;  %v8291_v55 = vunpack.c.l.s8.bf16 %v4608_v50  ;;  %v8287_v60 = vunpack.c.h.s8.bf16 %v4608_v50 }
 0x22f   :  { %983 = vmatpush1.bf16.msra.mxu0 %v893_v56  ;;  %1065 = vmatpush1.bf16.msra.mxu1 %v895_v57  ;;  %v8290_v56 = vunpack.c.l.s8.bf16 %v4610_v51  ;;  %v4624_v57 = vld [vmem:[#allocation10 + $0x40] sm:$0xff] }
 0x230   :  { %984 = vmatprep.subr.bf16.mxu0 %v898_v58  ;;  %1066 = vmatprep.subr.bf16.mxu1 %v900_v35  ;;  %v4626_v58 = vld [vmem:[#allocation10 + $0x50] sm:$0xff]  ;;  %v8289_v35 = vunpack.c.l.s8.bf16 %v4624_v57 }
 0x231   :  { %v8288_v59 = vunpack.c.l.s8.bf16 %v4626_v58  ;;  %v8282_v1 = vunpack.c.h.s8.bf16 %v4626_v58 }
 0x233   :  { %985 = vmatpush1.bf16.msra.mxu0 %v897_v61  ;;  %1067 = vmatpush1.bf16.msra.mxu1 %v899_v62  ;;  %v8284_v61 = vunpack.c.h.s8.bf16 %v4610_v51  ;;  %v4640_v62 = vld [vmem:[#allocation10 + $0x88] sm:$0xff] }
 0x234   :  { %986 = vmatprep.subr.bf16.mxu0 %v902_v63  ;;  %1068 = vmatprep.subr.bf16.mxu1 %v904_v0  ;;  %v4642_v63 = vld [vmem:[#allocation10 + $0x98] sm:$0xff]  ;;  %v8283_v0 = vunpack.c.h.s8.bf16 %v4624_v57  ;;  %v8281_v2 = vunpack.c.l.s8.bf16 %v4640_v62  ;;  %v8269_v7 = vunpack.c.h.s8.bf16 %v4640_v62 }
 0x237   :  { %987 = vmatpush1.bf16.msra.mxu0 %v901_v41  ;;  %1069 = vmatpush1.bf16.msra.mxu1 %v903_v3  ;;  %v8280_v41 = vunpack.c.l.s8.bf16 %v4642_v63  ;;  %v4656_v3 = vld [vmem:[#allocation10 + $0x80] sm:$0xff] }
 0x238   :  { %988 = vmatprep.subr.bf16.mxu0 %v906_v4  ;;  %1070 = vmatprep.subr.bf16.mxu1 %v908_v5  ;;  %v4658_v4 = vld [vmem:[#allocation10 + $0x90] sm:$0xff]  ;;  %v8279_v5 = vunpack.c.l.s8.bf16 %v4656_v3 }
 0x239   :  { %v8270_v6 = vunpack.c.l.s8.bf16 %v4658_v4  ;;  %v8256_v11 = vunpack.c.h.s8.bf16 %v4658_v4 }
 0x23b   :  { %989 = vmatpush1.bf16.msra.mxu0 %v905_v8  ;;  %1071 = vmatpush1.bf16.msra.mxu1 %v907_v9  ;;  %v8266_v8 = vunpack.c.h.s8.bf16 %v4642_v63  ;;  %v4672_v9 = vld [vmem:[#allocation10 + $0xc8] sm:$0xff] }
 0x23c   :  { %990 = vmatprep.subr.bf16.mxu0 %v910_v10  ;;  %1072 = vmatprep.subr.bf16.mxu1 %v912_v21  ;;  %v4674_v10 = vld [vmem:[#allocation10 + $0xd8] sm:$0xff]  ;;  %v8263_v21 = vunpack.c.h.s8.bf16 %v4656_v3  ;;  %v8251_v12 = vunpack.c.l.s8.bf16 %v4672_v9  ;;  %v8239_v18 = vunpack.c.h.s8.bf16 %v4672_v9 }
 0x23f   :  { %991 = vmatpush1.bf16.msra.mxu0 %v909_v13  ;;  %1073 = vmatpush1.bf16.msra.mxu1 %v911_v14  ;;  %v8250_v13 = vunpack.c.l.s8.bf16 %v4674_v10  ;;  %v4688_v14 = vld [vmem:[#allocation10 + $0xc0] sm:$0xff] }
 0x240   :  { %992 = vmatprep.subr.bf16.mxu0 %v914_v15  ;;  %1074 = vmatprep.subr.bf16.mxu1 %v916_v16  ;;  %v4690_v15 = vld [vmem:[#allocation10 + $0xd0] sm:$0xff]  ;;  %v8245_v16 = vunpack.c.l.s8.bf16 %v4688_v14 }
 0x241   :  { %v8244_v17 = vunpack.c.l.s8.bf16 %v4690_v15  ;;  %v8235_v24 = vunpack.c.h.s8.bf16 %v4690_v15 }
 0x243   :  { %993 = vmatpush1.bf16.msra.mxu0 %v913_v19  ;;  %1075 = vmatpush1.bf16.msra.mxu1 %v915_v20  ;;  %v8238_v19 = vunpack.c.h.s8.bf16 %v4674_v10  ;;  %v4704_v20 = vld [vmem:[#allocation10 + $0x108] sm:$0xff] }
 0x244   :  { %994 = vmatprep.subr.bf16.mxu0 %v918_v22  ;;  %1076 = vmatprep.subr.bf16.mxu1 %v920_v23  ;;  %v4706_v22 = vld [vmem:[#allocation10 + $0x118] sm:$0xff]  ;;  %v8234_v23 = vunpack.c.h.s8.bf16 %v4688_v14  ;;  %v8236_v28 = vunpack.c.l.s8.bf16 %v4704_v20 }
 0x245   :  { %v8243_v52 = vunpack.c.h.s8.bf16 %v4706_v22 }
 0x247   :  { %995 = vmatpush1.bf16.msra.mxu0 %v917_v31  ;;  %1077 = vmatpush1.bf16.msra.mxu1 %v919_v32  ;;  %v8237_v31 = vunpack.c.l.s8.bf16 %v4706_v22  ;;  %v4720_v32 = vld [vmem:[#allocation10 + $0x100] sm:$0xff] }
 0x248   :  { %996 = vmatprep.subr.bf16.mxu0 %v922_v33  ;;  %1078 = vmatprep.subr.bf16.mxu1 %v924_v34  ;;  %v4722_v33 = vld [vmem:[#allocation10 + $0x110] sm:$0xff]  ;;  %v8240_v34 = vunpack.c.l.s8.bf16 %v4720_v32 }
 0x249   :  { %9156 = vst [vmem:[#allocation22_spill] sm:$0xff] %v4722_v33 }
 0x24b   :  { %997 = vmatpush1.bf16.msra.mxu0 %v921_v39  ;;  %1079 = vmatpush1.bf16.msra.mxu1 %v923_v40  ;;  %v8241_v39 = vunpack.c.l.s8.bf16 %v4722_v33  ;;  %v8242_v40 = vunpack.c.h.s8.bf16 %v4704_v20 }
 0x24c   :  { %1528 = vmatprep.subr.bf16.mxu0 %v8299_v42  ;;  %1610 = vmatprep.subr.bf16.mxu1 %v8298_v43  ;;  %v4870_v42 = vld [vmem:[#allocation10 + $0x210] sm:$0xff] }
 0x24d   :  { %9174 = vst [vmem:[#allocation40_spill] sm:$0xff] %v4870_v42 }
 0x24e   :  { %999 = vmatmul.mubr.bf16.vlgmr.msra.gmra.mrb[4].mxu0 %v731_v48  ;;  %1081 = vmatmul.mubr.bf16.vlgmr.msra.gmra.mrb[4].mxu1 %v731_v48  ;;  %v4736_v48 = vld [vmem:[#allocation10 + $0x148] sm:$0xff] }
 0x24f   :  { %1529 = vmatpush1.bf16.msra.mxu0 %v8297_v46  ;;  %1611 = vmatpush1.bf16.msra.mxu1 %v8296_v47  ;;  %9157 = vst [vmem:[#allocation23_spill] sm:$0xff] %v4736_v48 }
 0x250   :  { %1530 = vmatprep.subr.bf16.mxu0 %v8295_v54  ;;  %1612 = vmatprep.subr.bf16.mxu1 %v8294_v49  ;;  %v4864_v54 = vld [vmem:[#allocation10 + $0x200] sm:$0xff] }
 0x251   :  { %9171 = vst [vmem:[#allocation37_spill] sm:$0xff] %v4864_v54 }
 0x253   :  { %1531 = vmatpush1.bf16.msra.mxu0 %v8293_v53  ;;  %1613 = vmatpush1.bf16.msra.mxu1 %v8292_v36 }
 0x254   :  { %1532 = vmatprep.subr.bf16.mxu0 %v8291_v55  ;;  %1614 = vmatprep.subr.bf16.mxu1 %v8290_v56 }
 0x257   :  { %1533 = vmatpush1.bf16.msra.mxu0 %v8289_v35  ;;  %1615 = vmatpush1.bf16.msra.mxu1 %v8288_v59 }
 0x258   :  { %1534 = vmatprep.subr.bf16.mxu0 %v8287_v60  ;;  %1616 = vmatprep.subr.bf16.mxu1 %v8284_v61 }
 0x25b   :  { %1535 = vmatpush1.bf16.msra.mxu0 %v8283_v0  ;;  %1617 = vmatpush1.bf16.msra.mxu1 %v8282_v1 }
 0x25c   :  { %1536 = vmatprep.subr.bf16.mxu0 %v8281_v2  ;;  %1618 = vmatprep.subr.bf16.mxu1 %v8280_v41 }
 0x25f   :  { %1537 = vmatpush1.bf16.msra.mxu0 %v8279_v5  ;;  %1619 = vmatpush1.bf16.msra.mxu1 %v8270_v6 }
 0x260   :  { %1538 = vmatprep.subr.bf16.mxu0 %v8269_v7  ;;  %1620 = vmatprep.subr.bf16.mxu1 %v8266_v8 }
 0x263   :  { %1539 = vmatpush1.bf16.msra.mxu0 %v8263_v21  ;;  %1621 = vmatpush1.bf16.msra.mxu1 %v8256_v11  ;;  %v4820_v21 = vld [vmem:[#allocation10 + $0x1c0] sm:$0xff] }
 0x264   :  { %1540 = vmatprep.subr.bf16.mxu0 %v8251_v12  ;;  %1622 = vmatprep.subr.bf16.mxu1 %v8250_v13  ;;  %v4784_v12 = vld [vmem:[#allocation10 + $0x180] sm:$0xff]  ;;  %9167 = vst [vmem:[#allocation33_spill] sm:$0xff] %v4820_v21  ;;  %v8277_v7 = vunpack.c.h.s8.bf16 %v4820_v21 }
 0x265   :  { %9163 = vst [vmem:[#allocation29_spill] sm:$0xff] %v4784_v12 }
 0x267   :  { %1541 = vmatpush1.bf16.msra.mxu0 %v8245_v16  ;;  %1623 = vmatpush1.bf16.msra.mxu1 %v8244_v17  ;;  %v4768_v16 = vld [vmem:[#allocation10 + $0x188] sm:$0xff] }
 0x268   :  { %1542 = vmatprep.subr.bf16.mxu0 %v8239_v18  ;;  %1624 = vmatprep.subr.bf16.mxu1 %v8238_v19  ;;  %v4752_v18 = vld [vmem:[#allocation10 + $0x140] sm:$0xff]  ;;  %9161 = vst [vmem:[#allocation27_spill] sm:$0xff] %v4768_v16 }
 0x269   :  { %9159 = vst [vmem:[#allocation25_spill] sm:$0xff] %v4752_v18 }
 0x26b   :  { %1543 = vmatpush1.bf16.msra.mxu0 %v8234_v23  ;;  %1625 = vmatpush1.bf16.msra.mxu1 %v8235_v24  ;;  %v4738_v23 = vld [vmem:[#allocation10 + $0x158] sm:$0xff]  ;;  %v8246_v24 = vunpack.c.h.s8.bf16 %v4720_v32 }
 0x26c   :  { %1544 = vmatprep.subr.bf16.mxu0 %v8236_v28  ;;  %1626 = vmatprep.subr.bf16.mxu1 %v8237_v31  ;;  %9158 = vst [vmem:[#allocation24_spill] sm:$0xff] %v4738_v23  ;;  %v8247_v28 = vunpack.c.h.s8.bf16 %v4722_v33  ;;  %v8248_v31 = vunpack.c.l.s8.bf16 %v4736_v48  ;;  %v8249_v19 = vunpack.c.l.s8.bf16 %v4738_v23  ;;  %v8255_v17 = vunpack.c.h.s8.bf16 %v4738_v23 }
 0x26f   :  { %1545 = vmatpush1.bf16.msra.mxu0 %v8240_v34  ;;  %1627 = vmatpush1.bf16.msra.mxu1 %v8241_v39  ;;  %v4754_v34 = vld [vmem:[#allocation10 + $0x150] sm:$0xff]  ;;  %v8252_v39 = vunpack.c.l.s8.bf16 %v4752_v18 }
 0x270   :  { %1546 = vmatprep.subr.bf16.mxu0 %v8242_v40  ;;  %1628 = vmatprep.subr.bf16.mxu1 %v8243_v52  ;;  %9160 = vst [vmem:[#allocation26_spill] sm:$0xff] %v4754_v34  ;;  %v8253_v40 = vunpack.c.l.s8.bf16 %v4754_v34  ;;  %v8254_v52 = vunpack.c.h.s8.bf16 %v4736_v48 }
 0x273   :  { %1547 = vmatpush1.bf16.msra.mxu0 %v8246_v24  ;;  %1629 = vmatpush1.bf16.msra.mxu1 %v8247_v28  ;;  %v4770_v24 = vld [vmem:[#allocation10 + $0x198] sm:$0xff]  ;;  %v8258_v28 = vunpack.c.h.s8.bf16 %v4752_v18 }
 0x274   :  { %1548 = vmatprep.subr.bf16.mxu0 %v8248_v31  ;;  %1630 = vmatprep.subr.bf16.mxu1 %v8249_v19  ;;  %9162 = vst [vmem:[#allocation28_spill] sm:$0xff] %v4770_v24  ;;  %v8257_v31 = vunpack.c.h.s8.bf16 %v4754_v34  ;;  %v8262_v19 = vunpack.c.l.s8.bf16 %v4768_v16  ;;  %v8260_v13 = vunpack.c.l.s8.bf16 %v4770_v24  ;;  %v8265_v11 = vunpack.c.h.s8.bf16 %v4770_v24 }
 0x277   :  { %1549 = vmatpush1.bf16.msra.mxu0 %v8252_v39  ;;  %1631 = vmatpush1.bf16.msra.mxu1 %v8253_v40  ;;  %v4786_v39 = vld [vmem:[#allocation10 + $0x190] sm:$0xff]  ;;  %v8259_v40 = vunpack.c.l.s8.bf16 %v4784_v12 }
 0x278   :  { %1550 = vmatprep.subr.bf16.mxu0 %v8254_v52  ;;  %1632 = vmatprep.subr.bf16.mxu1 %v8255_v17  ;;  %9164 = vst [vmem:[#allocation30_spill] sm:$0xff] %v4786_v39  ;;  %v8261_v52 = vunpack.c.l.s8.bf16 %v4786_v39  ;;  %v8264_v17 = vunpack.c.h.s8.bf16 %v4768_v16 }
 0x27b   :  { %1551 = vmatpush1.bf16.msra.mxu0 %v8258_v28  ;;  %1633 = vmatpush1.bf16.msra.mxu1 %v8257_v31  ;;  %v8268_v31 = vunpack.c.h.s8.bf16 %v4784_v12  ;;  %v8267_v28 = vunpack.c.h.s8.bf16 %v4786_v39 }
 0x27c   :  { %1552 = vmatprep.subr.bf16.mxu0 %v8262_v19  ;;  %1634 = vmatprep.subr.bf16.mxu1 %v8260_v13  ;;  %v4816_v13 = vld [vmem:[#allocation10 + $0x1d8] sm:$0xff] }
 0x27d   :  { %9166 = vst [vmem:[#allocation32_spill] sm:$0xff] %v4816_v13  ;;  %v8273_v19 = vunpack.c.l.s8.bf16 %v4816_v13 }
 0x27f   :  { %1553 = vmatpush1.bf16.msra.mxu0 %v8259_v40  ;;  %1635 = vmatpush1.bf16.msra.mxu1 %v8261_v52  ;;  %v4814_v40 = vld [vmem:[#allocation10 + $0x1c8] sm:$0xff] }
 0x280   :  { %1554 = vmatprep.subr.bf16.mxu0 %v8264_v17  ;;  %1636 = vmatprep.subr.bf16.mxu1 %v8265_v11  ;;  %9165 = vst [vmem:[#allocation31_spill] sm:$0xff] %v4814_v40  ;;  %v8274_v52 = vunpack.c.l.s8.bf16 %v4814_v40  ;;  %v4822_v17 = vld [vmem:[#allocation10 + $0x1d0] sm:$0xff]  ;;  %v8272_v11 = vunpack.c.l.s8.bf16 %v4820_v21 }
 0x281   :  { %9168 = vst [vmem:[#allocation34_spill] sm:$0xff] %v4822_v17  ;;  %v8271_v8 = vunpack.c.l.s8.bf16 %v4822_v17  ;;  %v8278_v6 = vunpack.c.h.s8.bf16 %v4822_v17 }
 0x283   :  { %1555 = vmatpush1.bf16.msra.mxu0 %v8268_v31  ;;  %1637 = vmatpush1.bf16.msra.mxu1 %v8267_v28  ;;  %v8276_v28 = vunpack.c.h.s8.bf16 %v4814_v40  ;;  %v8275_v31 = vunpack.c.h.s8.bf16 %v4816_v13 }
 0x284   :  { %1556 = vmatprep.subr.bf16.mxu0 %v8274_v52  ;;  %1638 = vmatprep.subr.bf16.mxu1 %v8273_v19 }
 0x287   :  { %1557 = vmatpush1.bf16.msra.mxu0 %v8272_v11  ;;  %1639 = vmatpush1.bf16.msra.mxu1 %v8271_v8  ;;  %v4846_v8 = vld [vmem:[#allocation10 + $0x208] sm:$0xff]  ;;  %v4848_v11 = vld [vmem:[#allocation10 + $0x218] sm:$0xff] }
 0x288   :  { %1558 = vmatprep.subr.bf16.mxu0 %v8276_v28  ;;  %1640 = vmatprep.subr.bf16.mxu1 %v8275_v31  ;;  %9169 = vst [vmem:[#allocation35_spill] sm:$0xff] %v4846_v8  ;;  %9170 = vst [vmem:[#allocation36_spill] sm:$0xff] %v4848_v11  ;;  %v8285_v19 = vunpack.c.l.s8.bf16 %v4846_v8  ;;  %v8286_v52 = vunpack.c.l.s8.bf16 %v4848_v11  ;;  %v106_v31 = vld [vmem:[#allocation5 + $0x8] sm:$0xf]  ;;  %v107_v28 = vld [vmem:[#allocation5 + $0xc] sm:$0xf] }
 0x289   :  { %v1097_v5 = vrot.slane %v106_v31, %v4572_v29  ;;  %v1105_v41 = vrot.slane %v106_v31, %v4575_v30  ;;  %v1118_v2 = vrot.slane %v107_v28, %v4566_v25  ;;  %v1126_v1 = vrot.slane %v107_v28, %v4569_v27 }
 0x28b   :  { %1559 = vmatpush1.bf16.msra.mxu0 %v8277_v7  ;;  %1641 = vmatpush1.bf16.msra.mxu1 %v8278_v6  ;;  %v1093_v7 = vrot.slane %v106_v31, %v4566_v25  ;;  %v1101_v6 = vrot.slane %v106_v31, %v4569_v27 }
 0x28c   :  { %1569 = vmatprep.subr.bf16.mxu0 %v8285_v19  ;;  %1651 = vmatprep.subr.bf16.mxu1 %v8286_v52  ;;  %v1122_v19 = vrot.slane %v107_v28, %v4572_v29  ;;  %v1130_v52 = vrot.slane %v107_v28, %v4575_v30 }
 0x321   :  { %v1000_v0 = vpop.f32.mrb[4].mxu0  ;;  %v1082_v61 = vpop.f32.mrb[4].mxu1 }
 0x322   :  { %v1110_v60 = vmul.f32 %v1093_v7, %v1000_v0  ;;  %v1112_v59 = vmul.f32 %v1101_v6, %v1082_v61  ;;  %v1002_v35 = vpop.f32.mrb[5].mxu0  ;;  %v1084_v56 = vpop.f32.mrb[5].mxu1  ;;  %v4909_v7 = vld [vmem:[#allocation10 + $0x258] sm:$0xff] }
 0x323   :  { %v1111_v55 = vmul.f32 %v1097_v5, %v1002_v35  ;;  %v1113_v36 = vmul.f32 %v1105_v41, %v1084_v56  ;;  %v1004_v53 = vpop.f32.mrb[6].mxu0  ;;  %v1086_v49 = vpop.f32.mrb[6].mxu1  ;;  %v8302_v35 = vunpack.c.l.s8.bf16 %v4864_v54  ;;  %v8303_v56 = vunpack.c.l.s8.bf16 %v4870_v42  ;;  %9180 = vst [vmem:[#allocation46_spill] sm:$0xff] %v4909_v7  ;;  %v4922_v5 = vld [vmem:[#allocation10 + $0x240] sm:$0xff] }
 0x324   :  { %v4866_v31 = vadd.f32 %v1118_v2, %v1110_v60  ;;  %v4868_v47 = vadd.f32 %v1126_v1, %v1112_v59  ;;  %v1005_v46 = vpop.f32.mrb[7].mxu0  ;;  %v1087_v43 = vpop.f32.mrb[7].mxu1  ;;  %v8308_v59 = vunpack.c.h.s8.bf16 %v4846_v8  ;;  %v4900_v2 = vld [vmem:[#allocation10 + $0x248] sm:$0xff]  ;;  %9181 = vst [vmem:[#allocation47_spill] sm:$0xff] %v4922_v5 }
 0x325   :  { %v4872_v17 = vadd.f32 %v1122_v19, %v1111_v55  ;;  %v4874_v0 = vadd.f32 %v1130_v52, %v1113_v36  ;;  %9178 = vst [vmem:[#allocation44_spill] sm:$0xff] %v4900_v2  ;;  %v9183_v19 = vunpack.c.h.s8.bf16 %v4848_v11 }
 0x326   :  { %9172 = vst [vmem:[#allocation38_spill] sm:$0xff] %v4866_v31  ;;  %9173 = vst [vmem:[#allocation39_spill] sm:$0xff] %v4868_v47  ;;  %v3963_v49 = vmul.f32 %v4866_v31, %v4866_v31  ;;  %v3965_v46 = vmul.f32 %v4868_v47, %v4868_v47  ;;  %v4890_v36 = vpack.c.bf16 %v4866_v31, %v4866_v31 }
 0x327   :  { %9175 = vst [vmem:[#allocation41_spill] sm:$0xff] %v4872_v17  ;;  %9176 = vst [vmem:[#allocation42_spill] sm:$0xff] %v4874_v0  ;;  %v4881_v53 = vpack.c.bf16 %v4872_v17, %v4872_v17  ;;  %v3964_v43 = vmul.f32 %v4872_v17, %v4872_v17  ;;  %v3966_v61 = vmul.f32 %v4874_v0, %v4874_v0  ;;  %v9185_v17 = vunpack.c.h.s8.bf16 %v4870_v42 }
 0x328   :  { %9177 = vst [vmem:[#allocation43_spill] sm:$0xff] %v4890_v36  ;;  %v3968_v55 = vsel %vm3967_vm0, %v3963_v49, 0.0  ;;  %v4904_v41 = vpack.c.bf16 %v4874_v0, %v4874_v0  ;;  %v3971_v28 = vsel %vm3967_vm0, %v3965_v46, 0.0  ;;  %v4027_v52 = vsel %vm1955_vm1, %v3963_v49, 0.0 }
 0x329   :  { %1560 = vmatprep.mubr.bf16.mxu0 %v4881_v53  ;;  %1642 = vmatprep.mubr.bf16.mxu1 %v4881_v53  ;;  %v3969_v1 = vsel %vm3967_vm0, %v3964_v43, 0.0  ;;  %v4028_v60 = vsel %vm1955_vm1, %v3964_v43, 0.0  ;;  %v3973_v49 = vsel %vm3967_vm0, %v3966_v61, 0.0  ;;  %v8317_v43 = vunpack.c.l.s8.bf16 %v4909_v7 }
 0x32a   :  { %9179 = vst [vmem:[#allocation45_spill] sm:$0xff] %v4904_v41  ;;  %1561 = vmatmul.mubr.bf16.vlgmr.msra.gmra.mrb[8].mxu0 %v4890_v36  ;;  %1643 = vmatmul.mubr.bf16.vlgmr.msra.gmra.mrb[8].mxu1 %v4890_v36  ;;  %v3970_v6 = vadd.f32 %v3969_v1, %v3968_v55  ;;  %v4030_v0 = vsel %vm1955_vm1, %v3965_v46, 0.0  ;;  %v9184_v1 = vunpack.c.h.s8.bf16 %v4864_v54  ;;  %v8309_v46 = vunpack.c.h.s8.bf16 %v4900_v2 }
 0x32b   :  { %1570 = vmatpush1.bf16.msra.mxu0 %v8302_v35  ;;  %1652 = vmatpush1.bf16.msra.mxu1 %v8303_v56  ;;  %v4924_v35 = vld [vmem:[#allocation10 + $0x250] sm:$0xff]  ;;  %v4029_v56 = vadd.f32 %v4028_v60, %v4027_v52  ;;  %v8312_v60 = vunpack.c.l.s8.bf16 %v4922_v5 }
 0x32c   :  { %1601 = vmatprep.mubr.bf16.mxu0 %v4904_v41  ;;  %1683 = vmatprep.mubr.bf16.mxu1 %v4904_v41  ;;  %v3972_v55 = vadd.f32 %v3971_v28, %v3970_v6  ;;  %9182 = vst [vmem:[#allocation48_spill] sm:$0xff] %v4924_v35  ;;  %v8311_v52 = vunpack.c.l.s8.bf16 %v4924_v35 }
 0x32d   :  { %1571 = vmatprep.subr.bf16.mxu0 %v8308_v59  ;;  %1653 = vmatprep.subr.bf16.mxu1 %v9183_v19  ;;  %v4031_v28 = vadd.f32 %v4030_v0, %v4029_v56  ;;  %v4032_v19 = vsel %vm1955_vm1, %v3966_v61, 0.0  ;;  %v9186_v59 = vunpack.c.l.s8.bf16 %v4900_v2  ;;  %v8310_v0 = vunpack.c.h.s8.bf16 %v4909_v7 }
 0x32e   :  { %v3974_v6 = vadd.f32 %v3973_v49, %v3972_v55  ;;  %v4950_v55 = vld [vmem:[#allocation10 + $0x298] sm:$0xff]  ;;  %v8314_v61 = vunpack.c.h.s8.bf16 %v4924_v35 }
 0x32f   :  { %1572 = vmatpush1.bf16.msra.mxu0 %v9184_v1  ;;  %1654 = vmatpush1.bf16.msra.mxu1 %v9185_v17  ;;  %v4944_v56 = vadd.f32 %v4032_v19, %v4031_v28  ;;  %v4948_v17 = vld [vmem:[#allocation10 + $0x288] sm:$0xff]  ;;  %9189 = vst [vmem:[#allocation51_spill] sm:$0xff] %v4950_v55  ;;  %v8316_v49 = vunpack.c.l.s8.bf16 %v4950_v55  ;;  %v4966_v28 = vld [vmem:[#allocation10 + $0x290] sm:$0xff] }
 0x330   :  { %3975 = vadd.xlane.f32.xlu0 %v3974_v6  ;;  %1573 = vmatprep.subr.bf16.mxu0 %v9186_v59  ;;  %9188 = vst [vmem:[#allocation50_spill] sm:$0xff] %v4948_v17  ;;  %v8313_v59 = vunpack.c.h.s8.bf16 %v4922_v5  ;;  %v8315_v1 = vunpack.c.l.s8.bf16 %v4948_v17  ;;  %v4964_v6 = vld [vmem:[#allocation10 + $0x280] sm:$0xff]  ;;  %9191 = vst [vmem:[#allocation53_spill] sm:$0xff] %v4966_v28 }
 0x331   :  { %9187 = vst [vmem:[#allocation49_spill] sm:$0xff] %v4944_v56  ;;  %1655 = vmatprep.subr.bf16.mxu1 %v8317_v43  ;;  %9190 = vst [vmem:[#allocation52_spill] sm:$0xff] %v4964_v6  ;;  %v8318_v19 = vunpack.c.l.s8.bf16 %v4964_v6  ;;  %v4996_v56 = vld [vmem:[#allocation10 + $0x2c0] sm:$0xff] }
 0x332   :  { %9194 = vst [vmem:[#allocation56_spill] sm:$0xff] %v4996_v56 }
 0x333   :  { %1574 = vmatpush1.bf16.msra.mxu0 %v8312_v60  ;;  %1656 = vmatpush1.bf16.msra.mxu1 %v8311_v52  ;;  %v8321_v52 = vunpack.c.h.s8.bf16 %v4950_v55  ;;  %v4980_v60 = vld [vmem:[#allocation10 + $0x2c8] sm:$0xff] }
 0x334   :  { %1575 = vmatprep.subr.bf16.mxu0 %v8309_v46  ;;  %1657 = vmatprep.subr.bf16.mxu1 %v8310_v0  ;;  %v8319_v46 = vunpack.c.l.s8.bf16 %v4966_v28  ;;  %v8320_v0 = vunpack.c.h.s8.bf16 %v4948_v17  ;;  %9192 = vst [vmem:[#allocation54_spill] sm:$0xff] %v4980_v60  ;;  %v5012_v55 = vld [vmem:[#allocation10 + $0x308] sm:$0xff] }
 0x335   :  { %9196 = vst [vmem:[#allocation58_spill] sm:$0xff] %v5012_v55 }
 0x337   :  { %1576 = vmatpush1.bf16.msra.mxu0 %v8313_v59  ;;  %1658 = vmatpush1.bf16.msra.mxu1 %v8314_v61  ;;  %v4982_v59 = vld [vmem:[#allocation10 + $0x2d8] sm:$0xff]  ;;  %v8326_v61 = vunpack.c.h.s8.bf16 %v4964_v6  ;;  %v5028_v6 = vld [vmem:[#allocation10 + $0x300] sm:$0xff] }
 0x338   :  { %1577 = vmatprep.subr.bf16.mxu0 %v8315_v1  ;;  %1659 = vmatprep.subr.bf16.mxu1 %v8316_v49  ;;  %9193 = vst [vmem:[#allocation55_spill] sm:$0xff] %v4982_v59  ;;  %v8327_v1 = vunpack.c.h.s8.bf16 %v4966_v28  ;;  %v8328_v49 = vunpack.c.l.s8.bf16 %v4980_v60  ;;  %v8329_v43 = vunpack.c.l.s8.bf16 %v4982_v59  ;;  %v8337_v31 = vunpack.c.h.s8.bf16 %v4982_v59  ;;  %9198 = vst [vmem:[#allocation60_spill] sm:$0xff] %v5028_v6 }
 0x33b   :  { %1578 = vmatpush1.bf16.msra.mxu0 %v8318_v19  ;;  %1660 = vmatpush1.bf16.msra.mxu1 %v8319_v46  ;;  %v4998_v19 = vld [vmem:[#allocation10 + $0x2d0] sm:$0xff]  ;;  %v8334_v46 = vunpack.c.l.s8.bf16 %v4996_v56 }
 0x33c   :  { %1579 = vmatprep.subr.bf16.mxu0 %v8320_v0  ;;  %1661 = vmatprep.subr.bf16.mxu1 %v8321_v52  ;;  %9195 = vst [vmem:[#allocation57_spill] sm:$0xff] %v4998_v19  ;;  %v8335_v0 = vunpack.c.l.s8.bf16 %v4998_v19  ;;  %v8336_v52 = vunpack.c.h.s8.bf16 %v4980_v60  ;;  %v5044_v60 = vld [vmem:[#allocation10 + $0x348] sm:$0xff] }
 0x33d   :  { %9200 = vst [vmem:[#allocation62_spill] sm:$0xff] %v5044_v60 }
 0x33f   :  { %1580 = vmatpush1.bf16.msra.mxu0 %v8326_v61  ;;  %1662 = vmatpush1.bf16.msra.mxu1 %v8327_v1  ;;  %v5014_v61 = vld [vmem:[#allocation10 + $0x318] sm:$0xff]  ;;  %v8342_v1 = vunpack.c.h.s8.bf16 %v4996_v56  ;;  %v5060_v56 = vld [vmem:[#allocation10 + $0x340] sm:$0xff] }
 0x340   :  { %1581 = vmatprep.subr.bf16.mxu0 %v8328_v49  ;;  %1663 = vmatprep.subr.bf16.mxu1 %v8329_v43  ;;  %9197 = vst [vmem:[#allocation59_spill] sm:$0xff] %v5014_v61  ;;  %v8343_v49 = vunpack.c.h.s8.bf16 %v4998_v19  ;;  %v8344_v43 = vunpack.c.l.s8.bf16 %v5012_v55  ;;  %v8345_v28 = vunpack.c.l.s8.bf16 %v5014_v61  ;;  %v8353_v59 = vunpack.c.h.s8.bf16 %v5014_v61  ;;  %9202 = vst [vmem:[#allocation64_spill] sm:$0xff] %v5060_v56 }
 0x343   :  { %1582 = vmatpush1.bf16.msra.mxu0 %v8334_v46  ;;  %1664 = vmatpush1.bf16.msra.mxu1 %v8335_v0  ;;  %v5030_v46 = vld [vmem:[#allocation10 + $0x310] sm:$0xff]  ;;  %v8350_v0 = vunpack.c.l.s8.bf16 %v5028_v6 }
 0x344   :  { %1583 = vmatprep.subr.bf16.mxu0 %v8336_v52  ;;  %1665 = vmatprep.subr.bf16.mxu1 %v8337_v31  ;;  %9199 = vst [vmem:[#allocation61_spill] sm:$0xff] %v5030_v46  ;;  %v8351_v52 = vunpack.c.l.s8.bf16 %v5030_v46  ;;  %v8352_v31 = vunpack.c.h.s8.bf16 %v5012_v55  ;;  %v5076_v55 = vld [vmem:[#allocation10 + $0x388] sm:$0xff] }
 0x345   :  { %9204 = vst [vmem:[#allocation66_spill] sm:$0xff] %v5076_v55 }
 0x347   :  { %1584 = vmatpush1.bf16.msra.mxu0 %v8342_v1  ;;  %1666 = vmatpush1.bf16.msra.mxu1 %v8343_v49  ;;  %v5046_v1 = vld [vmem:[#allocation10 + $0x358] sm:$0xff]  ;;  %v8358_v49 = vunpack.c.h.s8.bf16 %v5028_v6  ;;  %v5092_v6 = vld [vmem:[#allocation10 + $0x380] sm:$0xff] }
 0x348   :  { %1585 = vmatprep.subr.bf16.mxu0 %v8344_v43  ;;  %1667 = vmatprep.subr.bf16.mxu1 %v8345_v28  ;;  %9201 = vst [vmem:[#allocation63_spill] sm:$0xff] %v5046_v1  ;;  %v8359_v43 = vunpack.c.h.s8.bf16 %v5030_v46  ;;  %v8360_v28 = vunpack.c.l.s8.bf16 %v5044_v60  ;;  %v8361_v19 = vunpack.c.l.s8.bf16 %v5046_v1  ;;  %v8369_v61 = vunpack.c.h.s8.bf16 %v5046_v1  ;;  %9206 = vst [vmem:[#allocation68_spill] sm:$0xff] %v5092_v6 }
 0x34b   :  { %1586 = vmatpush1.bf16.msra.mxu0 %v8350_v0  ;;  %1668 = vmatpush1.bf16.msra.mxu1 %v8351_v52  ;;  %v5062_v0 = vld [vmem:[#allocation10 + $0x350] sm:$0xff]  ;;  %v8366_v52 = vunpack.c.l.s8.bf16 %v5060_v56 }
 0x34c   :  { %1587 = vmatprep.subr.bf16.mxu0 %v8352_v31  ;;  %1669 = vmatprep.subr.bf16.mxu1 %v8353_v59  ;;  %9203 = vst [vmem:[#allocation65_spill] sm:$0xff] %v5062_v0  ;;  %v8367_v31 = vunpack.c.l.s8.bf16 %v5062_v0  ;;  %v8368_v59 = vunpack.c.h.s8.bf16 %v5044_v60  ;;  %v5108_v60 = vld [vmem:[#allocation10 + $0x3c8] sm:$0xff] }
 0x34d   :  { %9208 = vst [vmem:[#allocation70_spill] sm:$0xff] %v5108_v60 }
 0x34f   :  { %1588 = vmatpush1.bf16.msra.mxu0 %v8358_v49  ;;  %1670 = vmatpush1.bf16.msra.mxu1 %v8359_v43  ;;  %v5078_v49 = vld [vmem:[#allocation10 + $0x398] sm:$0xff]  ;;  %v8374_v43 = vunpack.c.h.s8.bf16 %v5060_v56  ;;  %v5124_v56 = vld [vmem:[#allocation10 + $0x3c0] sm:$0xff] }
 0x350   :  { %1589 = vmatprep.subr.bf16.mxu0 %v8360_v28  ;;  %1671 = vmatprep.subr.bf16.mxu1 %v8361_v19  ;;  %9205 = vst [vmem:[#allocation67_spill] sm:$0xff] %v5078_v49  ;;  %v8375_v28 = vunpack.c.h.s8.bf16 %v5062_v0  ;;  %v8376_v19 = vunpack.c.l.s8.bf16 %v5076_v55  ;;  %v8377_v46 = vunpack.c.l.s8.bf16 %v5078_v49  ;;  %v8385_v1 = vunpack.c.h.s8.bf16 %v5078_v49  ;;  %9210 = vst [vmem:[#allocation72_spill] sm:$0xff] %v5124_v56 }
 0x353   :  { %1590 = vmatpush1.bf16.msra.mxu0 %v8366_v52  ;;  %1672 = vmatpush1.bf16.msra.mxu1 %v8367_v31  ;;  %v5094_v52 = vld [vmem:[#allocation10 + $0x390] sm:$0xff]  ;;  %v8382_v31 = vunpack.c.l.s8.bf16 %v5092_v6 }
 0x354   :  { %1591 = vmatprep.subr.bf16.mxu0 %v8368_v59  ;;  %1673 = vmatprep.subr.bf16.mxu1 %v8369_v61  ;;  %9207 = vst [vmem:[#allocation69_spill] sm:$0xff] %v5094_v52  ;;  %v8383_v59 = vunpack.c.l.s8.bf16 %v5094_v52  ;;  %v8384_v61 = vunpack.c.h.s8.bf16 %v5076_v55  ;;  %v5140_v55 = vld [vmem:[#allocation10 + $0x28] sm:$0xff] }
 0x355   :  { %9212 = vst [vmem:[#allocation74_spill] sm:$0xff] %v5140_v55 }
 0x357   :  { %1592 = vmatpush1.bf16.msra.mxu0 %v8374_v43  ;;  %1674 = vmatpush1.bf16.msra.mxu1 %v8375_v28  ;;  %v5110_v43 = vld [vmem:[#allocation10 + $0x3d8] sm:$0xff]  ;;  %v8390_v28 = vunpack.c.h.s8.bf16 %v5092_v6  ;;  %v5156_v6 = vld [vmem:[#allocation10 + $0x20] sm:$0xff] }
 0x358   :  { %1593 = vmatprep.subr.bf16.mxu0 %v8376_v19  ;;  %1675 = vmatprep.subr.bf16.mxu1 %v8377_v46  ;;  %9209 = vst [vmem:[#allocation71_spill] sm:$0xff] %v5110_v43  ;;  %v8391_v19 = vunpack.c.h.s8.bf16 %v5094_v52  ;;  %v8392_v46 = vunpack.c.l.s8.bf16 %v5108_v60  ;;  %v8393_v0 = vunpack.c.l.s8.bf16 %v5110_v43  ;;  %v8401_v49 = vunpack.c.h.s8.bf16 %v5110_v43  ;;  %9214 = vst [vmem:[#allocation76_spill] sm:$0xff] %v5156_v6 }
 0x35b   :  { %1594 = vmatpush1.bf16.msra.mxu0 %v8382_v31  ;;  %1676 = vmatpush1.bf16.msra.mxu1 %v8383_v59  ;;  %v5126_v31 = vld [vmem:[#allocation10 + $0x3d0] sm:$0xff]  ;;  %v8398_v59 = vunpack.c.l.s8.bf16 %v5124_v56 }
 0x35c   :  { %1595 = vmatprep.subr.bf16.mxu0 %v8384_v61  ;;  %1677 = vmatprep.subr.bf16.mxu1 %v8385_v1  ;;  %9211 = vst [vmem:[#allocation73_spill] sm:$0xff] %v5126_v31  ;;  %v8399_v61 = vunpack.c.l.s8.bf16 %v5126_v31  ;;  %v8400_v1 = vunpack.c.h.s8.bf16 %v5108_v60 }
 0x35f   :  { %1596 = vmatpush1.bf16.msra.mxu0 %v8390_v28  ;;  %1678 = vmatpush1.bf16.msra.mxu1 %v8391_v19  ;;  %v5142_v28 = vld [vmem:[#allocation10 + $0x38] sm:$0xff]  ;;  %v8404_v19 = vunpack.c.h.s8.bf16 %v5124_v56  ;;  %v5191_v56 = vld [vmem:[#allocation10 + $0x60] sm:$0xff] }
 0x360   :  { %1597 = vmatprep.subr.bf16.mxu0 %v8392_v46  ;;  %1679 = vmatprep.subr.bf16.mxu1 %v8393_v0  ;;  %9213 = vst [vmem:[#allocation75_spill] sm:$0xff] %v5142_v28  ;;  %v8407_v46 = vunpack.c.h.s8.bf16 %v5126_v31  ;;  %v8409_v0 = vunpack.c.l.s8.bf16 %v5140_v55  ;;  %v8408_v52 = vunpack.c.l.s8.bf16 %v5142_v28  ;;  %v5176_v31 = vld [vmem:[#allocation10 + $0x68] sm:$0xff]  ;;  %9219 = vst [vmem:[#allocation81_spill] sm:$0xff] %v5191_v56  ;;  %v8429_v60 = vunpack.c.l.s8.bf16 %v5191_v56 }
 0x361   :  { %9217 = vst [vmem:[#allocation79_spill] sm:$0xff] %v5176_v31 }
 0x363   :  { %1598 = vmatpush1.bf16.msra.mxu0 %v8398_v59  ;;  %1680 = vmatpush1.bf16.msra.mxu1 %v8399_v61  ;;  %v5158_v59 = vld [vmem:[#allocation10 + $0x30] sm:$0xff]  ;;  %v8412_v61 = vunpack.c.l.s8.bf16 %v5156_v6 }
 0x364   :  { %1599 = vmatprep.subr.bf16.mxu0 %v8400_v1  ;;  %1681 = vmatprep.subr.bf16.mxu1 %v8401_v49  ;;  %9215 = vst [vmem:[#allocation77_spill] sm:$0xff] %v5158_v59  ;;  %v5167_v1 = vpack.c.bf16 %v4868_v47, %v4868_v47  ;;  %v8415_v49 = vunpack.c.l.s8.bf16 %v5158_v59  ;;  %v9220_v47 = vunpack.c.h.s8.bf16 %v5140_v55  ;;  %v5212_v55 = vld [vmem:[#allocation10 + $0xa8] sm:$0xff] }
 0x365   :  { %9224 = vst [vmem:[#allocation83_spill] sm:$0xff] %v5212_v55 }
 0x366   :  { %9216 = vst [vmem:[#allocation78_spill] sm:$0xff] %v5167_v1 }
 0x367   :  { %1600 = vmatpush1.bf16.msra.mxu0 %v8404_v19  ;;  %1682 = vmatpush1.bf16.msra.mxu1 %v8407_v46  ;;  %v5180_v46 = vld [vmem:[#allocation10 + $0x78] sm:$0xff]  ;;  %v8423_v19 = vunpack.c.l.s8.bf16 %v5176_v31 }
 0x368   :  { %1692 = vmatprep.subr.bf16.mxu0 %v8409_v0  ;;  %1774 = vmatprep.subr.bf16.mxu1 %v8408_v52  ;;  %9218 = vst [vmem:[#allocation80_spill] sm:$0xff] %v5180_v46  ;;  %v8422_v0 = vunpack.c.h.s8.bf16 %v5158_v59  ;;  %v8424_v43 = vunpack.c.l.s8.bf16 %v5180_v46  ;;  %v5198_v52 = vld [vmem:[#allocation10 + $0x70] sm:$0xff]  ;;  %v9227_v59 = vunpack.c.h.s8.bf16 %v5180_v46  ;;  %v8446_v46 = vunpack.c.h.s8.bf16 %v5212_v55 }
 0x369   :  { %9222 = vst [vmem:[#allocation82_spill] sm:$0xff] %v5198_v52 }
 0x36a   :  { %1602 = vmatmul.mubr.bf16.vlgmr.msra.gmra.mrb[8].mxu0 %v5167_v1  ;;  %1684 = vmatmul.mubr.bf16.vlgmr.msra.gmra.mrb[8].mxu1 %v5167_v1 }
 0x36b   :  { %1693 = vmatpush1.bf16.msra.mxu0 %v8412_v61  ;;  %1724 = vmatprep.mubr.bf16.mxu0 %v4881_v53  ;;  %v9221_v61 = vunpack.c.h.s8.bf16 %v5142_v28  ;;  %v8431_v28 = vunpack.c.h.s8.bf16 %v5176_v31  ;;  %v5244_v31 = vld [vmem:[#allocation10 + $0xe8] sm:$0xff] }
 0x36c   :  { %1775 = vmatpush1.bf16.msra.mxu1 %v8415_v49  ;;  %1806 = vmatprep.mubr.bf16.mxu1 %v4881_v53  ;;  %v9223_v49 = vunpack.c.h.s8.bf16 %v5156_v6  ;;  %9229 = vst [vmem:[#allocation87_spill] sm:$0xff] %v5244_v31 }
 0x36d   :  { %1694 = vmatprep.subr.bf16.mxu0 %v9220_v47  ;;  %1776 = vmatprep.subr.bf16.mxu1 %v9221_v61  ;;  %v8430_v47 = vunpack.c.l.s8.bf16 %v5198_v52  ;;  %v5225_v61 = vld [vmem:[#allocation10 + $0xa0] sm:$0xff] }
 0x36e   :  { %9226 = vst [vmem:[#allocation85_spill] sm:$0xff] %v5225_v61 }
 0x36f   :  { %1695 = vmatpush1.bf16.msra.mxu0 %v9223_v49  ;;  %v5214_v49 = vld [vmem:[#allocation10 + $0xb8] sm:$0xff] }
 0x370   :  { %1777 = vmatpush1.bf16.msra.mxu1 %v8422_v0  ;;  %1696 = vmatprep.subr.bf16.mxu0 %v8423_v19  ;;  %9225 = vst [vmem:[#allocation84_spill] sm:$0xff] %v5214_v49  ;;  %v8436_v0 = vunpack.c.h.s8.bf16 %v5191_v56  ;;  %v8437_v19 = vunpack.c.h.s8.bf16 %v5198_v52  ;;  %v8439_v6 = vunpack.c.l.s8.bf16 %v5214_v49  ;;  %v9232_v52 = vunpack.c.h.s8.bf16 %v5214_v49 }
 0x371   :  { %1778 = vmatprep.subr.bf16.mxu1 %v8424_v43  ;;  %v8438_v43 = vunpack.c.l.s8.bf16 %v5212_v55  ;;  %v8461_v49 = vunpack.c.h.s8.bf16 %v5244_v31  ;;  %v5276_v55 = vld [vmem:[#allocation10 + $0x128] sm:$0xff] }
 0x372   :  { %9234 = vst [vmem:[#allocation91_spill] sm:$0xff] %v5276_v55 }
 0x373   :  { %1697 = vmatpush1.bf16.msra.mxu0 %v8429_v60  ;;  %v5230_v60 = vld [vmem:[#allocation10 + $0xb0] sm:$0xff] }
 0x374   :  { %1779 = vmatpush1.bf16.msra.mxu1 %v8430_v47  ;;  %1698 = vmatprep.subr.bf16.mxu0 %v8431_v28  ;;  %9228 = vst [vmem:[#allocation86_spill] sm:$0xff] %v5230_v60  ;;  %v8444_v47 = vunpack.c.l.s8.bf16 %v5225_v61  ;;  %v8445_v28 = vunpack.c.l.s8.bf16 %v5230_v60 }
 0x375   :  { %1780 = vmatprep.subr.bf16.mxu1 %v9227_v59  ;;  %v5257_v59 = vld [vmem:[#allocation10 + $0xe0] sm:$0xff] }
 0x376   :  { %9231 = vst [vmem:[#allocation89_spill] sm:$0xff] %v5257_v59 }
 0x377   :  { %1699 = vmatpush1.bf16.msra.mxu0 %v8436_v0  ;;  %v5246_v0 = vld [vmem:[#allocation10 + $0xf8] sm:$0xff] }
 0x378   :  { %1781 = vmatpush1.bf16.msra.mxu1 %v8437_v19  ;;  %1700 = vmatprep.subr.bf16.mxu0 %v8438_v43  ;;  %9230 = vst [vmem:[#allocation88_spill] sm:$0xff] %v5246_v0  ;;  %v8451_v19 = vunpack.c.h.s8.bf16 %v5225_v61  ;;  %v8452_v43 = vunpack.c.h.s8.bf16 %v5230_v60  ;;  %v8454_v56 = vunpack.c.l.s8.bf16 %v5246_v0  ;;  %v9237_v60 = vunpack.c.h.s8.bf16 %v5246_v0 }
 0x379   :  { %1782 = vmatprep.subr.bf16.mxu1 %v8439_v6  ;;  %v8453_v6 = vunpack.c.l.s8.bf16 %v5244_v31  ;;  %v8476_v0 = vunpack.c.h.s8.bf16 %v5276_v55  ;;  %v5308_v31 = vld [vmem:[#allocation10 + $0x168] sm:$0xff] }
 0x37a   :  { %9239 = vst [vmem:[#allocation95_spill] sm:$0xff] %v5308_v31 }
 0x37b   :  { %1701 = vmatpush1.bf16.msra.mxu0 %v8444_v47  ;;  %v5262_v47 = vld [vmem:[#allocation10 + $0xf0] sm:$0xff] }
 0x37c   :  { %1783 = vmatpush1.bf16.msra.mxu1 %v8445_v28  ;;  %1702 = vmatprep.subr.bf16.mxu0 %v8446_v46  ;;  %9233 = vst [vmem:[#allocation90_spill] sm:$0xff] %v5262_v47  ;;  %v8459_v28 = vunpack.c.l.s8.bf16 %v5257_v59  ;;  %v8460_v46 = vunpack.c.l.s8.bf16 %v5262_v47 }
 0x37d   :  { %1784 = vmatprep.subr.bf16.mxu1 %v9232_v52  ;;  %v5289_v52 = vld [vmem:[#allocation10 + $0x120] sm:$0xff] }
 0x37e   :  { %9236 = vst [vmem:[#allocation93_spill] sm:$0xff] %v5289_v52 }
 0x37f   :  { %1703 = vmatpush1.bf16.msra.mxu0 %v8451_v19  ;;  %v5278_v19 = vld [vmem:[#allocation10 + $0x138] sm:$0xff] }
 0x380   :  { %1785 = vmatpush1.bf16.msra.mxu1 %v8452_v43  ;;  %1704 = vmatprep.subr.bf16.mxu0 %v8453_v6  ;;  %9235 = vst [vmem:[#allocation92_spill] sm:$0xff] %v5278_v19  ;;  %v8466_v43 = vunpack.c.h.s8.bf16 %v5257_v59  ;;  %v8467_v6 = vunpack.c.h.s8.bf16 %v5262_v47  ;;  %v8469_v61 = vunpack.c.l.s8.bf16 %v5278_v19  ;;  %v9242_v47 = vunpack.c.h.s8.bf16 %v5278_v19 }
 0x381   :  { %1786 = vmatprep.subr.bf16.mxu1 %v8454_v56  ;;  %v8468_v56 = vunpack.c.l.s8.bf16 %v5276_v55  ;;  %v8491_v19 = vunpack.c.h.s8.bf16 %v5308_v31  ;;  %v5340_v55 = vld [vmem:[#allocation10 + $0x1a8] sm:$0xff] }
 0x382   :  { %9244 = vst [vmem:[#allocation99_spill] sm:$0xff] %v5340_v55 }
 0x383   :  { %1705 = vmatpush1.bf16.msra.mxu0 %v8459_v28  ;;  %v5294_v28 = vld [vmem:[#allocation10 + $0x130] sm:$0xff] }
 0x384   :  { %1787 = vmatpush1.bf16.msra.mxu1 %v8460_v46  ;;  %1706 = vmatprep.subr.bf16.mxu0 %v8461_v49  ;;  %9238 = vst [vmem:[#allocation94_spill] sm:$0xff] %v5294_v28  ;;  %v8474_v46 = vunpack.c.l.s8.bf16 %v5289_v52  ;;  %v8475_v49 = vunpack.c.l.s8.bf16 %v5294_v28 }
 0x385   :  { %1788 = vmatprep.subr.bf16.mxu1 %v9237_v60  ;;  %v5321_v60 = vld [vmem:[#allocation10 + $0x160] sm:$0xff] }
 0x386   :  { %9241 = vst [vmem:[#allocation97_spill] sm:$0xff] %v5321_v60 }
 0x387   :  { %1707 = vmatpush1.bf16.msra.mxu0 %v8466_v43  ;;  %v5310_v43 = vld [vmem:[#allocation10 + $0x178] sm:$0xff] }
 0x388   :  { %1789 = vmatpush1.bf16.msra.mxu1 %v8467_v6  ;;  %1708 = vmatprep.subr.bf16.mxu0 %v8468_v56  ;;  %9240 = vst [vmem:[#allocation96_spill] sm:$0xff] %v5310_v43  ;;  %v8481_v6 = vunpack.c.h.s8.bf16 %v5289_v52  ;;  %v8482_v56 = vunpack.c.h.s8.bf16 %v5294_v28  ;;  %v8484_v59 = vunpack.c.l.s8.bf16 %v5310_v43  ;;  %v9247_v28 = vunpack.c.h.s8.bf16 %v5310_v43 }
 0x389   :  { %1790 = vmatprep.subr.bf16.mxu1 %v8469_v61  ;;  %v8483_v61 = vunpack.c.l.s8.bf16 %v5308_v31  ;;  %v8506_v43 = vunpack.c.h.s8.bf16 %v5340_v55  ;;  %v5372_v31 = vld [vmem:[#allocation10 + $0x1e8] sm:$0xff] }
 0x38a   :  { %9249 = vst [vmem:[#allocation103_spill] sm:$0xff] %v5372_v31 }
 0x38b   :  { %1709 = vmatpush1.bf16.msra.mxu0 %v8474_v46  ;;  %v5326_v46 = vld [vmem:[#allocation10 + $0x170] sm:$0xff] }
 0x38c   :  { %1791 = vmatpush1.bf16.msra.mxu1 %v8475_v49  ;;  %1710 = vmatprep.subr.bf16.mxu0 %v8476_v0  ;;  %9243 = vst [vmem:[#allocation98_spill] sm:$0xff] %v5326_v46  ;;  %v8489_v49 = vunpack.c.l.s8.bf16 %v5321_v60  ;;  %v8490_v0 = vunpack.c.l.s8.bf16 %v5326_v46 }
 0x38d   :  { %1792 = vmatprep.subr.bf16.mxu1 %v9242_v47  ;;  %v5353_v47 = vld [vmem:[#allocation10 + $0x1a0] sm:$0xff] }
 0x38e   :  { %9246 = vst [vmem:[#allocation101_spill] sm:$0xff] %v5353_v47 }
 0x38f   :  { %1711 = vmatpush1.bf16.msra.mxu0 %v8481_v6  ;;  %v5342_v6 = vld [vmem:[#allocation10 + $0x1b8] sm:$0xff] }
 0x390   :  { %1793 = vmatpush1.bf16.msra.mxu1 %v8482_v56  ;;  %1712 = vmatprep.subr.bf16.mxu0 %v8483_v61  ;;  %9245 = vst [vmem:[#allocation100_spill] sm:$0xff] %v5342_v6  ;;  %v8496_v56 = vunpack.c.h.s8.bf16 %v5321_v60  ;;  %v8497_v61 = vunpack.c.h.s8.bf16 %v5326_v46  ;;  %v8499_v52 = vunpack.c.l.s8.bf16 %v5342_v6  ;;  %v9252_v46 = vunpack.c.h.s8.bf16 %v5342_v6 }
 0x391   :  { %1794 = vmatprep.subr.bf16.mxu1 %v8484_v59  ;;  %v8498_v59 = vunpack.c.l.s8.bf16 %v5340_v55  ;;  %v8521_v6 = vunpack.c.h.s8.bf16 %v5372_v31  ;;  %v5404_v55 = vld [vmem:[#allocation10 + $0x228] sm:$0xff] }
 0x392   :  { %9254 = vst [vmem:[#allocation107_spill] sm:$0xff] %v5404_v55 }
 0x393   :  { %1713 = vmatpush1.bf16.msra.mxu0 %v8489_v49  ;;  %v5358_v49 = vld [vmem:[#allocation10 + $0x1b0] sm:$0xff] }
 0x394   :  { %1795 = vmatpush1.bf16.msra.mxu1 %v8490_v0  ;;  %1714 = vmatprep.subr.bf16.mxu0 %v8491_v19  ;;  %9248 = vst [vmem:[#allocation102_spill] sm:$0xff] %v5358_v49  ;;  %v8504_v0 = vunpack.c.l.s8.bf16 %v5353_v47  ;;  %v8505_v19 = vunpack.c.l.s8.bf16 %v5358_v49 }
 0x395   :  { %1796 = vmatprep.subr.bf16.mxu1 %v9247_v28  ;;  %v5385_v28 = vld [vmem:[#allocation10 + $0x1e0] sm:$0xff] }
 0x396   :  { %9251 = vst [vmem:[#allocation105_spill] sm:$0xff] %v5385_v28 }
 0x397   :  { %1715 = vmatpush1.bf16.msra.mxu0 %v8496_v56  ;;  %v5374_v56 = vld [vmem:[#allocation10 + $0x1f8] sm:$0xff] }
 0x398   :  { %1797 = vmatpush1.bf16.msra.mxu1 %v8497_v61  ;;  %1716 = vmatprep.subr.bf16.mxu0 %v8498_v59  ;;  %9250 = vst [vmem:[#allocation104_spill] sm:$0xff] %v5374_v56  ;;  %v8511_v61 = vunpack.c.h.s8.bf16 %v5353_v47  ;;  %v8512_v59 = vunpack.c.h.s8.bf16 %v5358_v49  ;;  %v8514_v60 = vunpack.c.l.s8.bf16 %v5374_v56  ;;  %v9257_v49 = vunpack.c.h.s8.bf16 %v5374_v56  ;;  %v5435_v56 = vld [vmem:[#allocation10 + $0x268] sm:$0xff] }
 0x399   :  { %1798 = vmatprep.subr.bf16.mxu1 %v8499_v52  ;;  %v8513_v52 = vunpack.c.l.s8.bf16 %v5372_v31  ;;  %9259 = vst [vmem:[#allocation111_spill] sm:$0xff] %v5435_v56  ;;  %v9268_v31 = vunpack.c.l.s8.bf16 %v5435_v56 }
 0x39b   :  { %1717 = vmatpush1.bf16.msra.mxu0 %v8504_v0  ;;  %v5390_v0 = vld [vmem:[#allocation10 + $0x1f0] sm:$0xff] }
 0x39c   :  { %1799 = vmatpush1.bf16.msra.mxu1 %v8505_v19  ;;  %1718 = vmatprep.subr.bf16.mxu0 %v8506_v43  ;;  %9253 = vst [vmem:[#allocation106_spill] sm:$0xff] %v5390_v0  ;;  %v8519_v19 = vunpack.c.l.s8.bf16 %v5385_v28  ;;  %v8520_v43 = vunpack.c.l.s8.bf16 %v5390_v0 }
 0x39d   :  { %1800 = vmatprep.subr.bf16.mxu1 %v9252_v46  ;;  %v5417_v46 = vld [vmem:[#allocation10 + $0x220] sm:$0xff] }
 0x39e   :  { %9256 = vst [vmem:[#allocation109_spill] sm:$0xff] %v5417_v46 }
 0x39f   :  { %1719 = vmatpush1.bf16.msra.mxu0 %v8511_v61  ;;  %v5406_v61 = vld [vmem:[#allocation10 + $0x238] sm:$0xff] }
 0x3a0   :  { %1801 = vmatpush1.bf16.msra.mxu1 %v8512_v59  ;;  %1720 = vmatprep.subr.bf16.mxu0 %v8513_v52  ;;  %9255 = vst [vmem:[#allocation108_spill] sm:$0xff] %v5406_v61  ;;  %v8524_v59 = vunpack.c.h.s8.bf16 %v5385_v28  ;;  %v8525_v52 = vunpack.c.h.s8.bf16 %v5390_v0  ;;  %v8527_v47 = vunpack.c.l.s8.bf16 %v5406_v61  ;;  %v5450_v0 = vld [vmem:[#allocation10 + $0x260] sm:$0xff]  ;;  %v5456_v28 = vld [vmem:[#allocation10 + $0x270] sm:$0xff] }
 0x3a1   :  { %1802 = vmatprep.subr.bf16.mxu1 %v8514_v60  ;;  %v8526_v60 = vunpack.c.l.s8.bf16 %v5404_v55  ;;  %9262 = vst [vmem:[#allocation113_spill] sm:$0xff] %v5450_v0  ;;  %9264 = vst [vmem:[#allocation114_spill] sm:$0xff] %v5456_v28 }
 0x3a3   :  { %1721 = vmatpush1.bf16.msra.mxu0 %v8519_v19  ;;  %v5422_v19 = vld [vmem:[#allocation10 + $0x230] sm:$0xff] }
 0x3a4   :  { %1803 = vmatpush1.bf16.msra.mxu1 %v8520_v43  ;;  %1722 = vmatprep.subr.bf16.mxu0 %v8521_v6  ;;  %9258 = vst [vmem:[#allocation110_spill] sm:$0xff] %v5422_v19  ;;  %v8532_v6 = vunpack.c.l.s8.bf16 %v5422_v19  ;;  %v5439_v43 = vld [vmem:[#allocation10 + $0x278] sm:$0xff] }
 0x3a5   :  { %1804 = vmatprep.subr.bf16.mxu1 %v9257_v49  ;;  %9260 = vst [vmem:[#allocation112_spill] sm:$0xff] %v5439_v43  ;;  %v9267_v49 = vunpack.c.h.s8.bf16 %v5422_v19  ;;  %v9273_v19 = vunpack.c.h.s8.bf16 %v5439_v43 }
 0x3a7   :  { %1723 = vmatpush1.bf16.msra.mxu0 %v8524_v59  ;;  %v9263_v59 = vunpack.c.h.s8.bf16 %v5404_v55  ;;  %v9269_v55 = vunpack.c.l.s8.bf16 %v5439_v43 }
 0x3a8   :  { %1805 = vmatpush1.bf16.msra.mxu1 %v8525_v52  ;;  %1733 = vmatprep.subr.bf16.mxu0 %v8526_v60  ;;  %v9261_v52 = vunpack.c.l.s8.bf16 %v5417_v46  ;;  %v9265_v60 = vunpack.c.h.s8.bf16 %v5406_v61  ;;  %v5472_v61 = vld [vmem:[#allocation10 + $0x2a8] sm:$0xff] }
 0x3a9   :  { %1815 = vmatprep.subr.bf16.mxu1 %v8527_v47  ;;  %v8543_v47 = vunpack.c.l.s8.bf16 %v5450_v0  ;;  %9270 = vst [vmem:[#allocation115_spill] sm:$0xff] %v5472_v61  ;;  %v8560_v43 = vunpack.c.h.s8.bf16 %v5472_v61 }
 0x3aa   :  { %1725 = vmatmul.mubr.bf16.vlgmr.msra.gmra.mrb[12].mxu0 %v4890_v36 }
 0x3ab   :  { %1807 = vmatmul.mubr.bf16.vlgmr.msra.gmra.mrb[12].mxu1 %v4890_v36  ;;  %1734 = vmatpush1.bf16.msra.mxu0 %v9261_v52  ;;  %v8545_v52 = vunpack.c.h.s8.bf16 %v5435_v56  ;;  %v5504_v56 = vld [vmem:[#allocation10 + $0x2e8] sm:$0xff] }
 0x3ac   :  { %1765 = vmatprep.mubr.bf16.mxu0 %v4904_v41  ;;  %1816 = vmatpush1.bf16.msra.mxu1 %v8532_v6  ;;  %v9266_v6 = vunpack.c.h.s8.bf16 %v5417_v46  ;;  %9275 = vst [vmem:[#allocation119_spill] sm:$0xff] %v5504_v56 }
 0x3ad   :  { %1847 = vmatprep.mubr.bf16.mxu1 %v4904_v41  ;;  %1735 = vmatprep.subr.bf16.mxu0 %v9263_v59  ;;  %v8544_v59 = vunpack.c.l.s8.bf16 %v5456_v28 }
 0x3ae   :  { %1817 = vmatprep.subr.bf16.mxu1 %v9265_v60  ;;  %v5485_v60 = vld [vmem:[#allocation10 + $0x2a0] sm:$0xff] }
 0x3af   :  { %1736 = vmatpush1.bf16.msra.mxu0 %v9266_v6  ;;  %v5474_v6 = vld [vmem:[#allocation10 + $0x2b8] sm:$0xff]  ;;  %9272 = vst [vmem:[#allocation117_spill] sm:$0xff] %v5485_v60 }
 0x3b0   :  { %1818 = vmatpush1.bf16.msra.mxu1 %v9267_v49  ;;  %1737 = vmatprep.subr.bf16.mxu0 %v9268_v31  ;;  %9271 = vst [vmem:[#allocation116_spill] sm:$0xff] %v5474_v6  ;;  %v8550_v49 = vunpack.c.h.s8.bf16 %v5450_v0  ;;  %v8551_v31 = vunpack.c.h.s8.bf16 %v5456_v28  ;;  %v8553_v46 = vunpack.c.l.s8.bf16 %v5474_v6  ;;  %v9278_v28 = vunpack.c.h.s8.bf16 %v5474_v6 }
 0x3b1   :  { %1819 = vmatprep.subr.bf16.mxu1 %v9269_v55  ;;  %v8552_v55 = vunpack.c.l.s8.bf16 %v5472_v61  ;;  %v8575_v6 = vunpack.c.h.s8.bf16 %v5504_v56  ;;  %v5536_v61 = vld [vmem:[#allocation10 + $0x328] sm:$0xff] }
 0x3b2   :  { %9280 = vst [vmem:[#allocation123_spill] sm:$0xff] %v5536_v61 }
 0x3b3   :  { %1738 = vmatpush1.bf16.msra.mxu0 %v8543_v47  ;;  %v5490_v47 = vld [vmem:[#allocation10 + $0x2b0] sm:$0xff] }
 0x3b4   :  { %1820 = vmatpush1.bf16.msra.mxu1 %v8544_v59  ;;  %1739 = vmatprep.subr.bf16.mxu0 %v8545_v52  ;;  %9274 = vst [vmem:[#allocation118_spill] sm:$0xff] %v5490_v47  ;;  %v8558_v59 = vunpack.c.l.s8.bf16 %v5485_v60  ;;  %v8559_v52 = vunpack.c.l.s8.bf16 %v5490_v47 }
 0x3b5   :  { %1821 = vmatprep.subr.bf16.mxu1 %v9273_v19  ;;  %v5517_v19 = vld [vmem:[#allocation10 + $0x2e0] sm:$0xff] }
 0x3b6   :  { %9277 = vst [vmem:[#allocation121_spill] sm:$0xff] %v5517_v19 }
 0x3b7   :  { %1740 = vmatpush1.bf16.msra.mxu0 %v8550_v49  ;;  %v5506_v49 = vld [vmem:[#allocation10 + $0x2f8] sm:$0xff] }
 0x3b8   :  { %1822 = vmatpush1.bf16.msra.mxu1 %v8551_v31  ;;  %1741 = vmatprep.subr.bf16.mxu0 %v8552_v55  ;;  %9276 = vst [vmem:[#allocation120_spill] sm:$0xff] %v5506_v49  ;;  %v8565_v31 = vunpack.c.h.s8.bf16 %v5485_v60  ;;  %v8566_v55 = vunpack.c.h.s8.bf16 %v5490_v47  ;;  %v8568_v0 = vunpack.c.l.s8.bf16 %v5506_v49  ;;  %v9283_v47 = vunpack.c.h.s8.bf16 %v5506_v49 }
 0x3b9   :  { %1823 = vmatprep.subr.bf16.mxu1 %v8553_v46  ;;  %v8567_v46 = vunpack.c.l.s8.bf16 %v5504_v56  ;;  %v8590_v49 = vunpack.c.h.s8.bf16 %v5536_v61  ;;  %v5568_v56 = vld [vmem:[#allocation10 + $0x368] sm:$0xff] }
 0x3ba   :  { %9285 = vst [vmem:[#allocation127_spill] sm:$0xff] %v5568_v56 }
 0x3bb   :  { %1742 = vmatpush1.bf16.msra.mxu0 %v8558_v59  ;;  %v5522_v59 = vld [vmem:[#allocation10 + $0x2f0] sm:$0xff] }
 0x3bc   :  { %1824 = vmatpush1.bf16.msra.mxu1 %v8559_v52  ;;  %1743 = vmatprep.subr.bf16.mxu0 %v8560_v43  ;;  %9279 = vst [vmem:[#allocation122_spill] sm:$0xff] %v5522_v59  ;;  %v8573_v52 = vunpack.c.l.s8.bf16 %v5517_v19  ;;  %v8574_v43 = vunpack.c.l.s8.bf16 %v5522_v59 }
 0x3bd   :  { %1825 = vmatprep.subr.bf16.mxu1 %v9278_v28  ;;  %v5549_v28 = vld [vmem:[#allocation10 + $0x320] sm:$0xff] }
 0x3be   :  { %9282 = vst [vmem:[#allocation125_spill] sm:$0xff] %v5549_v28 }
 0x3bf   :  { %1744 = vmatpush1.bf16.msra.mxu0 %v8565_v31  ;;  %v5538_v31 = vld [vmem:[#allocation10 + $0x338] sm:$0xff] }
 0x3c0   :  { %1826 = vmatpush1.bf16.msra.mxu1 %v8566_v55  ;;  %1745 = vmatprep.subr.bf16.mxu0 %v8567_v46  ;;  %9281 = vst [vmem:[#allocation124_spill] sm:$0xff] %v5538_v31  ;;  %v8580_v55 = vunpack.c.h.s8.bf16 %v5517_v19  ;;  %v8581_v46 = vunpack.c.h.s8.bf16 %v5522_v59  ;;  %v8583_v60 = vunpack.c.l.s8.bf16 %v5538_v31  ;;  %v9288_v59 = vunpack.c.h.s8.bf16 %v5538_v31 }
 0x3c1   :  { %1827 = vmatprep.subr.bf16.mxu1 %v8568_v0  ;;  %v8582_v0 = vunpack.c.l.s8.bf16 %v5536_v61  ;;  %v8605_v31 = vunpack.c.h.s8.bf16 %v5568_v56  ;;  %v5600_v61 = vld [vmem:[#allocation10 + $0x3a8] sm:$0xff] }
 0x3c2   :  { %9290 = vst [vmem:[#allocation131_spill] sm:$0xff] %v5600_v61 }
 0x3c3   :  { %1746 = vmatpush1.bf16.msra.mxu0 %v8573_v52  ;;  %v5554_v52 = vld [vmem:[#allocation10 + $0x330] sm:$0xff] }
 0x3c4   :  { %1828 = vmatpush1.bf16.msra.mxu1 %v8574_v43  ;;  %1747 = vmatprep.subr.bf16.mxu0 %v8575_v6  ;;  %9284 = vst [vmem:[#allocation126_spill] sm:$0xff] %v5554_v52  ;;  %v8588_v43 = vunpack.c.l.s8.bf16 %v5549_v28  ;;  %v8589_v6 = vunpack.c.l.s8.bf16 %v5554_v52 }
 0x3c5   :  { %1829 = vmatprep.subr.bf16.mxu1 %v9283_v47  ;;  %v5581_v47 = vld [vmem:[#allocation10 + $0x360] sm:$0xff] }
 0x3c6   :  { %9287 = vst [vmem:[#allocation129_spill] sm:$0xff] %v5581_v47 }
 0x3c7   :  { %1748 = vmatpush1.bf16.msra.mxu0 %v8580_v55  ;;  %v5570_v55 = vld [vmem:[#allocation10 + $0x378] sm:$0xff] }
 0x3c8   :  { %1830 = vmatpush1.bf16.msra.mxu1 %v8581_v46  ;;  %1749 = vmatprep.subr.bf16.mxu0 %v8582_v0  ;;  %9286 = vst [vmem:[#allocation128_spill] sm:$0xff] %v5570_v55  ;;  %v8595_v46 = vunpack.c.h.s8.bf16 %v5549_v28  ;;  %v8596_v0 = vunpack.c.h.s8.bf16 %v5554_v52  ;;  %v8598_v19 = vunpack.c.l.s8.bf16 %v5570_v55  ;;  %v9293_v52 = vunpack.c.h.s8.bf16 %v5570_v55 }
 0x3c9   :  { %1831 = vmatprep.subr.bf16.mxu1 %v8583_v60  ;;  %v8597_v60 = vunpack.c.l.s8.bf16 %v5568_v56  ;;  %v8620_v55 = vunpack.c.h.s8.bf16 %v5600_v61  ;;  %v5632_v56 = vld [vmem:[#allocation10 + $0x3e8] sm:$0xff] }
 0x3ca   :  { %9295 = vst [vmem:[#allocation135_spill] sm:$0xff] %v5632_v56 }
 0x3cb   :  { %1750 = vmatpush1.bf16.msra.mxu0 %v8588_v43  ;;  %v5586_v43 = vld [vmem:[#allocation10 + $0x370] sm:$0xff] }
 0x3cc   :  { %1832 = vmatpush1.bf16.msra.mxu1 %v8589_v6  ;;  %1751 = vmatprep.subr.bf16.mxu0 %v8590_v49  ;;  %9289 = vst [vmem:[#allocation130_spill] sm:$0xff] %v5586_v43  ;;  %v8603_v6 = vunpack.c.l.s8.bf16 %v5581_v47  ;;  %v8604_v49 = vunpack.c.l.s8.bf16 %v5586_v43 }
 0x3cd   :  { %1833 = vmatprep.subr.bf16.mxu1 %v9288_v59  ;;  %v5613_v59 = vld [vmem:[#allocation10 + $0x3a0] sm:$0xff] }
 0x3ce   :  { %9292 = vst [vmem:[#allocation133_spill] sm:$0xff] %v5613_v59 }
 0x3cf   :  { %1752 = vmatpush1.bf16.msra.mxu0 %v8595_v46  ;;  %v5602_v46 = vld [vmem:[#allocation10 + $0x3b8] sm:$0xff] }
 0x3d0   :  { %1834 = vmatpush1.bf16.msra.mxu1 %v8596_v0  ;;  %1753 = vmatprep.subr.bf16.mxu0 %v8597_v60  ;;  %9291 = vst [vmem:[#allocation132_spill] sm:$0xff] %v5602_v46  ;;  %v8610_v0 = vunpack.c.h.s8.bf16 %v5581_v47  ;;  %v8611_v60 = vunpack.c.h.s8.bf16 %v5586_v43  ;;  %v8613_v28 = vunpack.c.l.s8.bf16 %v5602_v46  ;;  %v9298_v43 = vunpack.c.h.s8.bf16 %v5602_v46 }
 0x3d1   :  { %1835 = vmatprep.subr.bf16.mxu1 %v8598_v19  ;;  %v8612_v19 = vunpack.c.l.s8.bf16 %v5600_v61  ;;  %v8635_v46 = vunpack.c.h.s8.bf16 %v5632_v56  ;;  %v5664_v61 = vld [vmem:[#allocation11 + $0x8] sm:$0xff] }
 0x3d2   :  { %9300 = vst [vmem:[#allocation139_spill] sm:$0xff] %v5664_v61 }
 0x3d3   :  { %1754 = vmatpush1.bf16.msra.mxu0 %v8603_v6  ;;  %v5618_v6 = vld [vmem:[#allocation10 + $0x3b0] sm:$0xff] }
 0x3d4   :  { %1836 = vmatpush1.bf16.msra.mxu1 %v8604_v49  ;;  %1755 = vmatprep.subr.bf16.mxu0 %v8605_v31  ;;  %9294 = vst [vmem:[#allocation134_spill] sm:$0xff] %v5618_v6  ;;  %v8618_v49 = vunpack.c.l.s8.bf16 %v5613_v59  ;;  %v8619_v31 = vunpack.c.l.s8.bf16 %v5618_v6 }
 0x3d5   :  { %1837 = vmatprep.subr.bf16.mxu1 %v9293_v52  ;;  %v5645_v52 = vld [vmem:[#allocation10 + $0x3e0] sm:$0xff] }
 0x3d6   :  { %9297 = vst [vmem:[#allocation137_spill] sm:$0xff] %v5645_v52 }
 0x3d7   :  { %1756 = vmatpush1.bf16.msra.mxu0 %v8610_v0  ;;  %v5634_v0 = vld [vmem:[#allocation10 + $0x3f8] sm:$0xff] }
 0x3d8   :  { %1838 = vmatpush1.bf16.msra.mxu1 %v8611_v60  ;;  %1757 = vmatprep.subr.bf16.mxu0 %v8612_v19  ;;  %9296 = vst [vmem:[#allocation136_spill] sm:$0xff] %v5634_v0  ;;  %v8625_v60 = vunpack.c.h.s8.bf16 %v5613_v59  ;;  %v8626_v19 = vunpack.c.h.s8.bf16 %v5618_v6  ;;  %v8628_v47 = vunpack.c.l.s8.bf16 %v5634_v0  ;;  %v9303_v6 = vunpack.c.h.s8.bf16 %v5634_v0 }
 0x3d9   :  { %1839 = vmatprep.subr.bf16.mxu1 %v8613_v28  ;;  %v8627_v28 = vunpack.c.l.s8.bf16 %v5632_v56  ;;  %v8650_v0 = vunpack.c.h.s8.bf16 %v5664_v61  ;;  %v5696_v56 = vld [vmem:[#allocation11 + $0x28] sm:$0xff] }
 0x3da   :  { %9305 = vst [vmem:[#allocation143_spill] sm:$0xff] %v5696_v56 }
 0x3db   :  { %1758 = vmatpush1.bf16.msra.mxu0 %v8618_v49  ;;  %v5650_v49 = vld [vmem:[#allocation10 + $0x3f0] sm:$0xff] }
 0x3dc   :  { %1840 = vmatpush1.bf16.msra.mxu1 %v8619_v31  ;;  %1759 = vmatprep.subr.bf16.mxu0 %v8620_v55  ;;  %9299 = vst [vmem:[#allocation138_spill] sm:$0xff] %v5650_v49  ;;  %v8633_v31 = vunpack.c.l.s8.bf16 %v5645_v52  ;;  %v8634_v55 = vunpack.c.l.s8.bf16 %v5650_v49 }
 0x3dd   :  { %1841 = vmatprep.subr.bf16.mxu1 %v9298_v43  ;;  %v5677_v43 = vld [vmem:[#allocation11] sm:$0xff] }
 0x3de   :  { %9302 = vst [vmem:[#allocation141_spill] sm:$0xff] %v5677_v43 }
 0x3df   :  { %1760 = vmatpush1.bf16.msra.mxu0 %v8625_v60  ;;  %v5666_v60 = vld [vmem:[#allocation11 + $0x18] sm:$0xff] }
 0x3e0   :  { %1842 = vmatpush1.bf16.msra.mxu1 %v8626_v19  ;;  %1761 = vmatprep.subr.bf16.mxu0 %v8627_v28  ;;  %9301 = vst [vmem:[#allocation140_spill] sm:$0xff] %v5666_v60  ;;  %v8640_v19 = vunpack.c.h.s8.bf16 %v5645_v52  ;;  %v8643_v28 = vunpack.c.h.s8.bf16 %v5650_v49  ;;  %v8642_v59 = vunpack.c.l.s8.bf16 %v5666_v60  ;;  %v9308_v49 = vunpack.c.h.s8.bf16 %v5666_v60 }
 0x3e1   :  { %1843 = vmatprep.subr.bf16.mxu1 %v8628_v47  ;;  %v8641_v47 = vunpack.c.l.s8.bf16 %v5664_v61  ;;  %v8665_v60 = vunpack.c.h.s8.bf16 %v5696_v56  ;;  %v5730_v61 = vld [vmem:[#allocation11 + $0x48] sm:$0xff] }
 0x3e2   :  { %9310 = vst [vmem:[#allocation147_spill] sm:$0xff] %v5730_v61 }
 0x3e3   :  { %1762 = vmatpush1.bf16.msra.mxu0 %v8633_v31  ;;  %v5682_v31 = vld [vmem:[#allocation11 + $0x10] sm:$0xff] }
 0x3e4   :  { %1844 = vmatpush1.bf16.msra.mxu1 %v8634_v55  ;;  %1763 = vmatprep.subr.bf16.mxu0 %v8635_v46  ;;  %9304 = vst [vmem:[#allocation142_spill] sm:$0xff] %v5682_v31  ;;  %v8648_v55 = vunpack.c.l.s8.bf16 %v5677_v43  ;;  %v8649_v46 = vunpack.c.l.s8.bf16 %v5682_v31 }
 0x3e5   :  { %1845 = vmatprep.subr.bf16.mxu1 %v9303_v6  ;;  %v5711_v6 = vld [vmem:[#allocation11 + $0x20] sm:$0xff] }
 0x3e6   :  { %9307 = vst [vmem:[#allocation145_spill] sm:$0xff] %v5711_v6 }
 0x3e7   :  { %1764 = vmatpush1.bf16.msra.mxu0 %v8640_v19  ;;  %v5699_v19 = vld [vmem:[#allocation11 + $0x38] sm:$0xff] }
 0x3e8   :  { %1846 = vmatpush1.bf16.msra.mxu1 %v8643_v28  ;;  %2650 = vmatprep.subr.bf16.mxu0 %v8641_v47  ;;  %9306 = vst [vmem:[#allocation144_spill] sm:$0xff] %v5699_v19  ;;  %v8655_v47 = vunpack.c.h.s8.bf16 %v5677_v43  ;;  %v8657_v28 = vunpack.c.l.s8.bf16 %v5696_v56  ;;  %v8658_v52 = vunpack.c.l.s8.bf16 %v5699_v19  ;;  %v5762_v56 = vld [vmem:[#allocation11 + $0x68] sm:$0xff] }
 0x3e9   :  { %2814 = vmatprep.subr.bf16.mxu1 %v8642_v59  ;;  %v8656_v59 = vunpack.c.h.s8.bf16 %v5682_v31  ;;  %v9313_v31 = vunpack.c.h.s8.bf16 %v5699_v19  ;;  %v8680_v19 = vunpack.c.h.s8.bf16 %v5730_v61  ;;  %9315 = vst [vmem:[#allocation151_spill] sm:$0xff] %v5762_v56 }
 0x3ea   :  { %1766 = vmatmul.mubr.bf16.vlgmr.msra.gmra.mrb[12].mxu0 %v5167_v1 }
 0x3eb   :  { %1848 = vmatmul.mubr.bf16.vlgmr.msra.gmra.mrb[12].mxu1 %v5167_v1  ;;  %2651 = vmatpush1.bf16.msra.mxu0 %v8648_v55  ;;  %v5716_v55 = vld [vmem:[#allocation11 + $0x30] sm:$0xff] }
 0x3ec   :  { %2815 = vmatpush1.bf16.msra.mxu1 %v8649_v46  ;;  %2652 = vmatprep.subr.bf16.mxu0 %v8650_v0  ;;  %9309 = vst [vmem:[#allocation146_spill] sm:$0xff] %v5716_v55  ;;  %v8663_v46 = vunpack.c.l.s8.bf16 %v5711_v6  ;;  %v8664_v0 = vunpack.c.l.s8.bf16 %v5716_v55 }
 0x3ed   :  { %2816 = vmatprep.subr.bf16.mxu1 %v9308_v49  ;;  %v5743_v49 = vld [vmem:[#allocation11 + $0x40] sm:$0xff] }
 0x3ee   :  { %9312 = vst [vmem:[#allocation149_spill] sm:$0xff] %v5743_v49 }
 0x3ef   :  { %2653 = vmatpush1.bf16.msra.mxu0 %v8655_v47  ;;  %v5732_v47 = vld [vmem:[#allocation11 + $0x58] sm:$0xff] }
 0x3f0   :  { %2817 = vmatpush1.bf16.msra.mxu1 %v8656_v59  ;;  %2654 = vmatprep.subr.bf16.mxu0 %v8657_v28  ;;  %9311 = vst [vmem:[#allocation148_spill] sm:$0xff] %v5732_v47  ;;  %v8670_v59 = vunpack.c.h.s8.bf16 %v5711_v6  ;;  %v8671_v28 = vunpack.c.h.s8.bf16 %v5716_v55  ;;  %v8673_v43 = vunpack.c.l.s8.bf16 %v5732_v47  ;;  %v9318_v55 = vunpack.c.h.s8.bf16 %v5732_v47 }
 0x3f1   :  { %2818 = vmatprep.subr.bf16.mxu1 %v8658_v52  ;;  %v8672_v52 = vunpack.c.l.s8.bf16 %v5730_v61  ;;  %v8695_v47 = vunpack.c.h.s8.bf16 %v5762_v56  ;;  %v5794_v61 = vld [vmem:[#allocation11 + $0x88] sm:$0xff] }
 0x3f2   :  { %9320 = vst [vmem:[#allocation155_spill] sm:$0xff] %v5794_v61 }
 0x3f3   :  { %2655 = vmatpush1.bf16.msra.mxu0 %v8663_v46  ;;  %v5748_v46 = vld [vmem:[#allocation11 + $0x50] sm:$0xff] }
 0x3f4   :  { %2819 = vmatpush1.bf16.msra.mxu1 %v8664_v0  ;;  %2656 = vmatprep.subr.bf16.mxu0 %v8665_v60  ;;  %9314 = vst [vmem:[#allocation150_spill] sm:$0xff] %v5748_v46  ;;  %v8678_v0 = vunpack.c.l.s8.bf16 %v5743_v49  ;;  %v8679_v60 = vunpack.c.l.s8.bf16 %v5748_v46 }
 0x3f5   :  { %2820 = vmatprep.subr.bf16.mxu1 %v9313_v31  ;;  %v5775_v31 = vld [vmem:[#allocation11 + $0x60] sm:$0xff] }
 0x3f6   :  { %9317 = vst [vmem:[#allocation153_spill] sm:$0xff] %v5775_v31 }
 0x3f7   :  { %2657 = vmatpush1.bf16.msra.mxu0 %v8670_v59  ;;  %v5764_v59 = vld [vmem:[#allocation11 + $0x78] sm:$0xff] }
 0x3f8   :  { %2821 = vmatpush1.bf16.msra.mxu1 %v8671_v28  ;;  %2658 = vmatprep.subr.bf16.mxu0 %v8672_v52  ;;  %9316 = vst [vmem:[#allocation152_spill] sm:$0xff] %v5764_v59  ;;  %v8685_v28 = vunpack.c.h.s8.bf16 %v5743_v49  ;;  %v8686_v52 = vunpack.c.h.s8.bf16 %v5748_v46  ;;  %v8688_v6 = vunpack.c.l.s8.bf16 %v5764_v59  ;;  %v9323_v46 = vunpack.c.h.s8.bf16 %v5764_v59 }
 0x3f9   :  { %2822 = vmatprep.subr.bf16.mxu1 %v8673_v43  ;;  %v8687_v43 = vunpack.c.l.s8.bf16 %v5762_v56  ;;  %v8710_v59 = vunpack.c.h.s8.bf16 %v5794_v61  ;;  %v5826_v56 = vld [vmem:[#allocation11 + $0xa8] sm:$0xff] }
 0x3fa   :  { %9325 = vst [vmem:[#allocation159_spill] sm:$0xff] %v5826_v56 }
 0x3fb   :  { %2659 = vmatpush1.bf16.msra.mxu0 %v8678_v0  ;;  %v5780_v0 = vld [vmem:[#allocation11 + $0x70] sm:$0xff] }
 0x3fc   :  { %2823 = vmatpush1.bf16.msra.mxu1 %v8679_v60  ;;  %2660 = vmatprep.subr.bf16.mxu0 %v8680_v19  ;;  %9319 = vst [vmem:[#allocation154_spill] sm:$0xff] %v5780_v0  ;;  %v8693_v60 = vunpack.c.l.s8.bf16 %v5775_v31  ;;  %v8694_v19 = vunpack.c.l.s8.bf16 %v5780_v0 }
 0x3fd   :  { %2824 = vmatprep.subr.bf16.mxu1 %v9318_v55  ;;  %v5807_v55 = vld [vmem:[#allocation11 + $0x80] sm:$0xff] }
 0x3fe   :  { %9322 = vst [vmem:[#allocation157_spill] sm:$0xff] %v5807_v55 }
 0x3ff   :  { %2661 = vmatpush1.bf16.msra.mxu0 %v8685_v28  ;;  %v5796_v28 = vld [vmem:[#allocation11 + $0x98] sm:$0xff] }
 0x400   :  { %2825 = vmatpush1.bf16.msra.mxu1 %v8686_v52  ;;  %2662 = vmatprep.subr.bf16.mxu0 %v8687_v43  ;;  %9321 = vst [vmem:[#allocation156_spill] sm:$0xff] %v5796_v28  ;;  %v8700_v52 = vunpack.c.h.s8.bf16 %v5775_v31  ;;  %v8701_v43 = vunpack.c.h.s8.bf16 %v5780_v0  ;;  %v8703_v49 = vunpack.c.l.s8.bf16 %v5796_v28  ;;  %v9328_v0 = vunpack.c.h.s8.bf16 %v5796_v28 }
 0x401   :  { %2826 = vmatprep.subr.bf16.mxu1 %v8688_v6  ;;  %v8702_v6 = vunpack.c.l.s8.bf16 %v5794_v61  ;;  %v8725_v28 = vunpack.c.h.s8.bf16 %v5826_v56  ;;  %v5858_v61 = vld [vmem:[#allocation11 + $0xc8] sm:$0xff] }
 0x402   :  { %9330 = vst [vmem:[#allocation163_spill] sm:$0xff] %v5858_v61 }
 0x403   :  { %2663 = vmatpush1.bf16.msra.mxu0 %v8693_v60  ;;  %v5812_v60 = vld [vmem:[#allocation11 + $0x90] sm:$0xff] }
 0x404   :  { %2827 = vmatpush1.bf16.msra.mxu1 %v8694_v19  ;;  %2664 = vmatprep.subr.bf16.mxu0 %v8695_v47  ;;  %9324 = vst [vmem:[#allocation158_spill] sm:$0xff] %v5812_v60  ;;  %v8708_v19 = vunpack.c.l.s8.bf16 %v5807_v55  ;;  %v8709_v47 = vunpack.c.l.s8.bf16 %v5812_v60 }
 0x405   :  { %2828 = vmatprep.subr.bf16.mxu1 %v9323_v46  ;;  %v5839_v46 = vld [vmem:[#allocation11 + $0xa0] sm:$0xff] }
 0x406   :  { %9327 = vst [vmem:[#allocation161_spill] sm:$0xff] %v5839_v46 }
 0x407   :  { %2665 = vmatpush1.bf16.msra.mxu0 %v8700_v52  ;;  %v5828_v52 = vld [vmem:[#allocation11 + $0xb8] sm:$0xff] }
 0x408   :  { %2829 = vmatpush1.bf16.msra.mxu1 %v8701_v43  ;;  %2666 = vmatprep.subr.bf16.mxu0 %v8702_v6  ;;  %9326 = vst [vmem:[#allocation160_spill] sm:$0xff] %v5828_v52  ;;  %v8715_v43 = vunpack.c.h.s8.bf16 %v5807_v55  ;;  %v8716_v6 = vunpack.c.h.s8.bf16 %v5812_v60  ;;  %v8718_v31 = vunpack.c.l.s8.bf16 %v5828_v52  ;;  %v9333_v60 = vunpack.c.h.s8.bf16 %v5828_v52 }
 0x409   :  { %2830 = vmatprep.subr.bf16.mxu1 %v8703_v49  ;;  %v8717_v49 = vunpack.c.l.s8.bf16 %v5826_v56  ;;  %v8740_v52 = vunpack.c.h.s8.bf16 %v5858_v61  ;;  %v5890_v56 = vld [vmem:[#allocation11 + $0xe8] sm:$0xff] }
 0x40a   :  { %9335 = vst [vmem:[#allocation167_spill] sm:$0xff] %v5890_v56 }
 0x40b   :  { %2667 = vmatpush1.bf16.msra.mxu0 %v8708_v19  ;;  %v5844_v19 = vld [vmem:[#allocation11 + $0xb0] sm:$0xff] }
 0x40c   :  { %2831 = vmatpush1.bf16.msra.mxu1 %v8709_v47  ;;  %2668 = vmatprep.subr.bf16.mxu0 %v8710_v59  ;;  %9329 = vst [vmem:[#allocation162_spill] sm:$0xff] %v5844_v19  ;;  %v8723_v47 = vunpack.c.l.s8.bf16 %v5839_v46  ;;  %v8724_v59 = vunpack.c.l.s8.bf16 %v5844_v19 }
 0x40d   :  { %2832 = vmatprep.subr.bf16.mxu1 %v9328_v0  ;;  %v5871_v0 = vld [vmem:[#allocation11 + $0xc0] sm:$0xff] }
 0x40e   :  { %9332 = vst [vmem:[#allocation165_spill] sm:$0xff] %v5871_v0 }
 0x40f   :  { %2669 = vmatpush1.bf16.msra.mxu0 %v8715_v43  ;;  %v5860_v43 = vld [vmem:[#allocation11 + $0xd8] sm:$0xff] }
 0x410   :  { %2833 = vmatpush1.bf16.msra.mxu1 %v8716_v6  ;;  %2670 = vmatprep.subr.bf16.mxu0 %v8717_v49  ;;  %9331 = vst [vmem:[#allocation164_spill] sm:$0xff] %v5860_v43  ;;  %v8730_v6 = vunpack.c.h.s8.bf16 %v5839_v46  ;;  %v8731_v49 = vunpack.c.h.s8.bf16 %v5844_v19  ;;  %v8733_v55 = vunpack.c.l.s8.bf16 %v5860_v43  ;;  %v9338_v19 = vunpack.c.h.s8.bf16 %v5860_v43 }
 0x411   :  { %2834 = vmatprep.subr.bf16.mxu1 %v8718_v31  ;;  %v8732_v31 = vunpack.c.l.s8.bf16 %v5858_v61  ;;  %v8751_v43 = vunpack.c.h.s8.bf16 %v5890_v56  ;;  %v5922_v61 = vld [vmem:[#allocation11 + $0x108] sm:$0xff] }
 0x412   :  { %9340 = vst [vmem:[#allocation171_spill] sm:$0xff] %v5922_v61 }
 0x413   :  { %2671 = vmatpush1.bf16.msra.mxu0 %v8723_v47  ;;  %v5876_v47 = vld [vmem:[#allocation11 + $0xd0] sm:$0xff] }
 0x414   :  { %2835 = vmatpush1.bf16.msra.mxu1 %v8724_v59  ;;  %2672 = vmatprep.subr.bf16.mxu0 %v8725_v28  ;;  %9334 = vst [vmem:[#allocation166_spill] sm:$0xff] %v5876_v47  ;;  %v8738_v59 = vunpack.c.l.s8.bf16 %v5871_v0  ;;  %v8739_v28 = vunpack.c.l.s8.bf16 %v5876_v47 }
 0x415   :  { %2836 = vmatprep.subr.bf16.mxu1 %v9333_v60  ;;  %v5903_v60 = vld [vmem:[#allocation11 + $0xe0] sm:$0xff] }
 0x416   :  { %9337 = vst [vmem:[#allocation169_spill] sm:$0xff] %v5903_v60 }
 0x417   :  { %2673 = vmatpush1.bf16.msra.mxu0 %v8730_v6  ;;  %v5892_v6 = vld [vmem:[#allocation11 + $0xf8] sm:$0xff] }
 0x418   :  { %2837 = vmatpush1.bf16.msra.mxu1 %v8731_v49  ;;  %2674 = vmatprep.subr.bf16.mxu0 %v8732_v31  ;;  %9336 = vst [vmem:[#allocation168_spill] sm:$0xff] %v5892_v6  ;;  %v8745_v49 = vunpack.c.h.s8.bf16 %v5871_v0  ;;  %v8746_v31 = vunpack.c.h.s8.bf16 %v5876_v47  ;;  %v8748_v46 = vunpack.c.l.s8.bf16 %v5892_v6 }
 0x419   :  { %2838 = vmatprep.subr.bf16.mxu1 %v8733_v55  ;;  %v8747_v55 = vunpack.c.l.s8.bf16 %v5890_v56 }
 0x41b   :  { %2675 = vmatpush1.bf16.msra.mxu0 %v8738_v59  ;;  %v5908_v59 = vld [vmem:[#allocation11 + $0xf0] sm:$0xff] }
 0x41c   :  { %2839 = vmatpush1.bf16.msra.mxu1 %v8739_v28  ;;  %2676 = vmatprep.subr.bf16.mxu0 %v8740_v52  ;;  %9339 = vst [vmem:[#allocation170_spill] sm:$0xff] %v5908_v59  ;;  %v8758_v28 = vunpack.c.l.s8.bf16 %v5903_v60  ;;  %v8752_v52 = vunpack.c.l.s8.bf16 %v5908_v59 }
 0x41d   :  { %2840 = vmatprep.subr.bf16.mxu1 %v9338_v19  ;;  %v8753_v19 = vunpack.c.h.s8.bf16 %v5892_v6 }
 0x41f   :  { %2677 = vmatpush1.bf16.msra.mxu0 %v8745_v49  ;;  %v5924_v49 = vld [vmem:[#allocation11 + $0x118] sm:$0xff] }
 0x420   :  { %2841 = vmatpush1.bf16.msra.mxu1 %v8746_v31  ;;  %2678 = vmatprep.subr.bf16.mxu0 %v8747_v55  ;;  %9341 = vst [vmem:[#allocation172_spill] sm:$0xff] %v5924_v49  ;;  %v8754_v31 = vunpack.c.h.s8.bf16 %v5903_v60  ;;  %v8755_v55 = vunpack.c.h.s8.bf16 %v5908_v59  ;;  %v8757_v47 = vunpack.c.l.s8.bf16 %v5924_v49 }
 0x421   :  { %2842 = vmatprep.subr.bf16.mxu1 %v8748_v46  ;;  %v8756_v46 = vunpack.c.l.s8.bf16 %v5922_v61 }
 0x423   :  { %2679 = vmatpush1.bf16.msra.mxu0 %v8758_v28 }
 0x424   :  { %2843 = vmatpush1.bf16.msra.mxu1 %v8752_v52  ;;  %2680 = vmatprep.subr.bf16.mxu0 %v8751_v43  ;;  %v5946_v43 = vld [vmem:[#allocation5 + $0x10] sm:$0xff]  ;;  %v5948_v52 = vld [vmem:[#allocation5 + $0x18] sm:$0xff] }
 0x425   :  { %2844 = vmatprep.subr.bf16.mxu1 %v8753_v19  ;;  %v5952_v19 = vrot.slane %v5946_v43, %v4566_v25  ;;  %v5970_v59 = vrot.slane %v5948_v52, %v4572_v29  ;;  %v5974_v60 = vrot.slane %v5948_v52, %v4575_v30 }
 0x427   :  { %2681 = vmatpush1.bf16.msra.mxu0 %v8754_v31  ;;  %9342 = vst [vmem:[#allocation173_spill] sm:$0xff] %v5952_v19  ;;  %v5956_v31 = vrot.slane %v5946_v43, %v4572_v29  ;;  %9346 = vst [vmem:[#allocation177_spill] sm:$0xff] %v5970_v59 }
 0x428   :  { %2845 = vmatpush1.bf16.msra.mxu1 %v8755_v55  ;;  %2691 = vmatprep.subr.bf16.mxu0 %v8756_v46  ;;  %v5960_v55 = vrot.slane %v5946_v43, %v4575_v30  ;;  %v5964_v46 = vrot.slane %v5948_v52, %v4566_v25  ;;  %9347 = vst [vmem:[#allocation178_spill] sm:$0xff] %v5974_v60 }
 0x429   :  { %2855 = vmatprep.subr.bf16.mxu1 %v8757_v47  ;;  %9343 = vst [vmem:[#allocation174_spill] sm:$0xff] %v5956_v31 }
 0x42a   :  { %9344 = vst [vmem:[#allocation175_spill] sm:$0xff] %v5960_v55  ;;  %9345 = vst [vmem:[#allocation176_spill] sm:$0xff] %v5964_v46 }
 0x43d   :  { %v1603_v47 = vpop.f32.mrb[8].mxu0  ;;  %v5966_v28 = vpop.f32.mrb[8].mxu1 }
 0x43e   :  { %v1897_v6 = vmul.f32 %v5952_v19, %v1603_v47  ;;  %v1605_v56 = vpop.f32.mrb[9].mxu0  ;;  %v1687_v0 = vpop.f32.mrb[9].mxu1 }
 0x43f   :  { %v1898_v1 = vmul.f32 %v5956_v31, %v1605_v56  ;;  %v1900_v17 = vmul.f32 %v5960_v55, %v1687_v0  ;;  %v1607_v35 = vpop.f32.mrb[10].mxu0  ;;  %v1689_v5 = vpop.f32.mrb[10].mxu1 }
 0x440   :  { %v5980_v7 = vadd.f32 %v5964_v46, %v1897_v6  ;;  %v1608_v2 = vpop.f32.mrb[11].mxu0  ;;  %v1690_v42 = vpop.f32.mrb[11].mxu1 }
 0x441   :  { %v5983_v54 = vadd.f32 %v5970_v59, %v1898_v1  ;;  %v5986_v41 = vadd.f32 %v5974_v60, %v1900_v17 }
 0x442   :  { %v1956_v47 = vsel %vm1955_vm1, %v5980_v7, 0.0  ;;  %v2021_v56 = vmul.f32 %v5980_v7, %v5980_v7 }
 0x443   :  { %v1957_v0 = vrot.slane %v1956_v47, 4  ;;  %v1963_v35 = vsel %vm1955_vm1, %v5983_v54, 0.0  ;;  %v2022_v2 = vmul.f32 %v5983_v54, %v5983_v54  ;;  %v1977_v17 = vsel %vm1955_vm1, %v5986_v41, 0.0 }
 0x444   :  { %v2029_v42 = vsel %vm1955_vm1, %v2021_v56, 0.0  ;;  %v1964_v5 = vrot.slane %v1963_v35, 4  ;;  %v1978_v55 = vrot.slane %v1977_v17, 4  ;;  %v2024_v46 = vmul.f32 %v5986_v41, %v5986_v41 }
 0x445   :  { %v1958_v1 = vadd.f32 %v1957_v0, %v1956_v47  ;;  %v2030_v6 = vrot.slane %v2029_v42, 4  ;;  %v2036_v59 = vsel %vm1955_vm1, %v2022_v2, 0.0 }
 0x446   :  { %v1965_v60 = vadd.f32 %v1964_v5, %v1963_v35  ;;  %v2037_v8 = vrot.slane %v2036_v59, 4  ;;  %v1979_v36 = vadd.f32 %v1978_v55, %v1977_v17  ;;  %v2050_v56 = vsel %vm1955_vm1, %v2024_v46, 0.0 }
 0x447   :  { %v1959_v31 = vrot.slane %v1958_v1, 2  ;;  %v2031_v19 = vadd.f32 %v2030_v6, %v2029_v42  ;;  %v2051_v0 = vrot.slane %v2050_v56, 4 }
 0x448   :  { %v1966_v11 = vrot.slane %v1965_v60, 2  ;;  %v2038_v39 = vadd.f32 %v2037_v8, %v2036_v59  ;;  %v1980_v47 = vrot.slane %v1979_v36, 2 }
 0x449   :  { %v1960_v21 = vadd.f32 %v1959_v31, %v1958_v1  ;;  %v2032_v13 = vrot.slane %v2031_v19, 2  ;;  %v2052_v16 = vadd.f32 %v2051_v0, %v2050_v56 }
 0x44a   :  { %v1967_v40 = vadd.f32 %v1966_v11, %v1965_v60  ;;  %v2039_v12 = vrot.slane %v2038_v39, 2  ;;  %v1981_v24 = vadd.f32 %v1980_v47, %v1979_v36 }
 0x44b   :  { %v1961_v35 = vrot.slane %v1960_v21, 1  ;;  %v2033_v5 = vadd.f32 %v2032_v13, %v2031_v19  ;;  %v2053_v55 = vrot.slane %v2052_v16, 2 }
 0x44c   :  { %v1968_v2 = vrot.slane %v1967_v40, 1  ;;  %v2040_v6 = vadd.f32 %v2039_v12, %v2038_v39  ;;  %v1982_v23 = vrot.slane %v1981_v24, 1 }
 0x44d   :  { %v1962_v34 = vadd.f32 %v1961_v35, %v1960_v21  ;;  %v2034_v18 = vrot.slane %v2033_v5, 1  ;;  %v2054_v8 = vadd.f32 %v2053_v55, %v2052_v16 }
 0x44e   :  { %v1969_v42 = vadd.f32 %v1968_v2, %v1967_v40  ;;  %v2041_v1 = vrot.slane %v2040_v6, 1  ;;  %v1983_v11 = vadd.f32 %v1982_v23, %v1981_v24  ;;  %v6013_v2 = vld [vmem:[#allocation5 + $0x20] sm:$0xff] }
 0x44f   :  { %v2013_v17 = vmul.f32 0.5, %v1962_v34  ;;  %v2035_v46 = vadd.f32 %v2034_v18, %v2033_v5  ;;  %v2055_v36 = vrot.slane %v2054_v8, 1  ;;  %v6005_v18 = vrot.slane %v5946_v43, %v4569_v27 }
 0x450   :  { %v2014_v31 = vmul.f32 0.5, %v1969_v42  ;;  %v2042_v48 = vadd.f32 %v2041_v1, %v2040_v6  ;;  %v2016_v33 = vmul.f32 0.5, %v1983_v11  ;;  %v6018_v6 = vld [vmem:[#allocation5 + $0x28] sm:$0xff] }
 0x451   :  { %v2085_v59 = vmul.f32 0.5, %v2035_v46  ;;  %v2093_v60 = vmul.f32 %v2013_v17, %v2013_v17  ;;  %v2056_v47 = vadd.f32 %v2055_v36, %v2054_v8  ;;  %9348 = vst [vmem:[#allocation179_spill] sm:$0xff] %v6005_v18  ;;  %v1899_v35 = vmul.f32 %v6005_v18, %v5966_v28 }
 0x452   :  { %v2094_v13 = vmul.f32 %v2014_v31, %v2014_v31  ;;  %v2086_v56 = vmul.f32 0.5, %v2042_v48  ;;  %v2096_v40 = vmul.f32 %v2016_v33, %v2016_v33  ;;  %v6011_v48 = vrot.slane %v5948_v52, %v4569_v27 }
 0x453   :  { %v2101_v19 = vsub.f32 %v2085_v59, %v2093_v60  ;;  %v2088_v0 = vmul.f32 0.5, %v2056_v47  ;;  %v2117_v55 = vsub.f32 %v5980_v7, %v2013_v17  ;;  %v6023_v46 = vrot.slane %v6013_v2, %v4566_v25 }
 0x454   :  { %v2102_v12 = vsub.f32 %v2086_v56, %v2094_v13  ;;  %9349 = vst [vmem:[#allocation180_spill] sm:$0xff] %v6011_v48  ;;  %v6016_v42 = vadd.f32 %v6011_v48, %v1899_v35  ;;  %v6031_v59 = vrot.slane %v6018_v6, %v4566_v25  ;;  %v2118_v60 = vsub.f32 %v5983_v54, %v2014_v31 }
 0x455   :  { %v2109_v21 = vmax.f32 %v2101_v19, 0.0  ;;  %v2104_v16 = vsub.f32 %v2088_v0, %v2096_v40  ;;  %9350 = vst [vmem:[#allocation181_spill] sm:$0xff] %v6023_v46  ;;  %v6036_v7 = vrot.slane %v6013_v2, %v4572_v29  ;;  %v6041_v56 = vrot.slane %v6018_v6, %v4572_v29 }
 0x456   :  { %v2110_v23 = vmax.f32 %v2102_v12, 0.0  ;;  %v1970_v11 = vsel %vm1955_vm1, %v6016_v42, 0.0  ;;  %v2023_v8 = vmul.f32 %v6016_v42, %v6016_v42  ;;  %9351 = vst [vmem:[#allocation182_spill] sm:$0xff] %v6031_v59  ;;  %v2120_v47 = vsub.f32 %v5986_v41, %v2016_v33  ;;  %v6058_v41 = vld [vmem:[#allocation11 + $0x110] sm:$0xff] }
 0x457   :  { %v2125_v39 = vadd.f32 1e-05, %v2109_v21  ;;  %v2112_v34 = vmax.f32 %v2104_v16, 0.0  ;;  %9352 = vst [vmem:[#allocation183_spill] sm:$0xff] %v6036_v7  ;;  %v1971_v19 = vrot.slane %v1970_v11, 4  ;;  %9353 = vst [vmem:[#allocation184_spill] sm:$0xff] %v6041_v56  ;;  %v6048_v54 = vrot.slane %v6013_v2, %v4575_v30 }
 0x458   :  { %v2126_v24 = vadd.f32 1e-05, %v2110_v23  ;;  %v2043_v21 = vsel %vm1955_vm1, %v2023_v8, 0.0  ;;  %v6053_v0 = vrot.slane %v6018_v6, %v4575_v30  ;;  %9357 = vst [vmem:[#allocation188_spill] sm:$0xff] %v6058_v41 }
 0x459   :  { %4194 = vrsqrt.f32 %v2125_v39  ;;  %v2128_v5 = vadd.f32 1e-05, %v2112_v34  ;;  %9354 = vst [vmem:[#allocation185_spill] sm:$0xff] %v6048_v54  ;;  %v1972_v23 = vadd.f32 %v1971_v19, %v1970_v11  ;;  %v2044_v16 = vrot.slane %v2043_v21, 4  ;;  %v6056_v34 = vld [vmem:[#allocation11 + $0x100] sm:$0xff] }
 0x45a   :  { %4196 = vrsqrt.f32 %v2126_v24  ;;  %9355 = vst [vmem:[#allocation186_spill] sm:$0xff] %v6053_v0  ;;  %9356 = vst [vmem:[#allocation187_spill] sm:$0xff] %v6056_v34  ;;  %v8834_v11 = vunpack.c.l.s8.bf16 %v6058_v41  ;;  %v8830_v19 = vunpack.c.h.s8.bf16 %v5922_v61 }
 0x45b   :  { %4198 = vrsqrt.f32 %v2128_v5  ;;  %v2045_v8 = vadd.f32 %v2044_v16, %v2043_v21  ;;  %v8820_v16 = vunpack.c.h.s8.bf16 %v6058_v41 }
 0x45d   :  { %v2046_v21 = vrot.slane %v2045_v8, 2 }
 0x463   :  { %v4195_v28 = vpop.eup %4194 }
 0x464   :  { %v2141_v1 = vmul.f32 %v4195_v28, %v2117_v55  ;;  %v4197_v17 = vpop.eup %4196  ;;  %v8835_v55 = vunpack.c.l.s8.bf16 %v6056_v34 }
 0x465   :  { %v2142_v36 = vmul.f32 %v4197_v17, %v2118_v60  ;;  %v4199_v31 = vpop.eup %4198 }
 0x466   :  { %v2191_v13 = vmul.f32 %v6023_v46, %v2141_v1  ;;  %v2144_v39 = vmul.f32 %v4199_v31, %v2120_v47  ;;  %v1973_v1 = vrot.slane %v1972_v23, 2  ;;  %v6066_v47 = vld [vmem:[#allocation11 + $0x128] sm:$0xff] }
 0x467   :  { %v2192_v12 = vmul.f32 %v6036_v7, %v2142_v36  ;;  %v8825_v36 = vunpack.c.h.s8.bf16 %v5924_v49  ;;  %9358 = vst [vmem:[#allocation189_spill] sm:$0xff] %v6066_v47 }
 0x468   :  { %v2241_v40 = vadd.f32 %v6031_v59, %v2191_v13  ;;  %v2194_v35 = vmul.f32 %v6048_v54, %v2144_v39  ;;  %v8823_v39 = vunpack.c.h.s8.bf16 %v6056_v34  ;;  %v6443_v34 = vld [vmem:[#allocation11 + $0x268] sm:$0xff] }
 0x469   :  { %v2242_v24 = vadd.f32 %v6041_v56, %v2192_v12  ;;  %v1974_v12 = vadd.f32 %v1973_v1, %v1972_v23  ;;  %v6080_v23 = vld [vmem:[#allocation11 + $0x130] sm:$0xff]  ;;  %9421 = vst [vmem:[#allocation237_spill] sm:$0xff] %v6443_v34 }
 0x46a   :  { %v2249_v33 = vmax.f32 %v2241_v40, 0.0  ;;  %v2244_v28 = vadd.f32 %v6053_v0, %v2194_v35  ;;  %v6068_v40 = vld [vmem:[#allocation11 + $0x138] sm:$0xff]  ;;  %v6078_v35 = vld [vmem:[#allocation11 + $0x120] sm:$0xff]  ;;  %9361 = vst [vmem:[#allocation192_spill] sm:$0xff] %v6080_v23 }
 0x46b   :  { %v2250_v5 = vmax.f32 %v2242_v24, 0.0  ;;  %9359 = vst [vmem:[#allocation190_spill] sm:$0xff] %v6068_v40  ;;  %v8821_v24 = vunpack.c.l.s8.bf16 %v6066_v47  ;;  %9360 = vst [vmem:[#allocation191_spill] sm:$0xff] %v6078_v35  ;;  %v8824_v1 = vunpack.c.l.s8.bf16 %v6078_v35 }
 0x46c   :  { %v2257_v17 = vpack.c.bf16 %v2249_v33, %v2249_v33  ;;  %v2252_v13 = vmax.f32 %v2244_v28, 0.0  ;;  %v8822_v33 = vunpack.c.l.s8.bf16 %v6068_v40  ;;  %v2047_v28 = vadd.f32 %v2046_v21, %v2045_v8 }
 0x46d   :  { %v2258_v60 = vpack.c.bf16 %v2250_v5, %v2250_v5  ;;  %v1975_v5 = vrot.slane %v1974_v12, 1  ;;  %v8828_v8 = vunpack.c.h.s8.bf16 %v6068_v40 }
 0x46e   :  { %v2260_v31 = vpack.c.bf16 %v2252_v13, %v2252_v13  ;;  %v6098_v13 = vld [vmem:[#allocation11 + $0x148] sm:$0xff] }
 0x46f   :  { %2682 = vmatprep.mubr.bf16.mxu0 %v2258_v60  ;;  %2846 = vmatprep.mubr.bf16.mxu1 %v2258_v60  ;;  %v8826_v60 = vunpack.c.l.s8.bf16 %v6080_v23  ;;  %9362 = vst [vmem:[#allocation193_spill] sm:$0xff] %v6098_v13  ;;  %v1976_v21 = vadd.f32 %v1975_v5, %v1974_v12  ;;  %v6114_v5 = vld [vmem:[#allocation11 + $0x140] sm:$0xff] }
 0x470   :  { %2683 = vmatmul.mubr.bf16.vlgmr.msra.gmra.mrb[16].mxu0 %v2257_v17  ;;  %2847 = vmatmul.mubr.bf16.vlgmr.msra.gmra.mrb[16].mxu1 %v2257_v17  ;;  %v8827_v17 = vunpack.c.h.s8.bf16 %v6066_v47  ;;  %9364 = vst [vmem:[#allocation195_spill] sm:$0xff] %v6114_v5 }
 0x471   :  { %2692 = vmatpush1.bf16.msra.mxu0 %v8835_v55  ;;  %2856 = vmatpush1.bf16.msra.mxu1 %v8834_v11  ;;  %v6150_v55 = vld [vmem:[#allocation11 + $0x160] sm:$0xff] }
 0x472   :  { %2723 = vmatprep.mubr.bf16.mxu0 %v2260_v31  ;;  %2887 = vmatprep.mubr.bf16.mxu1 %v2260_v31  ;;  %v6100_v31 = vld [vmem:[#allocation11 + $0x158] sm:$0xff]  ;;  %9368 = vst [vmem:[#allocation199_spill] sm:$0xff] %v6150_v55 }
 0x473   :  { %2693 = vmatprep.subr.bf16.mxu0 %v8830_v19  ;;  %2857 = vmatprep.subr.bf16.mxu1 %v8825_v36  ;;  %9363 = vst [vmem:[#allocation194_spill] sm:$0xff] %v6100_v31  ;;  %v8832_v12 = vunpack.c.l.s8.bf16 %v6100_v31  ;;  %v6118_v36 = vmul.f32 0.5, %v1976_v21  ;;  %v8840_v21 = vunpack.c.h.s8.bf16 %v6098_v13 }
 0x475   :  { %2694 = vmatpush1.bf16.msra.mxu0 %v8823_v39  ;;  %2858 = vmatpush1.bf16.msra.mxu1 %v8820_v16  ;;  %v2048_v16 = vrot.slane %v2047_v28, 1  ;;  %v8833_v39 = vunpack.c.l.s8.bf16 %v6098_v13 }
 0x476   :  { %2695 = vmatprep.subr.bf16.mxu0 %v8821_v24  ;;  %2859 = vmatprep.subr.bf16.mxu1 %v8822_v33  ;;  %v8829_v24 = vunpack.c.h.s8.bf16 %v6078_v35  ;;  %v8831_v33 = vunpack.c.h.s8.bf16 %v6080_v23 }
 0x479   :  { %2696 = vmatpush1.bf16.msra.mxu0 %v8824_v1  ;;  %2860 = vmatpush1.bf16.msra.mxu1 %v8826_v60  ;;  %v6116_v1 = vld [vmem:[#allocation11 + $0x150] sm:$0xff]  ;;  %v2049_v60 = vadd.f32 %v2048_v16, %v2047_v28  ;;  %v8841_v16 = vunpack.c.h.s8.bf16 %v6100_v31  ;;  %v6132_v28 = vld [vmem:[#allocation11 + $0x168] sm:$0xff] }
 0x47a   :  { %2697 = vmatprep.subr.bf16.mxu0 %v8827_v17  ;;  %2861 = vmatprep.subr.bf16.mxu1 %v8828_v8  ;;  %9365 = vst [vmem:[#allocation196_spill] sm:$0xff] %v6116_v1  ;;  %v8836_v17 = vunpack.c.l.s8.bf16 %v6114_v5  ;;  %v8839_v8 = vunpack.c.l.s8.bf16 %v6116_v1  ;;  %9366 = vst [vmem:[#allocation197_spill] sm:$0xff] %v6132_v28 }
 0x47b   :  { %v2087_v19 = vmul.f32 0.5, %v2049_v60  ;;  %v8846_v60 = vunpack.c.l.s8.bf16 %v6132_v28 }
 0x47d   :  { %2698 = vmatpush1.bf16.msra.mxu0 %v8829_v24  ;;  %2862 = vmatpush1.bf16.msra.mxu1 %v8831_v33  ;;  %v6134_v24 = vld [vmem:[#allocation11 + $0x178] sm:$0xff]  ;;  %v2095_v33 = vmul.f32 %v6118_v36, %v6118_v36 }
 0x47e   :  { %2699 = vmatprep.subr.bf16.mxu0 %v8833_v39  ;;  %2863 = vmatprep.subr.bf16.mxu1 %v8832_v12  ;;  %9367 = vst [vmem:[#allocation198_spill] sm:$0xff] %v6134_v24  ;;  %v8842_v12 = vunpack.c.h.s8.bf16 %v6114_v5  ;;  %v8845_v39 = vunpack.c.h.s8.bf16 %v6116_v1  ;;  %v8847_v11 = vunpack.c.l.s8.bf16 %v6134_v24  ;;  %v6182_v5 = vld [vmem:[#allocation11 + $0x180] sm:$0xff] }
 0x47f   :  { %v2103_v23 = vsub.f32 %v2087_v19, %v2095_v33  ;;  %v8855_v19 = vunpack.c.h.s8.bf16 %v6134_v24  ;;  %v6166_v33 = vld [vmem:[#allocation11 + $0x188] sm:$0xff]  ;;  %9372 = vst [vmem:[#allocation203_spill] sm:$0xff] %v6182_v5 }
 0x480   :  { %9370 = vst [vmem:[#allocation201_spill] sm:$0xff] %v6166_v33  ;;  %v6198_v24 = vld [vmem:[#allocation11 + $0x1a8] sm:$0xff] }
 0x481   :  { %2700 = vmatpush1.bf16.msra.mxu0 %v8836_v17  ;;  %2864 = vmatpush1.bf16.msra.mxu1 %v8839_v8  ;;  %v6152_v17 = vld [vmem:[#allocation11 + $0x170] sm:$0xff]  ;;  %v8850_v8 = vunpack.c.l.s8.bf16 %v6150_v55  ;;  %v2111_v1 = vmax.f32 %v2103_v23, 0.0  ;;  %9374 = vst [vmem:[#allocation205_spill] sm:$0xff] %v6198_v24 }
 0x482   :  { %2701 = vmatprep.subr.bf16.mxu0 %v8840_v21  ;;  %2865 = vmatprep.subr.bf16.mxu1 %v8841_v16  ;;  %9369 = vst [vmem:[#allocation200_spill] sm:$0xff] %v6152_v17  ;;  %v8853_v21 = vunpack.c.l.s8.bf16 %v6152_v17  ;;  %v8854_v16 = vunpack.c.h.s8.bf16 %v6132_v28  ;;  %v6413_v28 = vld [vmem:[#allocation11 + $0x250] sm:$0xff] }
 0x483   :  { %v2127_v31 = vadd.f32 1e-05, %v2111_v1  ;;  %9414 = vst [vmem:[#allocation234_spill] sm:$0xff] %v6413_v28 }
 0x485   :  { %2702 = vmatpush1.bf16.msra.mxu0 %v8842_v12  ;;  %2866 = vmatpush1.bf16.msra.mxu1 %v8845_v39  ;;  %v6168_v12 = vld [vmem:[#allocation11 + $0x198] sm:$0xff]  ;;  %v8858_v39 = vunpack.c.h.s8.bf16 %v6150_v55  ;;  %4200 = vrsqrt.f32 %v2127_v31 }
 0x486   :  { %2703 = vmatprep.subr.bf16.mxu0 %v8846_v60  ;;  %2867 = vmatprep.subr.bf16.mxu1 %v8847_v11  ;;  %9371 = vst [vmem:[#allocation202_spill] sm:$0xff] %v6168_v12  ;;  %v8859_v60 = vunpack.c.h.s8.bf16 %v6152_v17  ;;  %v8860_v11 = vunpack.c.l.s8.bf16 %v6166_v33  ;;  %v8861_v23 = vunpack.c.l.s8.bf16 %v6168_v12  ;;  %v8867_v1 = vunpack.c.h.s8.bf16 %v6168_v12  ;;  %v6214_v17 = vld [vmem:[#allocation11 + $0x1a0] sm:$0xff] }
 0x487   :  { %9376 = vst [vmem:[#allocation207_spill] sm:$0xff] %v6214_v17 }
 0x489   :  { %2704 = vmatpush1.bf16.msra.mxu0 %v8850_v8  ;;  %2868 = vmatpush1.bf16.msra.mxu1 %v8853_v21  ;;  %v6184_v8 = vld [vmem:[#allocation11 + $0x190] sm:$0xff]  ;;  %v8864_v21 = vunpack.c.l.s8.bf16 %v6182_v5 }
 0x48a   :  { %2705 = vmatprep.subr.bf16.mxu0 %v8854_v16  ;;  %2869 = vmatprep.subr.bf16.mxu1 %v8855_v19  ;;  %9373 = vst [vmem:[#allocation204_spill] sm:$0xff] %v6184_v8  ;;  %v8865_v16 = vunpack.c.l.s8.bf16 %v6184_v8  ;;  %v8866_v19 = vunpack.c.h.s8.bf16 %v6166_v33  ;;  %v6230_v33 = vld [vmem:[#allocation11 + $0x1c8] sm:$0xff] }
 0x48b   :  { %9378 = vst [vmem:[#allocation209_spill] sm:$0xff] %v6230_v33 }
 0x48d   :  { %2706 = vmatpush1.bf16.msra.mxu0 %v8858_v39  ;;  %2870 = vmatpush1.bf16.msra.mxu1 %v8859_v60  ;;  %v6200_v39 = vld [vmem:[#allocation11 + $0x1b8] sm:$0xff]  ;;  %v8872_v60 = vunpack.c.h.s8.bf16 %v6182_v5  ;;  %v6246_v5 = vld [vmem:[#allocation11 + $0x1c0] sm:$0xff] }
 0x48e   :  { %2707 = vmatprep.subr.bf16.mxu0 %v8860_v11  ;;  %2871 = vmatprep.subr.bf16.mxu1 %v8861_v23  ;;  %9375 = vst [vmem:[#allocation206_spill] sm:$0xff] %v6200_v39  ;;  %v8873_v11 = vunpack.c.h.s8.bf16 %v6184_v8  ;;  %v8874_v23 = vunpack.c.l.s8.bf16 %v6198_v24  ;;  %v8875_v31 = vunpack.c.l.s8.bf16 %v6200_v39  ;;  %v8884_v12 = vunpack.c.h.s8.bf16 %v6200_v39  ;;  %9380 = vst [vmem:[#allocation211_spill] sm:$0xff] %v6246_v5 }
 0x48f   :  { %v4201_v55 = vpop.eup %4200  ;;  %v9382_v8 = vunpack.c.l.s8.bf16 %v6230_v33 }
 0x491   :  { %2708 = vmatpush1.bf16.msra.mxu0 %v8864_v21  ;;  %2872 = vmatpush1.bf16.msra.mxu1 %v8865_v16  ;;  %v6216_v21 = vld [vmem:[#allocation11 + $0x1b0] sm:$0xff]  ;;  %v8880_v16 = vunpack.c.l.s8.bf16 %v6214_v17 }
 0x492   :  { %2709 = vmatprep.subr.bf16.mxu0 %v8866_v19  ;;  %2873 = vmatprep.subr.bf16.mxu1 %v8867_v1  ;;  %9377 = vst [vmem:[#allocation208_spill] sm:$0xff] %v6216_v21  ;;  %v8883_v19 = vunpack.c.l.s8.bf16 %v6216_v21  ;;  %v8885_v1 = vunpack.c.h.s8.bf16 %v6198_v24  ;;  %v8896_v24 = vunpack.c.h.s8.bf16 %v6230_v33  ;;  %v6322_v33 = vld [vmem:[#allocation11 + $0x200] sm:$0xff] }
 0x493   :  { %9395 = vst [vmem:[#allocation221_spill] sm:$0xff] %v6322_v33 }
 0x495   :  { %2710 = vmatpush1.bf16.msra.mxu0 %v8872_v60  ;;  %2874 = vmatpush1.bf16.msra.mxu1 %v8873_v11  ;;  %v6232_v60 = vld [vmem:[#allocation11 + $0x1d8] sm:$0xff]  ;;  %v8891_v11 = vunpack.c.h.s8.bf16 %v6214_v17  ;;  %v6411_v17 = vld [vmem:[#allocation11 + $0x240] sm:$0xff] }
 0x496   :  { %2711 = vmatprep.subr.bf16.mxu0 %v8874_v23  ;;  %2875 = vmatprep.subr.bf16.mxu1 %v8875_v31  ;;  %9379 = vst [vmem:[#allocation210_spill] sm:$0xff] %v6232_v60  ;;  %v8890_v23 = vunpack.c.h.s8.bf16 %v6216_v21  ;;  %v9383_v39 = vunpack.c.l.s8.bf16 %v6232_v60  ;;  %v6284_v21 = vld [vmem:[#allocation11 + $0x1e0] sm:$0xff]  ;;  %9413 = vst [vmem:[#allocation233_spill] sm:$0xff] %v6411_v17 }
 0x497   :  { %9387 = vst [vmem:[#allocation216_spill] sm:$0xff] %v6284_v21 }
 0x499   :  { %2712 = vmatpush1.bf16.msra.mxu0 %v8880_v16  ;;  %2876 = vmatpush1.bf16.msra.mxu1 %v8883_v19  ;;  %v6248_v16 = vld [vmem:[#allocation11 + $0x1d0] sm:$0xff]  ;;  %v2119_v19 = vsub.f32 %v6016_v42, %v6118_v36  ;;  %v8897_v42 = vunpack.c.h.s8.bf16 %v6232_v60  ;;  %v6266_v36 = vrot.slane %v6013_v2, %v4569_v27 }
 0x49a   :  { %2713 = vmatprep.subr.bf16.mxu0 %v8885_v1  ;;  %2877 = vmatprep.subr.bf16.mxu1 %v8884_v12  ;;  %9381 = vst [vmem:[#allocation212_spill] sm:$0xff] %v6248_v16  ;;  %v8894_v12 = vunpack.c.l.s8.bf16 %v6246_v5  ;;  %v8895_v1 = vunpack.c.l.s8.bf16 %v6248_v16 }
 0x49b   :  { %v2143_v31 = vmul.f32 %v4201_v55, %v2119_v19  ;;  %9384 = vst [vmem:[#allocation213_spill] sm:$0xff] %v6266_v36  ;;  %v6291_v55 = vrot.slane %v6018_v6, %v4569_v27 }
 0x49d   :  { %2714 = vmatpush1.bf16.msra.mxu0 %v8891_v11  ;;  %2878 = vmatpush1.bf16.msra.mxu1 %v8890_v23  ;;  %v6268_v23 = vld [vmem:[#allocation11 + $0x1e8] sm:$0xff]  ;;  %v6270_v11 = vld [vmem:[#allocation11 + $0x1f8] sm:$0xff]  ;;  %9389 = vst [vmem:[#allocation218_spill] sm:$0xff] %v6291_v55 }
 0x49e   :  { %2715 = vmatprep.subr.bf16.mxu0 %v9382_v8  ;;  %2879 = vmatprep.subr.bf16.mxu1 %v9383_v39  ;;  %9385 = vst [vmem:[#allocation214_spill] sm:$0xff] %v6268_v23  ;;  %9386 = vst [vmem:[#allocation215_spill] sm:$0xff] %v6270_v11  ;;  %v8905_v8 = vunpack.c.l.s8.bf16 %v6268_v23  ;;  %v9390_v39 = vunpack.c.h.s8.bf16 %v6246_v5  ;;  %v9392_v60 = vunpack.c.l.s8.bf16 %v6270_v11 }
 0x4a1   :  { %2716 = vmatpush1.bf16.msra.mxu0 %v8894_v12  ;;  %2880 = vmatpush1.bf16.msra.mxu1 %v8895_v1  ;;  %v6286_v12 = vld [vmem:[#allocation11 + $0x1f0] sm:$0xff]  ;;  %v2193_v1 = vmul.f32 %v6266_v36, %v2143_v31  ;;  %v8911_v31 = vunpack.c.h.s8.bf16 %v6268_v23  ;;  %v8912_v36 = vunpack.c.h.s8.bf16 %v6270_v11 }
 0x4a2   :  { %2717 = vmatprep.subr.bf16.mxu0 %v8896_v24  ;;  %2881 = vmatprep.subr.bf16.mxu1 %v8897_v42  ;;  %9388 = vst [vmem:[#allocation217_spill] sm:$0xff] %v6286_v12  ;;  %v9391_v24 = vunpack.c.h.s8.bf16 %v6248_v16  ;;  %v8909_v42 = vunpack.c.l.s8.bf16 %v6284_v21  ;;  %v8910_v19 = vunpack.c.l.s8.bf16 %v6286_v12  ;;  %v6308_v16 = vld [vmem:[#allocation11 + $0x218] sm:$0xff] }
 0x4a3   :  { %v2243_v5 = vadd.f32 %v6291_v55, %v2193_v1  ;;  %9394 = vst [vmem:[#allocation220_spill] sm:$0xff] %v6308_v16  ;;  %v8918_v55 = vunpack.c.l.s8.bf16 %v6308_v16  ;;  %v8924_v11 = vunpack.c.h.s8.bf16 %v6308_v16 }
 0x4a5   :  { %2718 = vmatpush1.bf16.msra.mxu0 %v9390_v39  ;;  %2882 = vmatpush1.bf16.msra.mxu1 %v9391_v24  ;;  %v6306_v39 = vld [vmem:[#allocation11 + $0x208] sm:$0xff]  ;;  %v8917_v24 = vunpack.c.h.s8.bf16 %v6284_v21  ;;  %v2251_v1 = vmax.f32 %v2243_v5, 0.0 }
 0x4a6   :  { %2719 = vmatprep.subr.bf16.mxu0 %v8905_v8  ;;  %2883 = vmatprep.subr.bf16.mxu1 %v9392_v60  ;;  %9393 = vst [vmem:[#allocation219_spill] sm:$0xff] %v6306_v39  ;;  %v8919_v60 = vunpack.c.h.s8.bf16 %v6286_v12  ;;  %v8920_v8 = vunpack.c.l.s8.bf16 %v6306_v39  ;;  %v8923_v5 = vunpack.c.h.s8.bf16 %v6306_v39  ;;  %v6338_v21 = vld [vmem:[#allocation11 + $0x228] sm:$0xff] }
 0x4a7   :  { %9397 = vst [vmem:[#allocation223_spill] sm:$0xff] %v6338_v21  ;;  %v9409_v12 = vunpack.c.h.s8.bf16 %v6338_v21 }
 0x4a9   :  { %2720 = vmatpush1.bf16.msra.mxu0 %v8909_v42  ;;  %2884 = vmatpush1.bf16.msra.mxu1 %v8910_v19  ;;  %v6324_v42 = vld [vmem:[#allocation11 + $0x210] sm:$0xff]  ;;  %v8921_v19 = vunpack.c.l.s8.bf16 %v6322_v33 }
 0x4aa   :  { %2721 = vmatprep.subr.bf16.mxu0 %v8911_v31  ;;  %2885 = vmatprep.subr.bf16.mxu1 %v8912_v36  ;;  %9396 = vst [vmem:[#allocation222_spill] sm:$0xff] %v6324_v42  ;;  %v8922_v31 = vunpack.c.l.s8.bf16 %v6324_v42  ;;  %v2259_v36 = vpack.c.bf16 %v2251_v1, %v2251_v1  ;;  %v8929_v1 = vunpack.c.h.s8.bf16 %v6322_v33 }
 0x4ad   :  { %2722 = vmatpush1.bf16.msra.mxu0 %v8917_v24  ;;  %2886 = vmatpush1.bf16.msra.mxu1 %v8919_v60  ;;  %v6340_v24 = vld [vmem:[#allocation11 + $0x238] sm:$0xff]  ;;  %v6368_v60 = vsub.s32 5, %v4529_v26 }
 0x4ae   :  { %2732 = vmatprep.subr.bf16.mxu0 %v8920_v8  ;;  %2896 = vmatprep.subr.bf16.mxu1 %v8918_v55  ;;  %9398 = vst [vmem:[#allocation224_spill] sm:$0xff] %v6340_v24  ;;  %v8932_v55 = vunpack.c.h.s8.bf16 %v6324_v42  ;;  %v6354_v8 = vld [vmem:[#allocation11 + $0x220] sm:$0xff]  ;;  %v9402_v16 = vunpack.c.l.s8.bf16 %v6340_v24  ;;  %v6377_v42 = vsub.s32 7, %v4529_v26  ;;  %v9410_v23 = vunpack.c.h.s8.bf16 %v6340_v24 }
 0x4af   :  { %9399 = vst [vmem:[#allocation225_spill] sm:$0xff] %v6354_v8  ;;  %v6395_v33 = vrot.slane %v5946_v43, %v6368_v60  ;;  %v9417_v39 = vunpack.c.h.s8.bf16 %v6354_v8 }
 0x4b0   :  { %2724 = vmatmul.mubr.bf16.vlgmr.msra.gmra.mrb[16].mxu0 %v2259_v36  ;;  %2888 = vmatmul.mubr.bf16.vlgmr.msra.gmra.mrb[16].mxu1 %v2259_v36  ;;  %v9401_v36 = vunpack.c.l.s8.bf16 %v6338_v21  ;;  %v6424_v35 = vrot.slane %v5948_v52, %v6377_v42 }
 0x4b1   :  { %2733 = vmatpush1.bf16.msra.mxu0 %v8921_v19  ;;  %2897 = vmatpush1.bf16.msra.mxu1 %v8922_v31  ;;  %v6356_v19 = vld [vmem:[#allocation11 + $0x230] sm:$0xff]  ;;  %v6359_v31 = vsub.s32 4, %v4529_v26  ;;  %9408 = vst [vmem:[#allocation230_spill] sm:$0xff] %v6395_v33 }
 0x4b2   :  { %2734 = vmatprep.subr.bf16.mxu0 %v8923_v5  ;;  %2898 = vmatprep.subr.bf16.mxu1 %v8924_v11  ;;  %9400 = vst [vmem:[#allocation226_spill] sm:$0xff] %v6356_v19  ;;  %v6381_v5 = vld [vmem:[#allocation11 + $0x258] sm:$0xff]  ;;  %9416 = vst [vmem:[#allocation236_spill] sm:$0xff] %v6424_v35 }
 0x4b3   :  { %9404 = vst [vmem:[#allocation228_spill] sm:$0xff] %v6381_v5  ;;  %v6385_v11 = vrot.slane %v5946_v43, %v6359_v31 }
 0x4b5   :  { %2735 = vmatpush1.bf16.msra.mxu0 %v8929_v1  ;;  %2899 = vmatpush1.bf16.msra.mxu1 %v8932_v55  ;;  %v6379_v55 = vld [vmem:[#allocation11 + $0x248] sm:$0xff]  ;;  %9405 = vst [vmem:[#allocation229_spill] sm:$0xff] %v6385_v11  ;;  %v9418_v1 = vunpack.c.h.s8.bf16 %v6356_v19 }
 0x4b6   :  { %2736 = vmatprep.subr.bf16.mxu0 %v9401_v36  ;;  %2900 = vmatprep.subr.bf16.mxu1 %v9402_v16  ;;  %9403 = vst [vmem:[#allocation227_spill] sm:$0xff] %v6379_v55  ;;  %v9406_v36 = vunpack.c.l.s8.bf16 %v6354_v8  ;;  %v9407_v16 = vunpack.c.l.s8.bf16 %v6356_v19  ;;  %v9419_v8 = vunpack.c.l.s8.bf16 %v6379_v55  ;;  %v9425_v19 = vunpack.c.h.s8.bf16 %v6379_v55 }
 0x4b9   :  { %2737 = vmatpush1.bf16.msra.mxu0 %v9406_v36  ;;  %2901 = vmatpush1.bf16.msra.mxu1 %v9407_v16  ;;  %v6403_v36 = vrot.slane %v5948_v52, %v6359_v31  ;;  %v6407_v16 = vrot.slane %v5946_v43, %v6377_v42 }
 0x4ba   :  { %2738 = vmatprep.subr.bf16.mxu0 %v9409_v12  ;;  %2902 = vmatprep.subr.bf16.mxu1 %v9410_v23  ;;  %v6417_v23 = vrot.slane %v5948_v52, %v6368_v60 }
 0x4bb   :  { %9411 = vst [vmem:[#allocation231_spill] sm:$0xff] %v6403_v36  ;;  %9412 = vst [vmem:[#allocation232_spill] sm:$0xff] %v6407_v16 }
 0x4bc   :  { %9415 = vst [vmem:[#allocation235_spill] sm:$0xff] %v6417_v23 }
 0x4bd   :  { %v1767_v12 = vpop.f32.mrb[12].mxu0  ;;  %2739 = vmatpush1.bf16.msra.mxu0 %v9417_v39  ;;  %2903 = vmatpush1.bf16.msra.mxu1 %v9418_v1  ;;  %v9420_v39 = vunpack.c.l.s8.bf16 %v6381_v5 }
 0x4be   :  { %v1901_v24 = vmul.f32 %v6385_v11, %v1767_v12  ;;  %v6420_v21 = vpop.f32.mrb[12].mxu1  ;;  %v1769_v13 = vpop.f32.mrb[13].mxu0  ;;  %2740 = vmatprep.subr.bf16.mxu0 %v9419_v8 }
 0x4bf   :  { %v1902_v40 = vmul.f32 %v6395_v33, %v1769_v13  ;;  %v1851_v47 = vpop.f32.mrb[13].mxu1  ;;  %v1771_v41 = vpop.f32.mrb[14].mxu0  ;;  %2904 = vmatprep.subr.bf16.mxu1 %v9420_v39 }
 0x4c0   :  { %v6434_v11 = vadd.f32 %v6403_v36, %v1901_v24  ;;  %v1904_v52 = vmul.f32 %v6407_v16, %v1851_v47  ;;  %v1853_v0 = vpop.f32.mrb[14].mxu1  ;;  %v1772_v1 = vpop.f32.mrb[15].mxu0  ;;  %v6448_v36 = vld [vmem:[#allocation11 + $0x278] sm:$0xff]  ;;  %v6466_v16 = vld [vmem:[#allocation11 + $0x260] sm:$0xff] }
 0x4c1   :  { %v6446_v12 = vadd.f32 %v6417_v23, %v1902_v40  ;;  %v1854_v24 = vpop.f32.mrb[15].mxu1  ;;  %9422 = vst [vmem:[#allocation238_spill] sm:$0xff] %v6448_v36  ;;  %v9423_v40 = vunpack.c.l.s8.bf16 %v6411_v17 }
 0x4c2   :  { %v1984_v0 = vsel %vm1955_vm1, %v6434_v11, 0.0  ;;  %v2025_v47 = vmul.f32 %v6434_v11, %v6434_v11  ;;  %v6455_v8 = vadd.f32 %v6424_v35, %v1904_v52  ;;  %v9424_v24 = vunpack.c.l.s8.bf16 %v6413_v28  ;;  %v6468_v52 = vld [vmem:[#allocation11 + $0x270] sm:$0xff] }
 0x4c3   :  { %v1985_v1 = vrot.slane %v1984_v0, 4  ;;  %v1991_v41 = vsel %vm1955_vm1, %v6446_v12, 0.0  ;;  %2741 = vmatpush1.bf16.msra.mxu0 %v9423_v40  ;;  %v2026_v33 = vmul.f32 %v6446_v12, %v6446_v12  ;;  %v9426_v40 = vunpack.c.h.s8.bf16 %v6381_v5 }
 0x4c4   :  { %2905 = vmatpush1.bf16.msra.mxu1 %v9424_v24  ;;  %v2057_v39 = vsel %vm1955_vm1, %v2025_v47, 0.0  ;;  %v1992_v35 = vrot.slane %v1991_v41, 4  ;;  %2742 = vmatprep.subr.bf16.mxu0 %v9425_v19  ;;  %v8985_v24 = vunpack.c.l.s8.bf16 %v6448_v36  ;;  %v2005_v54 = vsel %vm1955_vm1, %v6455_v8, 0.0 }
 0x4c5   :  { %2906 = vmatprep.subr.bf16.mxu1 %v9426_v40  ;;  %v1986_v13 = vadd.f32 %v1985_v1, %v1984_v0  ;;  %v2058_v23 = vrot.slane %v2057_v39, 4  ;;  %v2064_v47 = vsel %vm1955_vm1, %v2026_v33, 0.0  ;;  %v2006_v48 = vrot.slane %v2005_v54, 4 }
 0x4c6   :  { %v1993_v56 = vadd.f32 %v1992_v35, %v1991_v41  ;;  %v2065_v19 = vrot.slane %v2064_v47, 4  ;;  %v9427_v40 = vunpack.c.h.s8.bf16 %v6411_v17  ;;  %v9428_v0 = vunpack.c.h.s8.bf16 %v6413_v28  ;;  %v6495_v28 = vld [vmem:[#allocation11 + $0x288] sm:$0xff] }
 0x4c7   :  { %v1987_v46 = vrot.slane %v1986_v13, 2  ;;  %v2059_v55 = vadd.f32 %v2058_v23, %v2057_v39  ;;  %v2028_v35 = vmul.f32 %v6455_v8, %v6455_v8  ;;  %v9429_v33 = vunpack.c.l.s8.bf16 %v6443_v34 }
 0x4c8   :  { %2743 = vmatpush1.bf16.msra.mxu0 %v9427_v40  ;;  %2907 = vmatpush1.bf16.msra.mxu1 %v9428_v0  ;;  %v1994_v1 = vrot.slane %v1993_v56, 2  ;;  %v9000_v41 = vunpack.c.h.s8.bf16 %v6448_v36  ;;  %v2066_v40 = vadd.f32 %v2065_v19, %v2064_v47  ;;  %v2007_v59 = vadd.f32 %v2006_v48, %v2005_v54  ;;  %v6497_v0 = vld [vmem:[#allocation11 + $0x298] sm:$0xff]  ;;  %v6506_v54 = vld [vmem:[#allocation11 + $0x280] sm:$0xff] }
 0x4c9   :  { %2744 = vmatprep.subr.bf16.mxu0 %v9429_v33  ;;  %2908 = vmatprep.subr.bf16.mxu1 %v8985_v24  ;;  %v1988_v39 = vadd.f32 %v1987_v46, %v1986_v13  ;;  %v2060_v7 = vrot.slane %v2059_v55, 2  ;;  %v2078_v5 = vsel %vm1955_vm1, %v2028_v35, 0.0  ;;  %v9430_v46 = vunpack.c.l.s8.bf16 %v6466_v16  ;;  %v6508_v13 = vld [vmem:[#allocation11 + $0x290] sm:$0xff] }
 0x4ca   :  { %v1995_v17 = vadd.f32 %v1994_v1, %v1993_v56  ;;  %v2067_v23 = vrot.slane %v2066_v40, 2  ;;  %v2008_v61 = vrot.slane %v2007_v59, 2  ;;  %v9431_v48 = vunpack.c.l.s8.bf16 %v6468_v52 }
 0x4cb   :  { %v1989_v24 = vrot.slane %v1988_v39, 1  ;;  %v2061_v49 = vadd.f32 %v2060_v7, %v2059_v55  ;;  %v2079_v47 = vrot.slane %v2078_v5, 4  ;;  %v9432_v19 = vunpack.c.h.s8.bf16 %v6443_v34 }
 0x4cc   :  { %2745 = vmatpush1.bf16.msra.mxu0 %v9430_v46  ;;  %2909 = vmatpush1.bf16.msra.mxu1 %v9431_v48  ;;  %v1996_v56 = vrot.slane %v1995_v17, 1  ;;  %v9019_v7 = vunpack.c.l.s8.bf16 %v6495_v28  ;;  %v2068_v46 = vadd.f32 %v2067_v23, %v2066_v40  ;;  %v2009_v48 = vadd.f32 %v2008_v61, %v2007_v59 }
 0x4cd   :  { %2746 = vmatprep.subr.bf16.mxu0 %v9432_v19  ;;  %2910 = vmatprep.subr.bf16.mxu1 %v9000_v41  ;;  %v1990_v1 = vadd.f32 %v1989_v24, %v1988_v39  ;;  %v2062_v35 = vrot.slane %v2061_v49, 1  ;;  %v2080_v33 = vadd.f32 %v2079_v47, %v2078_v5  ;;  %v9016_v30 = vunpack.c.l.s8.bf16 %v6506_v54  ;;  %v6534_v39 = vld [vmem:[#allocation11 + $0x2a8] sm:$0xff] }
 0x4ce   :  { %v1997_v18 = vadd.f32 %v1996_v56, %v1995_v17  ;;  %v9001_v29 = vunpack.c.l.s8.bf16 %v6508_v13  ;;  %v2069_v34 = vrot.slane %v2068_v46, 1  ;;  %v2010_v36 = vrot.slane %v2009_v48, 1 }
 0x4cf   :  { %v6518_v27 = vmul.f32 0.5, %v1990_v1  ;;  %v2063_v19 = vadd.f32 %v2062_v35, %v2061_v49  ;;  %v9433_v41 = vunpack.c.h.s8.bf16 %v6466_v16  ;;  %v9434_v55 = vunpack.c.h.s8.bf16 %v6468_v52 }
 0x4d0   :  { %v6524_v24 = vmul.f32 0.5, %v1997_v18  ;;  %v2081_v61 = vrot.slane %v2080_v33, 2  ;;  %v9435_v59 = vunpack.c.l.s8.bf16 %v6497_v0  ;;  %v9003_v17 = vunpack.c.h.s8.bf16 %v6495_v28  ;;  %v6536_v18 = vld [vmem:[#allocation11 + $0x2b8] sm:$0xff] }
 0x4d1   :  { %2747 = vmatpush1.bf16.msra.mxu0 %v9433_v41  ;;  %2911 = vmatpush1.bf16.msra.mxu1 %v9434_v55  ;;  %v9002_v49 = vunpack.c.h.s8.bf16 %v6497_v0  ;;  %v2089_v5 = vmul.f32 0.5, %v2063_v19  ;;  %v2097_v23 = vmul.f32 %v6518_v27, %v6518_v27  ;;  %v2070_v41 = vadd.f32 %v2069_v34, %v2068_v46 }
 0x4d2   :  { %2748 = vmatprep.subr.bf16.mxu0 %v9019_v7  ;;  %2912 = vmatprep.subr.bf16.mxu1 %v9435_v59  ;;  %v2098_v40 = vmul.f32 %v6524_v24, %v6524_v24  ;;  %v9015_v56 = vunpack.c.h.s8.bf16 %v6506_v54  ;;  %v2011_v1 = vadd.f32 %v2010_v36, %v2009_v48  ;;  %v9005_v34 = vunpack.c.h.s8.bf16 %v6508_v13  ;;  %v6552_v36 = vld [vmem:[#allocation11 + $0x2a0] sm:$0xff]  ;;  %v6554_v48 = vld [vmem:[#allocation11 + $0x2b0] sm:$0xff] }
 0x4d3   :  { %v2105_v47 = vsub.f32 %v2089_v5, %v2097_v23  ;;  %v2090_v55 = vmul.f32 0.5, %v2070_v41  ;;  %v2082_v35 = vadd.f32 %v2081_v61, %v2080_v33  ;;  %v9010_v46 = vunpack.c.l.s8.bf16 %v6534_v39  ;;  %v6649_v7 = vld [vmem:[#allocation11 + $0x2f0] sm:$0xff] }
 0x4d4   :  { %v9004_v19 = vunpack.c.l.s8.bf16 %v6536_v18  ;;  %v6557_v5 = vsub.s32 6, %v4529_v26  ;;  %v6559_v33 = vmul.f32 0.5, %v2011_v1 }
 0x4d5   :  { %2749 = vmatpush1.bf16.msra.mxu0 %v9016_v30  ;;  %2913 = vmatpush1.bf16.msra.mxu1 %v9001_v29  ;;  %v2113_v59 = vmax.f32 %v2105_v47, 0.0  ;;  %v2106_v23 = vsub.f32 %v2090_v55, %v2098_v40  ;;  %v2083_v61 = vrot.slane %v2082_v35, 1  ;;  %v9009_v40 = vunpack.c.h.s8.bf16 %v6534_v39 }
 0x4d6   :  { %2750 = vmatprep.subr.bf16.mxu0 %v9003_v17  ;;  %2914 = vmatprep.subr.bf16.mxu1 %v9002_v49  ;;  %v9007_v49 = vunpack.c.l.s8.bf16 %v6552_v36  ;;  %v9006_v17 = vunpack.c.l.s8.bf16 %v6554_v48  ;;  %v2100_v26 = vmul.f32 %v6559_v33, %v6559_v33  ;;  %v9008_v55 = vunpack.c.h.s8.bf16 %v6536_v18 }
 0x4d7   :  { %v2129_v41 = vadd.f32 1e-05, %v2113_v59  ;;  %v2114_v29 = vmax.f32 %v2106_v23, 0.0  ;;  %v2084_v47 = vadd.f32 %v2083_v61, %v2082_v35  ;;  %v6577_v1 = vrot.slane %v5946_v43, %v6557_v5  ;;  %v6579_v35 = vld [vmem:[#allocation11 + $0x2c8] sm:$0xff]  ;;  %v6581_v23 = vld [vmem:[#allocation11 + $0x2d8] sm:$0xff] }
 0x4d8   :  { %9436 = vst [vmem:[#allocation239_spill] sm:$0xff] %v6581_v23  ;;  %v9014_v43 = vunpack.c.l.s8.bf16 %v6581_v23  ;;  %v6653_v30 = vrot.slane %v6018_v6, %v6359_v31 }
 0x4d9   :  { %2751 = vmatpush1.bf16.msra.mxu0 %v9015_v56  ;;  %2915 = vmatpush1.bf16.msra.mxu1 %v9005_v34  ;;  %4202 = vrsqrt.f32 %v2129_v41  ;;  %v2130_v59 = vadd.f32 1e-05, %v2114_v29  ;;  %v2092_v61 = vmul.f32 0.5, %v2084_v47  ;;  %v9012_v41 = vunpack.c.h.s8.bf16 %v6554_v48  ;;  %v6595_v47 = vld [vmem:[#allocation11 + $0x2c0] sm:$0xff] }
 0x4da   :  { %2752 = vmatprep.subr.bf16.mxu0 %v9010_v46  ;;  %2916 = vmatprep.subr.bf16.mxu1 %v9004_v19  ;;  %v9011_v19 = vunpack.c.h.s8.bf16 %v6552_v36  ;;  %v9013_v29 = vunpack.c.l.s8.bf16 %v6579_v35  ;;  %9440 = vst [vmem:[#allocation243_spill] sm:$0xff] %v6653_v30 }
 0x4db   :  { %4204 = vrsqrt.f32 %v2130_v59  ;;  %v2108_v34 = vsub.f32 %v2092_v61, %v2100_v26  ;;  %v6597_v59 = vld [vmem:[#allocation11 + $0x2d0] sm:$0xff] }
 0x4dc   :  { %v9026_v56 = vunpack.c.h.s8.bf16 %v6597_v59 }
 0x4dd   :  { %2753 = vmatpush1.bf16.msra.mxu0 %v9007_v49  ;;  %2917 = vmatpush1.bf16.msra.mxu1 %v9006_v17  ;;  %v1903_v17 = vmul.f32 %v6577_v1, %v6420_v21  ;;  %v4234_v49 = vld [vmem:[#allocation5 + $0x18] sm:$0xff]  ;;  %v2116_v61 = vmax.f32 %v2108_v34, 0.0  ;;  %v9021_v21 = vunpack.c.h.s8.bf16 %v6579_v35  ;;  %v6616_v34 = vld [vmem:[#allocation11 + $0x2e8] sm:$0xff] }
 0x4de   :  { %2754 = vmatprep.subr.bf16.mxu0 %v9009_v40  ;;  %2918 = vmatprep.subr.bf16.mxu1 %v9008_v55  ;;  %v6602_v26 = vrot.slane %v4234_v49, %v6557_v5  ;;  %v9018_v55 = vunpack.c.l.s8.bf16 %v6595_v47  ;;  %v9017_v40 = vunpack.c.l.s8.bf16 %v6597_v59  ;;  %v9020_v49 = vunpack.c.h.s8.bf16 %v6581_v23 }
 0x4df   :  { %v2132_v46 = vadd.f32 1e-05, %v2116_v61  ;;  %v2121_v61 = vsub.f32 %v6434_v11, %v6518_v27  ;;  %v6638_v27 = vrot.slane %v6013_v2, %v6368_v60 }
 0x4e0   :  { %9437 = vst [vmem:[#allocation240_spill] sm:$0xff] %v6602_v26 }
 0x4e1   :  { %2755 = vmatpush1.bf16.msra.mxu0 %v9011_v19  ;;  %2919 = vmatpush1.bf16.msra.mxu1 %v9012_v41  ;;  %v6619_v19 = vadd.f32 %v6602_v26, %v1903_v17  ;;  %v6621_v41 = vld [vmem:[#allocation11 + $0x2f8] sm:$0xff]  ;;  %4206 = vrsqrt.f32 %v2132_v46  ;;  %v9025_v17 = vunpack.c.h.s8.bf16 %v6595_v47  ;;  %9439 = vst [vmem:[#allocation242_spill] sm:$0xff] %v6638_v27  ;;  %v2122_v46 = vsub.f32 %v6446_v12, %v6524_v24 }
 0x4e2   :  { %2756 = vmatprep.subr.bf16.mxu0 %v9013_v29  ;;  %2920 = vmatprep.subr.bf16.mxu1 %v9014_v43  ;;  %v6627_v29 = vrot.slane %v6013_v2, %v6359_v31 }
 0x4e3   :  { %v4203_v43 = vpop.eup %4202  ;;  %v1998_v12 = vsel %vm1955_vm1, %v6619_v19, 0.0  ;;  %v2027_v24 = vmul.f32 %v6619_v19, %v6619_v19 }
 0x4e4   :  { %9438 = vst [vmem:[#allocation241_spill] sm:$0xff] %v6627_v29  ;;  %v2145_v11 = vmul.f32 %v4203_v43, %v2121_v61  ;;  %v1999_v26 = vrot.slane %v1998_v12, 4 }
 0x4e5   :  { %2757 = vmatpush1.bf16.msra.mxu0 %v9018_v55  ;;  %2921 = vmatpush1.bf16.msra.mxu1 %v9017_v40  ;;  %v6647_v55 = vld [vmem:[#allocation11 + $0x2e0] sm:$0xff]  ;;  %v4205_v43 = vpop.eup %4204  ;;  %v2071_v31 = vsel %vm1955_vm1, %v2027_v24, 0.0  ;;  %v6695_v24 = vrot.slane %v6013_v2, %v6377_v42  ;;  %v6708_v2 = vrot.slane %v6018_v6, %v6377_v42 }
 0x4e6   :  { %2758 = vmatprep.subr.bf16.mxu0 %v9021_v21  ;;  %2922 = vmatprep.subr.bf16.mxu1 %v9020_v49  ;;  %v2146_v61 = vmul.f32 %v4205_v43, %v2122_v46  ;;  %v6661_v49 = vrot.slane %v6018_v6, %v6368_v60  ;;  %v2195_v21 = vmul.f32 %v6627_v29, %v2145_v11  ;;  %v9442_v46 = vunpack.c.l.s8.bf16 %v6616_v34  ;;  %v6683_v29 = vld [vmem:[#allocation11 + $0x318] sm:$0xff]  ;;  %v6703_v11 = vld [vmem:[#allocation11 + $0x310] sm:$0xff] }
 0x4e7   :  { %v9443_v60 = vunpack.c.l.s8.bf16 %v6621_v41  ;;  %v2000_v40 = vadd.f32 %v1999_v26, %v1998_v12  ;;  %9448 = vst [vmem:[#allocation245_spill] sm:$0xff] %v6703_v11  ;;  %9449 = vst [vmem:[#allocation246_spill] sm:$0xff] %v6708_v2  ;;  %v9450_v12 = vunpack.c.h.s8.bf16 %v6647_v55 }
 0x4e8   :  { %9441 = vst [vmem:[#allocation244_spill] sm:$0xff] %v6661_v49  ;;  %v2196_v43 = vmul.f32 %v6638_v27, %v2146_v61  ;;  %v9445_v61 = vunpack.c.l.s8.bf16 %v6649_v7 }
 0x4e9   :  { %2759 = vmatpush1.bf16.msra.mxu0 %v9025_v17  ;;  %2923 = vmatpush1.bf16.msra.mxu1 %v9026_v56  ;;  %v6677_v17 = vld [vmem:[#allocation11 + $0x308] sm:$0xff]  ;;  %v2245_v56 = vadd.f32 %v6653_v30, %v2195_v21  ;;  %v9446_v30 = vunpack.c.h.s8.bf16 %v6616_v34  ;;  %v6726_v21 = vld [vmem:[#allocation11 + $0x338] sm:$0xff] }
 0x4ea   :  { %2760 = vmatprep.subr.bf16.mxu0 %v9442_v46  ;;  %2924 = vmatprep.subr.bf16.mxu1 %v9443_v60  ;;  %v2246_v23 = vadd.f32 %v6661_v49, %v2196_v43  ;;  %v2124_v46 = vsub.f32 %v6455_v8, %v6559_v33  ;;  %v9444_v60 = vunpack.c.l.s8.bf16 %v6647_v55  ;;  %v2072_v49 = vrot.slane %v2071_v31, 4  ;;  %9455 = vst [vmem:[#allocation248_spill] sm:$0xff] %v6726_v21 }
 0x4eb   :  { %v4207_v43 = vpop.eup %4206  ;;  %v9447_v8 = vunpack.c.h.s8.bf16 %v6621_v41  ;;  %v9452_v6 = vunpack.c.l.s8.bf16 %v6677_v17 }
 0x4ec   :  { %v2254_v33 = vmax.f32 %v2246_v23, 0.0  ;;  %v2148_v27 = vmul.f32 %v4207_v43, %v2124_v46  ;;  %v9038_v23 = vunpack.c.l.s8.bf16 %v6703_v11  ;;  %v2001_v46 = vrot.slane %v2000_v40, 2 }
 0x4ed   :  { %2761 = vmatpush1.bf16.msra.mxu0 %v9444_v60  ;;  %2925 = vmatpush1.bf16.msra.mxu1 %v9445_v61  ;;  %v2253_v60 = vmax.f32 %v2245_v56, 0.0  ;;  %v6701_v61 = vld [vmem:[#allocation11 + $0x300] sm:$0xff]  ;;  %v2073_v43 = vadd.f32 %v2072_v49, %v2071_v31 }
 0x4ee   :  { %2762 = vmatprep.subr.bf16.mxu0 %v9446_v30  ;;  %2926 = vmatprep.subr.bf16.mxu1 %v9447_v8  ;;  %v2262_v26 = vpack.c.bf16 %v2254_v33, %v2254_v33  ;;  %v9451_v30 = vunpack.c.h.s8.bf16 %v6649_v7  ;;  %v9031_v56 = vunpack.c.l.s8.bf16 %v6701_v61  ;;  %v2198_v8 = vmul.f32 %v6695_v24, %v2148_v27  ;;  %v6724_v27 = vld [vmem:[#allocation11 + $0x328] sm:$0xff] }
 0x4ef   :  { %v2261_v42 = vpack.c.bf16 %v2253_v60, %v2253_v60  ;;  %v9034_v33 = vunpack.c.h.s8.bf16 %v6683_v29  ;;  %9454 = vst [vmem:[#allocation247_spill] sm:$0xff] %v6724_v27  ;;  %v2002_v31 = vadd.f32 %v2001_v46, %v2000_v40  ;;  %v2074_v60 = vrot.slane %v2073_v43, 2 }
 0x4f0   :  { %2764 = vmatprep.mubr.bf16.mxu0 %v2262_v26  ;;  %2928 = vmatprep.mubr.bf16.mxu1 %v2262_v26  ;;  %v9456_v26 = vunpack.c.h.s8.bf16 %v6677_v17 }
 0x4f1   :  { %2763 = vmatpush1.bf16.msra.mxu0 %v9450_v12  ;;  %2927 = vmatpush1.bf16.msra.mxu1 %v9451_v30  ;;  %v9453_v12 = vunpack.c.l.s8.bf16 %v6683_v29  ;;  %v2248_v30 = vadd.f32 %v6708_v2, %v2198_v8  ;;  %v9033_v8 = vunpack.c.h.s8.bf16 %v6701_v61  ;;  %v6740_v2 = vld [vmem:[#allocation11 + $0x320] sm:$0xff]  ;;  %v2003_v40 = vrot.slane %v2002_v31, 1 }
 0x4f2   :  { %2773 = vmatprep.subr.bf16.mxu0 %v9452_v6  ;;  %v9035_v6 = vunpack.c.h.s8.bf16 %v6703_v11  ;;  %9457 = vst [vmem:[#allocation249_spill] sm:$0xff] %v6740_v2  ;;  %v2075_v46 = vadd.f32 %v2074_v60, %v2073_v43  ;;  %v9044_v43 = vunpack.c.h.s8.bf16 %v6726_v21  ;;  %v6756_v60 = vld [vmem:[#allocation11 + $0x348] sm:$0xff] }
 0x4f3   :  { %2937 = vmatprep.subr.bf16.mxu1 %v9453_v12  ;;  %v2256_v49 = vmax.f32 %v2248_v30, 0.0  ;;  %v9036_v12 = vunpack.c.l.s8.bf16 %v6724_v27  ;;  %v6742_v30 = vld [vmem:[#allocation11 + $0x330] sm:$0xff] }
 0x4f4   :  { %2765 = vmatmul.mubr.bf16.vlgmr.msra.gmra.mrb[16].mxu0 %v2261_v42  ;;  %2929 = vmatmul.mubr.bf16.vlgmr.msra.gmra.mrb[16].mxu1 %v2261_v42  ;;  %9458 = vst [vmem:[#allocation250_spill] sm:$0xff] %v6742_v30 }
 0x4f5   :  { %2774 = vmatpush1.bf16.msra.mxu0 %v9031_v56  ;;  %2938 = vmatpush1.bf16.msra.mxu1 %v9038_v23  ;;  %v2264_v42 = vpack.c.bf16 %v2256_v49, %v2256_v49  ;;  %v9037_v56 = vunpack.c.l.s8.bf16 %v6726_v21  ;;  %v9039_v49 = vunpack.c.l.s8.bf16 %v6740_v2  ;;  %v9050_v23 = vunpack.c.l.s8.bf16 %v6756_v60  ;;  %v6808_v21 = vld [vmem:[#allocation11 + $0x360] sm:$0xff] }
 0x4f6   :  { %2775 = vmatprep.subr.bf16.mxu0 %v9456_v26  ;;  %2939 = vmatprep.subr.bf16.mxu1 %v9034_v33  ;;  %v9042_v26 = vunpack.c.l.s8.bf16 %v6742_v30  ;;  %v2004_v33 = vadd.f32 %v2003_v40, %v2002_v31  ;;  %v6772_v40 = vld [vmem:[#allocation11 + $0x340] sm:$0xff]  ;;  %9464 = vst [vmem:[#allocation256_spill] sm:$0xff] %v6808_v21 }
 0x4f7   :  { %2805 = vmatprep.mubr.bf16.mxu0 %v2264_v42  ;;  %2969 = vmatprep.mubr.bf16.mxu1 %v2264_v42  ;;  %v9043_v42 = vunpack.c.h.s8.bf16 %v6724_v27  ;;  %9460 = vst [vmem:[#allocation252_spill] sm:$0xff] %v6772_v40 }
 0x4f8   :  { %v6776_v11 = vmul.f32 0.5, %v2004_v33  ;;  %v9058_v33 = vunpack.c.h.s8.bf16 %v6756_v60 }
 0x4f9   :  { %2776 = vmatpush1.bf16.msra.mxu0 %v9033_v8  ;;  %2940 = vmatpush1.bf16.msra.mxu1 %v9035_v6  ;;  %v6758_v8 = vld [vmem:[#allocation11 + $0x358] sm:$0xff]  ;;  %v2076_v6 = vrot.slane %v2075_v46, 1 }
 0x4fa   :  { %2777 = vmatprep.subr.bf16.mxu0 %v9036_v12  ;;  %2941 = vmatprep.subr.bf16.mxu1 %v9037_v56  ;;  %9459 = vst [vmem:[#allocation251_spill] sm:$0xff] %v6758_v8  ;;  %v9045_v12 = vunpack.c.h.s8.bf16 %v6740_v2  ;;  %v9048_v56 = vunpack.c.h.s8.bf16 %v6742_v30  ;;  %v9049_v31 = vunpack.c.l.s8.bf16 %v6758_v8 }
 0x4fd   :  { %2778 = vmatpush1.bf16.msra.mxu0 %v9039_v49  ;;  %2942 = vmatpush1.bf16.msra.mxu1 %v9042_v26  ;;  %v6774_v49 = vld [vmem:[#allocation11 + $0x350] sm:$0xff]  ;;  %v2077_v26 = vadd.f32 %v2076_v6, %v2075_v46  ;;  %v9060_v6 = vunpack.c.h.s8.bf16 %v6758_v8  ;;  %v6790_v46 = vld [vmem:[#allocation11 + $0x368] sm:$0xff] }
 0x4fe   :  { %2779 = vmatprep.subr.bf16.mxu0 %v9043_v42  ;;  %2943 = vmatprep.subr.bf16.mxu1 %v9044_v43  ;;  %9461 = vst [vmem:[#allocation253_spill] sm:$0xff] %v6774_v49  ;;  %v9055_v42 = vunpack.c.l.s8.bf16 %v6772_v40  ;;  %v9059_v43 = vunpack.c.l.s8.bf16 %v6774_v49  ;;  %9462 = vst [vmem:[#allocation254_spill] sm:$0xff] %v6790_v46 }
 0x4ff   :  { %v2091_v30 = vmul.f32 0.5, %v2077_v26  ;;  %v9064_v26 = vunpack.c.l.s8.bf16 %v6790_v46 }
 0x501   :  { %2780 = vmatpush1.bf16.msra.mxu0 %v9045_v12  ;;  %2944 = vmatpush1.bf16.msra.mxu1 %v9048_v56  ;;  %v6792_v12 = vld [vmem:[#allocation11 + $0x378] sm:$0xff]  ;;  %v2099_v56 = vmul.f32 %v6776_v11, %v6776_v11 }
 0x502   :  { %2781 = vmatprep.subr.bf16.mxu0 %v9050_v23  ;;  %2945 = vmatprep.subr.bf16.mxu1 %v9049_v31  ;;  %9463 = vst [vmem:[#allocation255_spill] sm:$0xff] %v6792_v12  ;;  %v9061_v31 = vunpack.c.h.s8.bf16 %v6772_v40  ;;  %v9065_v23 = vunpack.c.h.s8.bf16 %v6774_v49  ;;  %v9066_v2 = vunpack.c.l.s8.bf16 %v6792_v12  ;;  %v6840_v40 = vld [vmem:[#allocation11 + $0x380] sm:$0xff] }
 0x503   :  { %v2107_v27 = vsub.f32 %v2091_v30, %v2099_v56  ;;  %v9074_v56 = vunpack.c.h.s8.bf16 %v6792_v12  ;;  %v6824_v30 = vld [vmem:[#allocation11 + $0x388] sm:$0xff]  ;;  %9468 = vst [vmem:[#allocation260_spill] sm:$0xff] %v6840_v40 }
 0x504   :  { %9466 = vst [vmem:[#allocation258_spill] sm:$0xff] %v6824_v30  ;;  %v6856_v12 = vld [vmem:[#allocation11 + $0x3a8] sm:$0xff] }
 0x505   :  { %2782 = vmatpush1.bf16.msra.mxu0 %v9055_v42  ;;  %2946 = vmatpush1.bf16.msra.mxu1 %v9059_v43  ;;  %v6810_v42 = vld [vmem:[#allocation11 + $0x370] sm:$0xff]  ;;  %v2115_v49 = vmax.f32 %v2107_v27, 0.0  ;;  %9470 = vst [vmem:[#allocation262_spill] sm:$0xff] %v6856_v12 }
 0x506   :  { %2783 = vmatprep.subr.bf16.mxu0 %v9058_v33  ;;  %2947 = vmatprep.subr.bf16.mxu1 %v9060_v6  ;;  %9465 = vst [vmem:[#allocation257_spill] sm:$0xff] %v6810_v42  ;;  %v9069_v33 = vunpack.c.l.s8.bf16 %v6808_v21  ;;  %v9073_v43 = vunpack.c.l.s8.bf16 %v6810_v42  ;;  %v9072_v6 = vunpack.c.h.s8.bf16 %v6790_v46 }
 0x507   :  { %v2131_v8 = vadd.f32 1e-05, %v2115_v49 }
 0x509   :  { %2784 = vmatpush1.bf16.msra.mxu0 %v9061_v31  ;;  %2948 = vmatpush1.bf16.msra.mxu1 %v9065_v23  ;;  %v6826_v31 = vld [vmem:[#allocation11 + $0x398] sm:$0xff]  ;;  %v9079_v23 = vunpack.c.h.s8.bf16 %v6810_v42  ;;  %4208 = vrsqrt.f32 %v2131_v8  ;;  %v6872_v42 = vld [vmem:[#allocation11 + $0x3a0] sm:$0xff] }
 0x50a   :  { %2785 = vmatprep.subr.bf16.mxu0 %v9064_v26  ;;  %2949 = vmatprep.subr.bf16.mxu1 %v9066_v2  ;;  %9467 = vst [vmem:[#allocation259_spill] sm:$0xff] %v6826_v31  ;;  %v9077_v26 = vunpack.c.h.s8.bf16 %v6808_v21  ;;  %v9078_v2 = vunpack.c.l.s8.bf16 %v6824_v30  ;;  %v9080_v27 = vunpack.c.l.s8.bf16 %v6826_v31  ;;  %v9086_v49 = vunpack.c.h.s8.bf16 %v6826_v31  ;;  %9472 = vst [vmem:[#allocation264_spill] sm:$0xff] %v6872_v42 }
 0x50d   :  { %2786 = vmatpush1.bf16.msra.mxu0 %v9069_v33  ;;  %2950 = vmatpush1.bf16.msra.mxu1 %v9073_v43  ;;  %v6842_v33 = vld [vmem:[#allocation11 + $0x390] sm:$0xff] }
 0x50e   :  { %2787 = vmatprep.subr.bf16.mxu0 %v9072_v6  ;;  %2951 = vmatprep.subr.bf16.mxu1 %v9074_v56  ;;  %9469 = vst [vmem:[#allocation261_spill] sm:$0xff] %v6842_v33  ;;  %v9083_v6 = vunpack.c.l.s8.bf16 %v6840_v40  ;;  %v9084_v43 = vunpack.c.l.s8.bf16 %v6842_v33  ;;  %v9085_v56 = vunpack.c.h.s8.bf16 %v6824_v30  ;;  %v6888_v30 = vld [vmem:[#allocation11 + $0x3c8] sm:$0xff] }
 0x50f   :  { %9474 = vst [vmem:[#allocation266_spill] sm:$0xff] %v6888_v30 }
 0x511   :  { %2788 = vmatpush1.bf16.msra.mxu0 %v9077_v26  ;;  %2952 = vmatpush1.bf16.msra.mxu1 %v9079_v23  ;;  %v6858_v26 = vld [vmem:[#allocation11 + $0x3b8] sm:$0xff]  ;;  %v9092_v23 = vunpack.c.h.s8.bf16 %v6842_v33  ;;  %v9478_v33 = vunpack.c.l.s8.bf16 %v6888_v30 }
 0x512   :  { %2789 = vmatprep.subr.bf16.mxu0 %v9078_v2  ;;  %2953 = vmatprep.subr.bf16.mxu1 %v9080_v27  ;;  %9471 = vst [vmem:[#allocation263_spill] sm:$0xff] %v6858_v26  ;;  %v9091_v2 = vunpack.c.h.s8.bf16 %v6840_v40  ;;  %v9093_v27 = vunpack.c.l.s8.bf16 %v6856_v12  ;;  %v9094_v8 = vunpack.c.l.s8.bf16 %v6858_v26  ;;  %v9103_v31 = vunpack.c.h.s8.bf16 %v6858_v26  ;;  %v6904_v40 = vld [vmem:[#allocation11 + $0x3c0] sm:$0xff] }
 0x513   :  { %9476 = vst [vmem:[#allocation268_spill] sm:$0xff] %v6904_v40  ;;  %v4209_v21 = vpop.eup %4208 }
 0x515   :  { %2790 = vmatpush1.bf16.msra.mxu0 %v9083_v6  ;;  %2954 = vmatpush1.bf16.msra.mxu1 %v9084_v43  ;;  %v6874_v6 = vld [vmem:[#allocation11 + $0x3b0] sm:$0xff]  ;;  %v9099_v43 = vunpack.c.l.s8.bf16 %v6872_v42 }
 0x516   :  { %2791 = vmatprep.subr.bf16.mxu0 %v9085_v56  ;;  %2955 = vmatprep.subr.bf16.mxu1 %v9086_v49  ;;  %9473 = vst [vmem:[#allocation265_spill] sm:$0xff] %v6874_v6  ;;  %v9102_v56 = vunpack.c.l.s8.bf16 %v6874_v6  ;;  %v9104_v49 = vunpack.c.h.s8.bf16 %v6856_v12  ;;  %v9116_v12 = vunpack.c.h.s8.bf16 %v6888_v30 }
 0x519   :  { %2792 = vmatpush1.bf16.msra.mxu0 %v9091_v2  ;;  %2956 = vmatpush1.bf16.msra.mxu1 %v9092_v23  ;;  %v6890_v2 = vld [vmem:[#allocation11 + $0x3d8] sm:$0xff]  ;;  %v9109_v23 = vunpack.c.h.s8.bf16 %v6872_v42  ;;  %v4236_v42 = vld [vmem:[#allocation5 + $0x28] sm:$0xff] }
 0x51a   :  { %2793 = vmatprep.subr.bf16.mxu0 %v9093_v27  ;;  %2957 = vmatprep.subr.bf16.mxu1 %v9094_v8  ;;  %9475 = vst [vmem:[#allocation267_spill] sm:$0xff] %v6890_v2  ;;  %v9110_v27 = vunpack.c.h.s8.bf16 %v6874_v6  ;;  %v9479_v26 = vunpack.c.l.s8.bf16 %v6890_v2  ;;  %v6941_v6 = vld [vmem:[#allocation11 + $0x3e0] sm:$0xff] }
 0x51b   :  { %9484 = vst [vmem:[#allocation273_spill] sm:$0xff] %v6941_v6 }
 0x51d   :  { %2794 = vmatpush1.bf16.msra.mxu0 %v9099_v43  ;;  %2958 = vmatpush1.bf16.msra.mxu1 %v9102_v56  ;;  %v6906_v43 = vld [vmem:[#allocation11 + $0x3d0] sm:$0xff]  ;;  %v2123_v56 = vsub.f32 %v6619_v19, %v6776_v11  ;;  %v9117_v19 = vunpack.c.h.s8.bf16 %v6890_v2  ;;  %v4235_v11 = vld [vmem:[#allocation5 + $0x20] sm:$0xff] }
 0x51e   :  { %2795 = vmatprep.subr.bf16.mxu0 %v9104_v49  ;;  %2959 = vmatprep.subr.bf16.mxu1 %v9103_v31  ;;  %9477 = vst [vmem:[#allocation269_spill] sm:$0xff] %v6906_v43  ;;  %v9113_v49 = vunpack.c.l.s8.bf16 %v6906_v43  ;;  %v6927_v31 = vld [vmem:[#allocation11 + $0x3f8] sm:$0xff] }
 0x51f   :  { %v2147_v8 = vmul.f32 %v4209_v21, %v2123_v56  ;;  %9482 = vst [vmem:[#allocation272_spill] sm:$0xff] %v6927_v31  ;;  %v9483_v21 = vunpack.c.l.s8.bf16 %v6904_v40  ;;  %v9489_v2 = vunpack.c.l.s8.bf16 %v6927_v31 }
 0x521   :  { %2796 = vmatpush1.bf16.msra.mxu0 %v9109_v23  ;;  %2960 = vmatpush1.bf16.msra.mxu1 %v9110_v27  ;;  %v6923_v23 = vrot.slane %v4235_v11, %v6557_v5  ;;  %v6925_v27 = vld [vmem:[#allocation11 + $0x3e8] sm:$0xff] }
 0x522   :  { %2797 = vmatprep.subr.bf16.mxu0 %v9478_v33  ;;  %2961 = vmatprep.subr.bf16.mxu1 %v9479_v26  ;;  %9481 = vst [vmem:[#allocation271_spill] sm:$0xff] %v6925_v27  ;;  %v9122_v56 = vunpack.c.l.s8.bf16 %v6925_v27  ;;  %v6947_v33 = vrot.slane %v4236_v42, %v6557_v5  ;;  %v9487_v26 = vunpack.c.h.s8.bf16 %v6904_v40  ;;  %v9125_v5 = vunpack.c.h.s8.bf16 %v6927_v31 }
 0x523   :  { %9480 = vst [vmem:[#allocation270_spill] sm:$0xff] %v6923_v23 }
 0x524   :  { %9486 = vst [vmem:[#allocation275_spill] sm:$0xff] %v6947_v33 }
 0x525   :  { %2798 = vmatpush1.bf16.msra.mxu0 %v9483_v21  ;;  %2962 = vmatpush1.bf16.msra.mxu1 %v9113_v49  ;;  %v6943_v21 = vld [vmem:[#allocation11 + $0x3f0] sm:$0xff]  ;;  %v2197_v49 = vmul.f32 %v6923_v23, %v2147_v8  ;;  %v9126_v8 = vunpack.c.h.s8.bf16 %v6925_v27 }
 0x526   :  { %2799 = vmatprep.subr.bf16.mxu0 %v9116_v12  ;;  %2963 = vmatprep.subr.bf16.mxu1 %v9117_v19  ;;  %9485 = vst [vmem:[#allocation274_spill] sm:$0xff] %v6943_v21  ;;  %v9488_v12 = vunpack.c.h.s8.bf16 %v6906_v43  ;;  %v9121_v19 = vunpack.c.l.s8.bf16 %v6941_v6  ;;  %v9120_v11 = vunpack.c.l.s8.bf16 %v6943_v21 }
 0x527   :  { %v2247_v42 = vadd.f32 %v6947_v33, %v2197_v49 }
 0x529   :  { %2800 = vmatpush1.bf16.msra.mxu0 %v9487_v26  ;;  %2964 = vmatpush1.bf16.msra.mxu1 %v9488_v12  ;;  %v9123_v12 = vunpack.c.h.s8.bf16 %v6941_v6  ;;  %v9124_v26 = vunpack.c.h.s8.bf16 %v6943_v21 }
 0x52a   :  { %2801 = vmatprep.subr.bf16.mxu0 %v9122_v56  ;;  %2965 = vmatprep.subr.bf16.mxu1 %v9489_v2  ;;  %v2255_v2 = vmax.f32 %v2247_v42, 0.0  ;;  %v6981_v56 = vrot.slane %v4881_v53, 1  ;;  %v9492_v42 = vunpack.c.l.s8.bf16 %v4596_v44  ;;  %v9496_v53 = vunpack.c.h.s8.bf16 %v4596_v44 }
 0x52b   :  { %v9503_v44 = vunpack.c.h.s8.bf16 %v4610_v51 }
 0x52c   :  { %v2263_v49 = vpack.c.bf16 %v2255_v2, %v2255_v2  ;;  %v9497_v2 = vunpack.c.h.s8.bf16 %v4598_v45 }
 0x52d   :  { %2802 = vmatpush1.bf16.msra.mxu0 %v9121_v19  ;;  %2966 = vmatpush1.bf16.msra.mxu1 %v9120_v11  ;;  %v9490_v11 = vunpack.c.l.s8.bf16 %v4589_v37  ;;  %v9491_v19 = vunpack.c.l.s8.bf16 %v4591_v38 }
 0x52e   :  { %2803 = vmatprep.subr.bf16.mxu0 %v9126_v8  ;;  %2967 = vmatprep.subr.bf16.mxu1 %v9125_v5 }
 0x531   :  { %2804 = vmatpush1.bf16.msra.mxu0 %v9123_v12  ;;  %2968 = vmatpush1.bf16.msra.mxu1 %v9124_v26  ;;  %v9493_v12 = vunpack.c.l.s8.bf16 %v4598_v45  ;;  %v9504_v45 = vunpack.c.h.s8.bf16 %v4624_v57 }
 0x532   :  { %3041 = vmatprep.subr.bf16.mxu0 %v9490_v11  ;;  %3123 = vmatprep.subr.bf16.mxu1 %v9491_v19  ;;  %v9494_v11 = vunpack.c.h.s8.bf16 %v4589_v37  ;;  %v9495_v19 = vunpack.c.h.s8.bf16 %v4591_v38  ;;  %v9501_v37 = vunpack.c.l.s8.bf16 %v4626_v58  ;;  %v9502_v38 = vunpack.c.h.s8.bf16 %v4608_v50 }
 0x534   :  { %2806 = vmatmul.mubr.bf16.vlgmr.msra.gmra.mrb[16].mxu0 %v2263_v49  ;;  %2970 = vmatmul.mubr.bf16.vlgmr.msra.gmra.mrb[16].mxu1 %v2263_v49  ;;  %v9498_v49 = vunpack.c.l.s8.bf16 %v4608_v50  ;;  %v9509_v50 = vunpack.c.l.s8.bf16 %v4658_v4 }
 0x535   :  { %3042 = vmatpush1.bf16.msra.mxu0 %v9492_v42  ;;  %3073 = vmatprep.mubr.bf16.mxu0 %v6981_v56  ;;  %v9499_v42 = vunpack.c.l.s8.bf16 %v4610_v51  ;;  %v9510_v51 = vunpack.c.h.s8.bf16 %v4640_v62 }
 0x536   :  { %3124 = vmatpush1.bf16.msra.mxu1 %v9493_v12  ;;  %3155 = vmatprep.mubr.bf16.mxu1 %v6981_v56  ;;  %v9500_v12 = vunpack.c.l.s8.bf16 %v4624_v57  ;;  %v9511_v57 = vunpack.c.h.s8.bf16 %v4642_v63 }
 0x537   :  { %3043 = vmatprep.subr.bf16.mxu0 %v9494_v11  ;;  %3125 = vmatprep.subr.bf16.mxu1 %v9495_v19  ;;  %v9505_v11 = vunpack.c.h.s8.bf16 %v4626_v58  ;;  %v9506_v19 = vunpack.c.l.s8.bf16 %v4640_v62  ;;  %v9512_v58 = vunpack.c.h.s8.bf16 %v4656_v3  ;;  %v9517_v62 = vunpack.c.l.s8.bf16 %v4690_v15 }
 0x539   :  { %3044 = vmatpush1.bf16.msra.mxu0 %v9496_v53  ;;  %v9507_v53 = vunpack.c.l.s8.bf16 %v4642_v63  ;;  %v9518_v63 = vunpack.c.h.s8.bf16 %v4672_v9 }
 0x53a   :  { %3126 = vmatpush1.bf16.msra.mxu1 %v9497_v2  ;;  %3045 = vmatprep.subr.bf16.mxu0 %v9498_v49  ;;  %v9508_v2 = vunpack.c.l.s8.bf16 %v4656_v3  ;;  %v9513_v49 = vunpack.c.h.s8.bf16 %v4658_v4  ;;  %v9519_v3 = vunpack.c.h.s8.bf16 %v4674_v10  ;;  %v9520_v4 = vunpack.c.h.s8.bf16 %v4688_v14 }
 0x53b   :  { %3127 = vmatprep.subr.bf16.mxu1 %v9499_v42  ;;  %v9514_v42 = vunpack.c.l.s8.bf16 %v4672_v9  ;;  %v9525_v9 = vld [vmem:[#allocation22_spill] sm:$0xff] }
 0x53d   :  { %3046 = vmatpush1.bf16.msra.mxu0 %v9500_v12  ;;  %v9515_v12 = vunpack.c.l.s8.bf16 %v4674_v10  ;;  %v9527_v10 = vunpack.c.h.s8.bf16 %v4704_v20 }
 0x53e   :  { %3128 = vmatpush1.bf16.msra.mxu1 %v9501_v37  ;;  %3047 = vmatprep.subr.bf16.mxu0 %v9502_v38  ;;  %v9516_v37 = vunpack.c.l.s8.bf16 %v4688_v14  ;;  %v9521_v38 = vunpack.c.h.s8.bf16 %v4690_v15  ;;  %v9528_v14 = vunpack.c.h.s8.bf16 %v4706_v22  ;;  %v9529_v15 = vunpack.c.h.s8.bf16 %v4720_v32 }
 0x53f   :  { %3129 = vmatprep.subr.bf16.mxu1 %v9503_v44  ;;  %v9522_v44 = vunpack.c.l.s8.bf16 %v4704_v20  ;;  %v9537_v20 = vld [vmem:[#allocation26_spill] sm:$0xff] }
 0x541   :  { %3048 = vmatpush1.bf16.msra.mxu0 %v9504_v45  ;;  %v9523_v45 = vunpack.c.l.s8.bf16 %v4706_v22 }
 0x542   :  { %3130 = vmatpush1.bf16.msra.mxu1 %v9505_v11  ;;  %3049 = vmatprep.subr.bf16.mxu0 %v9506_v19  ;;  %v9524_v11 = vunpack.c.l.s8.bf16 %v4720_v32  ;;  %v9526_v19 = vunpack.c.l.s8.bf16 %v9525_v9 }
 0x543   :  { %3131 = vmatprep.subr.bf16.mxu1 %v9507_v53  ;;  %v9530_v53 = vunpack.c.h.s8.bf16 %v9525_v9 }
 0x545   :  { %3050 = vmatpush1.bf16.msra.mxu0 %v9508_v2  ;;  %v9531_v2 = vld [vmem:[#allocation23_spill] sm:$0xff] }
 0x546   :  { %3132 = vmatpush1.bf16.msra.mxu1 %v9509_v50  ;;  %3051 = vmatprep.subr.bf16.mxu0 %v9510_v51  ;;  %v9532_v50 = vunpack.c.l.s8.bf16 %v9531_v2  ;;  %v9533_v51 = vld [vmem:[#allocation24_spill] sm:$0xff]  ;;  %v9539_v22 = vunpack.c.h.s8.bf16 %v9531_v2 }
 0x547   :  { %3133 = vmatprep.subr.bf16.mxu1 %v9511_v57  ;;  %v9534_v57 = vunpack.c.l.s8.bf16 %v9533_v51  ;;  %v9540_v32 = vunpack.c.h.s8.bf16 %v9533_v51  ;;  %v9557_v2 = vld [vmem:[#allocation32_spill] sm:$0xff]  ;;  %v9559_v51 = vld [vmem:[#allocation33_spill] sm:$0xff] }
 0x549   :  { %3052 = vmatpush1.bf16.msra.mxu0 %v9512_v58  ;;  %v9535_v58 = vld [vmem:[#allocation25_spill] sm:$0xff] }
 0x54a   :  { %3134 = vmatpush1.bf16.msra.mxu1 %v9513_v49  ;;  %3053 = vmatprep.subr.bf16.mxu0 %v9514_v42  ;;  %v9536_v49 = vunpack.c.l.s8.bf16 %v9535_v58  ;;  %v9538_v42 = vunpack.c.l.s8.bf16 %v9537_v20 }
 0x54b   :  { %3135 = vmatprep.subr.bf16.mxu1 %v9515_v12  ;;  %v9541_v12 = vunpack.c.h.s8.bf16 %v9535_v58  ;;  %v9561_v58 = vld [vmem:[#allocation34_spill] sm:$0xff] }
 0x54d   :  { %3054 = vmatpush1.bf16.msra.mxu0 %v9516_v37  ;;  %v9542_v37 = vunpack.c.h.s8.bf16 %v9537_v20 }
 0x54e   :  { %3136 = vmatpush1.bf16.msra.mxu1 %v9517_v62  ;;  %3055 = vmatprep.subr.bf16.mxu0 %v9518_v63  ;;  %v9543_v62 = vld [vmem:[#allocation27_spill] sm:$0xff] }
 0x54f   :  { %3137 = vmatprep.subr.bf16.mxu1 %v9519_v3  ;;  %v9544_v63 = vunpack.c.l.s8.bf16 %v9543_v62  ;;  %v9545_v3 = vld [vmem:[#allocation28_spill] sm:$0xff]  ;;  %v9551_v9 = vunpack.c.h.s8.bf16 %v9543_v62  ;;  %v9568_v62 = vld [vmem:[#allocation35_spill] sm:$0xff] }
 0x551   :  { %3056 = vmatpush1.bf16.msra.mxu0 %v9520_v4  ;;  %v9546_v4 = vunpack.c.l.s8.bf16 %v9545_v3 }
 0x552   :  { %3138 = vmatpush1.bf16.msra.mxu1 %v9521_v38  ;;  %3057 = vmatprep.subr.bf16.mxu0 %v9522_v44  ;;  %v9547_v38 = vld [vmem:[#allocation29_spill] sm:$0xff] }
 0x553   :  { %3139 = vmatprep.subr.bf16.mxu1 %v9523_v45  ;;  %v9548_v44 = vunpack.c.l.s8.bf16 %v9547_v38  ;;  %v9549_v45 = vld [vmem:[#allocation30_spill] sm:$0xff] }
 0x555   :  { %3058 = vmatpush1.bf16.msra.mxu0 %v9524_v11  ;;  %v9550_v11 = vunpack.c.l.s8.bf16 %v9549_v45 }
 0x556   :  { %3140 = vmatpush1.bf16.msra.mxu1 %v9526_v19  ;;  %3059 = vmatprep.subr.bf16.mxu0 %v9527_v10  ;;  %v9552_v19 = vunpack.c.h.s8.bf16 %v9545_v3  ;;  %v9553_v10 = vunpack.c.h.s8.bf16 %v9547_v38  ;;  %v9570_v3 = vld [vmem:[#allocation36_spill] sm:$0xff]  ;;  %v9572_v38 = vld [vmem:[#allocation45_spill] sm:$0xff] }
 0x557   :  { %3141 = vmatprep.subr.bf16.mxu1 %v9528_v14  ;;  %v9554_v14 = vunpack.c.h.s8.bf16 %v9549_v45  ;;  %v9573_v45 = vld [vmem:[#allocation37_spill] sm:$0xff] }
 0x559   :  { %3060 = vmatpush1.bf16.msra.mxu0 %v9529_v15  ;;  %v9555_v15 = vld [vmem:[#allocation31_spill] sm:$0xff] }
 0x55a   :  { %3142 = vmatpush1.bf16.msra.mxu1 %v9530_v53  ;;  %3061 = vmatprep.subr.bf16.mxu0 %v9532_v50  ;;  %v9556_v53 = vunpack.c.l.s8.bf16 %v9555_v15  ;;  %v9558_v50 = vunpack.c.l.s8.bf16 %v9557_v2  ;;  %v9563_v20 = vunpack.c.h.s8.bf16 %v9555_v15  ;;  %v9579_v15 = vunpack.c.h.s8.bf16 %v9573_v45 }
 0x55b   :  { %3143 = vmatprep.subr.bf16.mxu1 %v9534_v57  ;;  %v9560_v57 = vunpack.c.l.s8.bf16 %v9559_v51 }
 0x55d   :  { %3062 = vmatpush1.bf16.msra.mxu0 %v9536_v49  ;;  %v9562_v49 = vunpack.c.l.s8.bf16 %v9561_v58 }
 0x55e   :  { %3144 = vmatpush1.bf16.msra.mxu1 %v9538_v42  ;;  %3063 = vmatprep.subr.bf16.mxu0 %v9539_v22  ;;  %v9564_v42 = vunpack.c.h.s8.bf16 %v9557_v2  ;;  %v9565_v22 = vunpack.c.h.s8.bf16 %v9559_v51  ;;  %v9581_v2 = vld [vmem:[#allocation44_spill] sm:$0xff]  ;;  %v9583_v51 = vld [vmem:[#allocation46_spill] sm:$0xff] }
 0x55f   :  { %3145 = vmatprep.subr.bf16.mxu1 %v9540_v32  ;;  %v9566_v32 = vunpack.c.h.s8.bf16 %v9561_v58  ;;  %v9585_v58 = vld [vmem:[#allocation47_spill] sm:$0xff] }
 0x561   :  { %3064 = vmatpush1.bf16.msra.mxu0 %v9541_v12  ;;  %v9567_v12 = vld [vmem:[#allocation43_spill] sm:$0xff] }
 0x562   :  { %3146 = vmatpush1.bf16.msra.mxu1 %v9542_v37  ;;  %3065 = vmatprep.subr.bf16.mxu0 %v9544_v63  ;;  %v7110_v37 = vrot.slane %v9567_v12, 1  ;;  %v9569_v63 = vunpack.c.l.s8.bf16 %v9568_v62  ;;  %v9591_v12 = vunpack.c.h.s8.bf16 %v9585_v58 }
 0x563   :  { %3147 = vmatprep.subr.bf16.mxu1 %v9546_v4  ;;  %v9571_v4 = vunpack.c.l.s8.bf16 %v9570_v3 }
 0x565   :  { %3066 = vmatpush1.bf16.msra.mxu0 %v9548_v44  ;;  %v7118_v44 = vrot.slane %v9572_v38, 1 }
 0x566   :  { %3148 = vmatpush1.bf16.msra.mxu1 %v9550_v11  ;;  %3067 = vmatprep.subr.bf16.mxu0 %v9551_v9  ;;  %v9574_v11 = vunpack.c.l.s8.bf16 %v9573_v45  ;;  %v9575_v9 = vld [vmem:[#allocation40_spill] sm:$0xff] }
 0x567   :  { %3149 = vmatprep.subr.bf16.mxu1 %v9552_v19  ;;  %v9576_v19 = vunpack.c.l.s8.bf16 %v9575_v9  ;;  %v9597_v45 = vld [vmem:[#allocation52_spill] sm:$0xff] }
 0x569   :  { %3068 = vmatpush1.bf16.msra.mxu0 %v9553_v10  ;;  %v9577_v10 = vunpack.c.h.s8.bf16 %v9568_v62 }
 0x56a   :  { %3150 = vmatpush1.bf16.msra.mxu1 %v9554_v14  ;;  %3069 = vmatprep.subr.bf16.mxu0 %v9556_v53  ;;  %v9578_v14 = vunpack.c.h.s8.bf16 %v9570_v3  ;;  %v9580_v53 = vunpack.c.h.s8.bf16 %v9575_v9  ;;  %v9599_v9 = vld [vmem:[#allocation53_spill] sm:$0xff] }
 0x56b   :  { %3151 = vmatprep.subr.bf16.mxu1 %v9558_v50  ;;  %v9582_v50 = vunpack.c.l.s8.bf16 %v9581_v2 }
 0x56d   :  { %3070 = vmatpush1.bf16.msra.mxu0 %v9560_v57  ;;  %v9584_v57 = vunpack.c.l.s8.bf16 %v9583_v51 }
 0x56e   :  { %3152 = vmatpush1.bf16.msra.mxu1 %v9562_v49  ;;  %3071 = vmatprep.subr.bf16.mxu0 %v9563_v20  ;;  %v9586_v49 = vunpack.c.l.s8.bf16 %v9585_v58  ;;  %v9587_v20 = vld [vmem:[#allocation48_spill] sm:$0xff] }
 0x56f   :  { %3153 = vmatprep.subr.bf16.mxu1 %v9564_v42  ;;  %v9588_v42 = vunpack.c.l.s8.bf16 %v9587_v20  ;;  %v9592_v62 = vunpack.c.h.s8.bf16 %v9587_v20  ;;  %v9609_v58 = vld [vmem:[#allocation56_spill] sm:$0xff]  ;;  %v9611_v20 = vld [vmem:[#allocation57_spill] sm:$0xff] }
 0x571   :  { %3072 = vmatpush1.bf16.msra.mxu0 %v9565_v22  ;;  %v9589_v22 = vunpack.c.h.s8.bf16 %v9581_v2  ;;  %v9605_v2 = vld [vmem:[#allocation54_spill] sm:$0xff] }
 0x572   :  { %3154 = vmatpush1.bf16.msra.mxu1 %v9566_v32  ;;  %3082 = vmatprep.subr.bf16.mxu0 %v9569_v63  ;;  %v9590_v32 = vunpack.c.h.s8.bf16 %v9583_v51  ;;  %v9593_v63 = vld [vmem:[#allocation50_spill] sm:$0xff]  ;;  %v9607_v51 = vld [vmem:[#allocation55_spill] sm:$0xff] }
 0x573   :  { %3164 = vmatprep.subr.bf16.mxu1 %v9571_v4  ;;  %v9594_v3 = vunpack.c.l.s8.bf16 %v9593_v63  ;;  %v9595_v4 = vld [vmem:[#allocation51_spill] sm:$0xff] }
 0x574   :  { %3074 = vmatmul.mubr.bf16.vlgmr.msra.gmra.mrb[20].mxu0 %v7110_v37  ;;  %v9596_v38 = vunpack.c.l.s8.bf16 %v9595_v4 }
 0x575   :  { %3156 = vmatmul.mubr.bf16.vlgmr.msra.gmra.mrb[20].mxu1 %v7110_v37  ;;  %3083 = vmatpush1.bf16.msra.mxu0 %v9574_v11  ;;  %v9598_v11 = vunpack.c.l.s8.bf16 %v9597_v45 }
 0x576   :  { %3114 = vmatprep.mubr.bf16.mxu0 %v7118_v44  ;;  %3165 = vmatpush1.bf16.msra.mxu1 %v9576_v19  ;;  %v9600_v19 = vunpack.c.l.s8.bf16 %v9599_v9 }
 0x577   :  { %3196 = vmatprep.mubr.bf16.mxu1 %v7118_v44  ;;  %3084 = vmatprep.subr.bf16.mxu0 %v9577_v10  ;;  %v9601_v10 = vunpack.c.h.s8.bf16 %v9593_v63  ;;  %v9617_v63 = vld [vmem:[#allocation58_spill] sm:$0xff] }
 0x578   :  { %3166 = vmatprep.subr.bf16.mxu1 %v9578_v14  ;;  %v9602_v14 = vunpack.c.h.s8.bf16 %v9595_v4  ;;  %v9619_v4 = vld [vmem:[#allocation59_spill] sm:$0xff] }
 0x579   :  { %3085 = vmatpush1.bf16.msra.mxu0 %v9579_v15  ;;  %v9603_v15 = vunpack.c.h.s8.bf16 %v9597_v45  ;;  %v9621_v45 = vld [vmem:[#allocation60_spill] sm:$0xff] }
 0x57a   :  { %3167 = vmatpush1.bf16.msra.mxu1 %v9580_v53  ;;  %3086 = vmatprep.subr.bf16.mxu0 %v9582_v50  ;;  %v9604_v53 = vunpack.c.h.s8.bf16 %v9599_v9  ;;  %v9606_v50 = vunpack.c.l.s8.bf16 %v9605_v2  ;;  %v9623_v9 = vld [vmem:[#allocation61_spill] sm:$0xff] }
 0x57b   :  { %3168 = vmatprep.subr.bf16.mxu1 %v9584_v57  ;;  %v9608_v57 = vunpack.c.l.s8.bf16 %v9607_v51 }
 0x57d   :  { %3087 = vmatpush1.bf16.msra.mxu0 %v9586_v49  ;;  %v9610_v49 = vunpack.c.l.s8.bf16 %v9609_v58 }
 0x57e   :  { %3169 = vmatpush1.bf16.msra.mxu1 %v9588_v42  ;;  %3088 = vmatprep.subr.bf16.mxu0 %v9589_v22  ;;  %v9612_v42 = vunpack.c.l.s8.bf16 %v9611_v20  ;;  %v9613_v22 = vunpack.c.h.s8.bf16 %v9605_v2  ;;  %v9629_v2 = vld [vmem:[#allocation62_spill] sm:$0xff] }
 0x57f   :  { %3170 = vmatprep.subr.bf16.mxu1 %v9590_v32  ;;  %v9614_v32 = vunpack.c.h.s8.bf16 %v9607_v51  ;;  %v9631_v51 = vld [vmem:[#allocation63_spill] sm:$0xff] }
 0x581   :  { %3089 = vmatpush1.bf16.msra.mxu0 %v9591_v12  ;;  %v9615_v12 = vunpack.c.h.s8.bf16 %v9609_v58  ;;  %v9633_v58 = vld [vmem:[#allocation64_spill] sm:$0xff] }
 0x582   :  { %3171 = vmatpush1.bf16.msra.mxu1 %v9592_v62  ;;  %3090 = vmatprep.subr.bf16.mxu0 %v9594_v3  ;;  %v9616_v62 = vunpack.c.h.s8.bf16 %v9611_v20  ;;  %v9618_v3 = vunpack.c.l.s8.bf16 %v9617_v63  ;;  %v9635_v20 = vld [vmem:[#allocation65_spill] sm:$0xff] }
 0x583   :  { %3172 = vmatprep.subr.bf16.mxu1 %v9596_v38  ;;  %v9620_v38 = vunpack.c.l.s8.bf16 %v9619_v4 }
 0x585   :  { %3091 = vmatpush1.bf16.msra.mxu0 %v9598_v11  ;;  %v9622_v11 = vunpack.c.l.s8.bf16 %v9621_v45 }
 0x586   :  { %3173 = vmatpush1.bf16.msra.mxu1 %v9600_v19  ;;  %3092 = vmatprep.subr.bf16.mxu0 %v9601_v10  ;;  %v9624_v19 = vunpack.c.l.s8.bf16 %v9623_v9  ;;  %v9625_v10 = vunpack.c.h.s8.bf16 %v9617_v63  ;;  %v9641_v63 = vld [vmem:[#allocation66_spill] sm:$0xff] }
 0x587   :  { %3174 = vmatprep.subr.bf16.mxu1 %v9602_v14  ;;  %v9626_v14 = vunpack.c.h.s8.bf16 %v9619_v4  ;;  %v9643_v4 = vld [vmem:[#allocation67_spill] sm:$0xff] }
 0x589   :  { %3093 = vmatpush1.bf16.msra.mxu0 %v9603_v15  ;;  %v9627_v15 = vunpack.c.h.s8.bf16 %v9621_v45  ;;  %v9645_v45 = vld [vmem:[#allocation68_spill] sm:$0xff] }
 0x58a   :  { %3175 = vmatpush1.bf16.msra.mxu1 %v9604_v53  ;;  %3094 = vmatprep.subr.bf16.mxu0 %v9606_v50  ;;  %v9628_v53 = vunpack.c.h.s8.bf16 %v9623_v9  ;;  %v9630_v50 = vunpack.c.l.s8.bf16 %v9629_v2  ;;  %v9647_v9 = vld [vmem:[#allocation69_spill] sm:$0xff] }
 0x58b   :  { %3176 = vmatprep.subr.bf16.mxu1 %v9608_v57  ;;  %v9632_v57 = vunpack.c.l.s8.bf16 %v9631_v51 }
 0x58d   :  { %3095 = vmatpush1.bf16.msra.mxu0 %v9610_v49  ;;  %v9634_v49 = vunpack.c.l.s8.bf16 %v9633_v58 }
 0x58e   :  { %3177 = vmatpush1.bf16.msra.mxu1 %v9612_v42  ;;  %3096 = vmatprep.subr.bf16.mxu0 %v9613_v22  ;;  %v9636_v42 = vunpack.c.l.s8.bf16 %v9635_v20  ;;  %v9637_v22 = vunpack.c.h.s8.bf16 %v9629_v2  ;;  %v9653_v2 = vld [vmem:[#allocation70_spill] sm:$0xff] }
 0x58f   :  { %3178 = vmatprep.subr.bf16.mxu1 %v9614_v32  ;;  %v9638_v32 = vunpack.c.h.s8.bf16 %v9631_v51  ;;  %v9655_v51 = vld [vmem:[#allocation71_spill] sm:$0xff] }
 0x591   :  { %3097 = vmatpush1.bf16.msra.mxu0 %v9615_v12  ;;  %v9639_v12 = vunpack.c.h.s8.bf16 %v9633_v58  ;;  %v9657_v58 = vld [vmem:[#allocation72_spill] sm:$0xff] }
 0x592   :  { %3179 = vmatpush1.bf16.msra.mxu1 %v9616_v62  ;;  %3098 = vmatprep.subr.bf16.mxu0 %v9618_v3  ;;  %v9640_v62 = vunpack.c.h.s8.bf16 %v9635_v20  ;;  %v9642_v3 = vunpack.c.l.s8.bf16 %v9641_v63  ;;  %v9659_v20 = vld [vmem:[#allocation73_spill] sm:$0xff] }
 0x593   :  { %3180 = vmatprep.subr.bf16.mxu1 %v9620_v38  ;;  %v9644_v38 = vunpack.c.l.s8.bf16 %v9643_v4 }
 0x595   :  { %3099 = vmatpush1.bf16.msra.mxu0 %v9622_v11  ;;  %v9646_v11 = vunpack.c.l.s8.bf16 %v9645_v45 }
 0x596   :  { %3181 = vmatpush1.bf16.msra.mxu1 %v9624_v19  ;;  %3100 = vmatprep.subr.bf16.mxu0 %v9625_v10  ;;  %v9648_v19 = vunpack.c.l.s8.bf16 %v9647_v9  ;;  %v9649_v10 = vunpack.c.h.s8.bf16 %v9641_v63  ;;  %v9665_v63 = vld [vmem:[#allocation78_spill] sm:$0xff] }
 0x597   :  { %3182 = vmatprep.subr.bf16.mxu1 %v9626_v14  ;;  %v9650_v14 = vunpack.c.h.s8.bf16 %v9643_v4  ;;  %v9666_v4 = vld [vmem:[#allocation74_spill] sm:$0xff] }
 0x599   :  { %3101 = vmatpush1.bf16.msra.mxu0 %v9627_v15  ;;  %v9651_v15 = vunpack.c.h.s8.bf16 %v9645_v45  ;;  %v9668_v45 = vld [vmem:[#allocation75_spill] sm:$0xff] }
 0x59a   :  { %3183 = vmatpush1.bf16.msra.mxu1 %v9628_v53  ;;  %3102 = vmatprep.subr.bf16.mxu0 %v9630_v50  ;;  %v9652_v53 = vunpack.c.h.s8.bf16 %v9647_v9  ;;  %v9654_v50 = vunpack.c.l.s8.bf16 %v9653_v2  ;;  %v9670_v9 = vld [vmem:[#allocation76_spill] sm:$0xff] }
 0x59b   :  { %3184 = vmatprep.subr.bf16.mxu1 %v9632_v57  ;;  %v9656_v57 = vunpack.c.l.s8.bf16 %v9655_v51 }
 0x59d   :  { %3103 = vmatpush1.bf16.msra.mxu0 %v9634_v49  ;;  %v9658_v49 = vunpack.c.l.s8.bf16 %v9657_v58 }
 0x59e   :  { %3185 = vmatpush1.bf16.msra.mxu1 %v9636_v42  ;;  %3104 = vmatprep.subr.bf16.mxu0 %v9637_v22  ;;  %v9660_v42 = vunpack.c.l.s8.bf16 %v9659_v20  ;;  %v9661_v22 = vunpack.c.h.s8.bf16 %v9653_v2  ;;  %v9676_v2 = vunpack.c.h.s8.bf16 %v9670_v9 }
 0x59f   :  { %3186 = vmatprep.subr.bf16.mxu1 %v9638_v32  ;;  %v9662_v32 = vunpack.c.h.s8.bf16 %v9655_v51  ;;  %v9678_v51 = vld [vmem:[#allocation79_spill] sm:$0xff] }
 0x5a1   :  { %3105 = vmatpush1.bf16.msra.mxu0 %v9639_v12  ;;  %v9663_v12 = vunpack.c.h.s8.bf16 %v9657_v58  ;;  %v9680_v58 = vld [vmem:[#allocation80_spill] sm:$0xff] }
 0x5a2   :  { %3187 = vmatpush1.bf16.msra.mxu1 %v9640_v62  ;;  %3106 = vmatprep.subr.bf16.mxu0 %v9642_v3  ;;  %v9664_v62 = vunpack.c.h.s8.bf16 %v9659_v20  ;;  %v7248_v3 = vrot.slane %v9665_v63, 1  ;;  %v9682_v20 = vld [vmem:[#allocation81_spill] sm:$0xff] }
 0x5a3   :  { %3188 = vmatprep.subr.bf16.mxu1 %v9644_v38  ;;  %v9667_v38 = vunpack.c.l.s8.bf16 %v9666_v4 }
 0x5a5   :  { %3107 = vmatpush1.bf16.msra.mxu0 %v9646_v11  ;;  %v9669_v11 = vunpack.c.l.s8.bf16 %v9668_v45 }
 0x5a6   :  { %3189 = vmatpush1.bf16.msra.mxu1 %v9648_v19  ;;  %3108 = vmatprep.subr.bf16.mxu0 %v9649_v10  ;;  %v9671_v19 = vunpack.c.l.s8.bf16 %v9670_v9  ;;  %v9672_v10 = vld [vmem:[#allocation77_spill] sm:$0xff] }
 0x5a7   :  { %3190 = vmatprep.subr.bf16.mxu1 %v9650_v14  ;;  %v9673_v14 = vunpack.c.l.s8.bf16 %v9672_v10  ;;  %v9694_v9 = vld [vmem:[#allocation85_spill] sm:$0xff] }
 0x5a9   :  { %3109 = vmatpush1.bf16.msra.mxu0 %v9651_v15  ;;  %v9674_v15 = vunpack.c.h.s8.bf16 %v9666_v4  ;;  %v9690_v4 = vld [vmem:[#allocation83_spill] sm:$0xff] }
 0x5aa   :  { %3191 = vmatpush1.bf16.msra.mxu1 %v9652_v53  ;;  %3110 = vmatprep.subr.bf16.mxu0 %v9654_v50  ;;  %v9675_v53 = vunpack.c.h.s8.bf16 %v9668_v45  ;;  %v9677_v50 = vunpack.c.h.s8.bf16 %v9672_v10  ;;  %v9692_v45 = vld [vmem:[#allocation84_spill] sm:$0xff]  ;;  %v9696_v10 = vld [vmem:[#allocation86_spill] sm:$0xff] }
 0x5ab   :  { %3192 = vmatprep.subr.bf16.mxu1 %v9656_v57  ;;  %v9679_v57 = vunpack.c.l.s8.bf16 %v9678_v51 }
 0x5ad   :  { %3111 = vmatpush1.bf16.msra.mxu0 %v9658_v49  ;;  %v9681_v49 = vunpack.c.l.s8.bf16 %v9680_v58 }
 0x5ae   :  { %3193 = vmatpush1.bf16.msra.mxu1 %v9660_v42  ;;  %3112 = vmatprep.subr.bf16.mxu0 %v9661_v22  ;;  %v9684_v42 = vld [vmem:[#allocation82_spill] sm:$0xff] }
 0x5af   :  { %3194 = vmatprep.subr.bf16.mxu1 %v9662_v32  ;;  %v9685_v22 = vunpack.c.l.s8.bf16 %v9684_v42  ;;  %v9686_v32 = vunpack.c.h.s8.bf16 %v9678_v51  ;;  %v9689_v63 = vunpack.c.h.s8.bf16 %v9684_v42  ;;  %v9702_v51 = vld [vmem:[#allocation87_spill] sm:$0xff]  ;;  %v9708_v42 = vld [vmem:[#allocation90_spill] sm:$0xff] }
 0x5b1   :  { %3113 = vmatpush1.bf16.msra.mxu0 %v9663_v12  ;;  %v9687_v12 = vunpack.c.h.s8.bf16 %v9680_v58  ;;  %v9704_v58 = vld [vmem:[#allocation88_spill] sm:$0xff] }
 0x5b2   :  { %3195 = vmatpush1.bf16.msra.mxu1 %v9664_v62  ;;  %3205 = vmatprep.subr.bf16.mxu0 %v9667_v38  ;;  %v9688_v62 = vunpack.c.h.s8.bf16 %v9682_v20  ;;  %v9691_v38 = vunpack.c.l.s8.bf16 %v9690_v4 }
 0x5b3   :  { %3287 = vmatprep.subr.bf16.mxu1 %v9669_v11  ;;  %v9693_v11 = vunpack.c.l.s8.bf16 %v9692_v45 }
 0x5b4   :  { %3115 = vmatmul.mubr.bf16.vlgmr.msra.gmra.mrb[20].mxu0 %v7248_v3 }
 0x5b5   :  { %3197 = vmatmul.mubr.bf16.vlgmr.msra.gmra.mrb[20].mxu1 %v7248_v3  ;;  %3206 = vmatpush1.bf16.msra.mxu0 %v9671_v19  ;;  %v9695_v19 = vunpack.c.l.s8.bf16 %v9694_v9 }
 0x5b6   :  { %3237 = vmatprep.mubr.bf16.mxu0 %v6981_v56  ;;  %3288 = vmatpush1.bf16.msra.mxu1 %v9673_v14  ;;  %v9697_v14 = vunpack.c.l.s8.bf16 %v9696_v10 }
 0x5b7   :  { %3319 = vmatprep.mubr.bf16.mxu1 %v6981_v56  ;;  %3207 = vmatprep.subr.bf16.mxu0 %v9674_v15  ;;  %v9683_v56 = vunpack.c.l.s8.bf16 %v9682_v20  ;;  %v9698_v15 = vunpack.c.h.s8.bf16 %v9690_v4  ;;  %v9706_v20 = vld [vmem:[#allocation89_spill] sm:$0xff]  ;;  %v9714_v4 = vld [vmem:[#allocation91_spill] sm:$0xff] }
 0x5b8   :  { %3289 = vmatprep.subr.bf16.mxu1 %v9675_v53  ;;  %v9699_v53 = vunpack.c.h.s8.bf16 %v9692_v45  ;;  %v9716_v45 = vld [vmem:[#allocation92_spill] sm:$0xff] }
 0x5b9   :  { %3208 = vmatpush1.bf16.msra.mxu0 %v9676_v2  ;;  %v9700_v2 = vunpack.c.h.s8.bf16 %v9694_v9  ;;  %v9718_v9 = vld [vmem:[#allocation93_spill] sm:$0xff] }
 0x5ba   :  { %3290 = vmatpush1.bf16.msra.mxu1 %v9677_v50  ;;  %3209 = vmatprep.subr.bf16.mxu0 %v9679_v57  ;;  %v9701_v50 = vunpack.c.h.s8.bf16 %v9696_v10  ;;  %v9703_v57 = vunpack.c.l.s8.bf16 %v9702_v51  ;;  %v9720_v10 = vld [vmem:[#allocation94_spill] sm:$0xff] }
 0x5bb   :  { %3291 = vmatprep.subr.bf16.mxu1 %v9681_v49  ;;  %v9705_v49 = vunpack.c.l.s8.bf16 %v9704_v58 }
 0x5bd   :  { %3210 = vmatpush1.bf16.msra.mxu0 %v9683_v56  ;;  %v9707_v56 = vunpack.c.l.s8.bf16 %v9706_v20 }
 0x5be   :  { %3292 = vmatpush1.bf16.msra.mxu1 %v9685_v22  ;;  %3211 = vmatprep.subr.bf16.mxu0 %v9686_v32  ;;  %v9709_v22 = vunpack.c.l.s8.bf16 %v9708_v42  ;;  %v9710_v32 = vunpack.c.h.s8.bf16 %v9702_v51  ;;  %v9726_v51 = vld [vmem:[#allocation95_spill] sm:$0xff] }
 0x5bf   :  { %3293 = vmatprep.subr.bf16.mxu1 %v9687_v12  ;;  %v9711_v12 = vunpack.c.h.s8.bf16 %v9704_v58  ;;  %v9728_v58 = vld [vmem:[#allocation96_spill] sm:$0xff] }
 0x5c1   :  { %3212 = vmatpush1.bf16.msra.mxu0 %v9688_v62  ;;  %v9712_v62 = vunpack.c.h.s8.bf16 %v9706_v20  ;;  %v9730_v20 = vld [vmem:[#allocation97_spill] sm:$0xff] }
 0x5c2   :  { %3294 = vmatpush1.bf16.msra.mxu1 %v9689_v63  ;;  %3213 = vmatprep.subr.bf16.mxu0 %v9691_v38  ;;  %v9713_v63 = vunpack.c.h.s8.bf16 %v9708_v42  ;;  %v9715_v38 = vunpack.c.l.s8.bf16 %v9714_v4  ;;  %v9732_v42 = vld [vmem:[#allocation98_spill] sm:$0xff] }
 0x5c3   :  { %3295 = vmatprep.subr.bf16.mxu1 %v9693_v11  ;;  %v9717_v11 = vunpack.c.l.s8.bf16 %v9716_v45 }
 0x5c5   :  { %3214 = vmatpush1.bf16.msra.mxu0 %v9695_v19  ;;  %v9719_v19 = vunpack.c.l.s8.bf16 %v9718_v9 }
 0x5c6   :  { %3296 = vmatpush1.bf16.msra.mxu1 %v9697_v14  ;;  %3215 = vmatprep.subr.bf16.mxu0 %v9698_v15  ;;  %v9721_v14 = vunpack.c.l.s8.bf16 %v9720_v10  ;;  %v9722_v15 = vunpack.c.h.s8.bf16 %v9714_v4  ;;  %v9738_v4 = vld [vmem:[#allocation99_spill] sm:$0xff] }
 0x5c7   :  { %3297 = vmatprep.subr.bf16.mxu1 %v9699_v53  ;;  %v9723_v53 = vunpack.c.h.s8.bf16 %v9716_v45  ;;  %v9740_v45 = vld [vmem:[#allocation100_spill] sm:$0xff] }
 0x5c9   :  { %3216 = vmatpush1.bf16.msra.mxu0 %v9700_v2  ;;  %v9724_v2 = vunpack.c.h.s8.bf16 %v9718_v9  ;;  %v9742_v9 = vld [vmem:[#allocation101_spill] sm:$0xff] }
 0x5ca   :  { %3298 = vmatpush1.bf16.msra.mxu1 %v9701_v50  ;;  %3217 = vmatprep.subr.bf16.mxu0 %v9703_v57  ;;  %v9725_v50 = vunpack.c.h.s8.bf16 %v9720_v10  ;;  %v9727_v57 = vunpack.c.l.s8.bf16 %v9726_v51  ;;  %v9744_v10 = vld [vmem:[#allocation102_spill] sm:$0xff] }
 0x5cb   :  { %3299 = vmatprep.subr.bf16.mxu1 %v9705_v49  ;;  %v9729_v49 = vunpack.c.l.s8.bf16 %v9728_v58 }
 0x5cd   :  { %3218 = vmatpush1.bf16.msra.mxu0 %v9707_v56  ;;  %v9731_v56 = vunpack.c.l.s8.bf16 %v9730_v20 }
 0x5ce   :  { %3300 = vmatpush1.bf16.msra.mxu1 %v9709_v22  ;;  %3219 = vmatprep.subr.bf16.mxu0 %v9710_v32  ;;  %v9733_v22 = vunpack.c.l.s8.bf16 %v9732_v42  ;;  %v9734_v32 = vunpack.c.h.s8.bf16 %v9726_v51  ;;  %v9750_v51 = vld [vmem:[#allocation103_spill] sm:$0xff] }
 0x5cf   :  { %3301 = vmatprep.subr.bf16.mxu1 %v9711_v12  ;;  %v9735_v12 = vunpack.c.h.s8.bf16 %v9728_v58  ;;  %v9752_v58 = vld [vmem:[#allocation104_spill] sm:$0xff] }
 0x5d1   :  { %3220 = vmatpush1.bf16.msra.mxu0 %v9712_v62  ;;  %v9736_v62 = vunpack.c.h.s8.bf16 %v9730_v20  ;;  %v9754_v20 = vld [vmem:[#allocation105_spill] sm:$0xff] }
 0x5d2   :  { %3302 = vmatpush1.bf16.msra.mxu1 %v9713_v63  ;;  %3221 = vmatprep.subr.bf16.mxu0 %v9715_v38  ;;  %v9737_v63 = vunpack.c.h.s8.bf16 %v9732_v42  ;;  %v9739_v38 = vunpack.c.l.s8.bf16 %v9738_v4  ;;  %v9756_v42 = vld [vmem:[#allocation106_spill] sm:$0xff] }
 0x5d3   :  { %3303 = vmatprep.subr.bf16.mxu1 %v9717_v11  ;;  %v9741_v11 = vunpack.c.l.s8.bf16 %v9740_v45 }
 0x5d5   :  { %3222 = vmatpush1.bf16.msra.mxu0 %v9719_v19  ;;  %v9743_v19 = vunpack.c.l.s8.bf16 %v9742_v9 }
 0x5d6   :  { %3304 = vmatpush1.bf16.msra.mxu1 %v9721_v14  ;;  %3223 = vmatprep.subr.bf16.mxu0 %v9722_v15  ;;  %v9745_v14 = vunpack.c.l.s8.bf16 %v9744_v10  ;;  %v9746_v15 = vunpack.c.h.s8.bf16 %v9738_v4  ;;  %v9762_v4 = vld [vmem:[#allocation107_spill] sm:$0xff] }
 0x5d7   :  { %3305 = vmatprep.subr.bf16.mxu1 %v9723_v53  ;;  %v9747_v53 = vunpack.c.h.s8.bf16 %v9740_v45  ;;  %v9764_v45 = vld [vmem:[#allocation108_spill] sm:$0xff] }
 0x5d9   :  { %3224 = vmatpush1.bf16.msra.mxu0 %v9724_v2  ;;  %v9748_v2 = vunpack.c.h.s8.bf16 %v9742_v9  ;;  %v9766_v9 = vld [vmem:[#allocation109_spill] sm:$0xff] }
 0x5da   :  { %3306 = vmatpush1.bf16.msra.mxu1 %v9725_v50  ;;  %3225 = vmatprep.subr.bf16.mxu0 %v9727_v57  ;;  %v9749_v50 = vunpack.c.h.s8.bf16 %v9744_v10  ;;  %v9751_v57 = vunpack.c.l.s8.bf16 %v9750_v51  ;;  %v9768_v10 = vld [vmem:[#allocation110_spill] sm:$0xff] }
 0x5db   :  { %3307 = vmatprep.subr.bf16.mxu1 %v9729_v49  ;;  %v9753_v49 = vunpack.c.l.s8.bf16 %v9752_v58 }
 0x5dd   :  { %3226 = vmatpush1.bf16.msra.mxu0 %v9731_v56  ;;  %v9755_v56 = vunpack.c.l.s8.bf16 %v9754_v20 }
 0x5de   :  { %3308 = vmatpush1.bf16.msra.mxu1 %v9733_v22  ;;  %3227 = vmatprep.subr.bf16.mxu0 %v9734_v32  ;;  %v9757_v22 = vunpack.c.l.s8.bf16 %v9756_v42  ;;  %v9758_v32 = vunpack.c.h.s8.bf16 %v9750_v51 }
 0x5df   :  { %3309 = vmatprep.subr.bf16.mxu1 %v9735_v12  ;;  %v9759_v12 = vunpack.c.h.s8.bf16 %v9752_v58 }
 0x5e1   :  { %3228 = vmatpush1.bf16.msra.mxu0 %v9736_v62  ;;  %v9760_v62 = vunpack.c.h.s8.bf16 %v9754_v20  ;;  %v9780_v20 = vld [vmem:[#allocation114_spill] sm:$0xff] }
 0x5e2   :  { %3310 = vmatpush1.bf16.msra.mxu1 %v9737_v63  ;;  %3229 = vmatprep.subr.bf16.mxu0 %v9739_v38  ;;  %v9761_v63 = vunpack.c.h.s8.bf16 %v9756_v42  ;;  %v9763_v38 = vunpack.c.l.s8.bf16 %v9762_v4 }
 0x5e3   :  { %3311 = vmatprep.subr.bf16.mxu1 %v9741_v11  ;;  %v9765_v11 = vunpack.c.l.s8.bf16 %v9764_v45 }
 0x5e5   :  { %3230 = vmatpush1.bf16.msra.mxu0 %v9743_v19  ;;  %v9767_v19 = vunpack.c.l.s8.bf16 %v9766_v9 }
 0x5e6   :  { %3312 = vmatpush1.bf16.msra.mxu1 %v9745_v14  ;;  %3231 = vmatprep.subr.bf16.mxu0 %v9746_v15  ;;  %v9769_v14 = vunpack.c.l.s8.bf16 %v9768_v10  ;;  %v9770_v15 = vunpack.c.h.s8.bf16 %v9762_v4 }
 0x5e7   :  { %3313 = vmatprep.subr.bf16.mxu1 %v9747_v53  ;;  %v9771_v53 = vunpack.c.h.s8.bf16 %v9764_v45 }
 0x5e9   :  { %3232 = vmatpush1.bf16.msra.mxu0 %v9748_v2  ;;  %v9772_v2 = vunpack.c.h.s8.bf16 %v9766_v9 }
 0x5ea   :  { %3314 = vmatpush1.bf16.msra.mxu1 %v9749_v50  ;;  %3233 = vmatprep.subr.bf16.mxu0 %v9751_v57  ;;  %v9774_v50 = vld [vmem:[#allocation111_spill] sm:$0xff]  ;;  %v9776_v57 = vld [vmem:[#allocation112_spill] sm:$0xff] }
 0x5eb   :  { %3315 = vmatprep.subr.bf16.mxu1 %v9753_v49  ;;  %v9775_v51 = vunpack.c.l.s8.bf16 %v9774_v50  ;;  %v9777_v58 = vunpack.c.l.s8.bf16 %v9776_v57  ;;  %v9778_v49 = vld [vmem:[#allocation113_spill] sm:$0xff]  ;;  %v9782_v42 = vunpack.c.h.s8.bf16 %v9774_v50 }
 0x5ed   :  { %3234 = vmatpush1.bf16.msra.mxu0 %v9755_v56  ;;  %v9781_v56 = vunpack.c.l.s8.bf16 %v9780_v20 }
 0x5ee   :  { %3316 = vmatpush1.bf16.msra.mxu1 %v9757_v22  ;;  %3235 = vmatprep.subr.bf16.mxu0 %v9758_v32  ;;  %v9783_v22 = vunpack.c.h.s8.bf16 %v9776_v57  ;;  %v9784_v32 = vunpack.c.h.s8.bf16 %v9778_v49 }
 0x5ef   :  { %3317 = vmatprep.subr.bf16.mxu1 %v9759_v12  ;;  %v2265_v12 = vld [vmem:[#allocation5 + $0x30] sm:$0xf] }
 0x5f0   :  { %v7423_v9 = vrot.slane %v2265_v12, %v4566_v25 }
 0x5f1   :  { %3236 = vmatpush1.bf16.msra.mxu0 %v9760_v62  ;;  %v9785_v62 = vunpack.c.h.s8.bf16 %v9780_v20 }
 0x5f2   :  { %3318 = vmatpush1.bf16.msra.mxu1 %v9761_v63  ;;  %3246 = vmatprep.subr.bf16.mxu0 %v9763_v38  ;;  %v9786_v63 = vld [vmem:[#allocation115_spill] sm:$0xff]  ;;  %v9788_v38 = vld [vmem:[#allocation116_spill] sm:$0xff]  ;;  %9790 = vst [vmem:[#allocation22_spill] sm:$0xff] %v7423_v9 }
 0x5f3   :  { %3328 = vmatprep.subr.bf16.mxu1 %v9765_v11  ;;  %v9787_v4 = vunpack.c.l.s8.bf16 %v9786_v63  ;;  %v9789_v45 = vunpack.c.l.s8.bf16 %v9788_v38  ;;  %v3003_v11 = vld [vmem:[#allocation5 + $0x34] sm:$0xf] }
 0x5f4   :  { %3238 = vmatmul.mubr.bf16.vlgmr.msra.gmra.mrb[24].mxu0 %v7110_v37 }
 0x5f5   :  { %3320 = vmatmul.mubr.bf16.vlgmr.msra.gmra.mrb[24].mxu1 %v7110_v37  ;;  %3247 = vmatpush1.bf16.msra.mxu0 %v9767_v19  ;;  %v9773_v37 = vunpack.c.h.s8.bf16 %v9768_v10  ;;  %v9791_v19 = vld [vmem:[#allocation19_spill] sm:$0xff] }
 0x5f6   :  { %3278 = vmatprep.mubr.bf16.mxu0 %v7118_v44  ;;  %3329 = vmatpush1.bf16.msra.mxu1 %v9769_v14  ;;  %v7426_v10 = vrot.slane %v2265_v12, %v9791_v19  ;;  %v9793_v14 = vld [vmem:[#allocation117_spill] sm:$0xff] }
 0x5f7   :  { %3360 = vmatprep.mubr.bf16.mxu1 %v7118_v44  ;;  %3248 = vmatprep.subr.bf16.mxu0 %v9770_v15  ;;  %v9779_v44 = vunpack.c.l.s8.bf16 %v9778_v49  ;;  %v9794_v15 = vunpack.c.l.s8.bf16 %v9793_v14  ;;  %v7442_v49 = vrot.slane %v3003_v11, %v9791_v19 }
 0x5f8   :  { %3330 = vmatprep.subr.bf16.mxu1 %v9771_v53  ;;  %9792 = vst [vmem:[#allocation23_spill] sm:$0xff] %v7426_v10  ;;  %v9795_v53 = vld [vmem:[#allocation20_spill] sm:$0xff] }
 0x5f9   :  { %3249 = vmatpush1.bf16.msra.mxu0 %v9772_v2  ;;  %v7431_v2 = vrot.slane %v2265_v12, %v9795_v53  ;;  %9802 = vst [vmem:[#allocation27_spill] sm:$0xff] %v7442_v49 }
 0x5fa   :  { %3331 = vmatpush1.bf16.msra.mxu1 %v9773_v37  ;;  %3250 = vmatprep.subr.bf16.mxu0 %v9775_v51  ;;  %v9797_v37 = vld [vmem:[#allocation21_spill] sm:$0xff]  ;;  %v9799_v51 = vld [vmem:[#allocation118_spill] sm:$0xff] }
 0x5fb   :  { %3332 = vmatprep.subr.bf16.mxu1 %v9777_v58  ;;  %9796 = vst [vmem:[#allocation24_spill] sm:$0xff] %v7431_v2  ;;  %v7434_v50 = vrot.slane %v2265_v12, %v9797_v37  ;;  %v9800_v57 = vunpack.c.l.s8.bf16 %v9799_v51  ;;  %v7439_v58 = vrot.slane %v3003_v11, %v4566_v25 }
 0x5fd   :  { %3251 = vmatpush1.bf16.msra.mxu0 %v9779_v44  ;;  %9798 = vst [vmem:[#allocation25_spill] sm:$0xff] %v7434_v50  ;;  %9801 = vst [vmem:[#allocation26_spill] sm:$0xff] %v7439_v58  ;;  %v9803_v44 = vunpack.c.h.s8.bf16 %v9786_v63 }
 0x5fe   :  { %3333 = vmatpush1.bf16.msra.mxu1 %v9781_v56  ;;  %3252 = vmatprep.subr.bf16.mxu0 %v9782_v42  ;;  %v7447_v42 = vrot.slane %v3003_v11, %v9795_v53  ;;  %v9807_v53 = vunpack.c.h.s8.bf16 %v9793_v14 }
 0x5ff   :  { %3334 = vmatprep.subr.bf16.mxu1 %v9783_v22  ;;  %v7450_v22 = vrot.slane %v3003_v11, %v9797_v37  ;;  %v9808_v37 = vunpack.c.h.s8.bf16 %v9799_v51 }
 0x600   :  { %9804 = vst [vmem:[#allocation28_spill] sm:$0xff] %v7447_v42 }
 0x601   :  { %3253 = vmatpush1.bf16.msra.mxu0 %v9784_v32  ;;  %9805 = vst [vmem:[#allocation29_spill] sm:$0xff] %v7450_v22  ;;  %v9806_v32 = vunpack.c.h.s8.bf16 %v9788_v38 }
 0x602   :  { %3335 = vmatpush1.bf16.msra.mxu1 %v9785_v62  ;;  %3254 = vmatprep.subr.bf16.mxu0 %v9787_v4 }
 0x603   :  { %3336 = vmatprep.subr.bf16.mxu1 %v9789_v45 }
 0x605   :  { %3255 = vmatpush1.bf16.msra.mxu0 %v9794_v15 }
 0x606   :  { %3337 = vmatpush1.bf16.msra.mxu1 %v9800_v57  ;;  %3256 = vmatprep.subr.bf16.mxu0 %v9803_v44 }
 0x607   :  { %v2807_v20 = vpop.f32.mrb[16].mxu0  ;;  %v2971_v56 = vpop.f32.mrb[16].mxu1  ;;  %3338 = vmatprep.subr.bf16.mxu1 %v9806_v32 }
 0x608   :  { %v2999_v25 = vmul.f32 %v7423_v9, %v2807_v20  ;;  %v3001_v12 = vmul.f32 %v7426_v10, %v2971_v56  ;;  %v2809_v62 = vpop.f32.mrb[17].mxu0  ;;  %v2973_v4 = vpop.f32.mrb[17].mxu1  ;;  %v9809_v20 = vld [vmem:[#allocation119_spill] sm:$0xff] }
 0x609   :  { %v3000_v63 = vmul.f32 %v7431_v2, %v2809_v62  ;;  %v3002_v45 = vmul.f32 %v7434_v50, %v2973_v4  ;;  %v2811_v19 = vpop.f32.mrb[18].mxu0  ;;  %v2975_v15 = vpop.f32.mrb[18].mxu1  ;;  %3257 = vmatpush1.bf16.msra.mxu0 %v9807_v53  ;;  %v9810_v56 = vunpack.c.l.s8.bf16 %v9809_v20  ;;  %v9811_v62 = vld [vmem:[#allocation120_spill] sm:$0xff] }
 0x60a   :  { %v7461_v11 = vadd.f32 %v7439_v58, %v2999_v25  ;;  %v7464_v38 = vadd.f32 %v7442_v49, %v3001_v12  ;;  %3339 = vmatpush1.bf16.msra.mxu1 %v9808_v37  ;;  %v2812_v57 = vpop.f32.mrb[19].mxu0  ;;  %v2976_v44 = vpop.f32.mrb[19].mxu1  ;;  %v9812_v25 = vunpack.c.l.s8.bf16 %v9811_v62  ;;  %v9813_v19 = vld [vmem:[#allocation121_spill] sm:$0xff] }
 0x60b   :  { %3258 = vmatprep.subr.bf16.mxu0 %v9810_v56  ;;  %v7471_v32 = vadd.f32 %v7447_v42, %v3000_v63  ;;  %v7474_v14 = vadd.f32 %v7450_v22, %v3002_v45  ;;  %v9814_v15 = vunpack.c.l.s8.bf16 %v9813_v19  ;;  %v9815_v63 = vld [vmem:[#allocation122_spill] sm:$0xff]  ;;  %v9817_v45 = vunpack.c.h.s8.bf16 %v9809_v20  ;;  %v9821_v20 = vld [vmem:[#allocation123_spill] sm:$0xff] }
 0x60c   :  { %3340 = vmatprep.subr.bf16.mxu1 %v9812_v25  ;;  %v3945_v12 = vmul.f32 %v7461_v11, %v7461_v11  ;;  %v3947_v51 = vmul.f32 %v7464_v38, %v7464_v38  ;;  %v9816_v53 = vunpack.c.l.s8.bf16 %v9815_v63  ;;  %v9818_v57 = vunpack.c.h.s8.bf16 %v9811_v62  ;;  %v9823_v62 = vld [vmem:[#allocation124_spill] sm:$0xff] }
 0x60d   :  { %v3946_v4 = vmul.f32 %v7471_v32, %v7471_v32  ;;  %3259 = vmatpush1.bf16.msra.mxu0 %v9814_v15  ;;  %v3948_v44 = vmul.f32 %v7474_v14, %v7474_v14  ;;  %v9819_v26 = vunpack.c.h.s8.bf16 %v9813_v19  ;;  %v9827_v19 = vld [vmem:[#allocation126_spill] sm:$0xff] }
 0x60e   :  { %3341 = vmatpush1.bf16.msra.mxu1 %v9816_v53  ;;  %3260 = vmatprep.subr.bf16.mxu0 %v9817_v45  ;;  %v3949_v37 = vsel %vm1955_vm1, %v3945_v12, 0.0  ;;  %v3952_v15 = vsel %vm1955_vm1, %v3947_v51, 0.0  ;;  %v9820_v53 = vunpack.c.h.s8.bf16 %v9815_v63  ;;  %v9822_v45 = vunpack.c.l.s8.bf16 %v9821_v20 }
 0x60f   :  { %3342 = vmatprep.subr.bf16.mxu1 %v9818_v57  ;;  %v3950_v56 = vsel %vm1955_vm1, %v3946_v4, 0.0  ;;  %v9824_v57 = vunpack.c.l.s8.bf16 %v9823_v62  ;;  %v3954_v5 = vsel %vm1955_vm1, %v3948_v44, 0.0  ;;  %v9825_v4 = vld [vmem:[#allocation125_spill] sm:$0xff]  ;;  %v9829_v51 = vunpack.c.h.s8.bf16 %v9821_v20  ;;  %v9839_v20 = vld [vmem:[#allocation130_spill] sm:$0xff] }
 0x610   :  { %v3951_v25 = vadd.f32 %v3950_v56, %v3949_v37  ;;  %v9826_v37 = vunpack.c.l.s8.bf16 %v9825_v4  ;;  %v9830_v63 = vunpack.c.h.s8.bf16 %v9823_v62  ;;  %v9831_v56 = vunpack.c.h.s8.bf16 %v9825_v4 }
 0x611   :  { %3261 = vmatpush1.bf16.msra.mxu0 %v9819_v26  ;;  %v9828_v26 = vunpack.c.l.s8.bf16 %v9827_v19 }
 0x612   :  { %3343 = vmatpush1.bf16.msra.mxu1 %v9820_v53  ;;  %3262 = vmatprep.subr.bf16.mxu0 %v9822_v45  ;;  %v3953_v12 = vadd.f32 %v3952_v15, %v3951_v25  ;;  %v9832_v25 = vunpack.c.h.s8.bf16 %v9827_v19  ;;  %v9835_v15 = vld [vmem:[#allocation128_spill] sm:$0xff]  ;;  %v9837_v45 = vld [vmem:[#allocation129_spill] sm:$0xff]  ;;  %v9845_v19 = vld [vmem:[#allocation131_spill] sm:$0xff] }
 0x613   :  { %3344 = vmatprep.subr.bf16.mxu1 %v9824_v57  ;;  %v9836_v53 = vunpack.c.l.s8.bf16 %v9835_v15  ;;  %v9842_v57 = vunpack.c.h.s8.bf16 %v9835_v15  ;;  %v9843_v4 = vunpack.c.h.s8.bf16 %v9837_v45  ;;  %v9853_v15 = vunpack.c.h.s8.bf16 %v9845_v19 }
 0x614   :  { %v3955_v8 = vadd.f32 %v3954_v5, %v3953_v12  ;;  %v9833_v5 = vld [vmem:[#allocation127_spill] sm:$0xff]  ;;  %v9840_v12 = vunpack.c.l.s8.bf16 %v9839_v20 }
 0x615   :  { %3263 = vmatpush1.bf16.msra.mxu0 %v9826_v37  ;;  %v9834_v44 = vunpack.c.l.s8.bf16 %v9833_v5  ;;  %v9841_v62 = vunpack.c.h.s8.bf16 %v9833_v5  ;;  %v9844_v37 = vunpack.c.h.s8.bf16 %v9839_v20  ;;  %v9851_v5 = vld [vmem:[#allocation134_spill] sm:$0xff]  ;;  %v9857_v20 = vld [vmem:[#allocation135_spill] sm:$0xff] }
 0x616   :  { %3345 = vmatpush1.bf16.msra.mxu1 %v9828_v26  ;;  %3956 = vadd.xlane.f32.xlu0 %v3955_v8  ;;  %v9838_v8 = vunpack.c.l.s8.bf16 %v9837_v45  ;;  %v9846_v26 = vunpack.c.l.s8.bf16 %v9845_v19  ;;  %v9863_v19 = vld [vmem:[#allocation138_spill] sm:$0xff] }
 0x617   :  { %3264 = vmatprep.subr.bf16.mxu0 %v9829_v51  ;;  %3346 = vmatprep.subr.bf16.mxu1 %v9830_v63  ;;  %v9847_v51 = vld [vmem:[#allocation132_spill] sm:$0xff] }
 0x618   :  { %v9848_v63 = vunpack.c.l.s8.bf16 %v9847_v51 }
 0x619   :  { %3265 = vmatpush1.bf16.msra.mxu0 %v9831_v56  ;;  %v9849_v56 = vld [vmem:[#allocation133_spill] sm:$0xff] }
 0x61a   :  { %3347 = vmatpush1.bf16.msra.mxu1 %v9832_v25  ;;  %3266 = vmatprep.subr.bf16.mxu0 %v9834_v44  ;;  %v9850_v25 = vunpack.c.l.s8.bf16 %v9849_v56  ;;  %v9852_v44 = vunpack.c.l.s8.bf16 %v9851_v5  ;;  %v9855_v45 = vunpack.c.h.s8.bf16 %v9849_v56 }
 0x61b   :  { %3348 = vmatprep.subr.bf16.mxu1 %v9836_v53  ;;  %v9854_v53 = vunpack.c.h.s8.bf16 %v9847_v51  ;;  %v9865_v51 = vunpack.c.h.s8.bf16 %v9857_v20 }
 0x61d   :  { %3267 = vmatpush1.bf16.msra.mxu0 %v9838_v8  ;;  %v9856_v8 = vunpack.c.h.s8.bf16 %v9851_v5  ;;  %v9869_v5 = vld [vmem:[#allocation139_spill] sm:$0xff] }
 0x61e   :  { %3349 = vmatpush1.bf16.msra.mxu1 %v9840_v12  ;;  %3268 = vmatprep.subr.bf16.mxu0 %v9841_v62  ;;  %v9858_v12 = vunpack.c.l.s8.bf16 %v9857_v20  ;;  %v9859_v62 = vld [vmem:[#allocation136_spill] sm:$0xff]  ;;  %v9875_v20 = vld [vmem:[#allocation142_spill] sm:$0xff] }
 0x61f   :  { %3350 = vmatprep.subr.bf16.mxu1 %v9842_v57  ;;  %v9860_v57 = vunpack.c.l.s8.bf16 %v9859_v62 }
 0x621   :  { %3269 = vmatpush1.bf16.msra.mxu0 %v9843_v4  ;;  %v9861_v4 = vld [vmem:[#allocation137_spill] sm:$0xff] }
 0x622   :  { %3351 = vmatpush1.bf16.msra.mxu1 %v9844_v37  ;;  %3270 = vmatprep.subr.bf16.mxu0 %v9846_v26  ;;  %v9862_v37 = vunpack.c.l.s8.bf16 %v9861_v4  ;;  %v9864_v26 = vunpack.c.l.s8.bf16 %v9863_v19  ;;  %v9867_v56 = vunpack.c.h.s8.bf16 %v9861_v4 }
 0x623   :  { %3352 = vmatprep.subr.bf16.mxu1 %v9848_v63  ;;  %v9866_v63 = vunpack.c.h.s8.bf16 %v9859_v62  ;;  %v9877_v62 = vunpack.c.h.s8.bf16 %v9869_v5 }
 0x625   :  { %3271 = vmatpush1.bf16.msra.mxu0 %v9850_v25  ;;  %v9868_v25 = vunpack.c.h.s8.bf16 %v9863_v19  ;;  %v9881_v19 = vld [vmem:[#allocation143_spill] sm:$0xff] }
 0x626   :  { %3353 = vmatpush1.bf16.msra.mxu1 %v9852_v44  ;;  %3272 = vmatprep.subr.bf16.mxu0 %v9853_v15  ;;  %v9870_v44 = vunpack.c.l.s8.bf16 %v9869_v5  ;;  %v9871_v15 = vld [vmem:[#allocation140_spill] sm:$0xff] }
 0x627   :  { %3354 = vmatprep.subr.bf16.mxu1 %v9854_v53  ;;  %v9872_v53 = vunpack.c.l.s8.bf16 %v9871_v15 }
 0x629   :  { %3273 = vmatpush1.bf16.msra.mxu0 %v9855_v45  ;;  %v9873_v45 = vld [vmem:[#allocation141_spill] sm:$0xff] }
 0x62a   :  { %3355 = vmatpush1.bf16.msra.mxu1 %v9856_v8  ;;  %3274 = vmatprep.subr.bf16.mxu0 %v9858_v12  ;;  %v9874_v8 = vunpack.c.l.s8.bf16 %v9873_v45  ;;  %v9876_v12 = vunpack.c.l.s8.bf16 %v9875_v20  ;;  %v9879_v4 = vunpack.c.h.s8.bf16 %v9873_v45 }
 0x62b   :  { %3356 = vmatprep.subr.bf16.mxu1 %v9860_v57  ;;  %v9878_v57 = vunpack.c.h.s8.bf16 %v9871_v15 }
 0x62d   :  { %3275 = vmatpush1.bf16.msra.mxu0 %v9862_v37  ;;  %v9880_v37 = vunpack.c.h.s8.bf16 %v9875_v20 }
 0x62e   :  { %3357 = vmatpush1.bf16.msra.mxu1 %v9864_v26  ;;  %3276 = vmatprep.subr.bf16.mxu0 %v9865_v51  ;;  %v9883_v26 = vld [vmem:[#allocation144_spill] sm:$0xff] }
 0x62f   :  { %3358 = vmatprep.subr.bf16.mxu1 %v9866_v63  ;;  %v9884_v51 = vunpack.c.l.s8.bf16 %v9883_v26  ;;  %v9885_v63 = vld [vmem:[#allocation145_spill] sm:$0xff]  ;;  %v9890_v15 = vunpack.c.h.s8.bf16 %v9883_v26 }
 0x631   :  { %3277 = vmatpush1.bf16.msra.mxu0 %v9867_v56  ;;  %v9886_v56 = vunpack.c.l.s8.bf16 %v9885_v63 }
 0x632   :  { %3359 = vmatpush1.bf16.msra.mxu1 %v9868_v25  ;;  %3609 = vmatprep.subr.bf16.mxu0 %v9870_v44  ;;  %v9887_v25 = vld [vmem:[#allocation146_spill] sm:$0xff]  ;;  %v9889_v44 = vunpack.c.h.s8.bf16 %v9881_v19 }
 0x633   :  { %3773 = vmatprep.subr.bf16.mxu1 %v9872_v53  ;;  %v9888_v5 = vunpack.c.l.s8.bf16 %v9887_v25  ;;  %v9891_v53 = vunpack.c.h.s8.bf16 %v9885_v63  ;;  %v9892_v45 = vunpack.c.h.s8.bf16 %v9887_v25 }
 0x634   :  { %3279 = vmatmul.mubr.bf16.vlgmr.msra.gmra.mrb[24].mxu0 %v7248_v3 }
 0x635   :  { %3361 = vmatmul.mubr.bf16.vlgmr.msra.gmra.mrb[24].mxu1 %v7248_v3  ;;  %3610 = vmatpush1.bf16.msra.mxu0 %v9874_v8  ;;  %v9882_v3 = vunpack.c.l.s8.bf16 %v9881_v19  ;;  %v9893_v8 = vld [vmem:[#allocation147_spill] sm:$0xff] }
 0x636   :  { %3774 = vmatpush1.bf16.msra.mxu1 %v9876_v12  ;;  %3611 = vmatprep.subr.bf16.mxu0 %v9877_v62  ;;  %v9894_v20 = vunpack.c.l.s8.bf16 %v9893_v8  ;;  %v9895_v12 = vld [vmem:[#allocation148_spill] sm:$0xff] }
 0x637   :  { %3775 = vmatprep.subr.bf16.mxu1 %v9878_v57  ;;  %v9896_v62 = vunpack.c.l.s8.bf16 %v9895_v12  ;;  %v9897_v57 = vld [vmem:[#allocation149_spill] sm:$0xff]  ;;  %v9902_v26 = vunpack.c.h.s8.bf16 %v9895_v12 }
 0x639   :  { %3612 = vmatpush1.bf16.msra.mxu0 %v9879_v4  ;;  %v9898_v4 = vunpack.c.l.s8.bf16 %v9897_v57 }
 0x63a   :  { %3776 = vmatpush1.bf16.msra.mxu1 %v9880_v37  ;;  %3613 = vmatprep.subr.bf16.mxu0 %v9882_v3  ;;  %v9899_v37 = vld [vmem:[#allocation150_spill] sm:$0xff]  ;;  %v9901_v3 = vunpack.c.h.s8.bf16 %v9893_v8 }
 0x63b   :  { %3777 = vmatprep.subr.bf16.mxu1 %v9884_v51  ;;  %v9900_v19 = vunpack.c.l.s8.bf16 %v9899_v37  ;;  %v9903_v51 = vunpack.c.h.s8.bf16 %v9897_v57  ;;  %v9904_v63 = vunpack.c.h.s8.bf16 %v9899_v37 }
 0x63d   :  { %3614 = vmatpush1.bf16.msra.mxu0 %v9886_v56  ;;  %v9905_v56 = vld [vmem:[#allocation151_spill] sm:$0xff] }
 0x63e   :  { %3778 = vmatpush1.bf16.msra.mxu1 %v9888_v5  ;;  %3615 = vmatprep.subr.bf16.mxu0 %v9889_v44  ;;  %v9906_v25 = vunpack.c.l.s8.bf16 %v9905_v56  ;;  %v9907_v5 = vld [vmem:[#allocation152_spill] sm:$0xff] }
 0x63f   :  { %3779 = vmatprep.subr.bf16.mxu1 %v9890_v15  ;;  %v9908_v44 = vunpack.c.l.s8.bf16 %v9907_v5  ;;  %v9909_v15 = vld [vmem:[#allocation153_spill] sm:$0xff]  ;;  %v9914_v12 = vunpack.c.h.s8.bf16 %v9907_v5 }
 0x641   :  { %3616 = vmatpush1.bf16.msra.mxu0 %v9891_v53  ;;  %v9910_v53 = vunpack.c.l.s8.bf16 %v9909_v15 }
 0x642   :  { %3780 = vmatpush1.bf16.msra.mxu1 %v9892_v45  ;;  %3617 = vmatprep.subr.bf16.mxu0 %v9894_v20  ;;  %v9911_v45 = vld [vmem:[#allocation154_spill] sm:$0xff]  ;;  %v9913_v20 = vunpack.c.h.s8.bf16 %v9905_v56 }
 0x643   :  { %3781 = vmatprep.subr.bf16.mxu1 %v9896_v62  ;;  %v9912_v8 = vunpack.c.l.s8.bf16 %v9911_v45  ;;  %v9915_v62 = vunpack.c.h.s8.bf16 %v9909_v15  ;;  %v9916_v57 = vunpack.c.h.s8.bf16 %v9911_v45 }
 0x645   :  { %3618 = vmatpush1.bf16.msra.mxu0 %v9898_v4  ;;  %v9917_v4 = vld [vmem:[#allocation155_spill] sm:$0xff] }
 0x646   :  { %3782 = vmatpush1.bf16.msra.mxu1 %v9900_v19  ;;  %3619 = vmatprep.subr.bf16.mxu0 %v9901_v3  ;;  %v9918_v37 = vunpack.c.l.s8.bf16 %v9917_v4  ;;  %v9919_v19 = vld [vmem:[#allocation156_spill] sm:$0xff] }
 0x647   :  { %3783 = vmatprep.subr.bf16.mxu1 %v9902_v26  ;;  %v9920_v3 = vunpack.c.l.s8.bf16 %v9919_v19  ;;  %v9921_v26 = vld [vmem:[#allocation157_spill] sm:$0xff]  ;;  %v9926_v5 = vunpack.c.h.s8.bf16 %v9919_v19 }
 0x649   :  { %3620 = vmatpush1.bf16.msra.mxu0 %v9903_v51  ;;  %v9922_v51 = vunpack.c.l.s8.bf16 %v9921_v26 }
 0x64a   :  { %3784 = vmatpush1.bf16.msra.mxu1 %v9904_v63  ;;  %3621 = vmatprep.subr.bf16.mxu0 %v9906_v25  ;;  %v9923_v63 = vld [vmem:[#allocation158_spill] sm:$0xff]  ;;  %v9925_v25 = vunpack.c.h.s8.bf16 %v9917_v4 }
 0x64b   :  { %3785 = vmatprep.subr.bf16.mxu1 %v9908_v44  ;;  %v9924_v56 = vunpack.c.l.s8.bf16 %v9923_v63  ;;  %v9927_v44 = vunpack.c.h.s8.bf16 %v9921_v26  ;;  %v9928_v15 = vunpack.c.h.s8.bf16 %v9923_v63 }
 0x64d   :  { %3622 = vmatpush1.bf16.msra.mxu0 %v9910_v53  ;;  %v9929_v53 = vld [vmem:[#allocation159_spill] sm:$0xff] }
 0x64e   :  { %3786 = vmatpush1.bf16.msra.mxu1 %v9912_v8  ;;  %3623 = vmatprep.subr.bf16.mxu0 %v9913_v20  ;;  %v9930_v45 = vunpack.c.l.s8.bf16 %v9929_v53  ;;  %v9931_v8 = vld [vmem:[#allocation160_spill] sm:$0xff] }
 0x64f   :  { %3787 = vmatprep.subr.bf16.mxu1 %v9914_v12  ;;  %v9932_v20 = vunpack.c.l.s8.bf16 %v9931_v8  ;;  %v9933_v12 = vld [vmem:[#allocation161_spill] sm:$0xff]  ;;  %v9938_v19 = vunpack.c.h.s8.bf16 %v9931_v8 }
 0x651   :  { %3624 = vmatpush1.bf16.msra.mxu0 %v9915_v62  ;;  %v9934_v62 = vunpack.c.l.s8.bf16 %v9933_v12 }
 0x652   :  { %3788 = vmatpush1.bf16.msra.mxu1 %v9916_v57  ;;  %3625 = vmatprep.subr.bf16.mxu0 %v9918_v37  ;;  %v9935_v57 = vld [vmem:[#allocation162_spill] sm:$0xff]  ;;  %v9937_v37 = vunpack.c.h.s8.bf16 %v9929_v53 }
 0x653   :  { %3789 = vmatprep.subr.bf16.mxu1 %v9920_v3  ;;  %v9936_v4 = vunpack.c.l.s8.bf16 %v9935_v57  ;;  %v9939_v3 = vunpack.c.h.s8.bf16 %v9933_v12  ;;  %v9940_v26 = vunpack.c.h.s8.bf16 %v9935_v57 }
 0x655   :  { %3626 = vmatpush1.bf16.msra.mxu0 %v9922_v51  ;;  %v9941_v51 = vld [vmem:[#allocation163_spill] sm:$0xff] }
 0x656   :  { %3790 = vmatpush1.bf16.msra.mxu1 %v9924_v56  ;;  %3627 = vmatprep.subr.bf16.mxu0 %v9925_v25  ;;  %v9942_v63 = vunpack.c.l.s8.bf16 %v9941_v51  ;;  %v9943_v56 = vld [vmem:[#allocation164_spill] sm:$0xff] }
 0x657   :  { %3791 = vmatprep.subr.bf16.mxu1 %v9926_v5  ;;  %v9944_v25 = vunpack.c.l.s8.bf16 %v9943_v56  ;;  %v9945_v5 = vld [vmem:[#allocation165_spill] sm:$0xff]  ;;  %v9950_v8 = vunpack.c.h.s8.bf16 %v9943_v56 }
 0x659   :  { %3628 = vmatpush1.bf16.msra.mxu0 %v9927_v44  ;;  %v9946_v44 = vunpack.c.l.s8.bf16 %v9945_v5 }
 0x65a   :  { %3792 = vmatpush1.bf16.msra.mxu1 %v9928_v15  ;;  %3629 = vmatprep.subr.bf16.mxu0 %v9930_v45  ;;  %v9947_v15 = vld [vmem:[#allocation166_spill] sm:$0xff]  ;;  %v9949_v45 = vunpack.c.h.s8.bf16 %v9941_v51 }
 0x65b   :  { %3793 = vmatprep.subr.bf16.mxu1 %v9932_v20  ;;  %v9948_v53 = vunpack.c.l.s8.bf16 %v9947_v15  ;;  %v9951_v20 = vunpack.c.h.s8.bf16 %v9945_v5  ;;  %v9952_v12 = vunpack.c.h.s8.bf16 %v9947_v15 }
 0x65d   :  { %3630 = vmatpush1.bf16.msra.mxu0 %v9934_v62  ;;  %v9953_v62 = vld [vmem:[#allocation167_spill] sm:$0xff] }
 0x65e   :  { %3794 = vmatpush1.bf16.msra.mxu1 %v9936_v4  ;;  %3631 = vmatprep.subr.bf16.mxu0 %v9937_v37  ;;  %v9954_v57 = vunpack.c.l.s8.bf16 %v9953_v62  ;;  %v9955_v4 = vld [vmem:[#allocation168_spill] sm:$0xff] }
 0x65f   :  { %3795 = vmatprep.subr.bf16.mxu1 %v9938_v19  ;;  %v9956_v37 = vunpack.c.l.s8.bf16 %v9955_v4  ;;  %v9957_v19 = vld [vmem:[#allocation169_spill] sm:$0xff]  ;;  %v9962_v56 = vunpack.c.h.s8.bf16 %v9955_v4  ;;  %v9970_v4 = vld [vmem:[#allocation174_spill] sm:$0xff] }
 0x661   :  { %3632 = vmatpush1.bf16.msra.mxu0 %v9939_v3  ;;  %v9958_v3 = vunpack.c.l.s8.bf16 %v9957_v19 }
 0x662   :  { %3796 = vmatpush1.bf16.msra.mxu1 %v9940_v26  ;;  %3633 = vmatprep.subr.bf16.mxu0 %v9942_v63  ;;  %v9959_v26 = vld [vmem:[#allocation170_spill] sm:$0xff]  ;;  %v9961_v63 = vunpack.c.h.s8.bf16 %v9953_v62 }
 0x663   :  { %3797 = vmatprep.subr.bf16.mxu1 %v9944_v25  ;;  %v9960_v51 = vunpack.c.l.s8.bf16 %v9959_v26  ;;  %v9963_v25 = vunpack.c.h.s8.bf16 %v9957_v19  ;;  %v9964_v5 = vunpack.c.h.s8.bf16 %v9959_v26  ;;  %v9972_v26 = vld [vmem:[#allocation175_spill] sm:$0xff] }
 0x665   :  { %3634 = vmatpush1.bf16.msra.mxu0 %v9946_v44  ;;  %v9965_v44 = vld [vmem:[#allocation171_spill] sm:$0xff] }
 0x666   :  { %3798 = vmatpush1.bf16.msra.mxu1 %v9948_v53  ;;  %3635 = vmatprep.subr.bf16.mxu0 %v9949_v45  ;;  %v9966_v15 = vunpack.c.l.s8.bf16 %v9965_v44  ;;  %v9967_v53 = vld [vmem:[#allocation172_spill] sm:$0xff] }
 0x667   :  { %3799 = vmatprep.subr.bf16.mxu1 %v9950_v8  ;;  %v9968_v45 = vunpack.c.l.s8.bf16 %v9967_v53 }
 0x669   :  { %3636 = vmatpush1.bf16.msra.mxu0 %v9951_v20  ;;  %v9969_v20 = vld [vmem:[#allocation173_spill] sm:$0xff] }
 0x66a   :  { %3800 = vmatpush1.bf16.msra.mxu1 %v9952_v12  ;;  %3637 = vmatprep.subr.bf16.mxu0 %v9954_v57 }
 0x66b   :  { %3801 = vmatprep.subr.bf16.mxu1 %v9956_v37 }
 0x66d   :  { %3638 = vmatpush1.bf16.msra.mxu0 %v9958_v3 }
 0x66e   :  { %3802 = vmatpush1.bf16.msra.mxu1 %v9960_v51  ;;  %3639 = vmatprep.subr.bf16.mxu0 %v9961_v63  ;;  %v9971_v51 = vld [vmem:[#allocation176_spill] sm:$0xff] }
 0x66f   :  { %3803 = vmatprep.subr.bf16.mxu1 %v9962_v56 }
 0x671   :  { %3640 = vmatpush1.bf16.msra.mxu0 %v9963_v25 }
 0x672   :  { %3804 = vmatpush1.bf16.msra.mxu1 %v9964_v5  ;;  %3650 = vmatprep.subr.bf16.mxu0 %v9966_v15  ;;  %v9973_v15 = vld [vmem:[#allocation177_spill] sm:$0xff] }
 0x673   :  { %3814 = vmatprep.subr.bf16.mxu1 %v9968_v45 }
 0x687   :  { %v3116_v8 = vpop.f32.mrb[20].mxu0 }
 0x688   :  { %v3369_v12 = vmul.f32 %v3116_v8, %v9969_v20  ;;  %v7701_v62 = vpop.f32.mrb[20].mxu1  ;;  %v3118_v57 = vpop.f32.mrb[21].mxu0 }
 0x689   :  { %v3370_v37 = vmul.f32 %v3118_v57, %v9970_v4  ;;  %v3200_v3 = vpop.f32.mrb[21].mxu1  ;;  %v3120_v19 = vpop.f32.mrb[22].mxu0  ;;  %v9974_v57 = vld [vmem:[#allocation178_spill] sm:$0xff] }
 0x68a   :  { %v7705_v63 = vadd.f32 %v3369_v12, %v9971_v51  ;;  %v3372_v56 = vmul.f32 %v3200_v3, %v9972_v26  ;;  %v3202_v25 = vpop.f32.mrb[22].mxu1  ;;  %v3121_v5 = vpop.f32.mrb[23].mxu0 }
 0x68b   :  { %v7709_v22 = vadd.f32 %v3370_v37, %v9973_v15  ;;  %v3203_v45 = vpop.f32.mrb[23].mxu1 }
 0x68c   :  { %v3385_v8 = vsel %vm1955_vm1, %v7705_v63, 0.0  ;;  %v3449_v20 = vmul.f32 %v7705_v63, %v7705_v63  ;;  %v7716_v4 = vadd.f32 %v3372_v56, %v9974_v57 }
 0x68d   :  { %v3386_v19 = vrot.slane %v3385_v8, 4  ;;  %v3392_v12 = vsel %vm1955_vm1, %v7709_v22, 0.0  ;;  %v3450_v37 = vmul.f32 %v7709_v22, %v7709_v22 }
 0x68e   :  { %v3457_v3 = vsel %vm1955_vm1, %v3449_v20, 0.0  ;;  %v3393_v51 = vrot.slane %v3392_v12, 4  ;;  %v3406_v5 = vsel %vm1955_vm1, %v7716_v4, 0.0  ;;  %v3452_v20 = vmul.f32 %v7716_v4, %v7716_v4 }
 0x68f   :  { %v3387_v26 = vadd.f32 %v3386_v19, %v3385_v8  ;;  %v3458_v25 = vrot.slane %v3457_v3, 4  ;;  %v3464_v45 = vsel %vm1955_vm1, %v3450_v37, 0.0  ;;  %v3407_v49 = vrot.slane %v3406_v5, 4 }
 0x690   :  { %v3394_v15 = vadd.f32 %v3393_v51, %v3392_v12  ;;  %v3465_v42 = vrot.slane %v3464_v45, 4  ;;  %v3478_v19 = vsel %vm1955_vm1, %v3452_v20, 0.0 }
 0x691   :  { %v3388_v56 = vrot.slane %v3387_v26, 2  ;;  %v3459_v57 = vadd.f32 %v3458_v25, %v3457_v3  ;;  %v3408_v9 = vadd.f32 %v3407_v49, %v3406_v5  ;;  %v3479_v33 = vrot.slane %v3478_v19, 4  ;;  %v3976_v5 = vpop.xlane.xlu0 %3975 }
 0x692   :  { %v3395_v58 = vrot.slane %v3394_v15, 2  ;;  %v3466_v10 = vadd.f32 %v3465_v42, %v3464_v45  ;;  %4210 = vrsqrt.f32 %v3976_v5 }
 0x693   :  { %v3389_v50 = vadd.f32 %v3388_v56, %v3387_v26  ;;  %v3460_v2 = vrot.slane %v3459_v57, 2  ;;  %v3409_v51 = vrot.slane %v3408_v9, 2  ;;  %v3480_v43 = vadd.f32 %v3479_v33, %v3478_v19 }
 0x694   :  { %v3396_v8 = vadd.f32 %v3395_v58, %v3394_v15  ;;  %v3467_v12 = vrot.slane %v3466_v10, 2 }
 0x695   :  { %v3390_v21 = vrot.slane %v3389_v50, 1  ;;  %v3461_v6 = vadd.f32 %v3460_v2, %v3459_v57  ;;  %v3410_v27 = vadd.f32 %v3409_v51, %v3408_v9  ;;  %v3481_v58 = vrot.slane %v3480_v43, 2 }
 0x696   :  { %v3397_v37 = vrot.slane %v3396_v8, 1  ;;  %v3468_v31 = vadd.f32 %v3467_v12, %v3466_v10 }
 0x697   :  { %v3391_v3 = vadd.f32 %v3390_v21, %v3389_v50  ;;  %v3462_v25 = vrot.slane %v3461_v6, 1  ;;  %v3411_v42 = vrot.slane %v3410_v27, 1  ;;  %v3482_v21 = vadd.f32 %v3481_v58, %v3480_v43  ;;  %v9976_v43 = vld [vmem:[#allocation180_spill] sm:$0xff]  ;;  %v9978_v58 = vld [vmem:[#allocation41_spill] sm:$0xff] }
 0x698   :  { %v3398_v23 = vadd.f32 %v3397_v37, %v3396_v8  ;;  %v3469_v56 = vrot.slane %v3468_v31, 1  ;;  %v9975_v37 = vld [vmem:[#allocation179_spill] sm:$0xff] }
 0x699   :  { %v3441_v40 = vmul.f32 0.5, %v3391_v3  ;;  %v3463_v26 = vadd.f32 %v3462_v25, %v3461_v6  ;;  %v3412_v46 = vadd.f32 %v3411_v42, %v3410_v27  ;;  %v3483_v33 = vrot.slane %v3482_v21, 1 }
 0x69a   :  { %v3442_v49 = vmul.f32 0.5, %v3398_v23  ;;  %v3470_v2 = vadd.f32 %v3469_v56, %v3468_v31  ;;  %v3371_v31 = vmul.f32 %v7701_v62, %v9975_v37  ;;  %v9977_v56 = vld [vmem:[#allocation38_spill] sm:$0xff]  ;;  %v9981_v37 = vld [vmem:[#allocation181_spill] sm:$0xff] }
 0x69b   :  { %v3513_v15 = vmul.f32 0.5, %v3463_v26  ;;  %v3521_v45 = vmul.f32 %v3441_v40, %v3441_v40  ;;  %v3444_v50 = vmul.f32 0.5, %v3412_v46  ;;  %v3484_v19 = vadd.f32 %v3483_v33, %v3482_v21  ;;  %v9980_v33 = vld [vmem:[#allocation42_spill] sm:$0xff] }
 0x69c   :  { %v3522_v57 = vmul.f32 %v3442_v49, %v3442_v49  ;;  %v3514_v30 = vmul.f32 0.5, %v3470_v2  ;;  %v4211_v27 = vpop.eup %4210  ;;  %v7732_v26 = vadd.f32 %v3371_v31, %v9976_v43  ;;  %v3545_v2 = vsub.f32 %v7705_v63, %v3441_v40 }
 0x69d   :  { %v3529_v20 = vsub.f32 %v3513_v15, %v3521_v45  ;;  %v3524_v12 = vmul.f32 %v3444_v50, %v3444_v50  ;;  %v3516_v3 = vmul.f32 0.5, %v3484_v19  ;;  %v3978_v42 = vmul.f32 %v4211_v27, %v9977_v56  ;;  %v9979_v15 = vld [vmem:[#allocation39_spill] sm:$0xff] }
 0x69e   :  { %v3530_v9 = vsub.f32 %v3514_v30, %v3522_v57  ;;  %v3979_v5 = vmul.f32 %v4211_v27, %v9978_v58  ;;  %v3980_v45 = vmul.f32 %v4211_v27, %v9979_v15  ;;  %v3451_v62 = vmul.f32 %v7732_v26, %v7732_v26 }
 0x69f   :  { %v3537_v10 = vmax.f32 %v3529_v20, 0.0  ;;  %v3532_v25 = vsub.f32 %v3516_v3, %v3524_v12  ;;  %v3399_v20 = vsel %vm1955_vm1, %v7732_v26, 0.0 }
 0x6a0   :  { %v3538_v6 = vmax.f32 %v3530_v9, 0.0  ;;  %v3987_v19 = vrot.slane %v3979_v5, 2  ;;  %v3988_v12 = vrot.slane %v3980_v45, 2  ;;  %v3471_v40 = vsel %vm1955_vm1, %v3451_v62, 0.0 }
 0x6a1   :  { %v3553_v8 = vadd.f32 1e-05, %v3537_v10  ;;  %v3540_v46 = vmax.f32 %v3532_v25, 0.0  ;;  %v3546_v10 = vsub.f32 %v7709_v22, %v3442_v49  ;;  %v9982_v49 = vld [vmem:[#allocation183_spill] sm:$0xff] }
 0x6a2   :  { %v3554_v23 = vadd.f32 1e-05, %v3538_v6  ;;  %v3986_v6 = vrot.slane %v3978_v42, 2 }
 0x6a3   :  { %4212 = vrsqrt.f32 %v3553_v8  ;;  %v3957_v51 = vpop.xlane.xlu0 %3956  ;;  %v3556_v30 = vadd.f32 1e-05, %v3540_v46  ;;  %v3981_v8 = vmul.f32 %v4211_v27, %v9980_v33  ;;  %v9983_v46 = vld [vmem:[#allocation182_spill] sm:$0xff] }
 0x6a4   :  { %4214 = vrsqrt.f32 %v3554_v23 }
 0x6a5   :  { %4216 = vrsqrt.f32 %v3957_v51  ;;  %v3400_v51 = vrot.slane %v3399_v20, 4  ;;  %v3989_v42 = vrot.slane %v3981_v8, 2 }
 0x6a6   :  { %4218 = vrsqrt.f32 %v3556_v30 }
 0x6a7   :  { %v3401_v62 = vadd.f32 %v3400_v51, %v3399_v20 }
 0x6ad   :  { %v4213_v57 = vpop.eup %4212 }
 0x6ae   :  { %v3569_v21 = vmul.f32 %v4213_v57, %v3545_v2  ;;  %v4215_v9 = vpop.eup %4214  ;;  %v3472_v57 = vrot.slane %v3471_v40, 4 }
 0x6af   :  { %v4217_v23 = vpop.eup %4216  ;;  %v3570_v63 = vmul.f32 %v4215_v9, %v3546_v10  ;;  %v9984_v10 = vld [vmem:[#allocation184_spill] sm:$0xff] }
 0x6b0   :  { %v3577_v31 = vmul.f32 %v3569_v21, %v9981_v37  ;;  %v3959_v3 = vmul.f32 %v4217_v23, %v7461_v11  ;;  %v3960_v25 = vmul.f32 %v4217_v23, %v7471_v32  ;;  %v3961_v43 = vmul.f32 %v4217_v23, %v7464_v38 }
 0x6b1   :  { %v3962_v22 = vmul.f32 %v4217_v23, %v7474_v14  ;;  %v3578_v27 = vmul.f32 %v3570_v63, %v9982_v49  ;;  %v3548_v21 = vsub.f32 %v7716_v4, %v3444_v50  ;;  %v4219_v23 = vpop.eup %4218 }
 0x6b2   :  { %v3585_v30 = vadd.f32 %v3577_v31, %v9983_v46  ;;  %v3994_v5 = vmul.f32 %v3986_v6, %v3959_v3  ;;  %v3995_v45 = vmul.f32 %v3987_v19, %v3960_v25  ;;  %v3996_v2 = vmul.f32 %v3988_v12, %v3961_v43  ;;  %v9985_v31 = vld [vmem:[#allocation185_spill] sm:$0xff]  ;;  %v9986_v43 = vld [vmem:[#allocation186_spill] sm:$0xff]  ;;  %v9987_v46 = vld [vmem:[#allocation187_spill] sm:$0xff] }
 0x6b3   :  { %v3586_v11 = vadd.f32 %v3578_v27, %v9984_v10  ;;  %v3997_v9 = vmul.f32 %v3989_v42, %v3962_v22  ;;  %v3572_v6 = vmul.f32 %v4219_v23, %v3548_v21  ;;  %v3402_v19 = vrot.slane %v3401_v62, 2  ;;  %v9999_v23 = vld [vmem:[#allocation191_spill] sm:$0xff] }
 0x6b4   :  { %v3998_v32 = vsel %vm1955_vm1, %v3994_v5, 0.0  ;;  %v3999_v38 = vsel %vm1955_vm1, %v3995_v45, 0.0  ;;  %v3593_v14 = vmax.f32 %v3585_v30, 0.0  ;;  %v4001_v8 = vsel %vm1955_vm1, %v3996_v2, 0.0 }
 0x6b5   :  { %v3594_v63 = vmax.f32 %v3586_v11, 0.0  ;;  %v4000_v37 = vadd.f32 %v3999_v38, %v3998_v32  ;;  %v3473_v12 = vadd.f32 %v3472_v57, %v3471_v40  ;;  %v4003_v4 = vsel %vm1955_vm1, %v3997_v9, 0.0  ;;  %v9989_v40 = vld [vmem:[#allocation188_spill] sm:$0xff]  ;;  %v9995_v9 = vld [vmem:[#allocation189_spill] sm:$0xff]  ;;  %v9997_v38 = vld [vmem:[#allocation190_spill] sm:$0xff] }
 0x6b6   :  { %v3601_v50 = vpack.c.bf16 %v3593_v14, %v3593_v14  ;;  %v3580_v3 = vmul.f32 %v3572_v6, %v9985_v31  ;;  %v3403_v49 = vadd.f32 %v3402_v19, %v3401_v62  ;;  %v9988_v30 = vunpack.c.l.s8.bf16 %v9987_v46 }
 0x6b7   :  { %v3602_v20 = vpack.c.bf16 %v3594_v63, %v3594_v63  ;;  %v4002_v51 = vadd.f32 %v4001_v8, %v4000_v37  ;;  %v3474_v27 = vrot.slane %v3473_v12, 2  ;;  %v9990_v42 = vunpack.c.l.s8.bf16 %v9989_v40  ;;  %v10002_v8 = vld [vmem:[#allocation192_spill] sm:$0xff] }
 0x6b8   :  { %v3588_v22 = vadd.f32 %v3580_v3, %v9986_v43  ;;  %v9991_v45 = vunpack.c.h.s8.bf16 %v9965_v44  ;;  %v9992_v2 = vunpack.c.h.s8.bf16 %v9967_v53  ;;  %v3404_v21 = vrot.slane %v3403_v49, 1  ;;  %v10009_v3 = vld [vmem:[#allocation194_spill] sm:$0xff] }
 0x6b9   :  { %3641 = vmatprep.mubr.bf16.mxu0 %v3602_v20  ;;  %3805 = vmatprep.mubr.bf16.mxu1 %v3602_v20  ;;  %v4004_v25 = vadd.f32 %v4003_v4, %v4002_v51  ;;  %v3475_v10 = vadd.f32 %v3474_v27, %v3473_v12  ;;  %v9993_v62 = vunpack.c.h.s8.bf16 %v9987_v46  ;;  %v9994_v11 = vunpack.c.h.s8.bf16 %v9989_v40  ;;  %v10006_v4 = vld [vmem:[#allocation193_spill] sm:$0xff] }
 0x6ba   :  { %3642 = vmatmul.mubr.bf16.vlgmr.msra.gmra.mrb[28].mxu0 %v3601_v50  ;;  %3806 = vmatmul.mubr.bf16.vlgmr.msra.gmra.mrb[28].mxu1 %v3601_v50  ;;  %v3596_v5 = vmax.f32 %v3588_v22, 0.0  ;;  %v9996_v32 = vunpack.c.l.s8.bf16 %v9995_v9  ;;  %v9998_v44 = vunpack.c.l.s8.bf16 %v9997_v38  ;;  %v3405_v14 = vadd.f32 %v3404_v21, %v3403_v49  ;;  %v10011_v49 = vld [vmem:[#allocation195_spill] sm:$0xff] }
 0x6bb   :  { %4005 = vadd.xlane.f32.xlu0 %v4004_v25  ;;  %3651 = vmatpush1.bf16.msra.mxu0 %v9988_v30  ;;  %v3476_v53 = vrot.slane %v3475_v10, 1  ;;  %v10000_v63 = vunpack.c.l.s8.bf16 %v9999_v23  ;;  %v10001_v37 = vunpack.c.h.s8.bf16 %v9995_v9  ;;  %v10003_v6 = vunpack.c.l.s8.bf16 %v10002_v8  ;;  %v10014_v30 = vld [vmem:[#allocation196_spill] sm:$0xff]  ;;  %v10023_v9 = vld [vmem:[#allocation199_spill] sm:$0xff] }
 0x6bc   :  { %3815 = vmatpush1.bf16.msra.mxu1 %v9990_v42  ;;  %3652 = vmatprep.subr.bf16.mxu0 %v9991_v45  ;;  %v3604_v57 = vpack.c.bf16 %v3596_v5, %v3596_v5  ;;  %v10004_v19 = vunpack.c.h.s8.bf16 %v9997_v38  ;;  %v3443_v12 = vmul.f32 0.5, %v3405_v14  ;;  %v10005_v51 = vunpack.c.h.s8.bf16 %v9999_v23 }
 0x6bd   :  { %3816 = vmatprep.subr.bf16.mxu1 %v9992_v2  ;;  %v3477_v20 = vadd.f32 %v3476_v53, %v3475_v10  ;;  %v10007_v50 = vunpack.c.l.s8.bf16 %v10006_v4  ;;  %v10008_v31 = vunpack.c.h.s8.bf16 %v10002_v8  ;;  %v10010_v25 = vunpack.c.l.s8.bf16 %v10009_v3  ;;  %v10018_v2 = vld [vmem:[#allocation197_spill] sm:$0xff]  ;;  %v10021_v10 = vld [vmem:[#allocation198_spill] sm:$0xff] }
 0x6be   :  { %3682 = vmatprep.mubr.bf16.mxu0 %v3604_v57  ;;  %3846 = vmatprep.mubr.bf16.mxu1 %v3604_v57  ;;  %v3523_v22 = vmul.f32 %v3443_v12, %v3443_v12  ;;  %v10012_v27 = vunpack.c.l.s8.bf16 %v10011_v49  ;;  %v10013_v46 = vunpack.c.h.s8.bf16 %v10006_v4  ;;  %v10015_v40 = vunpack.c.l.s8.bf16 %v10014_v30 }
 0x6bf   :  { %3653 = vmatpush1.bf16.msra.mxu0 %v9993_v62  ;;  %v3515_v43 = vmul.f32 0.5, %v3477_v20  ;;  %v10016_v42 = vunpack.c.h.s8.bf16 %v10009_v3  ;;  %v10017_v45 = vunpack.c.h.s8.bf16 %v10011_v49  ;;  %v10019_v57 = vunpack.c.l.s8.bf16 %v10018_v2 }
 0x6c0   :  { %3817 = vmatpush1.bf16.msra.mxu1 %v9994_v11  ;;  %3654 = vmatprep.subr.bf16.mxu0 %v9996_v32  ;;  %v10020_v21 = vunpack.c.h.s8.bf16 %v10014_v30  ;;  %v10022_v62 = vunpack.c.l.s8.bf16 %v10021_v10  ;;  %v10024_v32 = vunpack.c.l.s8.bf16 %v10023_v9  ;;  %v10025_v38 = vunpack.c.h.s8.bf16 %v10018_v2  ;;  %v10050_v2 = vld [vmem:[#allocation208_spill] sm:$0xff] }
 0x6c1   :  { %3818 = vmatprep.subr.bf16.mxu1 %v9998_v44  ;;  %v3531_v5 = vsub.f32 %v3515_v43, %v3523_v22  ;;  %v10026_v44 = vld [vmem:[#allocation200_spill] sm:$0xff]  ;;  %v10028_v53 = vunpack.c.h.s8.bf16 %v10021_v10  ;;  %v10042_v22 = vld [vmem:[#allocation205_spill] sm:$0xff] }
 0x6c2   :  { %v10027_v14 = vunpack.c.l.s8.bf16 %v10026_v44  ;;  %v10043_v49 = vunpack.c.l.s8.bf16 %v10042_v22 }
 0x6c3   :  { %3655 = vmatpush1.bf16.msra.mxu0 %v10000_v63  ;;  %v3539_v11 = vmax.f32 %v3531_v5, 0.0  ;;  %v10029_v63 = vunpack.c.h.s8.bf16 %v10023_v9  ;;  %v10049_v5 = vunpack.c.h.s8.bf16 %v10042_v22  ;;  %v10054_v9 = vld [vmem:[#allocation209_spill] sm:$0xff] }
 0x6c4   :  { %3656 = vmatprep.subr.bf16.mxu0 %v10001_v37  ;;  %3819 = vmatpush1.bf16.msra.mxu1 %v10003_v6  ;;  %v10030_v37 = vld [vmem:[#allocation201_spill] sm:$0xff]  ;;  %v10032_v6 = vunpack.c.h.s8.bf16 %v10026_v44  ;;  %v10057_v44 = vld [vmem:[#allocation210_spill] sm:$0xff] }
 0x6c5   :  { %3820 = vmatprep.subr.bf16.mxu1 %v10004_v19  ;;  %v3555_v23 = vadd.f32 1e-05, %v3539_v11  ;;  %v10031_v8 = vunpack.c.l.s8.bf16 %v10030_v37  ;;  %v10033_v19 = vld [vmem:[#allocation202_spill] sm:$0xff] }
 0x6c6   :  { %v10034_v20 = vunpack.c.l.s8.bf16 %v10033_v19 }
 0x6c7   :  { %3657 = vmatpush1.bf16.msra.mxu0 %v10005_v51  ;;  %4220 = vrsqrt.f32 %v3555_v23  ;;  %v10035_v51 = vld [vmem:[#allocation203_spill] sm:$0xff] }
 0x6c8   :  { %3658 = vmatprep.subr.bf16.mxu0 %v10007_v50  ;;  %3821 = vmatpush1.bf16.msra.mxu1 %v10008_v31  ;;  %v10036_v4 = vunpack.c.l.s8.bf16 %v10035_v51  ;;  %v10037_v50 = vunpack.c.h.s8.bf16 %v10030_v37  ;;  %v10038_v31 = vld [vmem:[#allocation204_spill] sm:$0xff]  ;;  %v10041_v43 = vunpack.c.h.s8.bf16 %v10035_v51 }
 0x6c9   :  { %3822 = vmatprep.subr.bf16.mxu1 %v10010_v25  ;;  %v10039_v3 = vunpack.c.l.s8.bf16 %v10038_v31  ;;  %v10040_v25 = vunpack.c.h.s8.bf16 %v10033_v19  ;;  %v10063_v37 = vld [vmem:[#allocation212_spill] sm:$0xff] }
 0x6cb   :  { %3659 = vmatpush1.bf16.msra.mxu0 %v10012_v27  ;;  %v10044_v27 = vunpack.c.h.s8.bf16 %v10038_v31  ;;  %v10070_v31 = vunpack.c.h.s8.bf16 %v10063_v37 }
 0x6cc   :  { %3660 = vmatprep.subr.bf16.mxu0 %v10013_v46  ;;  %3823 = vmatpush1.bf16.msra.mxu1 %v10015_v40  ;;  %v10045_v46 = vld [vmem:[#allocation206_spill] sm:$0xff]  ;;  %v10047_v40 = vld [vmem:[#allocation207_spill] sm:$0xff] }
 0x6cd   :  { %3824 = vmatprep.subr.bf16.mxu1 %v10016_v42  ;;  %v10046_v30 = vunpack.c.l.s8.bf16 %v10045_v46  ;;  %v10048_v42 = vunpack.c.l.s8.bf16 %v10047_v40  ;;  %v10052_v10 = vunpack.c.h.s8.bf16 %v10045_v46  ;;  %v10076_v46 = vld [vmem:[#allocation217_spill] sm:$0xff] }
 0x6cf   :  { %3661 = vmatpush1.bf16.msra.mxu0 %v10017_v45 }
 0x6d0   :  { %3662 = vmatprep.subr.bf16.mxu0 %v10019_v57  ;;  %3825 = vmatpush1.bf16.msra.mxu1 %v10020_v21  ;;  %v10051_v57 = vunpack.c.l.s8.bf16 %v10050_v2  ;;  %v3547_v21 = vsub.f32 %v7732_v26, %v3443_v12  ;;  %v10061_v26 = vunpack.c.h.s8.bf16 %v10054_v9  ;;  %v10062_v12 = vld [vmem:[#allocation213_spill] sm:$0xff] }
 0x6d1   :  { %3826 = vmatprep.subr.bf16.mxu1 %v10022_v62  ;;  %v4221_v45 = vpop.eup %4220  ;;  %v10053_v62 = vunpack.c.h.s8.bf16 %v10047_v40 }
 0x6d2   :  { %v3571_v11 = vmul.f32 %v4221_v45, %v3547_v21  ;;  %v10080_v45 = vld [vmem:[#allocation219_spill] sm:$0xff]  ;;  %v10083_v21 = vld [vmem:[#allocation220_spill] sm:$0xff] }
 0x6d3   :  { %3663 = vmatpush1.bf16.msra.mxu0 %v10024_v32  ;;  %v10055_v32 = vunpack.c.l.s8.bf16 %v10054_v9  ;;  %v10087_v9 = vunpack.c.h.s8.bf16 %v10080_v45 }
 0x6d4   :  { %3664 = vmatprep.subr.bf16.mxu0 %v10025_v38  ;;  %3827 = vmatpush1.bf16.msra.mxu1 %v10027_v14  ;;  %v10056_v38 = vunpack.c.h.s8.bf16 %v10050_v2  ;;  %v10058_v14 = vunpack.c.l.s8.bf16 %v10057_v44  ;;  %v10081_v2 = vunpack.c.l.s8.bf16 %v10080_v45 }
 0x6d5   :  { %3828 = vmatprep.subr.bf16.mxu1 %v10028_v53  ;;  %v10059_v53 = vld [vmem:[#allocation211_spill] sm:$0xff] }
 0x6d6   :  { %v10060_v23 = vunpack.c.l.s8.bf16 %v10059_v53  ;;  %v10066_v19 = vunpack.c.h.s8.bf16 %v10059_v53  ;;  %v10092_v53 = vld [vmem:[#allocation223_spill] sm:$0xff] }
 0x6d7   :  { %3665 = vmatpush1.bf16.msra.mxu0 %v10029_v63  ;;  %v3579_v63 = vmul.f32 %v3571_v11, %v10062_v12  ;;  %v10095_v12 = vld [vmem:[#allocation224_spill] sm:$0xff] }
 0x6d8   :  { %3666 = vmatprep.subr.bf16.mxu0 %v10031_v8  ;;  %3829 = vmatpush1.bf16.msra.mxu1 %v10032_v6  ;;  %v10064_v8 = vunpack.c.l.s8.bf16 %v10063_v37  ;;  %v10065_v6 = vunpack.c.h.s8.bf16 %v10057_v44  ;;  %v10090_v44 = vunpack.c.h.s8.bf16 %v10083_v21  ;;  %v10097_v37 = vld [vmem:[#allocation225_spill] sm:$0xff] }
 0x6d9   :  { %3830 = vmatprep.subr.bf16.mxu1 %v10034_v20  ;;  %v10067_v20 = vld [vmem:[#allocation214_spill] sm:$0xff] }
 0x6da   :  { %v10068_v51 = vunpack.c.l.s8.bf16 %v10067_v20 }
 0x6db   :  { %3667 = vmatpush1.bf16.msra.mxu0 %v10036_v4  ;;  %v10069_v4 = vld [vmem:[#allocation218_spill] sm:$0xff] }
 0x6dc   :  { %3668 = vmatprep.subr.bf16.mxu0 %v10037_v50  ;;  %3831 = vmatpush1.bf16.msra.mxu1 %v10039_v3  ;;  %v3587_v50 = vadd.f32 %v3579_v63, %v10069_v4  ;;  %v10071_v3 = vld [vmem:[#allocation215_spill] sm:$0xff]  ;;  %v10096_v63 = vunpack.c.l.s8.bf16 %v10095_v12 }
 0x6dd   :  { %3832 = vmatprep.subr.bf16.mxu1 %v10040_v25  ;;  %v10072_v25 = vunpack.c.l.s8.bf16 %v10071_v3  ;;  %v10078_v40 = vunpack.c.h.s8.bf16 %v10071_v3 }
 0x6df   :  { %3669 = vmatpush1.bf16.msra.mxu0 %v10041_v43  ;;  %v10073_v43 = vld [vmem:[#allocation216_spill] sm:$0xff] }
 0x6e0   :  { %3670 = vmatprep.subr.bf16.mxu0 %v10043_v49  ;;  %3833 = vmatpush1.bf16.msra.mxu1 %v10044_v27  ;;  %v10074_v22 = vunpack.c.l.s8.bf16 %v10073_v43  ;;  %v10075_v49 = vunpack.c.h.s8.bf16 %v10067_v20  ;;  %v3595_v27 = vmax.f32 %v3587_v50, 0.0  ;;  %v10103_v50 = vunpack.c.h.s8.bf16 %v10097_v37 }
 0x6e1   :  { %3834 = vmatprep.subr.bf16.mxu1 %v10046_v30  ;;  %v10077_v30 = vunpack.c.l.s8.bf16 %v10076_v46 }
 0x6e3   :  { %3671 = vmatpush1.bf16.msra.mxu0 %v10048_v42  ;;  %v10079_v42 = vunpack.c.h.s8.bf16 %v10073_v43 }
 0x6e4   :  { %3672 = vmatprep.subr.bf16.mxu0 %v10049_v5  ;;  %3835 = vmatpush1.bf16.msra.mxu1 %v10051_v57  ;;  %v3603_v5 = vpack.c.bf16 %v3595_v27, %v3595_v27  ;;  %v10082_v57 = vunpack.c.h.s8.bf16 %v10076_v46 }
 0x6e5   :  { %3836 = vmatprep.subr.bf16.mxu1 %v10052_v10  ;;  %v10084_v10 = vunpack.c.l.s8.bf16 %v10083_v21 }
 0x6e7   :  { %3673 = vmatpush1.bf16.msra.mxu0 %v10053_v62  ;;  %v10085_v62 = vld [vmem:[#allocation221_spill] sm:$0xff] }
 0x6e8   :  { %3674 = vmatprep.subr.bf16.mxu0 %v10055_v32  ;;  %3837 = vmatpush1.bf16.msra.mxu1 %v10056_v38  ;;  %v10086_v11 = vunpack.c.l.s8.bf16 %v10085_v62  ;;  %v10088_v32 = vld [vmem:[#allocation222_spill] sm:$0xff] }
 0x6e9   :  { %3838 = vmatprep.subr.bf16.mxu1 %v10058_v14  ;;  %v10089_v38 = vunpack.c.l.s8.bf16 %v10088_v32  ;;  %v10091_v14 = vunpack.c.h.s8.bf16 %v10085_v62  ;;  %v10111_v62 = vld [vmem:[#allocation235_spill] sm:$0xff] }
 0x6eb   :  { %3675 = vmatpush1.bf16.msra.mxu0 %v10060_v23  ;;  %v10093_v23 = vunpack.c.l.s8.bf16 %v10092_v53 }
 0x6ec   :  { %3676 = vmatprep.subr.bf16.mxu0 %v10061_v26  ;;  %3839 = vmatpush1.bf16.msra.mxu1 %v10064_v8  ;;  %v10094_v26 = vunpack.c.h.s8.bf16 %v10088_v32  ;;  %v10098_v8 = vunpack.c.l.s8.bf16 %v10097_v37 }
 0x6ed   :  { %3840 = vmatprep.subr.bf16.mxu1 %v10065_v6  ;;  %v10099_v6 = vunpack.c.h.s8.bf16 %v10092_v53  ;;  %v10114_v53 = vld [vmem:[#allocation236_spill] sm:$0xff] }
 0x6ef   :  { %3677 = vmatpush1.bf16.msra.mxu0 %v10066_v19  ;;  %v10100_v19 = vld [vmem:[#allocation226_spill] sm:$0xff] }
 0x6f0   :  { %3678 = vmatprep.subr.bf16.mxu0 %v10068_v51  ;;  %3841 = vmatpush1.bf16.msra.mxu1 %v10070_v31  ;;  %v10101_v20 = vunpack.c.l.s8.bf16 %v10100_v19  ;;  %v10102_v51 = vunpack.c.h.s8.bf16 %v10095_v12  ;;  %v10104_v31 = vld [vmem:[#allocation229_spill] sm:$0xff] }
 0x6f1   :  { %3842 = vmatprep.subr.bf16.mxu1 %v10072_v25 }
 0x6f3   :  { %3679 = vmatpush1.bf16.msra.mxu0 %v10074_v22  ;;  %v10105_v22 = vld [vmem:[#allocation230_spill] sm:$0xff] }
 0x6f4   :  { %3680 = vmatprep.subr.bf16.mxu0 %v10075_v49  ;;  %3843 = vmatpush1.bf16.msra.mxu1 %v10077_v30  ;;  %v10106_v30 = vld [vmem:[#allocation227_spill] sm:$0xff] }
 0x6f5   :  { %3844 = vmatprep.subr.bf16.mxu1 %v10078_v40  ;;  %v10107_v40 = vunpack.c.l.s8.bf16 %v10106_v30 }
 0x6f7   :  { %3681 = vmatpush1.bf16.msra.mxu0 %v10079_v42  ;;  %v10108_v42 = vunpack.c.h.s8.bf16 %v10100_v19 }
 0x6f8   :  { %3691 = vmatprep.subr.bf16.mxu0 %v10081_v2  ;;  %3845 = vmatpush1.bf16.msra.mxu1 %v10082_v57  ;;  %v10110_v2 = vld [vmem:[#allocation232_spill] sm:$0xff] }
 0x6f9   :  { %3855 = vmatprep.subr.bf16.mxu1 %v10084_v10 }
 0x6fa   :  { %3683 = vmatmul.mubr.bf16.vlgmr.msra.gmra.mrb[28].mxu0 %v3603_v5 }
 0x6fb   :  { %3692 = vmatpush1.bf16.msra.mxu0 %v10086_v11  ;;  %3847 = vmatmul.mubr.bf16.vlgmr.msra.gmra.mrb[28].mxu1 %v3603_v5  ;;  %v10109_v5 = vld [vmem:[#allocation231_spill] sm:$0xff] }
 0x6fc   :  { %3693 = vmatprep.subr.bf16.mxu0 %v10087_v9  ;;  %3856 = vmatpush1.bf16.msra.mxu1 %v10089_v38  ;;  %v10112_v9 = vld [vmem:[#allocation228_spill] sm:$0xff] }
 0x6fd   :  { %3857 = vmatprep.subr.bf16.mxu1 %v10090_v44  ;;  %v10113_v32 = vunpack.c.l.s8.bf16 %v10112_v9 }
 0x6ff   :  { %3694 = vmatpush1.bf16.msra.mxu0 %v10091_v14 }
 0x700   :  { %3695 = vmatprep.subr.bf16.mxu0 %v10093_v23  ;;  %3858 = vmatpush1.bf16.msra.mxu1 %v10094_v26  ;;  %v10115_v26 = vld [vmem:[#allocation233_spill] sm:$0xff] }
 0x701   :  { %3859 = vmatprep.subr.bf16.mxu1 %v10096_v63  ;;  %v10116_v12 = vunpack.c.l.s8.bf16 %v10115_v26 }
 0x703   :  { %3696 = vmatpush1.bf16.msra.mxu0 %v10098_v8  ;;  %v10117_v8 = vunpack.c.h.s8.bf16 %v10106_v30 }
 0x704   :  { %3697 = vmatprep.subr.bf16.mxu0 %v10099_v6  ;;  %3860 = vmatpush1.bf16.msra.mxu1 %v10101_v20 }
 0x705   :  { %3861 = vmatprep.subr.bf16.mxu1 %v10102_v51  ;;  %v10118_v51 = vld [vmem:[#allocation234_spill] sm:$0xff] }
 0x707   :  { %v3280_v4 = vpop.f32.mrb[24].mxu0  ;;  %3698 = vmatpush1.bf16.msra.mxu0 %v10103_v50 }
 0x708   :  { %v3373_v3 = vmul.f32 %v3280_v4, %v10104_v31  ;;  %v7918_v25 = vpop.f32.mrb[24].mxu1  ;;  %v3282_v43 = vpop.f32.mrb[25].mxu0  ;;  %3699 = vmatprep.subr.bf16.mxu0 %v10107_v40  ;;  %3862 = vmatpush1.bf16.msra.mxu1 %v10108_v42  ;;  %v10119_v4 = vunpack.c.l.s8.bf16 %v10118_v51 }
 0x709   :  { %v3374_v49 = vmul.f32 %v3282_v43, %v10105_v22  ;;  %v3364_v27 = vpop.f32.mrb[25].mxu1  ;;  %v3284_v46 = vpop.f32.mrb[26].mxu0  ;;  %3863 = vmatprep.subr.bf16.mxu1 %v10113_v32  ;;  %v10120_v43 = vunpack.c.h.s8.bf16 %v10112_v9 }
 0x70a   :  { %v7926_v45 = vadd.f32 %v3373_v3, %v10109_v5  ;;  %v3376_v57 = vmul.f32 %v3364_v27, %v10110_v2  ;;  %v3366_v21 = vpop.f32.mrb[26].mxu1  ;;  %v3285_v10 = vpop.f32.mrb[27].mxu0  ;;  %v10121_v27 = vunpack.c.h.s8.bf16 %v10115_v26  ;;  %v10122_v5 = vld [vmem:[#allocation237_spill] sm:$0xff] }
 0x70b   :  { %v7930_v11 = vadd.f32 %v3374_v49, %v10111_v62  ;;  %v3367_v38 = vpop.f32.mrb[27].mxu1  ;;  %3700 = vmatpush1.bf16.msra.mxu0 %v10116_v12  ;;  %v10123_v2 = vunpack.c.l.s8.bf16 %v10122_v5  ;;  %v10124_v10 = vunpack.c.h.s8.bf16 %v10118_v51  ;;  %v10127_v12 = vunpack.c.l.s8.bf16 %v6466_v16 }
 0x70c   :  { %v3413_v44 = vsel %vm1955_vm1, %v7926_v45, 0.0  ;;  %v3453_v14 = vmul.f32 %v7926_v45, %v7926_v45  ;;  %v7939_v23 = vadd.f32 %v3376_v57, %v10114_v53  ;;  %3701 = vmatprep.subr.bf16.mxu0 %v10117_v8  ;;  %3864 = vmatpush1.bf16.msra.mxu1 %v10119_v4  ;;  %v10129_v4 = vunpack.c.l.s8.bf16 %v6468_v52 }
 0x70d   :  { %v3414_v63 = vrot.slane %v3413_v44, 4  ;;  %v3420_v37 = vsel %vm1955_vm1, %v7930_v11, 0.0  ;;  %v3454_v20 = vmul.f32 %v7930_v11, %v7930_v11  ;;  %3865 = vmatprep.subr.bf16.mxu1 %v10120_v43 }
 0x70e   :  { %v3485_v6 = vsel %vm1955_vm1, %v3453_v14, 0.0  ;;  %v3421_v19 = vrot.slane %v3420_v37, 4  ;;  %v3434_v3 = vsel %vm1955_vm1, %v7939_v23, 0.0  ;;  %v3456_v21 = vmul.f32 %v7939_v23, %v7939_v23 }
 0x70f   :  { %v3415_v50 = vadd.f32 %v3414_v63, %v3413_v44  ;;  %v3486_v31 = vrot.slane %v3485_v6, 4  ;;  %v3492_v49 = vsel %vm1955_vm1, %v3454_v20, 0.0  ;;  %3702 = vmatpush1.bf16.msra.mxu0 %v10121_v27  ;;  %v3435_v42 = vrot.slane %v3434_v3, 4  ;;  %v10125_v44 = vld [vmem:[#allocation238_spill] sm:$0xff] }
 0x710   :  { %v3422_v22 = vadd.f32 %v3421_v19, %v3420_v37  ;;  %v3493_v40 = vrot.slane %v3492_v49, 4  ;;  %3703 = vmatprep.subr.bf16.mxu0 %v10123_v2  ;;  %3866 = vmatpush1.bf16.msra.mxu1 %v10124_v10  ;;  %v10126_v14 = vunpack.c.l.s8.bf16 %v10125_v44  ;;  %v3506_v26 = vsel %vm1955_vm1, %v3456_v21, 0.0 }
 0x711   :  { %v3416_v46 = vrot.slane %v3415_v50, 2  ;;  %v3487_v30 = vadd.f32 %v3486_v31, %v3485_v6  ;;  %v3436_v38 = vadd.f32 %v3435_v42, %v3434_v3  ;;  %v10128_v19 = vunpack.c.h.s8.bf16 %v10122_v5 }
 0x712   :  { %v3423_v57 = vrot.slane %v3422_v22, 2  ;;  %v3494_v32 = vadd.f32 %v3493_v40, %v3492_v49  ;;  %3867 = vmatprep.subr.bf16.mxu1 %v10126_v14  ;;  %v3507_v51 = vrot.slane %v3506_v26, 4  ;;  %v10132_v2 = vunpack.c.l.s8.bf16 %v6495_v28 }
 0x713   :  { %v3417_v62 = vadd.f32 %v3416_v46, %v3415_v50  ;;  %v3488_v9 = vrot.slane %v3487_v30, 2  ;;  %3704 = vmatpush1.bf16.msra.mxu0 %v10127_v12  ;;  %v3437_v6 = vrot.slane %v3436_v38, 2  ;;  %v10131_v46 = vunpack.c.h.s8.bf16 %v6466_v16 }
 0x714   :  { %v3424_v53 = vadd.f32 %v3423_v57, %v3422_v22  ;;  %v3495_v8 = vrot.slane %v3494_v32, 2  ;;  %3705 = vmatprep.subr.bf16.mxu0 %v10128_v19  ;;  %3868 = vmatpush1.bf16.msra.mxu1 %v10129_v4  ;;  %v10130_v22 = vunpack.c.h.s8.bf16 %v10125_v44  ;;  %v3508_v27 = vadd.f32 %v3507_v51, %v3506_v26 }
 0x715   :  { %v3418_v63 = vrot.slane %v3417_v62, 1  ;;  %v3489_v37 = vadd.f32 %v3488_v9, %v3487_v30  ;;  %v3438_v43 = vadd.f32 %v3437_v6, %v3436_v38  ;;  %v10133_v10 = vunpack.c.h.s8.bf16 %v6468_v52 }
 0x716   :  { %v3425_v20 = vrot.slane %v3424_v53, 1  ;;  %v3496_v3 = vadd.f32 %v3495_v8, %v3494_v32  ;;  %3869 = vmatprep.subr.bf16.mxu1 %v10130_v22  ;;  %v3509_v21 = vrot.slane %v3508_v27, 2  ;;  %v10134_v38 = vunpack.c.l.s8.bf16 %v6497_v0 }
 0x717   :  { %v3419_v50 = vadd.f32 %v3418_v63, %v3417_v62  ;;  %v3490_v31 = vrot.slane %v3489_v37, 1  ;;  %3706 = vmatpush1.bf16.msra.mxu0 %v10131_v46  ;;  %v3439_v5 = vrot.slane %v3438_v43, 1  ;;  %v10135_v44 = vunpack.c.l.s8.bf16 %v6506_v54 }
 0x718   :  { %v3426_v49 = vadd.f32 %v3425_v20, %v3424_v53  ;;  %v3497_v42 = vrot.slane %v3496_v3, 1  ;;  %3707 = vmatprep.subr.bf16.mxu0 %v10132_v2  ;;  %3870 = vmatpush1.bf16.msra.mxu1 %v10133_v10  ;;  %v10136_v12 = vunpack.c.h.s8.bf16 %v6495_v28  ;;  %v3510_v63 = vadd.f32 %v3509_v21, %v3508_v27 }
 0x719   :  { %v3445_v30 = vmul.f32 0.5, %v3419_v50  ;;  %v3491_v40 = vadd.f32 %v3490_v31, %v3489_v37  ;;  %3871 = vmatprep.subr.bf16.mxu1 %v10134_v38  ;;  %v3440_v26 = vadd.f32 %v3439_v5, %v3438_v43  ;;  %v10137_v52 = vunpack.c.l.s8.bf16 %v6508_v13 }
 0x71a   :  { %v3446_v57 = vmul.f32 0.5, %v3426_v49  ;;  %v3498_v32 = vadd.f32 %v3497_v42, %v3496_v3  ;;  %v10138_v19 = vunpack.c.h.s8.bf16 %v6497_v0  ;;  %v3511_v20 = vrot.slane %v3510_v63, 1 }
 0x71b   :  { %v3517_v62 = vmul.f32 0.5, %v3491_v40  ;;  %v3525_v9 = vmul.f32 %v3445_v30, %v3445_v30  ;;  %3708 = vmatpush1.bf16.msra.mxu0 %v10135_v44  ;;  %v3448_v6 = vmul.f32 0.5, %v3440_v26  ;;  %v10139_v51 = vunpack.c.h.s8.bf16 %v6506_v54 }
 0x71c   :  { %v3526_v16 = vmul.f32 %v3446_v57, %v3446_v57  ;;  %v3518_v53 = vmul.f32 0.5, %v3498_v32  ;;  %3709 = vmatprep.subr.bf16.mxu0 %v10136_v12  ;;  %3872 = vmatpush1.bf16.msra.mxu1 %v10137_v52  ;;  %v10140_v31 = vunpack.c.l.s8.bf16 %v6534_v39  ;;  %v3512_v28 = vadd.f32 %v3511_v20, %v3510_v63  ;;  %v10151_v32 = vld [vmem:[#allocation239_spill] sm:$0xff]  ;;  %v10158_v12 = vld [vmem:[#allocation241_spill] sm:$0xff] }
 0x71d   :  { %v3533_v14 = vsub.f32 %v3517_v62, %v3525_v9  ;;  %3873 = vmatprep.subr.bf16.mxu1 %v10138_v19  ;;  %v3528_v3 = vmul.f32 %v3448_v6, %v3448_v6  ;;  %v10141_v43 = vunpack.c.h.s8.bf16 %v6508_v13  ;;  %v10142_v49 = vunpack.c.l.s8.bf16 %v6536_v18  ;;  %v10150_v62 = vld [vmem:[#allocation240_spill] sm:$0xff]  ;;  %v10162_v19 = vld [vmem:[#allocation243_spill] sm:$0xff] }
 0x71e   :  { %v3534_v8 = vsub.f32 %v3518_v53, %v3526_v16  ;;  %v3520_v0 = vmul.f32 0.5, %v3512_v28  ;;  %v10143_v27 = vunpack.c.l.s8.bf16 %v6552_v36  ;;  %v10144_v54 = vunpack.c.h.s8.bf16 %v6534_v39 }
 0x71f   :  { %v3541_v37 = vmax.f32 %v3533_v14, 0.0  ;;  %3710 = vmatpush1.bf16.msra.mxu0 %v10139_v51  ;;  %v10145_v40 = vunpack.c.l.s8.bf16 %v6554_v48  ;;  %v3375_v13 = vmul.f32 %v7918_v25, %v6577_v1  ;;  %v10146_v42 = vunpack.c.h.s8.bf16 %v6536_v18 }
 0x720   :  { %v3542_v50 = vmax.f32 %v3534_v8, 0.0  ;;  %3711 = vmatprep.subr.bf16.mxu0 %v10140_v31  ;;  %3874 = vmatpush1.bf16.msra.mxu1 %v10141_v43  ;;  %v3536_v46 = vsub.f32 %v3520_v0, %v3528_v3  ;;  %v10147_v2 = vunpack.c.h.s8.bf16 %v6552_v36  ;;  %v10148_v21 = vunpack.c.l.s8.bf16 %v6579_v35 }
 0x721   :  { %v3557_v4 = vadd.f32 1e-05, %v3541_v37  ;;  %3875 = vmatprep.subr.bf16.mxu1 %v10142_v49  ;;  %v10149_v39 = vunpack.c.h.s8.bf16 %v6554_v48  ;;  %v8017_v9 = vadd.f32 %v3375_v13, %v10150_v62  ;;  %v10152_v38 = vunpack.c.l.s8.bf16 %v10151_v32  ;;  %v10161_v37 = vld [vmem:[#allocation242_spill] sm:$0xff] }
 0x722   :  { %v3558_v22 = vadd.f32 1e-05, %v3542_v50  ;;  %v3544_v5 = vmax.f32 %v3536_v46, 0.0  ;;  %v3549_v18 = vsub.f32 %v7926_v45, %v3445_v30  ;;  %v10153_v1 = vunpack.c.l.s8.bf16 %v6595_v47  ;;  %v10165_v50 = vld [vmem:[#allocation244_spill] sm:$0xff] }
 0x723   :  { %4222 = vrsqrt.f32 %v3557_v4  ;;  %3712 = vmatpush1.bf16.msra.mxu0 %v10143_v27  ;;  %v10154_v25 = vunpack.c.h.s8.bf16 %v6579_v35  ;;  %v3550_v48 = vsub.f32 %v7930_v11, %v3446_v57  ;;  %v10155_v44 = vunpack.c.l.s8.bf16 %v6597_v59 }
 0x724   :  { %4224 = vrsqrt.f32 %v3558_v22  ;;  %3713 = vmatprep.subr.bf16.mxu0 %v10144_v54  ;;  %3876 = vmatpush1.bf16.msra.mxu1 %v10145_v40  ;;  %v3560_v10 = vadd.f32 1e-05, %v3544_v5  ;;  %v3427_v53 = vsel %vm1955_vm1, %v8017_v9, 0.0  ;;  %v3455_v45 = vmul.f32 %v8017_v9, %v8017_v9 }
 0x725   :  { %3877 = vmatprep.subr.bf16.mxu1 %v10146_v42  ;;  %v10156_v30 = vunpack.c.h.s8.bf16 %v10151_v32  ;;  %v10157_v26 = vunpack.c.h.s8.bf16 %v6595_v47  ;;  %v10159_v11 = vunpack.c.l.s8.bf16 %v6616_v34  ;;  %v3428_v57 = vrot.slane %v3427_v53, 4  ;;  %v10175_v32 = vld [vmem:[#allocation245_spill] sm:$0xff] }
 0x726   :  { %4226 = vrsqrt.f32 %v3560_v10  ;;  %v10160_v52 = vunpack.c.h.s8.bf16 %v6597_v59  ;;  %v3499_v51 = vsel %vm1955_vm1, %v3455_v45, 0.0  ;;  %v10163_v4 = vunpack.c.l.s8.bf16 %v6621_v41 }
 0x727   :  { %3714 = vmatpush1.bf16.msra.mxu0 %v10147_v2  ;;  %v10164_v47 = vunpack.c.l.s8.bf16 %v6647_v55  ;;  %v3552_v28 = vsub.f32 %v7939_v23, %v3448_v6  ;;  %v10166_v3 = vunpack.c.h.s8.bf16 %v6616_v34  ;;  %v3429_v43 = vadd.f32 %v3428_v57, %v3427_v53  ;;  %v10183_v53 = vld [vmem:[#allocation248_spill] sm:$0xff] }
 0x728   :  { %3715 = vmatprep.subr.bf16.mxu0 %v10148_v21  ;;  %3878 = vmatpush1.bf16.msra.mxu1 %v10149_v39  ;;  %v3500_v22 = vrot.slane %v3499_v51, 4  ;;  %v10167_v49 = vunpack.c.l.s8.bf16 %v6649_v7  ;;  %v10168_v54 = vunpack.c.h.s8.bf16 %v6621_v41  ;;  %v10169_v40 = vunpack.c.h.s8.bf16 %v6647_v55  ;;  %v10173_v21 = vld [vmem:[#allocation246_spill] sm:$0xff] }
 0x729   :  { %3879 = vmatprep.subr.bf16.mxu1 %v10152_v38  ;;  %v10170_v23 = vunpack.c.l.s8.bf16 %v6677_v17  ;;  %v3430_v6 = vrot.slane %v3429_v43, 2  ;;  %v10171_v5 = vunpack.c.h.s8.bf16 %v6649_v7  ;;  %v10172_v41 = vunpack.c.l.s8.bf16 %v6683_v29 }
 0x72a   :  { %v3501_v42 = vadd.f32 %v3500_v22, %v3499_v51  ;;  %v10174_v10 = vunpack.c.l.s8.bf16 %v6701_v61  ;;  %v10176_v38 = vunpack.c.l.s8.bf16 %v10175_v32  ;;  %v10177_v7 = vunpack.c.h.s8.bf16 %v6677_v17 }
 0x72b   :  { %3716 = vmatpush1.bf16.msra.mxu0 %v10153_v1  ;;  %v10178_v1 = vunpack.c.h.s8.bf16 %v6683_v29  ;;  %v10184_v17 = vunpack.c.l.s8.bf16 %v10183_v53  ;;  %v10185_v29 = vld [vmem:[#allocation249_spill] sm:$0xff] }
 0x72c   :  { %3717 = vmatprep.subr.bf16.mxu0 %v10154_v25  ;;  %3880 = vmatpush1.bf16.msra.mxu1 %v10155_v44  ;;  %v3502_v62 = vrot.slane %v3501_v42, 2  ;;  %v10181_v44 = vld [vmem:[#allocation247_spill] sm:$0xff] }
 0x72d   :  { %v4223_v36 = vpop.eup %4222  ;;  %3881 = vmatprep.subr.bf16.mxu1 %v10156_v30 }
 0x72e   :  { %v3573_v16 = vmul.f32 %v4223_v36, %v3549_v18  ;;  %v4225_v14 = vpop.eup %4224  ;;  %v3503_v25 = vadd.f32 %v3502_v62, %v3501_v42 }
 0x72f   :  { %3718 = vmatpush1.bf16.msra.mxu0 %v10157_v26  ;;  %v3574_v35 = vmul.f32 %v4225_v14, %v3550_v48  ;;  %v10180_v48 = vunpack.c.h.s8.bf16 %v10175_v32  ;;  %v10182_v14 = vunpack.c.l.s8.bf16 %v10181_v44  ;;  %v10186_v26 = vunpack.c.l.s8.bf16 %v10185_v29  ;;  %v10222_v32 = vld [vmem:[#allocation261_spill] sm:$0xff] }
 0x730   :  { %v3581_v63 = vmul.f32 %v3573_v16, %v10158_v12  ;;  %3719 = vmatprep.subr.bf16.mxu0 %v10159_v11  ;;  %3882 = vmatpush1.bf16.msra.mxu1 %v10160_v52  ;;  %v4227_v59 = vpop.eup %4226  ;;  %v10179_v16 = vunpack.c.h.s8.bf16 %v6701_v61  ;;  %v3504_v30 = vrot.slane %v3503_v25, 1  ;;  %v10189_v61 = vunpack.c.h.s8.bf16 %v10181_v44 }
 0x731   :  { %v3582_v8 = vmul.f32 %v3574_v35, %v10161_v37  ;;  %3883 = vmatprep.subr.bf16.mxu1 %v10163_v4  ;;  %v3576_v46 = vmul.f32 %v4227_v59, %v3552_v28  ;;  %v10187_v35 = vld [vmem:[#allocation250_spill] sm:$0xff]  ;;  %v10191_v52 = vunpack.c.h.s8.bf16 %v10185_v29 }
 0x732   :  { %v3589_v20 = vadd.f32 %v3581_v63, %v10162_v19  ;;  %v10188_v12 = vunpack.c.l.s8.bf16 %v10187_v35  ;;  %v10190_v63 = vunpack.c.h.s8.bf16 %v10183_v53  ;;  %v3505_v57 = vadd.f32 %v3504_v30, %v3503_v25  ;;  %v10194_v19 = vld [vmem:[#allocation251_spill] sm:$0xff]  ;;  %v10228_v25 = vld [vmem:[#allocation262_spill] sm:$0xff] }
 0x733   :  { %3720 = vmatpush1.bf16.msra.mxu0 %v10164_v47  ;;  %v3590_v31 = vadd.f32 %v3582_v8, %v10165_v50  ;;  %v3584_v34 = vmul.f32 %v3576_v46, %v6695_v24  ;;  %v3431_v24 = vadd.f32 %v3430_v6, %v3429_v43  ;;  %v10192_v37 = vunpack.c.h.s8.bf16 %v10187_v35  ;;  %v10196_v47 = vld [vmem:[#allocation252_spill] sm:$0xff] }
 0x734   :  { %3721 = vmatprep.subr.bf16.mxu0 %v10166_v3  ;;  %3884 = vmatpush1.bf16.msra.mxu1 %v10167_v49  ;;  %v3597_v27 = vmax.f32 %v3589_v20, 0.0  ;;  %v10193_v8 = vunpack.c.l.s8.bf16 %v6756_v60  ;;  %v10195_v20 = vunpack.c.l.s8.bf16 %v10194_v19  ;;  %v3519_v51 = vmul.f32 0.5, %v3505_v57  ;;  %v10240_v57 = vld [vmem:[#allocation266_spill] sm:$0xff] }
 0x735   :  { %v3598_v0 = vmax.f32 %v3590_v31, 0.0  ;;  %3885 = vmatprep.subr.bf16.mxu1 %v10168_v54  ;;  %v3592_v55 = vadd.f32 %v3584_v34, %v10173_v21  ;;  %v3432_v36 = vrot.slane %v3431_v24, 1  ;;  %v10197_v50 = vunpack.c.l.s8.bf16 %v10196_v47  ;;  %v10198_v31 = vld [vmem:[#allocation253_spill] sm:$0xff]  ;;  %v10206_v54 = vld [vmem:[#allocation255_spill] sm:$0xff]  ;;  %v10216_v21 = vld [vmem:[#allocation258_spill] sm:$0xff] }
 0x736   :  { %v3605_v2 = vpack.c.bf16 %v3597_v27, %v3597_v27  ;;  %v10199_v28 = vunpack.c.l.s8.bf16 %v10198_v31  ;;  %v10200_v3 = vunpack.c.h.s8.bf16 %v6756_v60  ;;  %v10201_v59 = vunpack.c.h.s8.bf16 %v10194_v19  ;;  %v10244_v19 = vld [vmem:[#allocation268_spill] sm:$0xff] }
 0x737   :  { %3722 = vmatpush1.bf16.msra.mxu0 %v10169_v40  ;;  %v3606_v13 = vpack.c.bf16 %v3598_v0, %v3598_v0  ;;  %v3600_v39 = vmax.f32 %v3592_v55, 0.0  ;;  %v3433_v45 = vadd.f32 %v3432_v36, %v3431_v24  ;;  %v10202_v22 = vunpack.c.h.s8.bf16 %v10196_v47  ;;  %v10204_v0 = vld [vmem:[#allocation254_spill] sm:$0xff]  ;;  %v10220_v24 = vld [vmem:[#allocation260_spill] sm:$0xff] }
 0x738   :  { %3732 = vmatprep.subr.bf16.mxu0 %v10170_v23  ;;  %3886 = vmatpush1.bf16.msra.mxu1 %v10171_v5  ;;  %v10203_v49 = vunpack.c.h.s8.bf16 %v10198_v31  ;;  %v10205_v27 = vunpack.c.l.s8.bf16 %v10204_v0  ;;  %v10207_v46 = vunpack.c.l.s8.bf16 %v10206_v54  ;;  %v10210_v23 = vld [vmem:[#allocation257_spill] sm:$0xff]  ;;  %v10212_v6 = vunpack.c.h.s8.bf16 %v10204_v0  ;;  %v10250_v47 = vld [vmem:[#allocation270_spill] sm:$0xff] }
 0x739   :  { %3723 = vmatprep.mubr.bf16.mxu0 %v3606_v13  ;;  %3887 = vmatprep.mubr.bf16.mxu1 %v3606_v13  ;;  %v3608_v18 = vpack.c.bf16 %v3600_v39, %v3600_v39  ;;  %v3447_v11 = vmul.f32 0.5, %v3433_v45  ;;  %v10208_v13 = vld [vmem:[#allocation256_spill] sm:$0xff]  ;;  %v10211_v34 = vunpack.c.l.s8.bf16 %v10210_v23  ;;  %v10213_v42 = vunpack.c.h.s8.bf16 %v10206_v54 }
 0x73a   :  { %3896 = vmatprep.subr.bf16.mxu1 %v10172_v41  ;;  %3724 = vmatmul.mubr.bf16.vlgmr.msra.gmra.mrb[28].mxu0 %v3605_v2  ;;  %v10209_v60 = vunpack.c.l.s8.bf16 %v10208_v13  ;;  %v10215_v41 = vunpack.c.h.s8.bf16 %v10210_v23  ;;  %v10217_v55 = vunpack.c.l.s8.bf16 %v10216_v21  ;;  %v10221_v62 = vunpack.c.l.s8.bf16 %v10220_v24 }
 0x73b   :  { %3733 = vmatpush1.bf16.msra.mxu0 %v10174_v10  ;;  %3888 = vmatmul.mubr.bf16.vlgmr.msra.gmra.mrb[28].mxu1 %v3605_v2  ;;  %v3527_v4 = vmul.f32 %v3447_v11, %v3447_v11  ;;  %v10214_v2 = vunpack.c.h.s8.bf16 %v10208_v13  ;;  %v10218_v10 = vld [vmem:[#allocation259_spill] sm:$0xff]  ;;  %v10227_v36 = vunpack.c.h.s8.bf16 %v10222_v32  ;;  %v10236_v30 = vunpack.c.h.s8.bf16 %v10228_v25 }
 0x73c   :  { %3897 = vmatpush1.bf16.msra.mxu1 %v10176_v38  ;;  %3734 = vmatprep.subr.bf16.mxu0 %v10177_v7  ;;  %v10219_v39 = vunpack.c.l.s8.bf16 %v10218_v10  ;;  %v10223_v38 = vunpack.c.l.s8.bf16 %v10222_v32  ;;  %v10224_v7 = vunpack.c.h.s8.bf16 %v10216_v21  ;;  %v3551_v35 = vsub.f32 %v8017_v9, %v3447_v11 }
 0x73d   :  { %3898 = vmatprep.subr.bf16.mxu1 %v10178_v1  ;;  %3764 = vmatprep.mubr.bf16.mxu0 %v3608_v18  ;;  %v3535_v43 = vsub.f32 %v3519_v51, %v3527_v4  ;;  %v10226_v1 = vunpack.c.h.s8.bf16 %v10220_v24  ;;  %v10246_v51 = vld [vmem:[#allocation269_spill] sm:$0xff]  ;;  %v10248_v9 = vunpack.c.h.s8.bf16 %v10240_v57  ;;  %v10251_v31 = vunpack.c.h.s8.bf16 %v10244_v19 }
 0x73e   :  { %3928 = vmatprep.mubr.bf16.mxu1 %v3608_v18  ;;  %v10225_v18 = vunpack.c.h.s8.bf16 %v10218_v10  ;;  %v10247_v4 = vunpack.c.l.s8.bf16 %v10246_v51 }
 0x73f   :  { %3735 = vmatpush1.bf16.msra.mxu0 %v10179_v16  ;;  %v3543_v40 = vmax.f32 %v3535_v43, 0.0  ;;  %v10229_v16 = vunpack.c.l.s8.bf16 %v10228_v25  ;;  %v10255_v43 = vld [vmem:[#allocation272_spill] sm:$0xff] }
 0x740   :  { %3899 = vmatpush1.bf16.msra.mxu1 %v10180_v48  ;;  %3736 = vmatprep.subr.bf16.mxu0 %v10182_v14  ;;  %v10230_v48 = vld [vmem:[#allocation263_spill] sm:$0xff]  ;;  %v10232_v14 = vld [vmem:[#allocation264_spill] sm:$0xff] }
 0x741   :  { %3900 = vmatprep.subr.bf16.mxu1 %v10184_v17  ;;  %v3559_v5 = vadd.f32 1e-05, %v3543_v40  ;;  %v10231_v44 = vunpack.c.l.s8.bf16 %v10230_v48  ;;  %v10233_v53 = vunpack.c.l.s8.bf16 %v10232_v14  ;;  %v10234_v17 = vld [vmem:[#allocation265_spill] sm:$0xff]  ;;  %v10237_v29 = vunpack.c.h.s8.bf16 %v10230_v48 }
 0x742   :  { %v10235_v45 = vunpack.c.l.s8.bf16 %v10234_v17 }
 0x743   :  { %3737 = vmatpush1.bf16.msra.mxu0 %v10186_v26  ;;  %4228 = vrsqrt.f32 %v3559_v5 }
 0x744   :  { %3901 = vmatpush1.bf16.msra.mxu1 %v10188_v12  ;;  %3738 = vmatprep.subr.bf16.mxu0 %v10189_v61  ;;  %v10238_v12 = vunpack.c.h.s8.bf16 %v10232_v14  ;;  %v10239_v61 = vunpack.c.h.s8.bf16 %v10234_v17 }
 0x745   :  { %3902 = vmatprep.subr.bf16.mxu1 %v10190_v63 }
 0x747   :  { %3739 = vmatpush1.bf16.msra.mxu0 %v10191_v52  ;;  %v10241_v52 = vunpack.c.l.s8.bf16 %v10240_v57 }
 0x748   :  { %3903 = vmatpush1.bf16.msra.mxu1 %v10192_v37  ;;  %3740 = vmatprep.subr.bf16.mxu0 %v10193_v8  ;;  %v10242_v37 = vld [vmem:[#allocation267_spill] sm:$0xff] }
 0x749   :  { %3904 = vmatprep.subr.bf16.mxu1 %v10195_v20  ;;  %v10243_v8 = vunpack.c.l.s8.bf16 %v10242_v37  ;;  %v10245_v20 = vunpack.c.l.s8.bf16 %v10244_v19  ;;  %v10249_v11 = vunpack.c.h.s8.bf16 %v10242_v37 }
 0x74b   :  { %3741 = vmatpush1.bf16.msra.mxu0 %v10197_v50 }
 0x74c   :  { %3905 = vmatpush1.bf16.msra.mxu1 %v10199_v28  ;;  %3742 = vmatprep.subr.bf16.mxu0 %v10200_v3  ;;  %v10252_v28 = vunpack.c.h.s8.bf16 %v10246_v51  ;;  %v10253_v3 = vld [vmem:[#allocation271_spill] sm:$0xff] }
 0x74d   :  { %3906 = vmatprep.subr.bf16.mxu1 %v10201_v59  ;;  %v4229_v26 = vpop.eup %4228  ;;  %v10254_v59 = vunpack.c.l.s8.bf16 %v10253_v3  ;;  %v10262_v13 = vunpack.c.h.s8.bf16 %v10253_v3 }
 0x74e   :  { %v3575_v63 = vmul.f32 %v4229_v26, %v3551_v35 }
 0x74f   :  { %3743 = vmatpush1.bf16.msra.mxu0 %v10202_v22  ;;  %v10256_v22 = vunpack.c.l.s8.bf16 %v10255_v43 }
 0x750   :  { %3907 = vmatpush1.bf16.msra.mxu1 %v10203_v49  ;;  %3744 = vmatprep.subr.bf16.mxu0 %v10205_v27  ;;  %v3583_v50 = vmul.f32 %v3575_v63, %v10250_v47  ;;  %v10257_v49 = vld [vmem:[#allocation275_spill] sm:$0xff]  ;;  %v10258_v27 = vld [vmem:[#allocation273_spill] sm:$0xff] }
 0x751   :  { %3908 = vmatprep.subr.bf16.mxu1 %v10207_v46  ;;  %v10259_v54 = vunpack.c.l.s8.bf16 %v10258_v27  ;;  %v10260_v46 = vld [vmem:[#allocation274_spill] sm:$0xff] }
 0x752   :  { %v3591_v0 = vadd.f32 %v3583_v50, %v10257_v49  ;;  %v10261_v40 = vunpack.c.l.s8.bf16 %v10260_v46 }
 0x753   :  { %3745 = vmatpush1.bf16.msra.mxu0 %v10209_v60  ;;  %v10263_v60 = vunpack.c.h.s8.bf16 %v10255_v43 }
 0x754   :  { %3909 = vmatpush1.bf16.msra.mxu1 %v10211_v34  ;;  %3746 = vmatprep.subr.bf16.mxu0 %v10212_v6  ;;  %v3599_v23 = vmax.f32 %v3591_v0, 0.0  ;;  %v10264_v34 = vunpack.c.h.s8.bf16 %v10258_v27  ;;  %v10265_v6 = vunpack.c.h.s8.bf16 %v10260_v46 }
 0x755   :  { %3910 = vmatprep.subr.bf16.mxu1 %v10213_v42 }
 0x756   :  { %v3607_v42 = vpack.c.bf16 %v3599_v23, %v3599_v23 }
 0x757   :  { %3747 = vmatpush1.bf16.msra.mxu0 %v10214_v2 }
 0x758   :  { %3911 = vmatpush1.bf16.msra.mxu1 %v10215_v41  ;;  %3748 = vmatprep.subr.bf16.mxu0 %v10217_v55  ;;  %v10266_v41 = vld [vmem:[#allocation22_spill] sm:$0xff]  ;;  %v10267_v55 = vld [vmem:[#allocation23_spill] sm:$0xff] }
 0x759   :  { %3912 = vmatprep.subr.bf16.mxu1 %v10219_v39 }
 0x75b   :  { %3749 = vmatpush1.bf16.msra.mxu0 %v10221_v62  ;;  %v10268_v62 = vld [vmem:[#allocation24_spill] sm:$0xff] }
 0x75c   :  { %3913 = vmatpush1.bf16.msra.mxu1 %v10223_v38  ;;  %3750 = vmatprep.subr.bf16.mxu0 %v10224_v7  ;;  %v10269_v38 = vld [vmem:[#allocation25_spill] sm:$0xff] }
 0x75d   :  { %3914 = vmatprep.subr.bf16.mxu1 %v10225_v18 }
 0x75f   :  { %3751 = vmatpush1.bf16.msra.mxu0 %v10226_v1 }
 0x760   :  { %3915 = vmatpush1.bf16.msra.mxu1 %v10227_v36  ;;  %3752 = vmatprep.subr.bf16.mxu0 %v10229_v16  ;;  %v10270_v36 = vld [vmem:[#allocation26_spill] sm:$0xff]  ;;  %v10271_v16 = vld [vmem:[#allocation27_spill] sm:$0xff] }
 0x761   :  { %3916 = vmatprep.subr.bf16.mxu1 %v10231_v44 }
 0x763   :  { %3753 = vmatpush1.bf16.msra.mxu0 %v10233_v53  ;;  %v10272_v53 = vld [vmem:[#allocation28_spill] sm:$0xff] }
 0x764   :  { %3917 = vmatpush1.bf16.msra.mxu1 %v10235_v45  ;;  %3754 = vmatprep.subr.bf16.mxu0 %v10236_v30  ;;  %v10273_v45 = vld [vmem:[#allocation29_spill] sm:$0xff] }
 0x765   :  { %3918 = vmatprep.subr.bf16.mxu1 %v10237_v29 }
 0x767   :  { %3755 = vmatpush1.bf16.msra.mxu0 %v10238_v12 }
 0x768   :  { %3919 = vmatpush1.bf16.msra.mxu1 %v10239_v61  ;;  %3756 = vmatprep.subr.bf16.mxu0 %v10241_v52 }
 0x769   :  { %3920 = vmatprep.subr.bf16.mxu1 %v10243_v8 }
 0x76b   :  { %3757 = vmatpush1.bf16.msra.mxu0 %v10245_v20  ;;  %v10274_v20 = vld [vmem:[#allocation49_spill] sm:$0xff] }
 0x76c   :  { %3921 = vmatpush1.bf16.msra.mxu1 %v10247_v4  ;;  %3758 = vmatprep.subr.bf16.mxu0 %v10248_v9 }
 0x76d   :  { %3922 = vmatprep.subr.bf16.mxu1 %v10249_v11 }
 0x76f   :  { %3759 = vmatpush1.bf16.msra.mxu0 %v10251_v31 }
 0x770   :  { %3923 = vmatpush1.bf16.msra.mxu1 %v10252_v28  ;;  %3760 = vmatprep.subr.bf16.mxu0 %v10254_v59 }
 0x771   :  { %3924 = vmatprep.subr.bf16.mxu1 %v10256_v22 }
 0x773   :  { %3761 = vmatpush1.bf16.msra.mxu0 %v10259_v54 }
 0x774   :  { %3925 = vmatpush1.bf16.msra.mxu1 %v10261_v40  ;;  %3762 = vmatprep.subr.bf16.mxu0 %v10262_v13 }
 0x775   :  { %3926 = vmatprep.subr.bf16.mxu1 %v10263_v60 }
 0x777   :  { %3763 = vmatpush1.bf16.msra.mxu0 %v10264_v34 }
 0x778   :  { %3927 = vmatpush1.bf16.msra.mxu1 %v10265_v6 }
 0x77a   :  { %3765 = vmatmul.mubr.bf16.vlgmr.msra.gmra.mrb[28].mxu0 %v3607_v42 }
 0x77b   :  { %3929 = vmatmul.mubr.bf16.vlgmr.msra.gmra.mrb[28].mxu1 %v3607_v42 }
 0x84d   :  { %v3766_v5 = vpop.f32.mrb[28].mxu0 }
 0x84e   :  { %v3930_v2 = vpop.f32.mrb[28].mxu1  ;;  %v3937_v21 = vmul.f32 %v3766_v5, %v10266_v41  ;;  %v3768_v39 = vpop.f32.mrb[29].mxu0 }
 0x84f   :  { %v3939_v10 = vmul.f32 %v3930_v2, %v10267_v55  ;;  %v3932_v24 = vpop.f32.mrb[29].mxu1  ;;  %v3938_v32 = vmul.f32 %v3768_v39, %v10268_v62  ;;  %v3770_v18 = vpop.f32.mrb[30].mxu0 }
 0x850   :  { %v3940_v7 = vmul.f32 %v3932_v24, %v10269_v38  ;;  %v3934_v1 = vpop.f32.mrb[30].mxu1  ;;  %v3941_v25 = vadd.f32 %v3937_v21, %v10270_v36  ;;  %v3771_v44 = vpop.f32.mrb[31].mxu0 }
 0x851   :  { %v3943_v48 = vadd.f32 %v3939_v10, %v10271_v16  ;;  %v3935_v14 = vpop.f32.mrb[31].mxu1  ;;  %v3942_v17 = vadd.f32 %v3938_v32, %v10272_v53 }
 0x852   :  { %v3944_v30 = vadd.f32 %v3940_v7, %v10273_v45  ;;  %v4009_v29 = vmul.f32 %v3941_v25, %v3941_v25 }
 0x853   :  { %v4011_v26 = vmul.f32 %v3943_v48, %v3943_v48  ;;  %v4010_v35 = vmul.f32 %v3942_v17, %v3942_v17 }
 0x854   :  { %v4013_v12 = vsel %vm1955_vm1, %v4009_v29, 0.0  ;;  %v4012_v61 = vmul.f32 %v3944_v30, %v3944_v30 }
 0x855   :  { %v4014_v63 = vsel %vm1955_vm1, %v4010_v35, 0.0  ;;  %v4016_v52 = vsel %vm1955_vm1, %v4011_v26, 0.0 }
 0x856   :  { %v4015_v57 = vadd.f32 %v4014_v63, %v4013_v12  ;;  %v4018_v8 = vsel %vm1955_vm1, %v4012_v61, 0.0 }
 0x858   :  { %v4017_v37 = vadd.f32 %v4016_v52, %v4015_v57 }
 0x85a   :  { %v4019_v19 = vadd.f32 %v4018_v8, %v4017_v37 }
 0x85c   :  { %4020 = vadd.xlane.f32.xlu1 %v4019_v19 }
 0x860   :  { %4034 = vadd.xlane.f32.xlu1 %v10274_v20 }
 0x8e9   :  { %v4021_v51 = vpop.xlane.xlu1 %4020 }
 0x8ea   :  { %4230 = vrsqrt.f32 %v4021_v51 }
 0x8ed   :  { %v4035_v4 = vpop.xlane.xlu1 %4034 }
 0x8ee   :  { %4232 = vrsqrt.f32 %v4035_v4 }
 0x8f4   :  { %v4231_v9 = vpop.eup %4230 }
 0x8f5   :  { %v4023_v47 = vmul.f32 %v4231_v9, %v3941_v25  ;;  %v4024_v50 = vmul.f32 %v4231_v9, %v3942_v17  ;;  %v4025_v31 = vmul.f32 %v4231_v9, %v3943_v48  ;;  %v4026_v22 = vmul.f32 %v4231_v9, %v3944_v30 }
 0x8f8   :  { %v4233_v11 = vpop.eup %4232 }
 0x8f9   :  { %v4037_v28 = vmul.f32 %v4233_v11, %v9977_v56  ;;  %v4038_v3 = vmul.f32 %v4233_v11, %v9978_v58  ;;  %v4039_v59 = vmul.f32 %v4233_v11, %v9979_v15  ;;  %v4040_v43 = vmul.f32 %v4233_v11, %v9980_v33  ;;  %v4006_v15 = vpop.xlane.xlu0 %4005 }
 0x8fa   :  { %v4007_v34 = vmul.f32 2.0, %v4006_v15 }
 0x8fb   :  { %v4041_v49 = vmul.f32 %v4037_v28, %v4023_v47  ;;  %v4042_v0 = vmul.f32 %v4038_v3, %v4024_v50  ;;  %v4043_v27 = vmul.f32 %v4039_v59, %v4025_v31  ;;  %v4044_v54 = vmul.f32 %v4040_v43, %v4026_v22 }
 0x8fc   :  { %v4008_v42 = vsub.f32 2.0, %v4007_v34 }
 0x8fd   :  { %v4045_v46 = vsel %vm1955_vm1, %v4041_v49, 0.0  ;;  %v4046_v40 = vsel %vm1955_vm1, %v4042_v0, 0.0  ;;  %v4048_v60 = vsel %vm1955_vm1, %v4043_v27, 0.0  ;;  %v4050_v56 = vsel %vm1955_vm1, %v4044_v54, 0.0 }
 0x8fe   :  { %v4047_v13 = vadd.f32 %v4046_v40, %v4045_v46 }
 0x900   :  { %v4049_v23 = vadd.f32 %v4048_v60, %v4047_v13 }
 0x902   :  { %v4051_v58 = vadd.f32 %v4050_v56, %v4049_v23 }
 0x904   :  { %4052 = vadd.xlane.f32.xlu1 %v4051_v58 }
 0x991   :  { %v4053_v33 = vpop.xlane.xlu1 %4052 }
 0x992   :  { %v4054_v6 = vmul.f32 2.0, %v4053_v33 }
 0x994   :  { %v4055_v5 = vsub.f32 2.0, %v4054_v6 }
 0x996   :  { %v4056_v2 = vadd.f32 %v4055_v5, %v4008_v42 }
 0x998   :  { %4057 = vst [vmem:[#allocation13] sm:$0x3] %v4056_v2 }
 0x999   :  { %4380 = shalt.err (!%p4377_p10)
}
 0x99a   :  { %s4381_s22 = scalar_lea.hbm %s8233_s6, 32 }
 0x99b   :  { %p4382_p11 = scmp.ne.s32.totalorder %s8233_s6, %s4381_s22  ;;  %p4385_p12 = scmp.lt.u32.totalorder %s4381_s22, %s8233_s6 }
 0x99d   :  { %p4387_p13 = pnand %p4385_p12, %p4382_p11 }
 0x99f   :  { %4390 = shalt.err (!%p4387_p13)
}
 0x9a0   :  { %4067 = dma.vmem_to_hbm [thread:$0]  %s4065_s20, 32, %s8233_s6, [#allocation4]  }
 0x9a1   :  { %4399 = dma.done.wait [#allocation4], 32  }
 0x9a2   :  { %4400 = vsyncadd [#allocation4], 4294967264 }
 0x9a3   :  { %4071 = vsyncpa [#allocation3], 1 }
 0x9a4   :  { %4072 = vsyncpa [#allocation6], 1 }
 0x9a5   :  { %4073 = vsyncpa [#allocation9], 1 }
 0x9a6   :  { %4074 = vsyncpa [#allocation12], 1 }
 0x9a7   :  { %4075 = vsyncpa [#allocation4], 1 }

</bundles_post_ra>
